<compile_context>
chip_gen: v7x
topology: tpu7x:2x2x1
jax: 0.10.0
libtpu: 0.0.40
codegen_flags: <defaults>
</compile_context>

<pallas_src>
import functools

import jax
import jax.numpy as jnp
from jax.experimental import pallas as pl
from jax.experimental.pallas import tpu as pltpu


_KS = (2, 3, 4, 5)            # Conv1d kernel sizes
_DELTAS = (-2, -1, 0, 1, 2)   # union of time shifts needed by the 4 branches
_FC_TAIL_DIMS = ((512, 128), (128, 64), (64, 2))   # fc3, fc4, fc5


def _round_up(x, m):
    return ((x + m - 1) // m) * m


def _conv_layout(E):
    off_bias = len(_DELTAS) * E
    return off_bias, _round_up(off_bias + 1, 8)


def _attn_layout(H):
    off_wqkv = 0
    off_bqkv = H
    off_wout = _round_up(H + 1, 8)
    off_bout = off_wout + H
    return off_wqkv, off_bqkv, off_wout, off_bout, _round_up(off_bout + 1, 8)


def _gru_layout(H):
    off_wih = 0
    off_whh = H
    off_bih = 3 * H
    off_bhh = _round_up(3 * H + 1, 8)
    return off_wih, off_whh, off_bih, off_bhh, _round_up(off_bhh + 1, 8)


def _fc_tail_layout():
    entries = []
    o = 0
    for din, dout in _FC_TAIL_DIMS:
        entries.append((din, dout, o, o + din))   # (din, dout, w_off, b_off)
        o = _round_up(o + din + 1, 8)
    return entries, o


def _sigmoid(x):
    return 1.0 / (1.0 + jnp.exp(-x))


# ---------------------------------------------------------------------------
# The single fused kernel
# ---------------------------------------------------------------------------

def _classifier_kernel(ids_ref, embed_ref, conv_ref, attn_ref, gru_ref,
                       fc1b_ref, fc2b_ref, fc1w_hbm, fc2w_hbm, fctail_hbm,
                       out_ref,
                       fc1w_vm, fc2w_vm, fctail_vm, flat_sc, dma_sem,
                       *, B, S, E, H, n_heads, V_pad):
    f32 = jnp.float32
    bf16 = jnp.bfloat16
    dh = H // n_heads
    BS = B * S

    # ---- start streaming the big FC weights; waits happen right before use.
    cp1 = pltpu.make_async_copy(fc1w_hbm, fc1w_vm, dma_sem.at[0])
    cp2 = pltpu.make_async_copy(fc2w_hbm, fc2w_vm, dma_sem.at[1])
    cp3 = pltpu.make_async_copy(fctail_hbm, fctail_vm, dma_sem.at[2])
    cp1.start()
    cp2.start()
    cp3.start()

    # ---- embedding lookup: one-hot @ table (padding_idx=0 row is zero) ----
    ids = ids_ref[...]                                                # (BS, 1)
    onehot = (jax.lax.broadcasted_iota(jnp.int32, (BS, V_pad), 1) == ids).astype(f32)
    emb = jnp.dot(onehot, embed_ref[...], preferred_element_type=f32)  # (BS, E)

    # ---- multi-scale CNN: 5 time-shift matmuls against pre-packed weights --
    off_cb, _ = _conv_layout(E)
    row_i = jax.lax.broadcasted_iota(jnp.int32, (BS, BS), 0)
    col_i = jax.lax.broadcasted_iota(jnp.int32, (BS, BS), 1)
    t_idx = row_i
    for b in range(1, B):                       # time index within each batch
        t_idx = t_idx - (row_i >= b * S).astype(jnp.int32) * S
    y = jnp.zeros((BS, 4 * H), f32) + conv_ref[off_cb:off_cb + 1, :]
    for d_idx, delta in enumerate(_DELTAS):
        valid = (t_idx + delta >= 0) & (t_idx + delta < S)
        m = ((col_i == row_i + delta) & valid).astype(f32)            # (BS, BS)
        shifted = jnp.dot(m, emb, preferred_element_type=f32)         # (BS, E)
        y = y + jnp.dot(shifted, conv_ref[d_idx * E:(d_idx + 1) * E, :],
                        preferred_element_type=f32)
    y = jnp.maximum(y, 0.0)                                           # per-branch ReLU
    h = y[:, 0:H] + y[:, H:2 * H] + y[:, 2 * H:3 * H] + y[:, 3 * H:4 * H]  # (BS, H)

    # ---- MultiheadAttention (scale folded into Q projection at init) -------
    ow_qkv, ob_qkv, ow_out, ob_out, _ = _attn_layout(H)
    wqkv = attn_ref[ow_qkv:ow_qkv + H, :]                             # (H, 3H)
    bqkv = attn_ref[ob_qkv:ob_qkv + 1, :]                             # (1, 3H)
    wout = attn_ref[ow_out:ow_out + H, 0:H]                           # (H, H)
    bout = attn_ref[ob_out:ob_out + 1, 0:H]                           # (1, H)

    qkv = jnp.dot(h, wqkv, preferred_element_type=f32) + bqkv         # (BS, 3H)

    scores = []
    for b in range(B):
        for hd in range(n_heads):
            q = qkv[b * S:(b + 1) * S, hd * dh:(hd + 1) * dh]
            k = qkv[b * S:(b + 1) * S, H + hd * dh:H + (hd + 1) * dh]
            scores.append(jax.lax.dot_general(q, k, (((1,), (1,)), ((), ())),
                                              preferred_element_type=f32))
    s_all = jnp.concatenate(scores, axis=0)                           # (B*nh*S, S)
    s_all = s_all - jnp.max(s_all, axis=-1, keepdims=True)
    p_all = jnp.exp(s_all)
    p_all = p_all / jnp.sum(p_all, axis=-1, keepdims=True)            # one softmax

    rows = []
    for b in range(B):
        acc = jnp.zeros((S, H), f32)
        for hd in range(n_heads):
            base = (b * n_heads + hd) * S
            v = qkv[b * S:(b + 1) * S, 2 * H + hd * dh:2 * H + (hd + 1) * dh]
            pv = jnp.dot(p_all[base:base + S, :], v, preferred_element_type=f32)
            acc = acc + jnp.dot(pv, wout[hd * dh:(hd + 1) * dh, :],
                                preferred_element_type=f32)           # fold out_proj
        rows.append(acc)
    x_attn = jnp.concatenate(rows, axis=0) + bout                     # (BS, H)

    # ---- bidirectional GRU packed across (batch x direction) --------------
    o_wih, o_whh, o_bih, o_bhh, _ = _gru_layout(H)
    wih = gru_ref[o_wih:o_wih + H, :]                                 # (H, 6H)
    whh = gru_ref[o_whh:o_whh + 2 * H, :]                             # (2H, 6H)
    bih = gru_ref[o_bih:o_bih + 1, :]                                 # (1, 6H)
    bhh = gru_ref[o_bhh:o_bhh + 1, :]                                 # (1, 6H)

    gx = jnp.dot(x_attn, wih, preferred_element_type=f32) + bih       # (BS, 6H)

    c6 = jax.lax.broadcasted_iota(jnp.int32, (B, 6 * H), 1)
    fwd_mask = ((c6 < H)
                | ((c6 >= 2 * H) & (c6 < 3 * H))
                | ((c6 >= 4 * H) & (c6 < 5 * H)))                     # fwd gate cols

    hcur = jnp.zeros((B, 2 * H), f32)                                 # [h_fwd | h_bwd]
    for s in range(S):
        gxf = jnp.concatenate([gx[b * S + s:b * S + s + 1, :] for b in range(B)],
                              axis=0)                                 # time s
        gxb = jnp.concatenate(
            [gx[b * S + (S - 1 - s):b * S + (S - s), :] for b in range(B)],
            axis=0)                                                   # time S-1-s
        gxt = jnp.where(fwd_mask, gxf, gxb)                           # (B, 6H)
        gh = jnp.dot(hcur, whh, preferred_element_type=f32) + bhh     # (B, 6H)
        rz = _sigmoid(gxt[:, 0:4 * H] + gh[:, 0:4 * H])               # (B, 4H)
        r = rz[:, 0:2 * H]
        z = rz[:, 2 * H:4 * H]
        n = jnp.tanh(gxt[:, 4 * H:6 * H] + r * gh[:, 4 * H:6 * H])    # (B, 2H)
        hcur = (1.0 - z) * n + z * hcur
        # store outputs straight into the flat (B, S*2H) layout of .view(B,-1)
        flat_sc[:, 2 * s * H:(2 * s + 1) * H] = hcur[:, 0:H]
        flat_sc[:, (2 * (S - 1 - s) + 1) * H:(2 * (S - 1 - s) + 2) * H] = hcur[:, H:2 * H]

    flat = flat_sc[...]                                               # (B, S*2H)

    # ---- FC head (weights were streamed while the chain above ran) --------
    cp1.wait()
    a = jnp.dot(flat.astype(bf16), fc1w_vm[...], preferred_element_type=f32) + fc1b_ref[...]
    a = jnp.maximum(a, 0.0)
    cp2.wait()
    a = jnp.dot(a.astype(bf16), fc2w_vm[...], preferred_element_type=f32) + fc2b_ref[...]
    a = jnp.maximum(a, 0.0)
    cp3.wait()
    tail_entries, _ = _fc_tail_layout()
    for din, dout, wo, bo in tail_entries:                            # fc3, fc4, fc5 (+ReLU)
        wslab = fctail_vm[wo:wo + din, 0:dout]
        bslab = fctail_vm[bo:bo + 1, 0:dout]
        a = jnp.maximum(jnp.dot(a, wslab, preferred_element_type=f32) + bslab, 0.0)

    # softmax over the relu'd fc5 logits (exact reciprocal)
    logits = a - jnp.max(a, axis=-1, keepdims=True)
    e = jnp.exp(logits)
    out_ref[...] = (e / jnp.sum(e, axis=-1, keepdims=True)).astype(out_ref.dtype)


# ---------------------------------------------------------------------------
# Parameters (deterministic synthetic init, pre-packed into a few slabs)
# ---------------------------------------------------------------------------

def init_params(key, vocab_size, seq_len, E, H, n_heads):
    keys = iter(jax.random.split(key, 64))

    def w(shape, scale=0.1):
        return scale * jax.random.normal(next(keys), shape, dtype=jnp.float32)

    p = {}

    # embedding table (padding_idx=0 row zeroed), padded to a multiple of 8 rows
    V_pad = _round_up(vocab_size, 8)
    emb = w((vocab_size, E)).at[0].set(0.0)
    p["embed"] = jnp.zeros((V_pad, E), jnp.float32).at[:vocab_size].set(emb)

    # conv slab: per-shift weight blocks (E rows each) + one bias row
    off_cb, conv_rows = _conv_layout(E)
    conv = jnp.zeros((conv_rows, 4 * H), jnp.float32)
    bvals = []
    for i, K in enumerate(_KS):
        wc = w((H, E, K))                                  # torch Conv1d (out, in, k)
        bc = w((H,))
        L = (K - 1) // 2                                   # PyTorch 'same' left pad
        for d_idx, delta in enumerate(_DELTAS):
            k = delta + L
            if 0 <= k < K:
                conv = conv.at[d_idx * E:(d_idx + 1) * E,
                               i * H:(i + 1) * H].set(wc[:, :, k].T)
        bvals.append(bc)
    conv = conv.at[off_cb, :].set(jnp.concatenate(bvals))
    p["conv"] = conv

    # attention slab: wqkv / bqkv / wout / bout, Q scale folded into wqkv/bqkv
    ow_qkv, ob_qkv, ow_out, ob_out, attn_rows = _attn_layout(H)
    in_w = w((3 * H, H))
    in_b = w((3 * H,))
    scale = float(H // n_heads) ** -0.5
    wqkv = in_w.T
    wqkv = wqkv.at[:, :H].multiply(scale)
    bqkv = in_b.at[:H].multiply(scale)
    out_w = w((H, H))
    out_b = w((H,))
    attn = jnp.zeros((attn_rows, 3 * H), jnp.float32)
    attn = attn.at[ow_qkv:ow_qkv + H, :].set(wqkv)
    attn = attn.at[ob_qkv, :].set(bqkv)
    attn = attn.at[ow_out:ow_out + H, 0:H].set(out_w.T)
    attn = attn.at[ob_out, 0:H].set(out_b)
    p["attn"] = attn

    # GRU slab; gate columns interleaved per direction: [r_f r_b z_f z_b n_f n_b]
    o_wih, o_whh, o_bih, o_bhh, gru_rows = _gru_layout(H)
    gru = jnp.zeros((gru_rows, 6 * H), jnp.float32)
    for d in range(2):                                     # 0 = fwd, 1 = bwd
        wih_t = w((3 * H, H))
        whh_t = w((3 * H, H))
        bih_t = w((3 * H,))
        bhh_t = w((3 * H,))
        for g in range(3):                                 # r, z, n
            c0 = (2 * g + d) * H
            gru = gru.at[o_wih:o_wih + H, c0:c0 + H].set(wih_t[g * H:(g + 1) * H, :].T)
            gru = gru.at[o_whh + d * H:o_whh + (d + 1) * H,
                         c0:c0 + H].set(whh_t[g * H:(g + 1) * H, :].T)
            gru = gru.at[o_bih, c0:c0 + H].set(bih_t[g * H:(g + 1) * H])
            gru = gru.at[o_bhh, c0:c0 + H].set(bhh_t[g * H:(g + 1) * H])
    p["gru"] = gru

    # FC head: fc1/fc2 weights in bf16 (streamed in-kernel), fc3-fc5 in one slab
    p["fc1_w"] = w((seq_len * H * 2, 1000), scale=0.05).astype(jnp.bfloat16)
    p["fc1_b"] = w((1000,)).reshape(1, 1000)
    p["fc2_w"] = w((1000, 512), scale=0.05).astype(jnp.bfloat16)
    p["fc2_b"] = w((512,)).reshape(1, 512)
    tail_entries, tail_rows = _fc_tail_layout()
    tail = jnp.zeros((tail_rows, 128), jnp.float32)
    for din, dout, wo, bo in tail_entries:
        tail = tail.at[wo:wo + din, 0:dout].set(w((din, dout), scale=0.05))
        tail = tail.at[bo, 0:dout].set(w((dout,)))
    p["fc_tail"] = tail
    return p


# ---------------------------------------------------------------------------
# Forward pass: one fused pallas_call
# ---------------------------------------------------------------------------

def classifier_forward(params, x_ids, *, seq_len, E, H, n_heads):
    B, S = x_ids.shape
    assert S == seq_len
    ids = x_ids.reshape(B * S, 1).astype(jnp.int32)
    V_pad = params["embed"].shape[0]

    kernel = functools.partial(_classifier_kernel, B=B, S=S, E=E, H=H,
                               n_heads=n_heads, V_pad=V_pad)
    vmem = pl.BlockSpec(memory_space=pltpu.MemorySpace.VMEM)
    hbm = pl.BlockSpec(memory_space=pl.ANY)

    args = (ids, params["embed"], params["conv"], params["attn"], params["gru"],
            params["fc1_b"], params["fc2_b"],
            params["fc1_w"], params["fc2_w"], params["fc_tail"])

    return pl.pallas_call(
        kernel,
        out_shape=jax.ShapeDtypeStruct((B, 2), jnp.float32),
        in_specs=[vmem] * 7 + [hbm] * 3,
        out_specs=vmem,
        scratch_shapes=[
            pltpu.VMEM(params["fc1_w"].shape, jnp.bfloat16),
            pltpu.VMEM(params["fc2_w"].shape, jnp.bfloat16),
            pltpu.VMEM(params["fc_tail"].shape, jnp.float32),
            pltpu.VMEM((B, 2 * S * H), jnp.float32),
            pltpu.SemaphoreType.DMA((3,)),
        ],
    )(*args)


# ---------------------------------------------------------------------------
if __name__ == "__main__":
    vocab_size, seq_len, E, H, n_heads = 50, 8, 16, 32, 4
    B = 2

    key = jax.random.PRNGKey(0)
    pkey, xkey = jax.random.split(key)
    params = init_params(pkey, vocab_size, seq_len, E, H, n_heads)
    x_ids = jax.random.randint(xkey, (B, seq_len), 0, vocab_size, dtype=jnp.int32)

    fwd = jax.jit(functools.partial(classifier_forward, seq_len=seq_len,
                                    E=E, H=H, n_heads=n_heads))
    out = fwd(params, x_ids)
    jax.block_until_ready(out)
    assert out.shape == (B, 2)
    assert bool(jnp.all(jnp.isfinite(out)))
    assert bool(jnp.allclose(jnp.sum(out, axis=-1), 1.0, atol=1e-3))
    print("KERNEL_OK")
</pallas_src>

<mosaic_0001>
module attributes {stable_mosaic.version = 11 : i64} {
  func.func @_classifier_kernel(%arg0: memref<16x1xi32, #tpu.memory_space<vmem>>, %arg1: memref<56x16xf32, #tpu.memory_space<vmem>>, %arg2: memref<88x128xf32, #tpu.memory_space<vmem>>, %arg3: memref<80x96xf32, #tpu.memory_space<vmem>>, %arg4: memref<112x192xf32, #tpu.memory_space<vmem>>, %arg5: memref<1x1000xf32, #tpu.memory_space<vmem>>, %arg6: memref<1x512xf32, #tpu.memory_space<vmem>>, %arg7: memref<512x1000xbf16, #tpu.memory_space<any>>, %arg8: memref<1000x512xbf16, #tpu.memory_space<any>>, %arg9: memref<728x128xf32, #tpu.memory_space<any>>, %arg10: memref<2x2xf32, #tpu.memory_space<vmem>>, %arg11: memref<512x1000xbf16, #tpu.memory_space<vmem>>, %arg12: memref<1000x512xbf16, #tpu.memory_space<vmem>>, %arg13: memref<728x128xf32, #tpu.memory_space<vmem>>, %arg14: memref<2x512xf32, #tpu.memory_space<vmem>>, %arg15: memref<3x!tpu.dma_semaphore, #tpu.memory_space<semaphore_mem>>) attributes {dimension_semantics = [], scalar_prefetch = 0 : i64, scratch_operands = 5 : i64, tpu.core_type = #tpu.core_type<tc>} {
    %c0_i32 = arith.constant 0 : i32
    %0 = tpu.memref_slice %arg15[%c0_i32] : memref<3x!tpu.dma_semaphore, #tpu.memory_space<semaphore_mem>> -> memref<1x!tpu.dma_semaphore, #tpu.memory_space<semaphore_mem>>
    %1 = tpu.memref_squeeze %0 : memref<1x!tpu.dma_semaphore, #tpu.memory_space<semaphore_mem>> -> memref<!tpu.dma_semaphore, #tpu.memory_space<semaphore_mem>>
    tpu.enqueue_dma source(%arg7 : memref<512x1000xbf16, #tpu.memory_space<any>>) target(%arg11 : memref<512x1000xbf16, #tpu.memory_space<vmem>>) target_semaphore(%1 : memref<!tpu.dma_semaphore, #tpu.memory_space<semaphore_mem>>)
    %c1_i32 = arith.constant 1 : i32
    %2 = tpu.memref_slice %arg15[%c1_i32] : memref<3x!tpu.dma_semaphore, #tpu.memory_space<semaphore_mem>> -> memref<1x!tpu.dma_semaphore, #tpu.memory_space<semaphore_mem>>
    %3 = tpu.memref_squeeze %2 : memref<1x!tpu.dma_semaphore, #tpu.memory_space<semaphore_mem>> -> memref<!tpu.dma_semaphore, #tpu.memory_space<semaphore_mem>>
    tpu.enqueue_dma source(%arg8 : memref<1000x512xbf16, #tpu.memory_space<any>>) target(%arg12 : memref<1000x512xbf16, #tpu.memory_space<vmem>>) target_semaphore(%3 : memref<!tpu.dma_semaphore, #tpu.memory_space<semaphore_mem>>)
    %c2_i32 = arith.constant 2 : i32
    %4 = tpu.memref_slice %arg15[%c2_i32] : memref<3x!tpu.dma_semaphore, #tpu.memory_space<semaphore_mem>> -> memref<1x!tpu.dma_semaphore, #tpu.memory_space<semaphore_mem>>
    %5 = tpu.memref_squeeze %4 : memref<1x!tpu.dma_semaphore, #tpu.memory_space<semaphore_mem>> -> memref<!tpu.dma_semaphore, #tpu.memory_space<semaphore_mem>>
    tpu.enqueue_dma source(%arg9 : memref<728x128xf32, #tpu.memory_space<any>>) target(%arg13 : memref<728x128xf32, #tpu.memory_space<vmem>>) target_semaphore(%5 : memref<!tpu.dma_semaphore, #tpu.memory_space<semaphore_mem>>)
    %c0 = arith.constant 0 : index
    %c0_0 = arith.constant 0 : index
    %6 = vector.load %arg0[%c0, %c0_0] : memref<16x1xi32, #tpu.memory_space<vmem>>, vector<16x1xi32>
    %7 = tpu.iota {dimensions = array<i32: 1>} : vector<16x56xi32>
    %8 = vector.broadcast %6 : vector<16x1xi32> to vector<16x56xi32>
    %9 = arith.cmpi eq, %7, %8 : vector<16x56xi32>
    %10 = arith.extui %9 : vector<16x56xi1> to vector<16x56xi32>
    %11 = arith.sitofp %10 : vector<16x56xi32> to vector<16x56xf32>
    %c0_1 = arith.constant 0 : index
    %c0_2 = arith.constant 0 : index
    %12 = vector.load %arg1[%c0_1, %c0_2] : memref<56x16xf32, #tpu.memory_space<vmem>>, vector<56x16xf32>
    %cst = arith.constant dense<0.000000e+00> : vector<16x16xf32>
    %13 = tpu.matmul %11, %12, %cst {dimension_numbers = #tpu.dot_dimension_numbers<[1], [0], [0], [1], [0, 0, 1, 1], [], []>} : vector<16x56xf32>, vector<56x16xf32>, vector<16x16xf32> -> vector<16x16xf32>
    %14 = tpu.iota {dimensions = array<i32: 0>} : vector<16x16xi32>
    %15 = tpu.iota {dimensions = array<i32: 1>} : vector<16x16xi32>
    %c8_i32 = arith.constant 8 : i32
    %16 = vector.broadcast %c8_i32 : i32 to vector<16x16xi32>
    %17 = arith.cmpi sge, %14, %16 : vector<16x16xi32>
    %18 = arith.extui %17 : vector<16x16xi1> to vector<16x16xi32>
    %c8_i32_3 = arith.constant 8 : i32
    %19 = vector.broadcast %c8_i32_3 : i32 to vector<16x16xi32>
    %20 = arith.muli %18, %19 : vector<16x16xi32>
    %21 = arith.subi %14, %20 : vector<16x16xi32>
    %cst_4 = arith.constant 0.000000e+00 : f32
    %22 = vector.broadcast %cst_4 : f32 to vector<16x128xf32>
    %c80 = arith.constant 80 : index
    %c0_5 = arith.constant 0 : index
    %23 = vector.load %arg2[%c80, %c0_5] : memref<88x128xf32, #tpu.memory_space<vmem>>, vector<1x128xf32>
    %24 = vector.broadcast %23 : vector<1x128xf32> to vector<16x128xf32>
    %25 = arith.addf %22, %24 : vector<16x128xf32>
    %c-2_i32 = arith.constant -2 : i32
    %26 = vector.broadcast %c-2_i32 : i32 to vector<16x16xi32>
    %27 = arith.addi %21, %26 : vector<16x16xi32>
    %c0_i32_6 = arith.constant 0 : i32
    %28 = vector.broadcast %c0_i32_6 : i32 to vector<16x16xi32>
    %29 = arith.cmpi sge, %27, %28 : vector<16x16xi32>
    %c-2_i32_7 = arith.constant -2 : i32
    %30 = vector.broadcast %c-2_i32_7 : i32 to vector<16x16xi32>
    %31 = arith.addi %21, %30 : vector<16x16xi32>
    %c8_i32_8 = arith.constant 8 : i32
    %32 = vector.broadcast %c8_i32_8 : i32 to vector<16x16xi32>
    %33 = arith.cmpi slt, %31, %32 : vector<16x16xi32>
    %34 = arith.andi %29, %33 : vector<16x16xi1>
    %c-2_i32_9 = arith.constant -2 : i32
    %35 = vector.broadcast %c-2_i32_9 : i32 to vector<16x16xi32>
    %36 = arith.addi %14, %35 : vector<16x16xi32>
    %37 = arith.cmpi eq, %15, %36 : vector<16x16xi32>
    %38 = arith.andi %37, %34 : vector<16x16xi1>
    %39 = arith.extui %38 : vector<16x16xi1> to vector<16x16xi32>
    %40 = arith.sitofp %39 : vector<16x16xi32> to vector<16x16xf32>
    %cst_10 = arith.constant dense<0.000000e+00> : vector<16x16xf32>
    %41 = tpu.matmul %40, %13, %cst_10 {dimension_numbers = #tpu.dot_dimension_numbers<[1], [0], [0], [1], [0, 0, 1, 1], [], []>} : vector<16x16xf32>, vector<16x16xf32>, vector<16x16xf32> -> vector<16x16xf32>
    %c0_11 = arith.constant 0 : index
    %c0_12 = arith.constant 0 : index
    %42 = vector.load %arg2[%c0_11, %c0_12] : memref<88x128xf32, #tpu.memory_space<vmem>>, vector<16x128xf32>
    %cst_13 = arith.constant dense<0.000000e+00> : vector<16x128xf32>
    %43 = tpu.matmul %41, %42, %cst_13 {dimension_numbers = #tpu.dot_dimension_numbers<[1], [0], [0], [1], [0, 0, 1, 1], [], []>} : vector<16x16xf32>, vector<16x128xf32>, vector<16x128xf32> -> vector<16x128xf32>
    %44 = arith.addf %25, %43 : vector<16x128xf32>
    %c-1_i32 = arith.constant -1 : i32
    %45 = vector.broadcast %c-1_i32 : i32 to vector<16x16xi32>
    %46 = arith.addi %21, %45 : vector<16x16xi32>
    %c0_i32_14 = arith.constant 0 : i32
    %47 = vector.broadcast %c0_i32_14 : i32 to vector<16x16xi32>
    %48 = arith.cmpi sge, %46, %47 : vector<16x16xi32>
    %c-1_i32_15 = arith.constant -1 : i32
    %49 = vector.broadcast %c-1_i32_15 : i32 to vector<16x16xi32>
    %50 = arith.addi %21, %49 : vector<16x16xi32>
    %c8_i32_16 = arith.constant 8 : i32
    %51 = vector.broadcast %c8_i32_16 : i32 to vector<16x16xi32>
    %52 = arith.cmpi slt, %50, %51 : vector<16x16xi32>
    %53 = arith.andi %48, %52 : vector<16x16xi1>
    %c-1_i32_17 = arith.constant -1 : i32
    %54 = vector.broadcast %c-1_i32_17 : i32 to vector<16x16xi32>
    %55 = arith.addi %14, %54 : vector<16x16xi32>
    %56 = arith.cmpi eq, %15, %55 : vector<16x16xi32>
    %57 = arith.andi %56, %53 : vector<16x16xi1>
    %58 = arith.extui %57 : vector<16x16xi1> to vector<16x16xi32>
    %59 = arith.sitofp %58 : vector<16x16xi32> to vector<16x16xf32>
    %cst_18 = arith.constant dense<0.000000e+00> : vector<16x16xf32>
    %60 = tpu.matmul %59, %13, %cst_18 {dimension_numbers = #tpu.dot_dimension_numbers<[1], [0], [0], [1], [0, 0, 1, 1], [], []>} : vector<16x16xf32>, vector<16x16xf32>, vector<16x16xf32> -> vector<16x16xf32>
    %c16 = arith.constant 16 : index
    %c0_19 = arith.constant 0 : index
    %61 = vector.load %arg2[%c16, %c0_19] : memref<88x128xf32, #tpu.memory_space<vmem>>, vector<16x128xf32>
    %cst_20 = arith.constant dense<0.000000e+00> : vector<16x128xf32>
    %62 = tpu.matmul %60, %61, %cst_20 {dimension_numbers = #tpu.dot_dimension_numbers<[1], [0], [0], [1], [0, 0, 1, 1], [], []>} : vector<16x16xf32>, vector<16x128xf32>, vector<16x128xf32> -> vector<16x128xf32>
    %63 = arith.addf %44, %62 : vector<16x128xf32>
    %c0_i32_21 = arith.constant 0 : i32
    %64 = vector.broadcast %c0_i32_21 : i32 to vector<16x16xi32>
    %65 = arith.addi %21, %64 : vector<16x16xi32>
    %c0_i32_22 = arith.constant 0 : i32
    %66 = vector.broadcast %c0_i32_22 : i32 to vector<16x16xi32>
    %67 = arith.cmpi sge, %65, %66 : vector<16x16xi32>
    %c0_i32_23 = arith.constant 0 : i32
    %68 = vector.broadcast %c0_i32_23 : i32 to vector<16x16xi32>
    %69 = arith.addi %21, %68 : vector<16x16xi32>
    %c8_i32_24 = arith.constant 8 : i32
    %70 = vector.broadcast %c8_i32_24 : i32 to vector<16x16xi32>
    %71 = arith.cmpi slt, %69, %70 : vector<16x16xi32>
    %72 = arith.andi %67, %71 : vector<16x16xi1>
    %c0_i32_25 = arith.constant 0 : i32
    %73 = vector.broadcast %c0_i32_25 : i32 to vector<16x16xi32>
    %74 = arith.addi %14, %73 : vector<16x16xi32>
    %75 = arith.cmpi eq, %15, %74 : vector<16x16xi32>
    %76 = arith.andi %75, %72 : vector<16x16xi1>
    %77 = arith.extui %76 : vector<16x16xi1> to vector<16x16xi32>
    %78 = arith.sitofp %77 : vector<16x16xi32> to vector<16x16xf32>
    %cst_26 = arith.constant dense<0.000000e+00> : vector<16x16xf32>
    %79 = tpu.matmul %78, %13, %cst_26 {dimension_numbers = #tpu.dot_dimension_numbers<[1], [0], [0], [1], [0, 0, 1, 1], [], []>} : vector<16x16xf32>, vector<16x16xf32>, vector<16x16xf32> -> vector<16x16xf32>
    %c32 = arith.constant 32 : index
    %c0_27 = arith.constant 0 : index
    %80 = vector.load %arg2[%c32, %c0_27] : memref<88x128xf32, #tpu.memory_space<vmem>>, vector<16x128xf32>
    %cst_28 = arith.constant dense<0.000000e+00> : vector<16x128xf32>
    %81 = tpu.matmul %79, %80, %cst_28 {dimension_numbers = #tpu.dot_dimension_numbers<[1], [0], [0], [1], [0, 0, 1, 1], [], []>} : vector<16x16xf32>, vector<16x128xf32>, vector<16x128xf32> -> vector<16x128xf32>
    %82 = arith.addf %63, %81 : vector<16x128xf32>
    %c1_i32_29 = arith.constant 1 : i32
    %83 = vector.broadcast %c1_i32_29 : i32 to vector<16x16xi32>
    %84 = arith.addi %21, %83 : vector<16x16xi32>
    %c0_i32_30 = arith.constant 0 : i32
    %85 = vector.broadcast %c0_i32_30 : i32 to vector<16x16xi32>
    %86 = arith.cmpi sge, %84, %85 : vector<16x16xi32>
    %c1_i32_31 = arith.constant 1 : i32
    %87 = vector.broadcast %c1_i32_31 : i32 to vector<16x16xi32>
    %88 = arith.addi %21, %87 : vector<16x16xi32>
    %c8_i32_32 = arith.constant 8 : i32
    %89 = vector.broadcast %c8_i32_32 : i32 to vector<16x16xi32>
    %90 = arith.cmpi slt, %88, %89 : vector<16x16xi32>
    %91 = arith.andi %86, %90 : vector<16x16xi1>
    %c1_i32_33 = arith.constant 1 : i32
    %92 = vector.broadcast %c1_i32_33 : i32 to vector<16x16xi32>
    %93 = arith.addi %14, %92 : vector<16x16xi32>
    %94 = arith.cmpi eq, %15, %93 : vector<16x16xi32>
    %95 = arith.andi %94, %91 : vector<16x16xi1>
    %96 = arith.extui %95 : vector<16x16xi1> to vector<16x16xi32>
    %97 = arith.sitofp %96 : vector<16x16xi32> to vector<16x16xf32>
    %cst_34 = arith.constant dense<0.000000e+00> : vector<16x16xf32>
    %98 = tpu.matmul %97, %13, %cst_34 {dimension_numbers = #tpu.dot_dimension_numbers<[1], [0], [0], [1], [0, 0, 1, 1], [], []>} : vector<16x16xf32>, vector<16x16xf32>, vector<16x16xf32> -> vector<16x16xf32>
    %c48 = arith.constant 48 : index
    %c0_35 = arith.constant 0 : index
    %99 = vector.load %arg2[%c48, %c0_35] : memref<88x128xf32, #tpu.memory_space<vmem>>, vector<16x128xf32>
    %cst_36 = arith.constant dense<0.000000e+00> : vector<16x128xf32>
    %100 = tpu.matmul %98, %99, %cst_36 {dimension_numbers = #tpu.dot_dimension_numbers<[1], [0], [0], [1], [0, 0, 1, 1], [], []>} : vector<16x16xf32>, vector<16x128xf32>, vector<16x128xf32> -> vector<16x128xf32>
    %101 = arith.addf %82, %100 : vector<16x128xf32>
    %c2_i32_37 = arith.constant 2 : i32
    %102 = vector.broadcast %c2_i32_37 : i32 to vector<16x16xi32>
    %103 = arith.addi %21, %102 : vector<16x16xi32>
    %c0_i32_38 = arith.constant 0 : i32
    %104 = vector.broadcast %c0_i32_38 : i32 to vector<16x16xi32>
    %105 = arith.cmpi sge, %103, %104 : vector<16x16xi32>
    %c2_i32_39 = arith.constant 2 : i32
    %106 = vector.broadcast %c2_i32_39 : i32 to vector<16x16xi32>
    %107 = arith.addi %21, %106 : vector<16x16xi32>
    %c8_i32_40 = arith.constant 8 : i32
    %108 = vector.broadcast %c8_i32_40 : i32 to vector<16x16xi32>
    %109 = arith.cmpi slt, %107, %108 : vector<16x16xi32>
    %110 = arith.andi %105, %109 : vector<16x16xi1>
    %c2_i32_41 = arith.constant 2 : i32
    %111 = vector.broadcast %c2_i32_41 : i32 to vector<16x16xi32>
    %112 = arith.addi %14, %111 : vector<16x16xi32>
    %113 = arith.cmpi eq, %15, %112 : vector<16x16xi32>
    %114 = arith.andi %113, %110 : vector<16x16xi1>
    %115 = arith.extui %114 : vector<16x16xi1> to vector<16x16xi32>
    %116 = arith.sitofp %115 : vector<16x16xi32> to vector<16x16xf32>
    %cst_42 = arith.constant dense<0.000000e+00> : vector<16x16xf32>
    %117 = tpu.matmul %116, %13, %cst_42 {dimension_numbers = #tpu.dot_dimension_numbers<[1], [0], [0], [1], [0, 0, 1, 1], [], []>} : vector<16x16xf32>, vector<16x16xf32>, vector<16x16xf32> -> vector<16x16xf32>
    %c64 = arith.constant 64 : index
    %c0_43 = arith.constant 0 : index
    %118 = vector.load %arg2[%c64, %c0_43] : memref<88x128xf32, #tpu.memory_space<vmem>>, vector<16x128xf32>
    %cst_44 = arith.constant dense<0.000000e+00> : vector<16x128xf32>
    %119 = tpu.matmul %117, %118, %cst_44 {dimension_numbers = #tpu.dot_dimension_numbers<[1], [0], [0], [1], [0, 0, 1, 1], [], []>} : vector<16x16xf32>, vector<16x128xf32>, vector<16x128xf32> -> vector<16x128xf32>
    %120 = arith.addf %101, %119 : vector<16x128xf32>
    %cst_45 = arith.constant 0.000000e+00 : f32
    %121 = vector.broadcast %cst_45 : f32 to vector<16x128xf32>
    %122 = arith.maximumf %120, %121 : vector<16x128xf32>
    %123 = vector.extract_strided_slice %122 {offsets = [0, 0], sizes = [16, 32], strides = [1, 1]} : vector<16x128xf32> to vector<16x32xf32>
    %124 = vector.extract_strided_slice %122 {offsets = [0, 32], sizes = [16, 32], strides = [1, 1]} : vector<16x128xf32> to vector<16x32xf32>
    %125 = arith.addf %123, %124 : vector<16x32xf32>
    %126 = vector.extract_strided_slice %122 {offsets = [0, 64], sizes = [16, 32], strides = [1, 1]} : vector<16x128xf32> to vector<16x32xf32>
    %127 = arith.addf %125, %126 : vector<16x32xf32>
    %128 = vector.extract_strided_slice %122 {offsets = [0, 96], sizes = [16, 32], strides = [1, 1]} : vector<16x128xf32> to vector<16x32xf32>
    %129 = arith.addf %127, %128 : vector<16x32xf32>
    %c0_46 = arith.constant 0 : index
    %c0_47 = arith.constant 0 : index
    %130 = vector.load %arg3[%c0_46, %c0_47] : memref<80x96xf32, #tpu.memory_space<vmem>>, vector<32x96xf32>
    %c32_48 = arith.constant 32 : index
    %c0_49 = arith.constant 0 : index
    %131 = vector.load %arg3[%c32_48, %c0_49] : memref<80x96xf32, #tpu.memory_space<vmem>>, vector<1x96xf32>
    %c40 = arith.constant 40 : index
    %c0_50 = arith.constant 0 : index
    %132 = vector.load %arg3[%c40, %c0_50] : memref<80x96xf32, #tpu.memory_space<vmem>>, vector<32x32xf32>
    %c72 = arith.constant 72 : index
    %c0_51 = arith.constant 0 : index
    %133 = vector.load %arg3[%c72, %c0_51] : memref<80x96xf32, #tpu.memory_space<vmem>>, vector<1x32xf32>
    %cst_52 = arith.constant dense<0.000000e+00> : vector<16x96xf32>
    %134 = tpu.matmul %129, %130, %cst_52 {dimension_numbers = #tpu.dot_dimension_numbers<[1], [0], [0], [1], [0, 0, 1, 1], [], []>} : vector<16x32xf32>, vector<32x96xf32>, vector<16x96xf32> -> vector<16x96xf32>
    %135 = vector.broadcast %131 : vector<1x96xf32> to vector<16x96xf32>
    %136 = arith.addf %134, %135 : vector<16x96xf32>
    %137 = vector.extract_strided_slice %136 {offsets = [0, 0], sizes = [8, 8], strides = [1, 1]} : vector<16x96xf32> to vector<8x8xf32>
    %138 = vector.extract_strided_slice %136 {offsets = [0, 32], sizes = [8, 8], strides = [1, 1]} : vector<16x96xf32> to vector<8x8xf32>
    %cst_53 = arith.constant dense<0.000000e+00> : vector<8x8xf32>
    %139 = tpu.matmul %137, %138, %cst_53 {dimension_numbers = #tpu.dot_dimension_numbers<[1], [1], [0], [0], [0, 0, 1, 0], [], []>} : vector<8x8xf32>, vector<8x8xf32>, vector<8x8xf32> -> vector<8x8xf32>
    %140 = vector.extract_strided_slice %136 {offsets = [0, 8], sizes = [8, 8], strides = [1, 1]} : vector<16x96xf32> to vector<8x8xf32>
    %141 = vector.extract_strided_slice %136 {offsets = [0, 40], sizes = [8, 8], strides = [1, 1]} : vector<16x96xf32> to vector<8x8xf32>
    %cst_54 = arith.constant dense<0.000000e+00> : vector<8x8xf32>
    %142 = tpu.matmul %140, %141, %cst_54 {dimension_numbers = #tpu.dot_dimension_numbers<[1], [1], [0], [0], [0, 0, 1, 0], [], []>} : vector<8x8xf32>, vector<8x8xf32>, vector<8x8xf32> -> vector<8x8xf32>
    %143 = vector.extract_strided_slice %136 {offsets = [0, 16], sizes = [8, 8], strides = [1, 1]} : vector<16x96xf32> to vector<8x8xf32>
    %144 = vector.extract_strided_slice %136 {offsets = [0, 48], sizes = [8, 8], strides = [1, 1]} : vector<16x96xf32> to vector<8x8xf32>
    %cst_55 = arith.constant dense<0.000000e+00> : vector<8x8xf32>
    %145 = tpu.matmul %143, %144, %cst_55 {dimension_numbers = #tpu.dot_dimension_numbers<[1], [1], [0], [0], [0, 0, 1, 0], [], []>} : vector<8x8xf32>, vector<8x8xf32>, vector<8x8xf32> -> vector<8x8xf32>
    %146 = vector.extract_strided_slice %136 {offsets = [0, 24], sizes = [8, 8], strides = [1, 1]} : vector<16x96xf32> to vector<8x8xf32>
    %147 = vector.extract_strided_slice %136 {offsets = [0, 56], sizes = [8, 8], strides = [1, 1]} : vector<16x96xf32> to vector<8x8xf32>
    %cst_56 = arith.constant dense<0.000000e+00> : vector<8x8xf32>
    %148 = tpu.matmul %146, %147, %cst_56 {dimension_numbers = #tpu.dot_dimension_numbers<[1], [1], [0], [0], [0, 0, 1, 0], [], []>} : vector<8x8xf32>, vector<8x8xf32>, vector<8x8xf32> -> vector<8x8xf32>
    %149 = vector.extract_strided_slice %136 {offsets = [8, 0], sizes = [8, 8], strides = [1, 1]} : vector<16x96xf32> to vector<8x8xf32>
    %150 = vector.extract_strided_slice %136 {offsets = [8, 32], sizes = [8, 8], strides = [1, 1]} : vector<16x96xf32> to vector<8x8xf32>
    %cst_57 = arith.constant dense<0.000000e+00> : vector<8x8xf32>
    %151 = tpu.matmul %149, %150, %cst_57 {dimension_numbers = #tpu.dot_dimension_numbers<[1], [1], [0], [0], [0, 0, 1, 0], [], []>} : vector<8x8xf32>, vector<8x8xf32>, vector<8x8xf32> -> vector<8x8xf32>
    %152 = vector.extract_strided_slice %136 {offsets = [8, 8], sizes = [8, 8], strides = [1, 1]} : vector<16x96xf32> to vector<8x8xf32>
    %153 = vector.extract_strided_slice %136 {offsets = [8, 40], sizes = [8, 8], strides = [1, 1]} : vector<16x96xf32> to vector<8x8xf32>
    %cst_58 = arith.constant dense<0.000000e+00> : vector<8x8xf32>
    %154 = tpu.matmul %152, %153, %cst_58 {dimension_numbers = #tpu.dot_dimension_numbers<[1], [1], [0], [0], [0, 0, 1, 0], [], []>} : vector<8x8xf32>, vector<8x8xf32>, vector<8x8xf32> -> vector<8x8xf32>
    %155 = vector.extract_strided_slice %136 {offsets = [8, 16], sizes = [8, 8], strides = [1, 1]} : vector<16x96xf32> to vector<8x8xf32>
    %156 = vector.extract_strided_slice %136 {offsets = [8, 48], sizes = [8, 8], strides = [1, 1]} : vector<16x96xf32> to vector<8x8xf32>
    %cst_59 = arith.constant dense<0.000000e+00> : vector<8x8xf32>
    %157 = tpu.matmul %155, %156, %cst_59 {dimension_numbers = #tpu.dot_dimension_numbers<[1], [1], [0], [0], [0, 0, 1, 0], [], []>} : vector<8x8xf32>, vector<8x8xf32>, vector<8x8xf32> -> vector<8x8xf32>
    %158 = vector.extract_strided_slice %136 {offsets = [8, 24], sizes = [8, 8], strides = [1, 1]} : vector<16x96xf32> to vector<8x8xf32>
    %159 = vector.extract_strided_slice %136 {offsets = [8, 56], sizes = [8, 8], strides = [1, 1]} : vector<16x96xf32> to vector<8x8xf32>
    %cst_60 = arith.constant dense<0.000000e+00> : vector<8x8xf32>
    %160 = tpu.matmul %158, %159, %cst_60 {dimension_numbers = #tpu.dot_dimension_numbers<[1], [1], [0], [0], [0, 0, 1, 0], [], []>} : vector<8x8xf32>, vector<8x8xf32>, vector<8x8xf32> -> vector<8x8xf32>
    %161 = tpu.concatenate %139, %142, %145, %148, %151, %154, %157, %160 in 0 : vector<8x8xf32>, vector<8x8xf32>, vector<8x8xf32>, vector<8x8xf32>, vector<8x8xf32>, vector<8x8xf32>, vector<8x8xf32>, vector<8x8xf32> -> vector<64x8xf32>
    %cst_61 = arith.constant dense<0xFF800000> : vector<64xf32>
    %162 = vector.multi_reduction <maximumf>, %161, %cst_61 [1] : vector<64x8xf32> to vector<64xf32>
    %163 = vector.shape_cast %162 : vector<64xf32> to vector<64x1xf32>
    %164 = vector.broadcast %163 : vector<64x1xf32> to vector<64x8xf32>
    %165 = arith.subf %161, %164 : vector<64x8xf32>
    %166 = math.exp %165 : vector<64x8xf32>
    %cst_62 = arith.constant dense<0.000000e+00> : vector<64xf32>
    %167 = vector.multi_reduction <add>, %166, %cst_62 [1] : vector<64x8xf32> to vector<64xf32>
    %168 = vector.shape_cast %167 : vector<64xf32> to vector<64x1xf32>
    %169 = vector.broadcast %168 : vector<64x1xf32> to vector<64x8xf32>
    %170 = arith.divf %166, %169 : vector<64x8xf32>
    %cst_63 = arith.constant 0.000000e+00 : f32
    %171 = vector.broadcast %cst_63 : f32 to vector<8x32xf32>
    %172 = vector.extract_strided_slice %136 {offsets = [0, 64], sizes = [8, 8], strides = [1, 1]} : vector<16x96xf32> to vector<8x8xf32>
    %173 = vector.extract_strided_slice %170 {offsets = [0, 0], sizes = [8, 8], strides = [1, 1]} : vector<64x8xf32> to vector<8x8xf32>
    %cst_64 = arith.constant dense<0.000000e+00> : vector<8x8xf32>
    %174 = tpu.matmul %173, %172, %cst_64 {dimension_numbers = #tpu.dot_dimension_numbers<[1], [0], [0], [1], [0, 0, 1, 1], [], []>} : vector<8x8xf32>, vector<8x8xf32>, vector<8x8xf32> -> vector<8x8xf32>
    %175 = vector.extract_strided_slice %132 {offsets = [0, 0], sizes = [8, 32], strides = [1, 1]} : vector<32x32xf32> to vector<8x32xf32>
    %cst_65 = arith.constant dense<0.000000e+00> : vector<8x32xf32>
    %176 = tpu.matmul %174, %175, %cst_65 {dimension_numbers = #tpu.dot_dimension_numbers<[1], [0], [0], [1], [0, 0, 1, 1], [], []>} : vector<8x8xf32>, vector<8x32xf32>, vector<8x32xf32> -> vector<8x32xf32>
    %177 = arith.addf %171, %176 : vector<8x32xf32>
    %178 = vector.extract_strided_slice %136 {offsets = [0, 72], sizes = [8, 8], strides = [1, 1]} : vector<16x96xf32> to vector<8x8xf32>
    %179 = vector.extract_strided_slice %170 {offsets = [8, 0], sizes = [8, 8], strides = [1, 1]} : vector<64x8xf32> to vector<8x8xf32>
    %cst_66 = arith.constant dense<0.000000e+00> : vector<8x8xf32>
    %180 = tpu.matmul %179, %178, %cst_66 {dimension_numbers = #tpu.dot_dimension_numbers<[1], [0], [0], [1], [0, 0, 1, 1], [], []>} : vector<8x8xf32>, vector<8x8xf32>, vector<8x8xf32> -> vector<8x8xf32>
    %181 = vector.extract_strided_slice %132 {offsets = [8, 0], sizes = [8, 32], strides = [1, 1]} : vector<32x32xf32> to vector<8x32xf32>
    %cst_67 = arith.constant dense<0.000000e+00> : vector<8x32xf32>
    %182 = tpu.matmul %180, %181, %cst_67 {dimension_numbers = #tpu.dot_dimension_numbers<[1], [0], [0], [1], [0, 0, 1, 1], [], []>} : vector<8x8xf32>, vector<8x32xf32>, vector<8x32xf32> -> vector<8x32xf32>
    %183 = arith.addf %177, %182 : vector<8x32xf32>
    %184 = vector.extract_strided_slice %136 {offsets = [0, 80], sizes = [8, 8], strides = [1, 1]} : vector<16x96xf32> to vector<8x8xf32>
    %185 = vector.extract_strided_slice %170 {offsets = [16, 0], sizes = [8, 8], strides = [1, 1]} : vector<64x8xf32> to vector<8x8xf32>
    %cst_68 = arith.constant dense<0.000000e+00> : vector<8x8xf32>
    %186 = tpu.matmul %185, %184, %cst_68 {dimension_numbers = #tpu.dot_dimension_numbers<[1], [0], [0], [1], [0, 0, 1, 1], [], []>} : vector<8x8xf32>, vector<8x8xf32>, vector<8x8xf32> -> vector<8x8xf32>
    %187 = vector.extract_strided_slice %132 {offsets = [16, 0], sizes = [8, 32], strides = [1, 1]} : vector<32x32xf32> to vector<8x32xf32>
    %cst_69 = arith.constant dense<0.000000e+00> : vector<8x32xf32>
    %188 = tpu.matmul %186, %187, %cst_69 {dimension_numbers = #tpu.dot_dimension_numbers<[1], [0], [0], [1], [0, 0, 1, 1], [], []>} : vector<8x8xf32>, vector<8x32xf32>, vector<8x32xf32> -> vector<8x32xf32>
    %189 = arith.addf %183, %188 : vector<8x32xf32>
    %190 = vector.extract_strided_slice %136 {offsets = [0, 88], sizes = [8, 8], strides = [1, 1]} : vector<16x96xf32> to vector<8x8xf32>
    %191 = vector.extract_strided_slice %170 {offsets = [24, 0], sizes = [8, 8], strides = [1, 1]} : vector<64x8xf32> to vector<8x8xf32>
    %cst_70 = arith.constant dense<0.000000e+00> : vector<8x8xf32>
    %192 = tpu.matmul %191, %190, %cst_70 {dimension_numbers = #tpu.dot_dimension_numbers<[1], [0], [0], [1], [0, 0, 1, 1], [], []>} : vector<8x8xf32>, vector<8x8xf32>, vector<8x8xf32> -> vector<8x8xf32>
    %193 = vector.extract_strided_slice %132 {offsets = [24, 0], sizes = [8, 32], strides = [1, 1]} : vector<32x32xf32> to vector<8x32xf32>
    %cst_71 = arith.constant dense<0.000000e+00> : vector<8x32xf32>
    %194 = tpu.matmul %192, %193, %cst_71 {dimension_numbers = #tpu.dot_dimension_numbers<[1], [0], [0], [1], [0, 0, 1, 1], [], []>} : vector<8x8xf32>, vector<8x32xf32>, vector<8x32xf32> -> vector<8x32xf32>
    %195 = arith.addf %189, %194 : vector<8x32xf32>
    %cst_72 = arith.constant 0.000000e+00 : f32
    %196 = vector.broadcast %cst_72 : f32 to vector<8x32xf32>
    %197 = vector.extract_strided_slice %136 {offsets = [8, 64], sizes = [8, 8], strides = [1, 1]} : vector<16x96xf32> to vector<8x8xf32>
    %198 = vector.extract_strided_slice %170 {offsets = [32, 0], sizes = [8, 8], strides = [1, 1]} : vector<64x8xf32> to vector<8x8xf32>
    %cst_73 = arith.constant dense<0.000000e+00> : vector<8x8xf32>
    %199 = tpu.matmul %198, %197, %cst_73 {dimension_numbers = #tpu.dot_dimension_numbers<[1], [0], [0], [1], [0, 0, 1, 1], [], []>} : vector<8x8xf32>, vector<8x8xf32>, vector<8x8xf32> -> vector<8x8xf32>
    %200 = vector.extract_strided_slice %132 {offsets = [0, 0], sizes = [8, 32], strides = [1, 1]} : vector<32x32xf32> to vector<8x32xf32>
    %cst_74 = arith.constant dense<0.000000e+00> : vector<8x32xf32>
    %201 = tpu.matmul %199, %200, %cst_74 {dimension_numbers = #tpu.dot_dimension_numbers<[1], [0], [0], [1], [0, 0, 1, 1], [], []>} : vector<8x8xf32>, vector<8x32xf32>, vector<8x32xf32> -> vector<8x32xf32>
    %202 = arith.addf %196, %201 : vector<8x32xf32>
    %203 = vector.extract_strided_slice %136 {offsets = [8, 72], sizes = [8, 8], strides = [1, 1]} : vector<16x96xf32> to vector<8x8xf32>
    %204 = vector.extract_strided_slice %170 {offsets = [40, 0], sizes = [8, 8], strides = [1, 1]} : vector<64x8xf32> to vector<8x8xf32>
    %cst_75 = arith.constant dense<0.000000e+00> : vector<8x8xf32>
    %205 = tpu.matmul %204, %203, %cst_75 {dimension_numbers = #tpu.dot_dimension_numbers<[1], [0], [0], [1], [0, 0, 1, 1], [], []>} : vector<8x8xf32>, vector<8x8xf32>, vector<8x8xf32> -> vector<8x8xf32>
    %206 = vector.extract_strided_slice %132 {offsets = [8, 0], sizes = [8, 32], strides = [1, 1]} : vector<32x32xf32> to vector<8x32xf32>
    %cst_76 = arith.constant dense<0.000000e+00> : vector<8x32xf32>
    %207 = tpu.matmul %205, %206, %cst_76 {dimension_numbers = #tpu.dot_dimension_numbers<[1], [0], [0], [1], [0, 0, 1, 1], [], []>} : vector<8x8xf32>, vector<8x32xf32>, vector<8x32xf32> -> vector<8x32xf32>
    %208 = arith.addf %202, %207 : vector<8x32xf32>
    %209 = vector.extract_strided_slice %136 {offsets = [8, 80], sizes = [8, 8], strides = [1, 1]} : vector<16x96xf32> to vector<8x8xf32>
    %210 = vector.extract_strided_slice %170 {offsets = [48, 0], sizes = [8, 8], strides = [1, 1]} : vector<64x8xf32> to vector<8x8xf32>
    %cst_77 = arith.constant dense<0.000000e+00> : vector<8x8xf32>
    %211 = tpu.matmul %210, %209, %cst_77 {dimension_numbers = #tpu.dot_dimension_numbers<[1], [0], [0], [1], [0, 0, 1, 1], [], []>} : vector<8x8xf32>, vector<8x8xf32>, vector<8x8xf32> -> vector<8x8xf32>
    %212 = vector.extract_strided_slice %132 {offsets = [16, 0], sizes = [8, 32], strides = [1, 1]} : vector<32x32xf32> to vector<8x32xf32>
    %cst_78 = arith.constant dense<0.000000e+00> : vector<8x32xf32>
    %213 = tpu.matmul %211, %212, %cst_78 {dimension_numbers = #tpu.dot_dimension_numbers<[1], [0], [0], [1], [0, 0, 1, 1], [], []>} : vector<8x8xf32>, vector<8x32xf32>, vector<8x32xf32> -> vector<8x32xf32>
    %214 = arith.addf %208, %213 : vector<8x32xf32>
    %215 = vector.extract_strided_slice %136 {offsets = [8, 88], sizes = [8, 8], strides = [1, 1]} : vector<16x96xf32> to vector<8x8xf32>
    %216 = vector.extract_strided_slice %170 {offsets = [56, 0], sizes = [8, 8], strides = [1, 1]} : vector<64x8xf32> to vector<8x8xf32>
    %cst_79 = arith.constant dense<0.000000e+00> : vector<8x8xf32>
    %217 = tpu.matmul %216, %215, %cst_79 {dimension_numbers = #tpu.dot_dimension_numbers<[1], [0], [0], [1], [0, 0, 1, 1], [], []>} : vector<8x8xf32>, vector<8x8xf32>, vector<8x8xf32> -> vector<8x8xf32>
    %218 = vector.extract_strided_slice %132 {offsets = [24, 0], sizes = [8, 32], strides = [1, 1]} : vector<32x32xf32> to vector<8x32xf32>
    %cst_80 = arith.constant dense<0.000000e+00> : vector<8x32xf32>
    %219 = tpu.matmul %217, %218, %cst_80 {dimension_numbers = #tpu.dot_dimension_numbers<[1], [0], [0], [1], [0, 0, 1, 1], [], []>} : vector<8x8xf32>, vector<8x32xf32>, vector<8x32xf32> -> vector<8x32xf32>
    %220 = arith.addf %214, %219 : vector<8x32xf32>
    %221 = tpu.concatenate %195, %220 in 0 : vector<8x32xf32>, vector<8x32xf32> -> vector<16x32xf32>
    %222 = vector.broadcast %133 : vector<1x32xf32> to vector<16x32xf32>
    %223 = arith.addf %221, %222 : vector<16x32xf32>
    %c0_81 = arith.constant 0 : index
    %c0_82 = arith.constant 0 : index
    %224 = vector.load %arg4[%c0_81, %c0_82] : memref<112x192xf32, #tpu.memory_space<vmem>>, vector<32x192xf32>
    %c32_83 = arith.constant 32 : index
    %c0_84 = arith.constant 0 : index
    %225 = vector.load %arg4[%c32_83, %c0_84] : memref<112x192xf32, #tpu.memory_space<vmem>>, vector<64x192xf32>
    %c96 = arith.constant 96 : index
    %c0_85 = arith.constant 0 : index
    %226 = vector.load %arg4[%c96, %c0_85] : memref<112x192xf32, #tpu.memory_space<vmem>>, vector<1x192xf32>
    %c104 = arith.constant 104 : index
    %c0_86 = arith.constant 0 : index
    %227 = vector.load %arg4[%c104, %c0_86] : memref<112x192xf32, #tpu.memory_space<vmem>>, vector<1x192xf32>
    %cst_87 = arith.constant dense<0.000000e+00> : vector<16x192xf32>
    %228 = tpu.matmul %223, %224, %cst_87 {dimension_numbers = #tpu.dot_dimension_numbers<[1], [0], [0], [1], [0, 0, 1, 1], [], []>} : vector<16x32xf32>, vector<32x192xf32>, vector<16x192xf32> -> vector<16x192xf32>
    %229 = vector.broadcast %226 : vector<1x192xf32> to vector<16x192xf32>
    %230 = arith.addf %228, %229 : vector<16x192xf32>
    %231 = tpu.iota {dimensions = array<i32: 1>} : vector<2x192xi32>
    %c32_i32 = arith.constant 32 : i32
    %232 = vector.broadcast %c32_i32 : i32 to vector<2x192xi32>
    %233 = arith.cmpi slt, %231, %232 : vector<2x192xi32>
    %c64_i32 = arith.constant 64 : i32
    %234 = vector.broadcast %c64_i32 : i32 to vector<2x192xi32>
    %235 = arith.cmpi sge, %231, %234 : vector<2x192xi32>
    %c96_i32 = arith.constant 96 : i32
    %236 = vector.broadcast %c96_i32 : i32 to vector<2x192xi32>
    %237 = arith.cmpi slt, %231, %236 : vector<2x192xi32>
    %238 = arith.andi %235, %237 : vector<2x192xi1>
    %239 = arith.ori %233, %238 : vector<2x192xi1>
    %c128_i32 = arith.constant 128 : i32
    %240 = vector.broadcast %c128_i32 : i32 to vector<2x192xi32>
    %241 = arith.cmpi sge, %231, %240 : vector<2x192xi32>
    %c160_i32 = arith.constant 160 : i32
    %242 = vector.broadcast %c160_i32 : i32 to vector<2x192xi32>
    %243 = arith.cmpi slt, %231, %242 : vector<2x192xi32>
    %244 = arith.andi %241, %243 : vector<2x192xi1>
    %245 = arith.ori %239, %244 : vector<2x192xi1>
    %cst_88 = arith.constant 0.000000e+00 : f32
    %246 = vector.broadcast %cst_88 : f32 to vector<2x64xf32>
    %247 = vector.extract_strided_slice %230 {offsets = [0, 0], sizes = [1, 192], strides = [1, 1]} : vector<16x192xf32> to vector<1x192xf32>
    %248 = vector.extract_strided_slice %230 {offsets = [8, 0], sizes = [1, 192], strides = [1, 1]} : vector<16x192xf32> to vector<1x192xf32>
    %249 = tpu.concatenate %247, %248 in 0 : vector<1x192xf32>, vector<1x192xf32> -> vector<2x192xf32>
    %250 = vector.extract_strided_slice %230 {offsets = [7, 0], sizes = [1, 192], strides = [1, 1]} : vector<16x192xf32> to vector<1x192xf32>
    %251 = vector.extract_strided_slice %230 {offsets = [15, 0], sizes = [1, 192], strides = [1, 1]} : vector<16x192xf32> to vector<1x192xf32>
    %252 = tpu.concatenate %250, %251 in 0 : vector<1x192xf32>, vector<1x192xf32> -> vector<2x192xf32>
    %253 = arith.select %245, %249, %252 : vector<2x192xi1>, vector<2x192xf32>
    %cst_89 = arith.constant dense<0.000000e+00> : vector<2x192xf32>
    %254 = tpu.matmul %246, %225, %cst_89 {dimension_numbers = #tpu.dot_dimension_numbers<[1], [0], [0], [1], [0, 0, 1, 1], [], []>} : vector<2x64xf32>, vector<64x192xf32>, vector<2x192xf32> -> vector<2x192xf32>
    %255 = vector.broadcast %227 : vector<1x192xf32> to vector<2x192xf32>
    %256 = arith.addf %254, %255 : vector<2x192xf32>
    %257 = vector.extract_strided_slice %253 {offsets = [0, 0], sizes = [2, 128], strides = [1, 1]} : vector<2x192xf32> to vector<2x128xf32>
    %258 = vector.extract_strided_slice %256 {offsets = [0, 0], sizes = [2, 128], strides = [1, 1]} : vector<2x192xf32> to vector<2x128xf32>
    %259 = arith.addf %257, %258 : vector<2x128xf32>
    %cst_90 = arith.constant 0.000000e+00 : f32
    %260 = vector.broadcast %cst_90 : f32 to vector<2x128xf32>
    %261 = arith.subf %260, %259 : vector<2x128xf32>
    %262 = math.exp %261 : vector<2x128xf32>
    %cst_91 = arith.constant 1.000000e+00 : f32
    %263 = vector.broadcast %cst_91 : f32 to vector<2x128xf32>
    %264 = arith.addf %263, %262 : vector<2x128xf32>
    %cst_92 = arith.constant 1.000000e+00 : f32
    %265 = vector.broadcast %cst_92 : f32 to vector<2x128xf32>
    %266 = arith.divf %265, %264 : vector<2x128xf32>
    %267 = vector.extract_strided_slice %266 {offsets = [0, 0], sizes = [2, 64], strides = [1, 1]} : vector<2x128xf32> to vector<2x64xf32>
    %268 = vector.extract_strided_slice %266 {offsets = [0, 64], sizes = [2, 64], strides = [1, 1]} : vector<2x128xf32> to vector<2x64xf32>
    %269 = vector.extract_strided_slice %253 {offsets = [0, 128], sizes = [2, 64], strides = [1, 1]} : vector<2x192xf32> to vector<2x64xf32>
    %270 = vector.extract_strided_slice %256 {offsets = [0, 128], sizes = [2, 64], strides = [1, 1]} : vector<2x192xf32> to vector<2x64xf32>
    %271 = arith.mulf %267, %270 : vector<2x64xf32>
    %272 = arith.addf %269, %271 : vector<2x64xf32>
    %273 = math.tanh %272 : vector<2x64xf32>
    %cst_93 = arith.constant 1.000000e+00 : f32
    %274 = vector.broadcast %cst_93 : f32 to vector<2x64xf32>
    %275 = arith.subf %274, %268 : vector<2x64xf32>
    %276 = arith.mulf %275, %273 : vector<2x64xf32>
    %277 = arith.mulf %268, %246 : vector<2x64xf32>
    %278 = arith.addf %276, %277 : vector<2x64xf32>
    %279 = vector.extract_strided_slice %278 {offsets = [0, 0], sizes = [2, 32], strides = [1, 1]} : vector<2x64xf32> to vector<2x32xf32>
    %c0_94 = arith.constant 0 : index
    %c0_95 = arith.constant 0 : index
    %280 = vector.load %arg14[%c0_94, %c0_95] : memref<2x512xf32, #tpu.memory_space<vmem>>, vector<2x32xf32>
    tpu.vector_store %arg14[%c0_94, %c0_95], %279 {strides = array<i32>} : memref<2x512xf32, #tpu.memory_space<vmem>>, vector<2x32xf32>,
    %281 = vector.extract_strided_slice %278 {offsets = [0, 32], sizes = [2, 32], strides = [1, 1]} : vector<2x64xf32> to vector<2x32xf32>
    %c0_96 = arith.constant 0 : index
    %c480 = arith.constant 480 : index
    %282 = vector.load %arg14[%c0_96, %c480] : memref<2x512xf32, #tpu.memory_space<vmem>>, vector<2x32xf32>
    tpu.vector_store %arg14[%c0_96, %c480], %281 {strides = array<i32>} : memref<2x512xf32, #tpu.memory_space<vmem>>, vector<2x32xf32>,
    %283 = vector.extract_strided_slice %230 {offsets = [1, 0], sizes = [1, 192], strides = [1, 1]} : vector<16x192xf32> to vector<1x192xf32>
    %284 = vector.extract_strided_slice %230 {offsets = [9, 0], sizes = [1, 192], strides = [1, 1]} : vector<16x192xf32> to vector<1x192xf32>
    %285 = tpu.concatenate %283, %284 in 0 : vector<1x192xf32>, vector<1x192xf32> -> vector<2x192xf32>
    %286 = vector.extract_strided_slice %230 {offsets = [6, 0], sizes = [1, 192], strides = [1, 1]} : vector<16x192xf32> to vector<1x192xf32>
    %287 = vector.extract_strided_slice %230 {offsets = [14, 0], sizes = [1, 192], strides = [1, 1]} : vector<16x192xf32> to vector<1x192xf32>
    %288 = tpu.concatenate %286, %287 in 0 : vector<1x192xf32>, vector<1x192xf32> -> vector<2x192xf32>
    %289 = arith.select %245, %285, %288 : vector<2x192xi1>, vector<2x192xf32>
    %cst_97 = arith.constant dense<0.000000e+00> : vector<2x192xf32>
    %290 = tpu.matmul %278, %225, %cst_97 {dimension_numbers = #tpu.dot_dimension_numbers<[1], [0], [0], [1], [0, 0, 1, 1], [], []>} : vector<2x64xf32>, vector<64x192xf32>, vector<2x192xf32> -> vector<2x192xf32>
    %291 = vector.broadcast %227 : vector<1x192xf32> to vector<2x192xf32>
    %292 = arith.addf %290, %291 : vector<2x192xf32>
    %293 = vector.extract_strided_slice %289 {offsets = [0, 0], sizes = [2, 128], strides = [1, 1]} : vector<2x192xf32> to vector<2x128xf32>
    %294 = vector.extract_strided_slice %292 {offsets = [0, 0], sizes = [2, 128], strides = [1, 1]} : vector<2x192xf32> to vector<2x128xf32>
    %295 = arith.addf %293, %294 : vector<2x128xf32>
    %cst_98 = arith.constant 0.000000e+00 : f32
    %296 = vector.broadcast %cst_98 : f32 to vector<2x128xf32>
    %297 = arith.subf %296, %295 : vector<2x128xf32>
    %298 = math.exp %297 : vector<2x128xf32>
    %cst_99 = arith.constant 1.000000e+00 : f32
    %299 = vector.broadcast %cst_99 : f32 to vector<2x128xf32>
    %300 = arith.addf %299, %298 : vector<2x128xf32>
    %cst_100 = arith.constant 1.000000e+00 : f32
    %301 = vector.broadcast %cst_100 : f32 to vector<2x128xf32>
    %302 = arith.divf %301, %300 : vector<2x128xf32>
    %303 = vector.extract_strided_slice %302 {offsets = [0, 0], sizes = [2, 64], strides = [1, 1]} : vector<2x128xf32> to vector<2x64xf32>
    %304 = vector.extract_strided_slice %302 {offsets = [0, 64], sizes = [2, 64], strides = [1, 1]} : vector<2x128xf32> to vector<2x64xf32>
    %305 = vector.extract_strided_slice %289 {offsets = [0, 128], sizes = [2, 64], strides = [1, 1]} : vector<2x192xf32> to vector<2x64xf32>
    %306 = vector.extract_strided_slice %292 {offsets = [0, 128], sizes = [2, 64], strides = [1, 1]} : vector<2x192xf32> to vector<2x64xf32>
    %307 = arith.mulf %303, %306 : vector<2x64xf32>
    %308 = arith.addf %305, %307 : vector<2x64xf32>
    %309 = math.tanh %308 : vector<2x64xf32>
    %cst_101 = arith.constant 1.000000e+00 : f32
    %310 = vector.broadcast %cst_101 : f32 to vector<2x64xf32>
    %311 = arith.subf %310, %304 : vector<2x64xf32>
    %312 = arith.mulf %311, %309 : vector<2x64xf32>
    %313 = arith.mulf %304, %278 : vector<2x64xf32>
    %314 = arith.addf %312, %313 : vector<2x64xf32>
    %315 = vector.extract_strided_slice %314 {offsets = [0, 0], sizes = [2, 32], strides = [1, 1]} : vector<2x64xf32> to vector<2x32xf32>
    %c0_102 = arith.constant 0 : index
    %c64_103 = arith.constant 64 : index
    %316 = vector.load %arg14[%c0_102, %c64_103] : memref<2x512xf32, #tpu.memory_space<vmem>>, vector<2x32xf32>
    tpu.vector_store %arg14[%c0_102, %c64_103], %315 {strides = array<i32>} : memref<2x512xf32, #tpu.memory_space<vmem>>, vector<2x32xf32>,
    %317 = vector.extract_strided_slice %314 {offsets = [0, 32], sizes = [2, 32], strides = [1, 1]} : vector<2x64xf32> to vector<2x32xf32>
    %c0_104 = arith.constant 0 : index
    %c416 = arith.constant 416 : index
    %318 = vector.load %arg14[%c0_104, %c416] : memref<2x512xf32, #tpu.memory_space<vmem>>, vector<2x32xf32>
    tpu.vector_store %arg14[%c0_104, %c416], %317 {strides = array<i32>} : memref<2x512xf32, #tpu.memory_space<vmem>>, vector<2x32xf32>,
    %319 = vector.extract_strided_slice %230 {offsets = [2, 0], sizes = [1, 192], strides = [1, 1]} : vector<16x192xf32> to vector<1x192xf32>
    %320 = vector.extract_strided_slice %230 {offsets = [10, 0], sizes = [1, 192], strides = [1, 1]} : vector<16x192xf32> to vector<1x192xf32>
    %321 = tpu.concatenate %319, %320 in 0 : vector<1x192xf32>, vector<1x192xf32> -> vector<2x192xf32>
    %322 = vector.extract_strided_slice %230 {offsets = [5, 0], sizes = [1, 192], strides = [1, 1]} : vector<16x192xf32> to vector<1x192xf32>
    %323 = vector.extract_strided_slice %230 {offsets = [13, 0], sizes = [1, 192], strides = [1, 1]} : vector<16x192xf32> to vector<1x192xf32>
    %324 = tpu.concatenate %322, %323 in 0 : vector<1x192xf32>, vector<1x192xf32> -> vector<2x192xf32>
    %325 = arith.select %245, %321, %324 : vector<2x192xi1>, vector<2x192xf32>
    %cst_105 = arith.constant dense<0.000000e+00> : vector<2x192xf32>
    %326 = tpu.matmul %314, %225, %cst_105 {dimension_numbers = #tpu.dot_dimension_numbers<[1], [0], [0], [1], [0, 0, 1, 1], [], []>} : vector<2x64xf32>, vector<64x192xf32>, vector<2x192xf32> -> vector<2x192xf32>
    %327 = vector.broadcast %227 : vector<1x192xf32> to vector<2x192xf32>
    %328 = arith.addf %326, %327 : vector<2x192xf32>
    %329 = vector.extract_strided_slice %325 {offsets = [0, 0], sizes = [2, 128], strides = [1, 1]} : vector<2x192xf32> to vector<2x128xf32>
    %330 = vector.extract_strided_slice %328 {offsets = [0, 0], sizes = [2, 128], strides = [1, 1]} : vector<2x192xf32> to vector<2x128xf32>
    %331 = arith.addf %329, %330 : vector<2x128xf32>
    %cst_106 = arith.constant 0.000000e+00 : f32
    %332 = vector.broadcast %cst_106 : f32 to vector<2x128xf32>
    %333 = arith.subf %332, %331 : vector<2x128xf32>
    %334 = math.exp %333 : vector<2x128xf32>
    %cst_107 = arith.constant 1.000000e+00 : f32
    %335 = vector.broadcast %cst_107 : f32 to vector<2x128xf32>
    %336 = arith.addf %335, %334 : vector<2x128xf32>
    %cst_108 = arith.constant 1.000000e+00 : f32
    %337 = vector.broadcast %cst_108 : f32 to vector<2x128xf32>
    %338 = arith.divf %337, %336 : vector<2x128xf32>
    %339 = vector.extract_strided_slice %338 {offsets = [0, 0], sizes = [2, 64], strides = [1, 1]} : vector<2x128xf32> to vector<2x64xf32>
    %340 = vector.extract_strided_slice %338 {offsets = [0, 64], sizes = [2, 64], strides = [1, 1]} : vector<2x128xf32> to vector<2x64xf32>
    %341 = vector.extract_strided_slice %325 {offsets = [0, 128], sizes = [2, 64], strides = [1, 1]} : vector<2x192xf32> to vector<2x64xf32>
    %342 = vector.extract_strided_slice %328 {offsets = [0, 128], sizes = [2, 64], strides = [1, 1]} : vector<2x192xf32> to vector<2x64xf32>
    %343 = arith.mulf %339, %342 : vector<2x64xf32>
    %344 = arith.addf %341, %343 : vector<2x64xf32>
    %345 = math.tanh %344 : vector<2x64xf32>
    %cst_109 = arith.constant 1.000000e+00 : f32
    %346 = vector.broadcast %cst_109 : f32 to vector<2x64xf32>
    %347 = arith.subf %346, %340 : vector<2x64xf32>
    %348 = arith.mulf %347, %345 : vector<2x64xf32>
    %349 = arith.mulf %340, %314 : vector<2x64xf32>
    %350 = arith.addf %348, %349 : vector<2x64xf32>
    %351 = vector.extract_strided_slice %350 {offsets = [0, 0], sizes = [2, 32], strides = [1, 1]} : vector<2x64xf32> to vector<2x32xf32>
    %c0_110 = arith.constant 0 : index
    %c128 = arith.constant 128 : index
    %352 = vector.load %arg14[%c0_110, %c128] : memref<2x512xf32, #tpu.memory_space<vmem>>, vector<2x32xf32>
    tpu.vector_store %arg14[%c0_110, %c128], %351 {strides = array<i32>} : memref<2x512xf32, #tpu.memory_space<vmem>>, vector<2x32xf32>,
    %353 = vector.extract_strided_slice %350 {offsets = [0, 32], sizes = [2, 32], strides = [1, 1]} : vector<2x64xf32> to vector<2x32xf32>
    %c0_111 = arith.constant 0 : index
    %c352 = arith.constant 352 : index
    %354 = vector.load %arg14[%c0_111, %c352] : memref<2x512xf32, #tpu.memory_space<vmem>>, vector<2x32xf32>
    tpu.vector_store %arg14[%c0_111, %c352], %353 {strides = array<i32>} : memref<2x512xf32, #tpu.memory_space<vmem>>, vector<2x32xf32>,
    %355 = vector.extract_strided_slice %230 {offsets = [3, 0], sizes = [1, 192], strides = [1, 1]} : vector<16x192xf32> to vector<1x192xf32>
    %356 = vector.extract_strided_slice %230 {offsets = [11, 0], sizes = [1, 192], strides = [1, 1]} : vector<16x192xf32> to vector<1x192xf32>
    %357 = tpu.concatenate %355, %356 in 0 : vector<1x192xf32>, vector<1x192xf32> -> vector<2x192xf32>
    %358 = vector.extract_strided_slice %230 {offsets = [4, 0], sizes = [1, 192], strides = [1, 1]} : vector<16x192xf32> to vector<1x192xf32>
    %359 = vector.extract_strided_slice %230 {offsets = [12, 0], sizes = [1, 192], strides = [1, 1]} : vector<16x192xf32> to vector<1x192xf32>
    %360 = tpu.concatenate %358, %359 in 0 : vector<1x192xf32>, vector<1x192xf32> -> vector<2x192xf32>
    %361 = arith.select %245, %357, %360 : vector<2x192xi1>, vector<2x192xf32>
    %cst_112 = arith.constant dense<0.000000e+00> : vector<2x192xf32>
    %362 = tpu.matmul %350, %225, %cst_112 {dimension_numbers = #tpu.dot_dimension_numbers<[1], [0], [0], [1], [0, 0, 1, 1], [], []>} : vector<2x64xf32>, vector<64x192xf32>, vector<2x192xf32> -> vector<2x192xf32>
    %363 = vector.broadcast %227 : vector<1x192xf32> to vector<2x192xf32>
    %364 = arith.addf %362, %363 : vector<2x192xf32>
    %365 = vector.extract_strided_slice %361 {offsets = [0, 0], sizes = [2, 128], strides = [1, 1]} : vector<2x192xf32> to vector<2x128xf32>
    %366 = vector.extract_strided_slice %364 {offsets = [0, 0], sizes = [2, 128], strides = [1, 1]} : vector<2x192xf32> to vector<2x128xf32>
    %367 = arith.addf %365, %366 : vector<2x128xf32>
    %cst_113 = arith.constant 0.000000e+00 : f32
    %368 = vector.broadcast %cst_113 : f32 to vector<2x128xf32>
    %369 = arith.subf %368, %367 : vector<2x128xf32>
    %370 = math.exp %369 : vector<2x128xf32>
    %cst_114 = arith.constant 1.000000e+00 : f32
    %371 = vector.broadcast %cst_114 : f32 to vector<2x128xf32>
    %372 = arith.addf %371, %370 : vector<2x128xf32>
    %cst_115 = arith.constant 1.000000e+00 : f32
    %373 = vector.broadcast %cst_115 : f32 to vector<2x128xf32>
    %374 = arith.divf %373, %372 : vector<2x128xf32>
    %375 = vector.extract_strided_slice %374 {offsets = [0, 0], sizes = [2, 64], strides = [1, 1]} : vector<2x128xf32> to vector<2x64xf32>
    %376 = vector.extract_strided_slice %374 {offsets = [0, 64], sizes = [2, 64], strides = [1, 1]} : vector<2x128xf32> to vector<2x64xf32>
    %377 = vector.extract_strided_slice %361 {offsets = [0, 128], sizes = [2, 64], strides = [1, 1]} : vector<2x192xf32> to vector<2x64xf32>
    %378 = vector.extract_strided_slice %364 {offsets = [0, 128], sizes = [2, 64], strides = [1, 1]} : vector<2x192xf32> to vector<2x64xf32>
    %379 = arith.mulf %375, %378 : vector<2x64xf32>
    %380 = arith.addf %377, %379 : vector<2x64xf32>
    %381 = math.tanh %380 : vector<2x64xf32>
    %cst_116 = arith.constant 1.000000e+00 : f32
    %382 = vector.broadcast %cst_116 : f32 to vector<2x64xf32>
    %383 = arith.subf %382, %376 : vector<2x64xf32>
    %384 = arith.mulf %383, %381 : vector<2x64xf32>
    %385 = arith.mulf %376, %350 : vector<2x64xf32>
    %386 = arith.addf %384, %385 : vector<2x64xf32>
    %387 = vector.extract_strided_slice %386 {offsets = [0, 0], sizes = [2, 32], strides = [1, 1]} : vector<2x64xf32> to vector<2x32xf32>
    %c0_117 = arith.constant 0 : index
    %c192 = arith.constant 192 : index
    %388 = vector.load %arg14[%c0_117, %c192] : memref<2x512xf32, #tpu.memory_space<vmem>>, vector<2x32xf32>
    tpu.vector_store %arg14[%c0_117, %c192], %387 {strides = array<i32>} : memref<2x512xf32, #tpu.memory_space<vmem>>, vector<2x32xf32>,
    %389 = vector.extract_strided_slice %386 {offsets = [0, 32], sizes = [2, 32], strides = [1, 1]} : vector<2x64xf32> to vector<2x32xf32>
    %c0_118 = arith.constant 0 : index
    %c288 = arith.constant 288 : index
    %390 = vector.load %arg14[%c0_118, %c288] : memref<2x512xf32, #tpu.memory_space<vmem>>, vector<2x32xf32>
    tpu.vector_store %arg14[%c0_118, %c288], %389 {strides = array<i32>} : memref<2x512xf32, #tpu.memory_space<vmem>>, vector<2x32xf32>,
    %391 = vector.extract_strided_slice %230 {offsets = [4, 0], sizes = [1, 192], strides = [1, 1]} : vector<16x192xf32> to vector<1x192xf32>
    %392 = vector.extract_strided_slice %230 {offsets = [12, 0], sizes = [1, 192], strides = [1, 1]} : vector<16x192xf32> to vector<1x192xf32>
    %393 = tpu.concatenate %391, %392 in 0 : vector<1x192xf32>, vector<1x192xf32> -> vector<2x192xf32>
    %394 = vector.extract_strided_slice %230 {offsets = [3, 0], sizes = [1, 192], strides = [1, 1]} : vector<16x192xf32> to vector<1x192xf32>
    %395 = vector.extract_strided_slice %230 {offsets = [11, 0], sizes = [1, 192], strides = [1, 1]} : vector<16x192xf32> to vector<1x192xf32>
    %396 = tpu.concatenate %394, %395 in 0 : vector<1x192xf32>, vector<1x192xf32> -> vector<2x192xf32>
    %397 = arith.select %245, %393, %396 : vector<2x192xi1>, vector<2x192xf32>
    %cst_119 = arith.constant dense<0.000000e+00> : vector<2x192xf32>
    %398 = tpu.matmul %386, %225, %cst_119 {dimension_numbers = #tpu.dot_dimension_numbers<[1], [0], [0], [1], [0, 0, 1, 1], [], []>} : vector<2x64xf32>, vector<64x192xf32>, vector<2x192xf32> -> vector<2x192xf32>
    %399 = vector.broadcast %227 : vector<1x192xf32> to vector<2x192xf32>
    %400 = arith.addf %398, %399 : vector<2x192xf32>
    %401 = vector.extract_strided_slice %397 {offsets = [0, 0], sizes = [2, 128], strides = [1, 1]} : vector<2x192xf32> to vector<2x128xf32>
    %402 = vector.extract_strided_slice %400 {offsets = [0, 0], sizes = [2, 128], strides = [1, 1]} : vector<2x192xf32> to vector<2x128xf32>
    %403 = arith.addf %401, %402 : vector<2x128xf32>
    %cst_120 = arith.constant 0.000000e+00 : f32
    %404 = vector.broadcast %cst_120 : f32 to vector<2x128xf32>
    %405 = arith.subf %404, %403 : vector<2x128xf32>
    %406 = math.exp %405 : vector<2x128xf32>
    %cst_121 = arith.constant 1.000000e+00 : f32
    %407 = vector.broadcast %cst_121 : f32 to vector<2x128xf32>
    %408 = arith.addf %407, %406 : vector<2x128xf32>
    %cst_122 = arith.constant 1.000000e+00 : f32
    %409 = vector.broadcast %cst_122 : f32 to vector<2x128xf32>
    %410 = arith.divf %409, %408 : vector<2x128xf32>
    %411 = vector.extract_strided_slice %410 {offsets = [0, 0], sizes = [2, 64], strides = [1, 1]} : vector<2x128xf32> to vector<2x64xf32>
    %412 = vector.extract_strided_slice %410 {offsets = [0, 64], sizes = [2, 64], strides = [1, 1]} : vector<2x128xf32> to vector<2x64xf32>
    %413 = vector.extract_strided_slice %397 {offsets = [0, 128], sizes = [2, 64], strides = [1, 1]} : vector<2x192xf32> to vector<2x64xf32>
    %414 = vector.extract_strided_slice %400 {offsets = [0, 128], sizes = [2, 64], strides = [1, 1]} : vector<2x192xf32> to vector<2x64xf32>
    %415 = arith.mulf %411, %414 : vector<2x64xf32>
    %416 = arith.addf %413, %415 : vector<2x64xf32>
    %417 = math.tanh %416 : vector<2x64xf32>
    %cst_123 = arith.constant 1.000000e+00 : f32
    %418 = vector.broadcast %cst_123 : f32 to vector<2x64xf32>
    %419 = arith.subf %418, %412 : vector<2x64xf32>
    %420 = arith.mulf %419, %417 : vector<2x64xf32>
    %421 = arith.mulf %412, %386 : vector<2x64xf32>
    %422 = arith.addf %420, %421 : vector<2x64xf32>
    %423 = vector.extract_strided_slice %422 {offsets = [0, 0], sizes = [2, 32], strides = [1, 1]} : vector<2x64xf32> to vector<2x32xf32>
    %c0_124 = arith.constant 0 : index
    %c256 = arith.constant 256 : index
    %424 = vector.load %arg14[%c0_124, %c256] : memref<2x512xf32, #tpu.memory_space<vmem>>, vector<2x32xf32>
    tpu.vector_store %arg14[%c0_124, %c256], %423 {strides = array<i32>} : memref<2x512xf32, #tpu.memory_space<vmem>>, vector<2x32xf32>,
    %425 = vector.extract_strided_slice %422 {offsets = [0, 32], sizes = [2, 32], strides = [1, 1]} : vector<2x64xf32> to vector<2x32xf32>
    %c0_125 = arith.constant 0 : index
    %c224 = arith.constant 224 : index
    %426 = vector.load %arg14[%c0_125, %c224] : memref<2x512xf32, #tpu.memory_space<vmem>>, vector<2x32xf32>
    tpu.vector_store %arg14[%c0_125, %c224], %425 {strides = array<i32>} : memref<2x512xf32, #tpu.memory_space<vmem>>, vector<2x32xf32>,
    %427 = vector.extract_strided_slice %230 {offsets = [5, 0], sizes = [1, 192], strides = [1, 1]} : vector<16x192xf32> to vector<1x192xf32>
    %428 = vector.extract_strided_slice %230 {offsets = [13, 0], sizes = [1, 192], strides = [1, 1]} : vector<16x192xf32> to vector<1x192xf32>
    %429 = tpu.concatenate %427, %428 in 0 : vector<1x192xf32>, vector<1x192xf32> -> vector<2x192xf32>
    %430 = vector.extract_strided_slice %230 {offsets = [2, 0], sizes = [1, 192], strides = [1, 1]} : vector<16x192xf32> to vector<1x192xf32>
    %431 = vector.extract_strided_slice %230 {offsets = [10, 0], sizes = [1, 192], strides = [1, 1]} : vector<16x192xf32> to vector<1x192xf32>
    %432 = tpu.concatenate %430, %431 in 0 : vector<1x192xf32>, vector<1x192xf32> -> vector<2x192xf32>
    %433 = arith.select %245, %429, %432 : vector<2x192xi1>, vector<2x192xf32>
    %cst_126 = arith.constant dense<0.000000e+00> : vector<2x192xf32>
    %434 = tpu.matmul %422, %225, %cst_126 {dimension_numbers = #tpu.dot_dimension_numbers<[1], [0], [0], [1], [0, 0, 1, 1], [], []>} : vector<2x64xf32>, vector<64x192xf32>, vector<2x192xf32> -> vector<2x192xf32>
    %435 = vector.broadcast %227 : vector<1x192xf32> to vector<2x192xf32>
    %436 = arith.addf %434, %435 : vector<2x192xf32>
    %437 = vector.extract_strided_slice %433 {offsets = [0, 0], sizes = [2, 128], strides = [1, 1]} : vector<2x192xf32> to vector<2x128xf32>
    %438 = vector.extract_strided_slice %436 {offsets = [0, 0], sizes = [2, 128], strides = [1, 1]} : vector<2x192xf32> to vector<2x128xf32>
    %439 = arith.addf %437, %438 : vector<2x128xf32>
    %cst_127 = arith.constant 0.000000e+00 : f32
    %440 = vector.broadcast %cst_127 : f32 to vector<2x128xf32>
    %441 = arith.subf %440, %439 : vector<2x128xf32>
    %442 = math.exp %441 : vector<2x128xf32>
    %cst_128 = arith.constant 1.000000e+00 : f32
    %443 = vector.broadcast %cst_128 : f32 to vector<2x128xf32>
    %444 = arith.addf %443, %442 : vector<2x128xf32>
    %cst_129 = arith.constant 1.000000e+00 : f32
    %445 = vector.broadcast %cst_129 : f32 to vector<2x128xf32>
    %446 = arith.divf %445, %444 : vector<2x128xf32>
    %447 = vector.extract_strided_slice %446 {offsets = [0, 0], sizes = [2, 64], strides = [1, 1]} : vector<2x128xf32> to vector<2x64xf32>
    %448 = vector.extract_strided_slice %446 {offsets = [0, 64], sizes = [2, 64], strides = [1, 1]} : vector<2x128xf32> to vector<2x64xf32>
    %449 = vector.extract_strided_slice %433 {offsets = [0, 128], sizes = [2, 64], strides = [1, 1]} : vector<2x192xf32> to vector<2x64xf32>
    %450 = vector.extract_strided_slice %436 {offsets = [0, 128], sizes = [2, 64], strides = [1, 1]} : vector<2x192xf32> to vector<2x64xf32>
    %451 = arith.mulf %447, %450 : vector<2x64xf32>
    %452 = arith.addf %449, %451 : vector<2x64xf32>
    %453 = math.tanh %452 : vector<2x64xf32>
    %cst_130 = arith.constant 1.000000e+00 : f32
    %454 = vector.broadcast %cst_130 : f32 to vector<2x64xf32>
    %455 = arith.subf %454, %448 : vector<2x64xf32>
    %456 = arith.mulf %455, %453 : vector<2x64xf32>
    %457 = arith.mulf %448, %422 : vector<2x64xf32>
    %458 = arith.addf %456, %457 : vector<2x64xf32>
    %459 = vector.extract_strided_slice %458 {offsets = [0, 0], sizes = [2, 32], strides = [1, 1]} : vector<2x64xf32> to vector<2x32xf32>
    %c0_131 = arith.constant 0 : index
    %c320 = arith.constant 320 : index
    %460 = vector.load %arg14[%c0_131, %c320] : memref<2x512xf32, #tpu.memory_space<vmem>>, vector<2x32xf32>
    tpu.vector_store %arg14[%c0_131, %c320], %459 {strides = array<i32>} : memref<2x512xf32, #tpu.memory_space<vmem>>, vector<2x32xf32>,
    %461 = vector.extract_strided_slice %458 {offsets = [0, 32], sizes = [2, 32], strides = [1, 1]} : vector<2x64xf32> to vector<2x32xf32>
    %c0_132 = arith.constant 0 : index
    %c160 = arith.constant 160 : index
    %462 = vector.load %arg14[%c0_132, %c160] : memref<2x512xf32, #tpu.memory_space<vmem>>, vector<2x32xf32>
    tpu.vector_store %arg14[%c0_132, %c160], %461 {strides = array<i32>} : memref<2x512xf32, #tpu.memory_space<vmem>>, vector<2x32xf32>,
    %463 = vector.extract_strided_slice %230 {offsets = [6, 0], sizes = [1, 192], strides = [1, 1]} : vector<16x192xf32> to vector<1x192xf32>
    %464 = vector.extract_strided_slice %230 {offsets = [14, 0], sizes = [1, 192], strides = [1, 1]} : vector<16x192xf32> to vector<1x192xf32>
    %465 = tpu.concatenate %463, %464 in 0 : vector<1x192xf32>, vector<1x192xf32> -> vector<2x192xf32>
    %466 = vector.extract_strided_slice %230 {offsets = [1, 0], sizes = [1, 192], strides = [1, 1]} : vector<16x192xf32> to vector<1x192xf32>
    %467 = vector.extract_strided_slice %230 {offsets = [9, 0], sizes = [1, 192], strides = [1, 1]} : vector<16x192xf32> to vector<1x192xf32>
    %468 = tpu.concatenate %466, %467 in 0 : vector<1x192xf32>, vector<1x192xf32> -> vector<2x192xf32>
    %469 = arith.select %245, %465, %468 : vector<2x192xi1>, vector<2x192xf32>
    %cst_133 = arith.constant dense<0.000000e+00> : vector<2x192xf32>
    %470 = tpu.matmul %458, %225, %cst_133 {dimension_numbers = #tpu.dot_dimension_numbers<[1], [0], [0], [1], [0, 0, 1, 1], [], []>} : vector<2x64xf32>, vector<64x192xf32>, vector<2x192xf32> -> vector<2x192xf32>
    %471 = vector.broadcast %227 : vector<1x192xf32> to vector<2x192xf32>
    %472 = arith.addf %470, %471 : vector<2x192xf32>
    %473 = vector.extract_strided_slice %469 {offsets = [0, 0], sizes = [2, 128], strides = [1, 1]} : vector<2x192xf32> to vector<2x128xf32>
    %474 = vector.extract_strided_slice %472 {offsets = [0, 0], sizes = [2, 128], strides = [1, 1]} : vector<2x192xf32> to vector<2x128xf32>
    %475 = arith.addf %473, %474 : vector<2x128xf32>
    %cst_134 = arith.constant 0.000000e+00 : f32
    %476 = vector.broadcast %cst_134 : f32 to vector<2x128xf32>
    %477 = arith.subf %476, %475 : vector<2x128xf32>
    %478 = math.exp %477 : vector<2x128xf32>
    %cst_135 = arith.constant 1.000000e+00 : f32
    %479 = vector.broadcast %cst_135 : f32 to vector<2x128xf32>
    %480 = arith.addf %479, %478 : vector<2x128xf32>
    %cst_136 = arith.constant 1.000000e+00 : f32
    %481 = vector.broadcast %cst_136 : f32 to vector<2x128xf32>
    %482 = arith.divf %481, %480 : vector<2x128xf32>
    %483 = vector.extract_strided_slice %482 {offsets = [0, 0], sizes = [2, 64], strides = [1, 1]} : vector<2x128xf32> to vector<2x64xf32>
    %484 = vector.extract_strided_slice %482 {offsets = [0, 64], sizes = [2, 64], strides = [1, 1]} : vector<2x128xf32> to vector<2x64xf32>
    %485 = vector.extract_strided_slice %469 {offsets = [0, 128], sizes = [2, 64], strides = [1, 1]} : vector<2x192xf32> to vector<2x64xf32>
    %486 = vector.extract_strided_slice %472 {offsets = [0, 128], sizes = [2, 64], strides = [1, 1]} : vector<2x192xf32> to vector<2x64xf32>
    %487 = arith.mulf %483, %486 : vector<2x64xf32>
    %488 = arith.addf %485, %487 : vector<2x64xf32>
    %489 = math.tanh %488 : vector<2x64xf32>
    %cst_137 = arith.constant 1.000000e+00 : f32
    %490 = vector.broadcast %cst_137 : f32 to vector<2x64xf32>
    %491 = arith.subf %490, %484 : vector<2x64xf32>
    %492 = arith.mulf %491, %489 : vector<2x64xf32>
    %493 = arith.mulf %484, %458 : vector<2x64xf32>
    %494 = arith.addf %492, %493 : vector<2x64xf32>
    %495 = vector.extract_strided_slice %494 {offsets = [0, 0], sizes = [2, 32], strides = [1, 1]} : vector<2x64xf32> to vector<2x32xf32>
    %c0_138 = arith.constant 0 : index
    %c384 = arith.constant 384 : index
    %496 = vector.load %arg14[%c0_138, %c384] : memref<2x512xf32, #tpu.memory_space<vmem>>, vector<2x32xf32>
    tpu.vector_store %arg14[%c0_138, %c384], %495 {strides = array<i32>} : memref<2x512xf32, #tpu.memory_space<vmem>>, vector<2x32xf32>,
    %497 = vector.extract_strided_slice %494 {offsets = [0, 32], sizes = [2, 32], strides = [1, 1]} : vector<2x64xf32> to vector<2x32xf32>
    %c0_139 = arith.constant 0 : index
    %c96_140 = arith.constant 96 : index
    %498 = vector.load %arg14[%c0_139, %c96_140] : memref<2x512xf32, #tpu.memory_space<vmem>>, vector<2x32xf32>
    tpu.vector_store %arg14[%c0_139, %c96_140], %497 {strides = array<i32>} : memref<2x512xf32, #tpu.memory_space<vmem>>, vector<2x32xf32>,
    %499 = vector.extract_strided_slice %230 {offsets = [7, 0], sizes = [1, 192], strides = [1, 1]} : vector<16x192xf32> to vector<1x192xf32>
    %500 = vector.extract_strided_slice %230 {offsets = [15, 0], sizes = [1, 192], strides = [1, 1]} : vector<16x192xf32> to vector<1x192xf32>
    %501 = tpu.concatenate %499, %500 in 0 : vector<1x192xf32>, vector<1x192xf32> -> vector<2x192xf32>
    %502 = vector.extract_strided_slice %230 {offsets = [0, 0], sizes = [1, 192], strides = [1, 1]} : vector<16x192xf32> to vector<1x192xf32>
    %503 = vector.extract_strided_slice %230 {offsets = [8, 0], sizes = [1, 192], strides = [1, 1]} : vector<16x192xf32> to vector<1x192xf32>
    %504 = tpu.concatenate %502, %503 in 0 : vector<1x192xf32>, vector<1x192xf32> -> vector<2x192xf32>
    %505 = arith.select %245, %501, %504 : vector<2x192xi1>, vector<2x192xf32>
    %cst_141 = arith.constant dense<0.000000e+00> : vector<2x192xf32>
    %506 = tpu.matmul %494, %225, %cst_141 {dimension_numbers = #tpu.dot_dimension_numbers<[1], [0], [0], [1], [0, 0, 1, 1], [], []>} : vector<2x64xf32>, vector<64x192xf32>, vector<2x192xf32> -> vector<2x192xf32>
    %507 = vector.broadcast %227 : vector<1x192xf32> to vector<2x192xf32>
    %508 = arith.addf %506, %507 : vector<2x192xf32>
    %509 = vector.extract_strided_slice %505 {offsets = [0, 0], sizes = [2, 128], strides = [1, 1]} : vector<2x192xf32> to vector<2x128xf32>
    %510 = vector.extract_strided_slice %508 {offsets = [0, 0], sizes = [2, 128], strides = [1, 1]} : vector<2x192xf32> to vector<2x128xf32>
    %511 = arith.addf %509, %510 : vector<2x128xf32>
    %cst_142 = arith.constant 0.000000e+00 : f32
    %512 = vector.broadcast %cst_142 : f32 to vector<2x128xf32>
    %513 = arith.subf %512, %511 : vector<2x128xf32>
    %514 = math.exp %513 : vector<2x128xf32>
    %cst_143 = arith.constant 1.000000e+00 : f32
    %515 = vector.broadcast %cst_143 : f32 to vector<2x128xf32>
    %516 = arith.addf %515, %514 : vector<2x128xf32>
    %cst_144 = arith.constant 1.000000e+00 : f32
    %517 = vector.broadcast %cst_144 : f32 to vector<2x128xf32>
    %518 = arith.divf %517, %516 : vector<2x128xf32>
    %519 = vector.extract_strided_slice %518 {offsets = [0, 0], sizes = [2, 64], strides = [1, 1]} : vector<2x128xf32> to vector<2x64xf32>
    %520 = vector.extract_strided_slice %518 {offsets = [0, 64], sizes = [2, 64], strides = [1, 1]} : vector<2x128xf32> to vector<2x64xf32>
    %521 = vector.extract_strided_slice %505 {offsets = [0, 128], sizes = [2, 64], strides = [1, 1]} : vector<2x192xf32> to vector<2x64xf32>
    %522 = vector.extract_strided_slice %508 {offsets = [0, 128], sizes = [2, 64], strides = [1, 1]} : vector<2x192xf32> to vector<2x64xf32>
    %523 = arith.mulf %519, %522 : vector<2x64xf32>
    %524 = arith.addf %521, %523 : vector<2x64xf32>
    %525 = math.tanh %524 : vector<2x64xf32>
    %cst_145 = arith.constant 1.000000e+00 : f32
    %526 = vector.broadcast %cst_145 : f32 to vector<2x64xf32>
    %527 = arith.subf %526, %520 : vector<2x64xf32>
    %528 = arith.mulf %527, %525 : vector<2x64xf32>
    %529 = arith.mulf %520, %494 : vector<2x64xf32>
    %530 = arith.addf %528, %529 : vector<2x64xf32>
    %531 = vector.extract_strided_slice %530 {offsets = [0, 0], sizes = [2, 32], strides = [1, 1]} : vector<2x64xf32> to vector<2x32xf32>
    %c0_146 = arith.constant 0 : index
    %c448 = arith.constant 448 : index
    %532 = vector.load %arg14[%c0_146, %c448] : memref<2x512xf32, #tpu.memory_space<vmem>>, vector<2x32xf32>
    tpu.vector_store %arg14[%c0_146, %c448], %531 {strides = array<i32>} : memref<2x512xf32, #tpu.memory_space<vmem>>, vector<2x32xf32>,
    %533 = vector.extract_strided_slice %530 {offsets = [0, 32], sizes = [2, 32], strides = [1, 1]} : vector<2x64xf32> to vector<2x32xf32>
    %c0_147 = arith.constant 0 : index
    %c32_148 = arith.constant 32 : index
    %534 = vector.load %arg14[%c0_147, %c32_148] : memref<2x512xf32, #tpu.memory_space<vmem>>, vector<2x32xf32>
    tpu.vector_store %arg14[%c0_147, %c32_148], %533 {strides = array<i32>} : memref<2x512xf32, #tpu.memory_space<vmem>>, vector<2x32xf32>,
    %c0_149 = arith.constant 0 : index
    %c0_150 = arith.constant 0 : index
    %535 = vector.load %arg14[%c0_149, %c0_150] : memref<2x512xf32, #tpu.memory_space<vmem>>, vector<2x512xf32>
    %c0_i32_151 = arith.constant 0 : i32
    %536 = tpu.memref_slice %arg15[%c0_i32_151] : memref<3x!tpu.dma_semaphore, #tpu.memory_space<semaphore_mem>> -> memref<1x!tpu.dma_semaphore, #tpu.memory_space<semaphore_mem>>
    %537 = tpu.memref_squeeze %536 : memref<1x!tpu.dma_semaphore, #tpu.memory_space<semaphore_mem>> -> memref<!tpu.dma_semaphore, #tpu.memory_space<semaphore_mem>>
    tpu.wait_dma2 semaphore(%537 : memref<!tpu.dma_semaphore, #tpu.memory_space<semaphore_mem>>) src(%arg7 : memref<512x1000xbf16, #tpu.memory_space<any>>) dst(%arg11 : memref<512x1000xbf16, #tpu.memory_space<vmem>>)
    %538 = arith.truncf %535 : vector<2x512xf32> to vector<2x512xbf16>
    %c0_152 = arith.constant 0 : index
    %c0_153 = arith.constant 0 : index
    %539 = vector.load %arg11[%c0_152, %c0_153] : memref<512x1000xbf16, #tpu.memory_space<vmem>>, vector<512x1000xbf16>
    %cst_154 = arith.constant dense<0.000000e+00> : vector<2x1000xf32>
    %540 = tpu.matmul %538, %539, %cst_154 {dimension_numbers = #tpu.dot_dimension_numbers<[1], [0], [0], [1], [0, 0, 1, 1], [], []>} : vector<2x512xbf16>, vector<512x1000xbf16>, vector<2x1000xf32> -> vector<2x1000xf32>
    %c0_155 = arith.constant 0 : index
    %c0_156 = arith.constant 0 : index
    %541 = vector.load %arg5[%c0_155, %c0_156] : memref<1x1000xf32, #tpu.memory_space<vmem>>, vector<1x1000xf32>
    %542 = vector.broadcast %541 : vector<1x1000xf32> to vector<2x1000xf32>
    %543 = arith.addf %540, %542 : vector<2x1000xf32>
    %cst_157 = arith.constant 0.000000e+00 : f32
    %544 = vector.broadcast %cst_157 : f32 to vector<2x1000xf32>
    %545 = arith.maximumf %543, %544 : vector<2x1000xf32>
    %c1_i32_158 = arith.constant 1 : i32
    %546 = tpu.memref_slice %arg15[%c1_i32_158] : memref<3x!tpu.dma_semaphore, #tpu.memory_space<semaphore_mem>> -> memref<1x!tpu.dma_semaphore, #tpu.memory_space<semaphore_mem>>
    %547 = tpu.memref_squeeze %546 : memref<1x!tpu.dma_semaphore, #tpu.memory_space<semaphore_mem>> -> memref<!tpu.dma_semaphore, #tpu.memory_space<semaphore_mem>>
    tpu.wait_dma2 semaphore(%547 : memref<!tpu.dma_semaphore, #tpu.memory_space<semaphore_mem>>) src(%arg8 : memref<1000x512xbf16, #tpu.memory_space<any>>) dst(%arg12 : memref<1000x512xbf16, #tpu.memory_space<vmem>>)
    %548 = arith.truncf %545 : vector<2x1000xf32> to vector<2x1000xbf16>
    %c0_159 = arith.constant 0 : index
    %c0_160 = arith.constant 0 : index
    %549 = vector.load %arg12[%c0_159, %c0_160] : memref<1000x512xbf16, #tpu.memory_space<vmem>>, vector<1000x512xbf16>
    %cst_161 = arith.constant dense<0.000000e+00> : vector<2x512xf32>
    %550 = tpu.matmul %548, %549, %cst_161 {dimension_numbers = #tpu.dot_dimension_numbers<[1], [0], [0], [1], [0, 0, 1, 1], [], []>} : vector<2x1000xbf16>, vector<1000x512xbf16>, vector<2x512xf32> -> vector<2x512xf32>
    %c0_162 = arith.constant 0 : index
    %c0_163 = arith.constant 0 : index
    %551 = vector.load %arg6[%c0_162, %c0_163] : memref<1x512xf32, #tpu.memory_space<vmem>>, vector<1x512xf32>
    %552 = vector.broadcast %551 : vector<1x512xf32> to vector<2x512xf32>
    %553 = arith.addf %550, %552 : vector<2x512xf32>
    %cst_164 = arith.constant 0.000000e+00 : f32
    %554 = vector.broadcast %cst_164 : f32 to vector<2x512xf32>
    %555 = arith.maximumf %553, %554 : vector<2x512xf32>
    %c2_i32_165 = arith.constant 2 : i32
    %556 = tpu.memref_slice %arg15[%c2_i32_165] : memref<3x!tpu.dma_semaphore, #tpu.memory_space<semaphore_mem>> -> memref<1x!tpu.dma_semaphore, #tpu.memory_space<semaphore_mem>>
    %557 = tpu.memref_squeeze %556 : memref<1x!tpu.dma_semaphore, #tpu.memory_space<semaphore_mem>> -> memref<!tpu.dma_semaphore, #tpu.memory_space<semaphore_mem>>
    tpu.wait_dma2 semaphore(%557 : memref<!tpu.dma_semaphore, #tpu.memory_space<semaphore_mem>>) src(%arg9 : memref<728x128xf32, #tpu.memory_space<any>>) dst(%arg13 : memref<728x128xf32, #tpu.memory_space<vmem>>)
    %c0_166 = arith.constant 0 : index
    %c0_167 = arith.constant 0 : index
    %558 = vector.load %arg13[%c0_166, %c0_167] : memref<728x128xf32, #tpu.memory_space<vmem>>, vector<512x128xf32>
    %c512 = arith.constant 512 : index
    %c0_168 = arith.constant 0 : index
    %559 = vector.load %arg13[%c512, %c0_168] : memref<728x128xf32, #tpu.memory_space<vmem>>, vector<1x128xf32>
    %cst_169 = arith.constant dense<0.000000e+00> : vector<2x128xf32>
    %560 = tpu.matmul %555, %558, %cst_169 {dimension_numbers = #tpu.dot_dimension_numbers<[1], [0], [0], [1], [0, 0, 1, 1], [], []>} : vector<2x512xf32>, vector<512x128xf32>, vector<2x128xf32> -> vector<2x128xf32>
    %561 = vector.broadcast %559 : vector<1x128xf32> to vector<2x128xf32>
    %562 = arith.addf %560, %561 : vector<2x128xf32>
    %cst_170 = arith.constant 0.000000e+00 : f32
    %563 = vector.broadcast %cst_170 : f32 to vector<2x128xf32>
    %564 = arith.maximumf %562, %563 : vector<2x128xf32>
    %c520 = arith.constant 520 : index
    %c0_171 = arith.constant 0 : index
    %565 = vector.load %arg13[%c520, %c0_171] : memref<728x128xf32, #tpu.memory_space<vmem>>, vector<128x64xf32>
    %c648 = arith.constant 648 : index
    %c0_172 = arith.constant 0 : index
    %566 = vector.load %arg13[%c648, %c0_172] : memref<728x128xf32, #tpu.memory_space<vmem>>, vector<1x64xf32>
    %cst_173 = arith.constant dense<0.000000e+00> : vector<2x64xf32>
    %567 = tpu.matmul %564, %565, %cst_173 {dimension_numbers = #tpu.dot_dimension_numbers<[1], [0], [0], [1], [0, 0, 1, 1], [], []>} : vector<2x128xf32>, vector<128x64xf32>, vector<2x64xf32> -> vector<2x64xf32>
    %568 = vector.broadcast %566 : vector<1x64xf32> to vector<2x64xf32>
    %569 = arith.addf %567, %568 : vector<2x64xf32>
    %cst_174 = arith.constant 0.000000e+00 : f32
    %570 = vector.broadcast %cst_174 : f32 to vector<2x64xf32>
    %571 = arith.maximumf %569, %570 : vector<2x64xf32>
    %c656 = arith.constant 656 : index
    %c0_175 = arith.constant 0 : index
    %572 = vector.load %arg13[%c656, %c0_175] : memref<728x128xf32, #tpu.memory_space<vmem>>, vector<64x2xf32>
    %c720 = arith.constant 720 : index
    %c0_176 = arith.constant 0 : index
    %573 = vector.load %arg13[%c720, %c0_176] : memref<728x128xf32, #tpu.memory_space<vmem>>, vector<1x2xf32>
    %cst_177 = arith.constant dense<0.000000e+00> : vector<2x2xf32>
    %574 = tpu.matmul %571, %572, %cst_177 {dimension_numbers = #tpu.dot_dimension_numbers<[1], [0], [0], [1], [0, 0, 1, 1], [], []>} : vector<2x64xf32>, vector<64x2xf32>, vector<2x2xf32> -> vector<2x2xf32>
    %575 = vector.broadcast %573 : vector<1x2xf32> to vector<2x2xf32>
    %576 = arith.addf %574, %575 : vector<2x2xf32>
    %cst_178 = arith.constant 0.000000e+00 : f32
    %577 = vector.broadcast %cst_178 : f32 to vector<2x2xf32>
    %578 = arith.maximumf %576, %577 : vector<2x2xf32>
    %cst_179 = arith.constant dense<0xFF800000> : vector<2xf32>
    %579 = vector.multi_reduction <maximumf>, %578, %cst_179 [1] : vector<2x2xf32> to vector<2xf32>
    %580 = vector.shape_cast %579 : vector<2xf32> to vector<2x1xf32>
    %581 = vector.broadcast %580 : vector<2x1xf32> to vector<2x2xf32>
    %582 = arith.subf %578, %581 : vector<2x2xf32>
    %583 = math.exp %582 : vector<2x2xf32>
    %cst_180 = arith.constant dense<0.000000e+00> : vector<2xf32>
    %584 = vector.multi_reduction <add>, %583, %cst_180 [1] : vector<2x2xf32> to vector<2xf32>
    %585 = vector.shape_cast %584 : vector<2xf32> to vector<2x1xf32>
    %586 = vector.broadcast %585 : vector<2x1xf32> to vector<2x2xf32>
    %587 = arith.divf %583, %586 : vector<2x2xf32>
    %c0_181 = arith.constant 0 : index
    %c0_182 = arith.constant 0 : index
    %588 = vector.load %arg10[%c0_181, %c0_182] : memref<2x2xf32, #tpu.memory_space<vmem>>, vector<2x2xf32>
    tpu.vector_store %arg10[%c0_181, %c0_182], %587 {strides = array<i32>} : memref<2x2xf32, #tpu.memory_space<vmem>>, vector<2x2xf32>,
    return
  }
}

</mosaic_0001>

<bundles_post_ra>
// kernel: classifier_forward.1
= control target key start
LH: loop header
LB: loop body
LE: loop exit
PB: predicated region body
PF: predicated region fallthrough
CT: control target
= control target key end

     0   :  { %15 = vsyncpa [#allocation8], 0  ;;  %s18021_s0 = inlined_call_operand.vmem [shape: s32[16,1], index: 0, kind: input, shape index: {}]   ;;  %s18022_s1 = inlined_call_operand.vmem [shape: f32[56,16], index: 1, kind: input, shape index: {}]   ;;  %s18023_s2 = inlined_call_operand.vmem [shape: f32[88,128], index: 2, kind: input, shape index: {}]   ;;  %s18024_s3 = inlined_call_operand.vmem [shape: f32[80,96], index: 3, kind: input, shape index: {}]   ;;  %s18025_s4 = inlined_call_operand.vmem [shape: f32[112,192], index: 4, kind: input, shape index: {}]   ;;  %s18026_s5 = inlined_call_operand.vmem [shape: f32[1,1000], index: 5, kind: input, shape index: {}]   ;;  %s18027_s6 = inlined_call_operand.vmem [shape: f32[1,512], index: 6, kind: input, shape index: {}]   ;;  %s18028_s7 = inlined_call_operand.vmem [shape: bf16[512,1000], index: 7, kind: input, shape index: {}]   ;;  %s18029_s8 = inlined_call_operand.vmem [shape: bf16[1000,512], index: 8, kind: input, shape index: {}]   ;;  %s18030_s9 = inlined_call_operand.vmem [shape: f32[728,128], index: 9, kind: input, shape index: {}]   ;;  %s18031_s10 = inlined_call_operand.hbm [shape: f32[2,2], index: 10, kind: output, shape index: {}]  }
   0x1   :  { %v48_v0 = vld [vmem:[%s18028_s7] sm:$0xf]  ;;  %v52_v2 = vld [vmem:[%s18028_s7 + $0x4] sm:$0xf]  ;;  %v56_v4 = vld [vmem:[%s18028_s7 + $0x8] sm:$0xf] }
   0x2   :  { %v50_v1 = vld [vmem:[%s18028_s7 + $0x20] sm:$0xf]  ;;  %49 = vst [vmem:[#allocation2] sm:$0xf] %v48_v0  ;;  %v54_v3 = vld [vmem:[%s18028_s7 + $0x24] sm:$0xf] }
   0x3   :  { %51 = vst [vmem:[#allocation2 + $0x4] sm:$0xf] %v50_v1  ;;  %53 = vst [vmem:[#allocation2 + $0x8] sm:$0xf] %v52_v2  ;;  %v58_v5 = vld [vmem:[%s18028_s7 + $0x28] sm:$0xf] }
   0x4   :  { %55 = vst [vmem:[#allocation2 + $0xc] sm:$0xf] %v54_v3  ;;  %57 = vst [vmem:[#allocation2 + $0x10] sm:$0xf] %v56_v4  ;;  %v60_v6 = vld [vmem:[%s18028_s7 + $0xc] sm:$0xf] }
   0x5   :  { %v62_v7 = vld [vmem:[%s18028_s7 + $0x2c] sm:$0xf]  ;;  %59 = vst [vmem:[#allocation2 + $0x14] sm:$0xf] %v58_v5  ;;  %61 = vst [vmem:[#allocation2 + $0x18] sm:$0xf] %v60_v6 }
   0x6   :  { %63 = vst [vmem:[#allocation2 + $0x1c] sm:$0xf] %v62_v7  ;;  %v64_v8 = vld [vmem:[%s18028_s7 + $0x10] sm:$0xf]  ;;  %v68_v10 = vld [vmem:[%s18028_s7 + $0x14] sm:$0xf] }
   0x7   :  { %v66_v9 = vld [vmem:[%s18028_s7 + $0x30] sm:$0xf]  ;;  %65 = vst [vmem:[#allocation2 + $0x20] sm:$0xf] %v64_v8  ;;  %69 = vst [vmem:[#allocation2 + $0x28] sm:$0xf] %v68_v10 }
   0x8   :  { %67 = vst [vmem:[#allocation2 + $0x24] sm:$0xf] %v66_v9  ;;  %v70_v11 = vld [vmem:[%s18028_s7 + $0x34] sm:$0xf]  ;;  %v72_v12 = vld [vmem:[%s18028_s7 + $0x18] sm:$0xf] }
   0x9   :  { %v74_v13 = vld [vmem:[%s18028_s7 + $0x38] sm:$0xf]  ;;  %71 = vst [vmem:[#allocation2 + $0x2c] sm:$0xf] %v70_v11  ;;  %73 = vst [vmem:[#allocation2 + $0x30] sm:$0xf] %v72_v12 }
   0xa   :  { %75 = vst [vmem:[#allocation2 + $0x34] sm:$0xf] %v74_v13  ;;  %v76_v14 = vld [vmem:[%s18028_s7 + $0x1c] sm:$0xf]  ;;  %v82_v16 = vld [vmem:[%s18028_s7 + $0x60] sm:$0xf] }
   0xb   :  { %v78_v15 = vld [vmem:[%s18028_s7 + $0x3c] sm:$0xff]   ;;  %77 = vst [vmem:[#allocation2 + $0x38] sm:$0xf] %v76_v14  ;;  %83 = vst [vmem:[#allocation2 + $0x44] sm:$0xf] %v82_v16 }
   0xc   :  { %79 = vst [vmem:[#allocation2 + $0x3c] sm:$0xff] %v78_v15   ;;  %v84_v17 = vld [vmem:[%s18028_s7 + $0x44] sm:$0xf]  ;;  %v88_v19 = vld [vmem:[%s18028_s7 + $0x48] sm:$0xf]  ;;  %v110_v30 = vld [vmem:[%s18028_s7 + $0x7c] sm:$0xff]  }
   0xd   :  { %v86_v18 = vld [vmem:[%s18028_s7 + $0x64] sm:$0xf]  ;;  %85 = vst [vmem:[#allocation2 + $0x48] sm:$0xf] %v84_v17  ;;  %89 = vst [vmem:[#allocation2 + $0x50] sm:$0xf] %v88_v19 }
   0xe   :  { %87 = vst [vmem:[#allocation2 + $0x4c] sm:$0xf] %v86_v18  ;;  %v90_v20 = vld [vmem:[%s18028_s7 + $0x68] sm:$0xf]  ;;  %v92_v21 = vld [vmem:[%s18028_s7 + $0x4c] sm:$0xf] }
   0xf   :  { %v94_v22 = vld [vmem:[%s18028_s7 + $0x6c] sm:$0xf]  ;;  %91 = vst [vmem:[#allocation2 + $0x54] sm:$0xf] %v90_v20  ;;  %93 = vst [vmem:[#allocation2 + $0x58] sm:$0xf] %v92_v21 }
  0x10   :  { %95 = vst [vmem:[#allocation2 + $0x5c] sm:$0xf] %v94_v22  ;;  %v96_v23 = vld [vmem:[%s18028_s7 + $0x50] sm:$0xf]  ;;  %v100_v25 = vld [vmem:[%s18028_s7 + $0x54] sm:$0xf] }
  0x11   :  { %v98_v24 = vld [vmem:[%s18028_s7 + $0x70] sm:$0xf]  ;;  %97 = vst [vmem:[#allocation2 + $0x60] sm:$0xf] %v96_v23  ;;  %101 = vst [vmem:[#allocation2 + $0x68] sm:$0xf] %v100_v25 }
  0x12   :  { %99 = vst [vmem:[#allocation2 + $0x64] sm:$0xf] %v98_v24  ;;  %v102_v26 = vld [vmem:[%s18028_s7 + $0x74] sm:$0xf]  ;;  %v104_v27 = vld [vmem:[%s18028_s7 + $0x58] sm:$0xf] }
  0x13   :  { %v106_v28 = vld [vmem:[%s18028_s7 + $0x78] sm:$0xf]  ;;  %103 = vst [vmem:[#allocation2 + $0x6c] sm:$0xf] %v102_v26  ;;  %105 = vst [vmem:[#allocation2 + $0x70] sm:$0xf] %v104_v27 }
  0x14   :  { %107 = vst [vmem:[#allocation2 + $0x74] sm:$0xf] %v106_v28  ;;  %v108_v29 = vld [vmem:[%s18028_s7 + $0x5c] sm:$0xf]  ;;  %v114_v31 = vld [vmem:[%s18028_s7 + $0xa0] sm:$0xf] }
  0x15   :  { %109 = vst [vmem:[#allocation2 + $0x78] sm:$0xf] %v108_v29  ;;  %111 = vst [vmem:[#allocation2 + $0x7c] sm:$0xff] %v110_v30   ;;  %v116_v32 = vld [vmem:[%s18028_s7 + $0x84] sm:$0xf]  ;;  %v142_v45 = vld [vmem:[%s18028_s7 + $0xbc] sm:$0xff]  }
  0x16   :  { %115 = vst [vmem:[#allocation2 + $0x84] sm:$0xf] %v114_v31  ;;  %v118_v33 = vld [vmem:[%s18028_s7 + $0xa4] sm:$0xf]  ;;  %v120_v34 = vld [vmem:[%s18028_s7 + $0x88] sm:$0xf] }
  0x17   :  { %117 = vst [vmem:[#allocation2 + $0x88] sm:$0xf] %v116_v32  ;;  %119 = vst [vmem:[#allocation2 + $0x8c] sm:$0xf] %v118_v33  ;;  %v122_v35 = vld [vmem:[%s18028_s7 + $0xa8] sm:$0xf] }
  0x18   :  { %121 = vst [vmem:[#allocation2 + $0x90] sm:$0xf] %v120_v34  ;;  %v124_v36 = vld [vmem:[%s18028_s7 + $0x8c] sm:$0xf]  ;;  %123 = vst [vmem:[#allocation2 + $0x94] sm:$0xf] %v122_v35 }
  0x19   :  { %v126_v37 = vld [vmem:[%s18028_s7 + $0xac] sm:$0xf]  ;;  %125 = vst [vmem:[#allocation2 + $0x98] sm:$0xf] %v124_v36  ;;  %v128_v38 = vld [vmem:[%s18028_s7 + $0x90] sm:$0xf] }
  0x1a   :  { %127 = vst [vmem:[#allocation2 + $0x9c] sm:$0xf] %v126_v37  ;;  %v130_v39 = vld [vmem:[%s18028_s7 + $0xb0] sm:$0xf]  ;;  %v132_v40 = vld [vmem:[%s18028_s7 + $0x94] sm:$0xf] }
  0x1b   :  { %129 = vst [vmem:[#allocation2 + $0xa0] sm:$0xf] %v128_v38  ;;  %131 = vst [vmem:[#allocation2 + $0xa4] sm:$0xf] %v130_v39  ;;  %v134_v41 = vld [vmem:[%s18028_s7 + $0xb4] sm:$0xf] }
  0x1c   :  { %133 = vst [vmem:[#allocation2 + $0xa8] sm:$0xf] %v132_v40  ;;  %v136_v42 = vld [vmem:[%s18028_s7 + $0x98] sm:$0xf]  ;;  %135 = vst [vmem:[#allocation2 + $0xac] sm:$0xf] %v134_v41 }
  0x1d   :  { %v138_v43 = vld [vmem:[%s18028_s7 + $0xb8] sm:$0xf]  ;;  %137 = vst [vmem:[#allocation2 + $0xb0] sm:$0xf] %v136_v42  ;;  %v140_v44 = vld [vmem:[%s18028_s7 + $0x9c] sm:$0xf] }
  0x1e   :  { %139 = vst [vmem:[#allocation2 + $0xb4] sm:$0xf] %v138_v43  ;;  %v146_v46 = vld [vmem:[%s18028_s7 + $0xe0] sm:$0xf]  ;;  %141 = vst [vmem:[#allocation2 + $0xb8] sm:$0xf] %v140_v44 }
  0x1f   :  { %143 = vst [vmem:[#allocation2 + $0xbc] sm:$0xff] %v142_v45   ;;  %147 = vst [vmem:[#allocation2 + $0xc4] sm:$0xf] %v146_v46  ;;  %v148_v47 = vld [vmem:[%s18028_s7 + $0xc4] sm:$0xf]  ;;  %v174_v60 = vld [vmem:[%s18028_s7 + $0xfc] sm:$0xff]  }
  0x20   :  { %v150_v48 = vld [vmem:[%s18028_s7 + $0xe4] sm:$0xf]  ;;  %v152_v49 = vld [vmem:[%s18028_s7 + $0xc8] sm:$0xf]  ;;  %149 = vst [vmem:[#allocation2 + $0xc8] sm:$0xf] %v148_v47 }
  0x21   :  { %151 = vst [vmem:[#allocation2 + $0xcc] sm:$0xf] %v150_v48  ;;  %153 = vst [vmem:[#allocation2 + $0xd0] sm:$0xf] %v152_v49  ;;  %v154_v50 = vld [vmem:[%s18028_s7 + $0xe8] sm:$0xf] }
  0x22   :  { %v156_v51 = vld [vmem:[%s18028_s7 + $0xcc] sm:$0xf]  ;;  %155 = vst [vmem:[#allocation2 + $0xd4] sm:$0xf] %v154_v50  ;;  %v160_v53 = vld [vmem:[%s18028_s7 + $0xd0] sm:$0xf] }
  0x23   :  { %v158_v52 = vld [vmem:[%s18028_s7 + $0xec] sm:$0xf]  ;;  %157 = vst [vmem:[#allocation2 + $0xd8] sm:$0xf] %v156_v51  ;;  %v162_v54 = vld [vmem:[%s18028_s7 + $0xf0] sm:$0xf] }
  0x24   :  { %159 = vst [vmem:[#allocation2 + $0xdc] sm:$0xf] %v158_v52  ;;  %v164_v55 = vld [vmem:[%s18028_s7 + $0xd4] sm:$0xf]  ;;  %161 = vst [vmem:[#allocation2 + $0xe0] sm:$0xf] %v160_v53 }
  0x25   :  { %163 = vst [vmem:[#allocation2 + $0xe4] sm:$0xf] %v162_v54  ;;  %165 = vst [vmem:[#allocation2 + $0xe8] sm:$0xf] %v164_v55  ;;  %v166_v56 = vld [vmem:[%s18028_s7 + $0xf4] sm:$0xf] }
  0x26   :  { %v168_v57 = vld [vmem:[%s18028_s7 + $0xd8] sm:$0xf]  ;;  %167 = vst [vmem:[#allocation2 + $0xec] sm:$0xf] %v166_v56  ;;  %v172_v59 = vld [vmem:[%s18028_s7 + $0xdc] sm:$0xf] }
  0x27   :  { %v170_v58 = vld [vmem:[%s18028_s7 + $0xf8] sm:$0xf]  ;;  %169 = vst [vmem:[#allocation2 + $0xf0] sm:$0xf] %v168_v57  ;;  %v178_v61 = vld [vmem:[%s18028_s7 + $0x120] sm:$0xf] }
  0x28   :  { %171 = vst [vmem:[#allocation2 + $0xf4] sm:$0xf] %v170_v58  ;;  %173 = vst [vmem:[#allocation2 + $0xf8] sm:$0xf] %v172_v59  ;;  %v180_v62 = vld [vmem:[%s18028_s7 + $0x104] sm:$0xf] }
  0x29   :  { %175 = vst [vmem:[#allocation2 + $0xfc] sm:$0xff] %v174_v60   ;;  %179 = vst [vmem:[#allocation2 + $0x104] sm:$0xf] %v178_v61  ;;  %v182_v63 = vld [vmem:[%s18028_s7 + $0x124] sm:$0xf]  ;;  %v206_v11 = vld [vmem:[%s18028_s7 + $0x13c] sm:$0xff]  }
  0x2a   :  { %v184_v0 = vld [vmem:[%s18028_s7 + $0x108] sm:$0xf]  ;;  %181 = vst [vmem:[#allocation2 + $0x108] sm:$0xf] %v180_v62  ;;  %183 = vst [vmem:[#allocation2 + $0x10c] sm:$0xf] %v182_v63 }
  0x2b   :  { %185 = vst [vmem:[#allocation2 + $0x110] sm:$0xf] %v184_v0  ;;  %v186_v1 = vld [vmem:[%s18028_s7 + $0x128] sm:$0xf]  ;;  %v188_v2 = vld [vmem:[%s18028_s7 + $0x10c] sm:$0xf] }
  0x2c   :  { %v190_v3 = vld [vmem:[%s18028_s7 + $0x12c] sm:$0xf]  ;;  %187 = vst [vmem:[#allocation2 + $0x114] sm:$0xf] %v186_v1  ;;  %189 = vst [vmem:[#allocation2 + $0x118] sm:$0xf] %v188_v2 }
  0x2d   :  { %191 = vst [vmem:[#allocation2 + $0x11c] sm:$0xf] %v190_v3  ;;  %v192_v4 = vld [vmem:[%s18028_s7 + $0x110] sm:$0xf]  ;;  %v196_v6 = vld [vmem:[%s18028_s7 + $0x114] sm:$0xf] }
  0x2e   :  { %v194_v5 = vld [vmem:[%s18028_s7 + $0x130] sm:$0xf]  ;;  %193 = vst [vmem:[#allocation2 + $0x120] sm:$0xf] %v192_v4  ;;  %197 = vst [vmem:[#allocation2 + $0x128] sm:$0xf] %v196_v6 }
  0x2f   :  { %195 = vst [vmem:[#allocation2 + $0x124] sm:$0xf] %v194_v5  ;;  %v198_v7 = vld [vmem:[%s18028_s7 + $0x134] sm:$0xf]  ;;  %v200_v8 = vld [vmem:[%s18028_s7 + $0x118] sm:$0xf] }
  0x30   :  { %v202_v9 = vld [vmem:[%s18028_s7 + $0x138] sm:$0xf]  ;;  %199 = vst [vmem:[#allocation2 + $0x12c] sm:$0xf] %v198_v7  ;;  %201 = vst [vmem:[#allocation2 + $0x130] sm:$0xf] %v200_v8 }
  0x31   :  { %203 = vst [vmem:[#allocation2 + $0x134] sm:$0xf] %v202_v9  ;;  %v204_v10 = vld [vmem:[%s18028_s7 + $0x11c] sm:$0xf]  ;;  %v210_v12 = vld [vmem:[%s18028_s7 + $0x160] sm:$0xf] }
  0x32   :  { %205 = vst [vmem:[#allocation2 + $0x138] sm:$0xf] %v204_v10  ;;  %207 = vst [vmem:[#allocation2 + $0x13c] sm:$0xff] %v206_v11   ;;  %v212_v13 = vld [vmem:[%s18028_s7 + $0x144] sm:$0xf]  ;;  %v238_v26 = vld [vmem:[%s18028_s7 + $0x17c] sm:$0xff]  }
  0x33   :  { %211 = vst [vmem:[#allocation2 + $0x144] sm:$0xf] %v210_v12  ;;  %v214_v14 = vld [vmem:[%s18028_s7 + $0x164] sm:$0xf]  ;;  %v216_v15 = vld [vmem:[%s18028_s7 + $0x148] sm:$0xf] }
  0x34   :  { %213 = vst [vmem:[#allocation2 + $0x148] sm:$0xf] %v212_v13  ;;  %215 = vst [vmem:[#allocation2 + $0x14c] sm:$0xf] %v214_v14  ;;  %v218_v16 = vld [vmem:[%s18028_s7 + $0x168] sm:$0xf] }
  0x35   :  { %217 = vst [vmem:[#allocation2 + $0x150] sm:$0xf] %v216_v15  ;;  %v220_v17 = vld [vmem:[%s18028_s7 + $0x14c] sm:$0xf]  ;;  %219 = vst [vmem:[#allocation2 + $0x154] sm:$0xf] %v218_v16 }
  0x36   :  { %v222_v18 = vld [vmem:[%s18028_s7 + $0x16c] sm:$0xf]  ;;  %221 = vst [vmem:[#allocation2 + $0x158] sm:$0xf] %v220_v17  ;;  %v224_v19 = vld [vmem:[%s18028_s7 + $0x150] sm:$0xf] }
  0x37   :  { %223 = vst [vmem:[#allocation2 + $0x15c] sm:$0xf] %v222_v18  ;;  %v226_v20 = vld [vmem:[%s18028_s7 + $0x170] sm:$0xf]  ;;  %v228_v21 = vld [vmem:[%s18028_s7 + $0x154] sm:$0xf] }
  0x38   :  { %225 = vst [vmem:[#allocation2 + $0x160] sm:$0xf] %v224_v19  ;;  %227 = vst [vmem:[#allocation2 + $0x164] sm:$0xf] %v226_v20  ;;  %v230_v22 = vld [vmem:[%s18028_s7 + $0x174] sm:$0xf] }
  0x39   :  { %229 = vst [vmem:[#allocation2 + $0x168] sm:$0xf] %v228_v21  ;;  %v232_v23 = vld [vmem:[%s18028_s7 + $0x158] sm:$0xf]  ;;  %231 = vst [vmem:[#allocation2 + $0x16c] sm:$0xf] %v230_v22 }
  0x3a   :  { %v234_v24 = vld [vmem:[%s18028_s7 + $0x178] sm:$0xf]  ;;  %233 = vst [vmem:[#allocation2 + $0x170] sm:$0xf] %v232_v23  ;;  %v236_v25 = vld [vmem:[%s18028_s7 + $0x15c] sm:$0xf] }
  0x3b   :  { %235 = vst [vmem:[#allocation2 + $0x174] sm:$0xf] %v234_v24  ;;  %v242_v27 = vld [vmem:[%s18028_s7 + $0x1a0] sm:$0xf]  ;;  %237 = vst [vmem:[#allocation2 + $0x178] sm:$0xf] %v236_v25 }
  0x3c   :  { %239 = vst [vmem:[#allocation2 + $0x17c] sm:$0xff] %v238_v26   ;;  %243 = vst [vmem:[#allocation2 + $0x184] sm:$0xf] %v242_v27  ;;  %v244_v28 = vld [vmem:[%s18028_s7 + $0x184] sm:$0xf]  ;;  %v270_v41 = vld [vmem:[%s18028_s7 + $0x1bc] sm:$0xff]  }
  0x3d   :  { %v246_v29 = vld [vmem:[%s18028_s7 + $0x1a4] sm:$0xf]  ;;  %v248_v30 = vld [vmem:[%s18028_s7 + $0x188] sm:$0xf]  ;;  %245 = vst [vmem:[#allocation2 + $0x188] sm:$0xf] %v244_v28 }
  0x3e   :  { %247 = vst [vmem:[#allocation2 + $0x18c] sm:$0xf] %v246_v29  ;;  %249 = vst [vmem:[#allocation2 + $0x190] sm:$0xf] %v248_v30  ;;  %v250_v31 = vld [vmem:[%s18028_s7 + $0x1a8] sm:$0xf] }
  0x3f   :  { %v252_v32 = vld [vmem:[%s18028_s7 + $0x18c] sm:$0xf]  ;;  %251 = vst [vmem:[#allocation2 + $0x194] sm:$0xf] %v250_v31  ;;  %v256_v34 = vld [vmem:[%s18028_s7 + $0x190] sm:$0xf] }
  0x40   :  { %v254_v33 = vld [vmem:[%s18028_s7 + $0x1ac] sm:$0xf]  ;;  %253 = vst [vmem:[#allocation2 + $0x198] sm:$0xf] %v252_v32  ;;  %v258_v35 = vld [vmem:[%s18028_s7 + $0x1b0] sm:$0xf] }
  0x41   :  { %255 = vst [vmem:[#allocation2 + $0x19c] sm:$0xf] %v254_v33  ;;  %v260_v36 = vld [vmem:[%s18028_s7 + $0x194] sm:$0xf]  ;;  %257 = vst [vmem:[#allocation2 + $0x1a0] sm:$0xf] %v256_v34 }
  0x42   :  { %259 = vst [vmem:[#allocation2 + $0x1a4] sm:$0xf] %v258_v35  ;;  %261 = vst [vmem:[#allocation2 + $0x1a8] sm:$0xf] %v260_v36  ;;  %v262_v37 = vld [vmem:[%s18028_s7 + $0x1b4] sm:$0xf] }
  0x43   :  { %v264_v38 = vld [vmem:[%s18028_s7 + $0x198] sm:$0xf]  ;;  %263 = vst [vmem:[#allocation2 + $0x1ac] sm:$0xf] %v262_v37  ;;  %v268_v40 = vld [vmem:[%s18028_s7 + $0x19c] sm:$0xf] }
  0x44   :  { %v266_v39 = vld [vmem:[%s18028_s7 + $0x1b8] sm:$0xf]  ;;  %265 = vst [vmem:[#allocation2 + $0x1b0] sm:$0xf] %v264_v38  ;;  %v274_v42 = vld [vmem:[%s18028_s7 + $0x1e0] sm:$0xf] }
  0x45   :  { %267 = vst [vmem:[#allocation2 + $0x1b4] sm:$0xf] %v266_v39  ;;  %269 = vst [vmem:[#allocation2 + $0x1b8] sm:$0xf] %v268_v40  ;;  %v276_v43 = vld [vmem:[%s18028_s7 + $0x1c4] sm:$0xf] }
  0x46   :  { %271 = vst [vmem:[#allocation2 + $0x1bc] sm:$0xff] %v270_v41   ;;  %275 = vst [vmem:[#allocation2 + $0x1c4] sm:$0xf] %v274_v42  ;;  %v278_v44 = vld [vmem:[%s18028_s7 + $0x1e4] sm:$0xf]  ;;  %v302_v56 = vld [vmem:[%s18028_s7 + $0x1fc] sm:$0xff]  }
  0x47   :  { %v280_v45 = vld [vmem:[%s18028_s7 + $0x1c8] sm:$0xf]  ;;  %277 = vst [vmem:[#allocation2 + $0x1c8] sm:$0xf] %v276_v43  ;;  %279 = vst [vmem:[#allocation2 + $0x1cc] sm:$0xf] %v278_v44 }
  0x48   :  { %281 = vst [vmem:[#allocation2 + $0x1d0] sm:$0xf] %v280_v45  ;;  %v282_v46 = vld [vmem:[%s18028_s7 + $0x1e8] sm:$0xf]  ;;  %v284_v47 = vld [vmem:[%s18028_s7 + $0x1cc] sm:$0xf] }
  0x49   :  { %v286_v48 = vld [vmem:[%s18028_s7 + $0x1ec] sm:$0xf]  ;;  %283 = vst [vmem:[#allocation2 + $0x1d4] sm:$0xf] %v282_v46  ;;  %285 = vst [vmem:[#allocation2 + $0x1d8] sm:$0xf] %v284_v47 }
  0x4a   :  { %287 = vst [vmem:[#allocation2 + $0x1dc] sm:$0xf] %v286_v48  ;;  %v288_v49 = vld [vmem:[%s18028_s7 + $0x1d0] sm:$0xf]  ;;  %v292_v51 = vld [vmem:[%s18028_s7 + $0x1d4] sm:$0xf] }
  0x4b   :  { %v290_v50 = vld [vmem:[%s18028_s7 + $0x1f0] sm:$0xf]  ;;  %289 = vst [vmem:[#allocation2 + $0x1e0] sm:$0xf] %v288_v49  ;;  %293 = vst [vmem:[#allocation2 + $0x1e8] sm:$0xf] %v292_v51 }
  0x4c   :  { %291 = vst [vmem:[#allocation2 + $0x1e4] sm:$0xf] %v290_v50  ;;  %v294_v52 = vld [vmem:[%s18028_s7 + $0x1f4] sm:$0xf]  ;;  %v296_v53 = vld [vmem:[%s18028_s7 + $0x1d8] sm:$0xf] }
  0x4d   :  { %v298_v54 = vld [vmem:[%s18028_s7 + $0x1f8] sm:$0xf]  ;;  %295 = vst [vmem:[#allocation2 + $0x1ec] sm:$0xf] %v294_v52  ;;  %297 = vst [vmem:[#allocation2 + $0x1f0] sm:$0xf] %v296_v53 }
  0x4e   :  { %299 = vst [vmem:[#allocation2 + $0x1f4] sm:$0xf] %v298_v54  ;;  %v300_v55 = vld [vmem:[%s18028_s7 + $0x1dc] sm:$0xf]  ;;  %v306_v57 = vld [vmem:[%s18028_s7 + $0x220] sm:$0xf] }
  0x4f   :  { %301 = vst [vmem:[#allocation2 + $0x1f8] sm:$0xf] %v300_v55  ;;  %303 = vst [vmem:[#allocation2 + $0x1fc] sm:$0xff] %v302_v56   ;;  %v308_v58 = vld [vmem:[%s18028_s7 + $0x204] sm:$0xf]  ;;  %v334_v7 = vld [vmem:[%s18028_s7 + $0x23c] sm:$0xff]  }
  0x50   :  { %307 = vst [vmem:[#allocation2 + $0x204] sm:$0xf] %v306_v57  ;;  %v310_v59 = vld [vmem:[%s18028_s7 + $0x224] sm:$0xf]  ;;  %v312_v60 = vld [vmem:[%s18028_s7 + $0x208] sm:$0xf] }
  0x51   :  { %309 = vst [vmem:[#allocation2 + $0x208] sm:$0xf] %v308_v58  ;;  %311 = vst [vmem:[#allocation2 + $0x20c] sm:$0xf] %v310_v59  ;;  %v314_v61 = vld [vmem:[%s18028_s7 + $0x228] sm:$0xf] }
  0x52   :  { %313 = vst [vmem:[#allocation2 + $0x210] sm:$0xf] %v312_v60  ;;  %v316_v62 = vld [vmem:[%s18028_s7 + $0x20c] sm:$0xf]  ;;  %315 = vst [vmem:[#allocation2 + $0x214] sm:$0xf] %v314_v61 }
  0x53   :  { %v318_v63 = vld [vmem:[%s18028_s7 + $0x22c] sm:$0xf]  ;;  %317 = vst [vmem:[#allocation2 + $0x218] sm:$0xf] %v316_v62  ;;  %v320_v0 = vld [vmem:[%s18028_s7 + $0x210] sm:$0xf] }
  0x54   :  { %319 = vst [vmem:[#allocation2 + $0x21c] sm:$0xf] %v318_v63  ;;  %v322_v1 = vld [vmem:[%s18028_s7 + $0x230] sm:$0xf]  ;;  %v324_v2 = vld [vmem:[%s18028_s7 + $0x214] sm:$0xf] }
  0x55   :  { %321 = vst [vmem:[#allocation2 + $0x220] sm:$0xf] %v320_v0  ;;  %323 = vst [vmem:[#allocation2 + $0x224] sm:$0xf] %v322_v1  ;;  %v326_v3 = vld [vmem:[%s18028_s7 + $0x234] sm:$0xf] }
  0x56   :  { %325 = vst [vmem:[#allocation2 + $0x228] sm:$0xf] %v324_v2  ;;  %v328_v4 = vld [vmem:[%s18028_s7 + $0x218] sm:$0xf]  ;;  %327 = vst [vmem:[#allocation2 + $0x22c] sm:$0xf] %v326_v3 }
  0x57   :  { %v330_v5 = vld [vmem:[%s18028_s7 + $0x238] sm:$0xf]  ;;  %329 = vst [vmem:[#allocation2 + $0x230] sm:$0xf] %v328_v4  ;;  %v332_v6 = vld [vmem:[%s18028_s7 + $0x21c] sm:$0xf] }
  0x58   :  { %331 = vst [vmem:[#allocation2 + $0x234] sm:$0xf] %v330_v5  ;;  %v338_v8 = vld [vmem:[%s18028_s7 + $0x260] sm:$0xf]  ;;  %333 = vst [vmem:[#allocation2 + $0x238] sm:$0xf] %v332_v6 }
  0x59   :  { %335 = vst [vmem:[#allocation2 + $0x23c] sm:$0xff] %v334_v7   ;;  %339 = vst [vmem:[#allocation2 + $0x244] sm:$0xf] %v338_v8  ;;  %v340_v9 = vld [vmem:[%s18028_s7 + $0x244] sm:$0xf]  ;;  %v366_v22 = vld [vmem:[%s18028_s7 + $0x27c] sm:$0xff]  }
  0x5a   :  { %v342_v10 = vld [vmem:[%s18028_s7 + $0x264] sm:$0xf]  ;;  %v344_v11 = vld [vmem:[%s18028_s7 + $0x248] sm:$0xf]  ;;  %341 = vst [vmem:[#allocation2 + $0x248] sm:$0xf] %v340_v9 }
  0x5b   :  { %343 = vst [vmem:[#allocation2 + $0x24c] sm:$0xf] %v342_v10  ;;  %345 = vst [vmem:[#allocation2 + $0x250] sm:$0xf] %v344_v11  ;;  %v346_v12 = vld [vmem:[%s18028_s7 + $0x268] sm:$0xf] }
  0x5c   :  { %v348_v13 = vld [vmem:[%s18028_s7 + $0x24c] sm:$0xf]  ;;  %347 = vst [vmem:[#allocation2 + $0x254] sm:$0xf] %v346_v12  ;;  %v352_v15 = vld [vmem:[%s18028_s7 + $0x250] sm:$0xf] }
  0x5d   :  { %v350_v14 = vld [vmem:[%s18028_s7 + $0x26c] sm:$0xf]  ;;  %349 = vst [vmem:[#allocation2 + $0x258] sm:$0xf] %v348_v13  ;;  %v354_v16 = vld [vmem:[%s18028_s7 + $0x270] sm:$0xf] }
  0x5e   :  { %351 = vst [vmem:[#allocation2 + $0x25c] sm:$0xf] %v350_v14  ;;  %v356_v17 = vld [vmem:[%s18028_s7 + $0x254] sm:$0xf]  ;;  %353 = vst [vmem:[#allocation2 + $0x260] sm:$0xf] %v352_v15 }
  0x5f   :  { %355 = vst [vmem:[#allocation2 + $0x264] sm:$0xf] %v354_v16  ;;  %357 = vst [vmem:[#allocation2 + $0x268] sm:$0xf] %v356_v17  ;;  %v358_v18 = vld [vmem:[%s18028_s7 + $0x274] sm:$0xf] }
  0x60   :  { %v360_v19 = vld [vmem:[%s18028_s7 + $0x258] sm:$0xf]  ;;  %359 = vst [vmem:[#allocation2 + $0x26c] sm:$0xf] %v358_v18  ;;  %v364_v21 = vld [vmem:[%s18028_s7 + $0x25c] sm:$0xf] }
  0x61   :  { %v362_v20 = vld [vmem:[%s18028_s7 + $0x278] sm:$0xf]  ;;  %361 = vst [vmem:[#allocation2 + $0x270] sm:$0xf] %v360_v19  ;;  %v370_v23 = vld [vmem:[%s18028_s7 + $0x2a0] sm:$0xf] }
  0x62   :  { %363 = vst [vmem:[#allocation2 + $0x274] sm:$0xf] %v362_v20  ;;  %365 = vst [vmem:[#allocation2 + $0x278] sm:$0xf] %v364_v21  ;;  %v372_v24 = vld [vmem:[%s18028_s7 + $0x284] sm:$0xf] }
  0x63   :  { %367 = vst [vmem:[#allocation2 + $0x27c] sm:$0xff] %v366_v22   ;;  %371 = vst [vmem:[#allocation2 + $0x284] sm:$0xf] %v370_v23  ;;  %v374_v25 = vld [vmem:[%s18028_s7 + $0x2a4] sm:$0xf]  ;;  %v398_v37 = vld [vmem:[%s18028_s7 + $0x2bc] sm:$0xff]  }
  0x64   :  { %v376_v26 = vld [vmem:[%s18028_s7 + $0x288] sm:$0xf]  ;;  %373 = vst [vmem:[#allocation2 + $0x288] sm:$0xf] %v372_v24  ;;  %375 = vst [vmem:[#allocation2 + $0x28c] sm:$0xf] %v374_v25 }
  0x65   :  { %377 = vst [vmem:[#allocation2 + $0x290] sm:$0xf] %v376_v26  ;;  %v378_v27 = vld [vmem:[%s18028_s7 + $0x2a8] sm:$0xf]  ;;  %v380_v28 = vld [vmem:[%s18028_s7 + $0x28c] sm:$0xf] }
  0x66   :  { %v382_v29 = vld [vmem:[%s18028_s7 + $0x2ac] sm:$0xf]  ;;  %379 = vst [vmem:[#allocation2 + $0x294] sm:$0xf] %v378_v27  ;;  %381 = vst [vmem:[#allocation2 + $0x298] sm:$0xf] %v380_v28 }
  0x67   :  { %383 = vst [vmem:[#allocation2 + $0x29c] sm:$0xf] %v382_v29  ;;  %v384_v30 = vld [vmem:[%s18028_s7 + $0x290] sm:$0xf]  ;;  %v388_v32 = vld [vmem:[%s18028_s7 + $0x294] sm:$0xf] }
  0x68   :  { %v386_v31 = vld [vmem:[%s18028_s7 + $0x2b0] sm:$0xf]  ;;  %385 = vst [vmem:[#allocation2 + $0x2a0] sm:$0xf] %v384_v30  ;;  %389 = vst [vmem:[#allocation2 + $0x2a8] sm:$0xf] %v388_v32 }
  0x69   :  { %387 = vst [vmem:[#allocation2 + $0x2a4] sm:$0xf] %v386_v31  ;;  %v390_v33 = vld [vmem:[%s18028_s7 + $0x2b4] sm:$0xf]  ;;  %v392_v34 = vld [vmem:[%s18028_s7 + $0x298] sm:$0xf] }
  0x6a   :  { %v394_v35 = vld [vmem:[%s18028_s7 + $0x2b8] sm:$0xf]  ;;  %391 = vst [vmem:[#allocation2 + $0x2ac] sm:$0xf] %v390_v33  ;;  %393 = vst [vmem:[#allocation2 + $0x2b0] sm:$0xf] %v392_v34 }
  0x6b   :  { %395 = vst [vmem:[#allocation2 + $0x2b4] sm:$0xf] %v394_v35  ;;  %v396_v36 = vld [vmem:[%s18028_s7 + $0x29c] sm:$0xf]  ;;  %v402_v38 = vld [vmem:[%s18028_s7 + $0x2e0] sm:$0xf] }
  0x6c   :  { %397 = vst [vmem:[#allocation2 + $0x2b8] sm:$0xf] %v396_v36  ;;  %399 = vst [vmem:[#allocation2 + $0x2bc] sm:$0xff] %v398_v37   ;;  %v404_v39 = vld [vmem:[%s18028_s7 + $0x2c4] sm:$0xf]  ;;  %v430_v52 = vld [vmem:[%s18028_s7 + $0x2fc] sm:$0xff]  }
  0x6d   :  { %403 = vst [vmem:[#allocation2 + $0x2c4] sm:$0xf] %v402_v38  ;;  %v406_v40 = vld [vmem:[%s18028_s7 + $0x2e4] sm:$0xf]  ;;  %v408_v41 = vld [vmem:[%s18028_s7 + $0x2c8] sm:$0xf] }
  0x6e   :  { %405 = vst [vmem:[#allocation2 + $0x2c8] sm:$0xf] %v404_v39  ;;  %407 = vst [vmem:[#allocation2 + $0x2cc] sm:$0xf] %v406_v40  ;;  %v410_v42 = vld [vmem:[%s18028_s7 + $0x2e8] sm:$0xf] }
  0x6f   :  { %409 = vst [vmem:[#allocation2 + $0x2d0] sm:$0xf] %v408_v41  ;;  %v412_v43 = vld [vmem:[%s18028_s7 + $0x2cc] sm:$0xf]  ;;  %411 = vst [vmem:[#allocation2 + $0x2d4] sm:$0xf] %v410_v42 }
  0x70   :  { %v414_v44 = vld [vmem:[%s18028_s7 + $0x2ec] sm:$0xf]  ;;  %413 = vst [vmem:[#allocation2 + $0x2d8] sm:$0xf] %v412_v43  ;;  %v416_v45 = vld [vmem:[%s18028_s7 + $0x2d0] sm:$0xf] }
  0x71   :  { %415 = vst [vmem:[#allocation2 + $0x2dc] sm:$0xf] %v414_v44  ;;  %v418_v46 = vld [vmem:[%s18028_s7 + $0x2f0] sm:$0xf]  ;;  %v420_v47 = vld [vmem:[%s18028_s7 + $0x2d4] sm:$0xf] }
  0x72   :  { %417 = vst [vmem:[#allocation2 + $0x2e0] sm:$0xf] %v416_v45  ;;  %419 = vst [vmem:[#allocation2 + $0x2e4] sm:$0xf] %v418_v46  ;;  %v422_v48 = vld [vmem:[%s18028_s7 + $0x2f4] sm:$0xf] }
  0x73   :  { %421 = vst [vmem:[#allocation2 + $0x2e8] sm:$0xf] %v420_v47  ;;  %v424_v49 = vld [vmem:[%s18028_s7 + $0x2d8] sm:$0xf]  ;;  %423 = vst [vmem:[#allocation2 + $0x2ec] sm:$0xf] %v422_v48 }
  0x74   :  { %v426_v50 = vld [vmem:[%s18028_s7 + $0x2f8] sm:$0xf]  ;;  %425 = vst [vmem:[#allocation2 + $0x2f0] sm:$0xf] %v424_v49  ;;  %v428_v51 = vld [vmem:[%s18028_s7 + $0x2dc] sm:$0xf] }
  0x75   :  { %427 = vst [vmem:[#allocation2 + $0x2f4] sm:$0xf] %v426_v50  ;;  %v434_v53 = vld [vmem:[%s18028_s7 + $0x320] sm:$0xf]  ;;  %429 = vst [vmem:[#allocation2 + $0x2f8] sm:$0xf] %v428_v51 }
  0x76   :  { %431 = vst [vmem:[#allocation2 + $0x2fc] sm:$0xff] %v430_v52   ;;  %435 = vst [vmem:[#allocation2 + $0x304] sm:$0xf] %v434_v53  ;;  %v436_v54 = vld [vmem:[%s18028_s7 + $0x304] sm:$0xf]  ;;  %v462_v3 = vld [vmem:[%s18028_s7 + $0x33c] sm:$0xff]  }
  0x77   :  { %v438_v55 = vld [vmem:[%s18028_s7 + $0x324] sm:$0xf]  ;;  %v440_v56 = vld [vmem:[%s18028_s7 + $0x308] sm:$0xf]  ;;  %437 = vst [vmem:[#allocation2 + $0x308] sm:$0xf] %v436_v54 }
  0x78   :  { %439 = vst [vmem:[#allocation2 + $0x30c] sm:$0xf] %v438_v55  ;;  %441 = vst [vmem:[#allocation2 + $0x310] sm:$0xf] %v440_v56  ;;  %v442_v57 = vld [vmem:[%s18028_s7 + $0x328] sm:$0xf] }
  0x79   :  { %v444_v58 = vld [vmem:[%s18028_s7 + $0x30c] sm:$0xf]  ;;  %443 = vst [vmem:[#allocation2 + $0x314] sm:$0xf] %v442_v57  ;;  %v448_v60 = vld [vmem:[%s18028_s7 + $0x310] sm:$0xf] }
  0x7a   :  { %v446_v59 = vld [vmem:[%s18028_s7 + $0x32c] sm:$0xf]  ;;  %445 = vst [vmem:[#allocation2 + $0x318] sm:$0xf] %v444_v58  ;;  %v450_v61 = vld [vmem:[%s18028_s7 + $0x330] sm:$0xf] }
  0x7b   :  { %447 = vst [vmem:[#allocation2 + $0x31c] sm:$0xf] %v446_v59  ;;  %v452_v62 = vld [vmem:[%s18028_s7 + $0x314] sm:$0xf]  ;;  %449 = vst [vmem:[#allocation2 + $0x320] sm:$0xf] %v448_v60 }
  0x7c   :  { %451 = vst [vmem:[#allocation2 + $0x324] sm:$0xf] %v450_v61  ;;  %453 = vst [vmem:[#allocation2 + $0x328] sm:$0xf] %v452_v62  ;;  %v454_v63 = vld [vmem:[%s18028_s7 + $0x334] sm:$0xf] }
  0x7d   :  { %v456_v0 = vld [vmem:[%s18028_s7 + $0x318] sm:$0xf]  ;;  %455 = vst [vmem:[#allocation2 + $0x32c] sm:$0xf] %v454_v63  ;;  %v460_v2 = vld [vmem:[%s18028_s7 + $0x31c] sm:$0xf] }
  0x7e   :  { %v458_v1 = vld [vmem:[%s18028_s7 + $0x338] sm:$0xf]  ;;  %457 = vst [vmem:[#allocation2 + $0x330] sm:$0xf] %v456_v0  ;;  %v466_v4 = vld [vmem:[%s18028_s7 + $0x360] sm:$0xf] }
  0x7f   :  { %459 = vst [vmem:[#allocation2 + $0x334] sm:$0xf] %v458_v1  ;;  %461 = vst [vmem:[#allocation2 + $0x338] sm:$0xf] %v460_v2  ;;  %v468_v5 = vld [vmem:[%s18028_s7 + $0x344] sm:$0xf] }
  0x80   :  { %463 = vst [vmem:[#allocation2 + $0x33c] sm:$0xff] %v462_v3   ;;  %467 = vst [vmem:[#allocation2 + $0x344] sm:$0xf] %v466_v4  ;;  %v470_v6 = vld [vmem:[%s18028_s7 + $0x364] sm:$0xf]  ;;  %v494_v18 = vld [vmem:[%s18028_s7 + $0x37c] sm:$0xff]  }
  0x81   :  { %v472_v7 = vld [vmem:[%s18028_s7 + $0x348] sm:$0xf]  ;;  %469 = vst [vmem:[#allocation2 + $0x348] sm:$0xf] %v468_v5  ;;  %471 = vst [vmem:[#allocation2 + $0x34c] sm:$0xf] %v470_v6 }
  0x82   :  { %473 = vst [vmem:[#allocation2 + $0x350] sm:$0xf] %v472_v7  ;;  %v474_v8 = vld [vmem:[%s18028_s7 + $0x368] sm:$0xf]  ;;  %v476_v9 = vld [vmem:[%s18028_s7 + $0x34c] sm:$0xf] }
  0x83   :  { %v478_v10 = vld [vmem:[%s18028_s7 + $0x36c] sm:$0xf]  ;;  %475 = vst [vmem:[#allocation2 + $0x354] sm:$0xf] %v474_v8  ;;  %477 = vst [vmem:[#allocation2 + $0x358] sm:$0xf] %v476_v9 }
  0x84   :  { %479 = vst [vmem:[#allocation2 + $0x35c] sm:$0xf] %v478_v10  ;;  %v480_v11 = vld [vmem:[%s18028_s7 + $0x350] sm:$0xf]  ;;  %v484_v13 = vld [vmem:[%s18028_s7 + $0x354] sm:$0xf] }
  0x85   :  { %v482_v12 = vld [vmem:[%s18028_s7 + $0x370] sm:$0xf]  ;;  %481 = vst [vmem:[#allocation2 + $0x360] sm:$0xf] %v480_v11  ;;  %485 = vst [vmem:[#allocation2 + $0x368] sm:$0xf] %v484_v13 }
  0x86   :  { %483 = vst [vmem:[#allocation2 + $0x364] sm:$0xf] %v482_v12  ;;  %v486_v14 = vld [vmem:[%s18028_s7 + $0x374] sm:$0xf]  ;;  %v488_v15 = vld [vmem:[%s18028_s7 + $0x358] sm:$0xf] }
  0x87   :  { %v490_v16 = vld [vmem:[%s18028_s7 + $0x378] sm:$0xf]  ;;  %487 = vst [vmem:[#allocation2 + $0x36c] sm:$0xf] %v486_v14  ;;  %489 = vst [vmem:[#allocation2 + $0x370] sm:$0xf] %v488_v15 }
  0x88   :  { %491 = vst [vmem:[#allocation2 + $0x374] sm:$0xf] %v490_v16  ;;  %v492_v17 = vld [vmem:[%s18028_s7 + $0x35c] sm:$0xf]  ;;  %v498_v19 = vld [vmem:[%s18028_s7 + $0x3a0] sm:$0xf] }
  0x89   :  { %493 = vst [vmem:[#allocation2 + $0x378] sm:$0xf] %v492_v17  ;;  %495 = vst [vmem:[#allocation2 + $0x37c] sm:$0xff] %v494_v18   ;;  %v500_v20 = vld [vmem:[%s18028_s7 + $0x384] sm:$0xf]  ;;  %v526_v33 = vld [vmem:[%s18028_s7 + $0x3bc] sm:$0xff]  }
  0x8a   :  { %499 = vst [vmem:[#allocation2 + $0x384] sm:$0xf] %v498_v19  ;;  %v502_v21 = vld [vmem:[%s18028_s7 + $0x3a4] sm:$0xf]  ;;  %v504_v22 = vld [vmem:[%s18028_s7 + $0x388] sm:$0xf] }
  0x8b   :  { %501 = vst [vmem:[#allocation2 + $0x388] sm:$0xf] %v500_v20  ;;  %503 = vst [vmem:[#allocation2 + $0x38c] sm:$0xf] %v502_v21  ;;  %v506_v23 = vld [vmem:[%s18028_s7 + $0x3a8] sm:$0xf] }
  0x8c   :  { %505 = vst [vmem:[#allocation2 + $0x390] sm:$0xf] %v504_v22  ;;  %v508_v24 = vld [vmem:[%s18028_s7 + $0x38c] sm:$0xf]  ;;  %507 = vst [vmem:[#allocation2 + $0x394] sm:$0xf] %v506_v23 }
  0x8d   :  { %v510_v25 = vld [vmem:[%s18028_s7 + $0x3ac] sm:$0xf]  ;;  %509 = vst [vmem:[#allocation2 + $0x398] sm:$0xf] %v508_v24  ;;  %v512_v26 = vld [vmem:[%s18028_s7 + $0x390] sm:$0xf] }
  0x8e   :  { %511 = vst [vmem:[#allocation2 + $0x39c] sm:$0xf] %v510_v25  ;;  %v514_v27 = vld [vmem:[%s18028_s7 + $0x3b0] sm:$0xf]  ;;  %v516_v28 = vld [vmem:[%s18028_s7 + $0x394] sm:$0xf] }
  0x8f   :  { %513 = vst [vmem:[#allocation2 + $0x3a0] sm:$0xf] %v512_v26  ;;  %515 = vst [vmem:[#allocation2 + $0x3a4] sm:$0xf] %v514_v27  ;;  %v518_v29 = vld [vmem:[%s18028_s7 + $0x3b4] sm:$0xf] }
  0x90   :  { %517 = vst [vmem:[#allocation2 + $0x3a8] sm:$0xf] %v516_v28  ;;  %v520_v30 = vld [vmem:[%s18028_s7 + $0x398] sm:$0xf]  ;;  %519 = vst [vmem:[#allocation2 + $0x3ac] sm:$0xf] %v518_v29 }
  0x91   :  { %v522_v31 = vld [vmem:[%s18028_s7 + $0x3b8] sm:$0xf]  ;;  %521 = vst [vmem:[#allocation2 + $0x3b0] sm:$0xf] %v520_v30  ;;  %v524_v32 = vld [vmem:[%s18028_s7 + $0x39c] sm:$0xf] }
  0x92   :  { %523 = vst [vmem:[#allocation2 + $0x3b4] sm:$0xf] %v522_v31  ;;  %v530_v34 = vld [vmem:[%s18028_s7 + $0x3e0] sm:$0xf]  ;;  %525 = vst [vmem:[#allocation2 + $0x3b8] sm:$0xf] %v524_v32 }
  0x93   :  { %527 = vst [vmem:[#allocation2 + $0x3bc] sm:$0xff] %v526_v33   ;;  %531 = vst [vmem:[#allocation2 + $0x3c4] sm:$0xf] %v530_v34  ;;  %v532_v35 = vld [vmem:[%s18028_s7 + $0x3c4] sm:$0xf]  ;;  %v558_v48 = vld [vmem:[%s18028_s7 + $0x3fc] sm:$0xff]  }
  0x94   :  { %v534_v36 = vld [vmem:[%s18028_s7 + $0x3e4] sm:$0xf]  ;;  %v536_v37 = vld [vmem:[%s18028_s7 + $0x3c8] sm:$0xf]  ;;  %533 = vst [vmem:[#allocation2 + $0x3c8] sm:$0xf] %v532_v35 }
  0x95   :  { %535 = vst [vmem:[#allocation2 + $0x3cc] sm:$0xf] %v534_v36  ;;  %537 = vst [vmem:[#allocation2 + $0x3d0] sm:$0xf] %v536_v37  ;;  %v538_v38 = vld [vmem:[%s18028_s7 + $0x3e8] sm:$0xf] }
  0x96   :  { %v540_v39 = vld [vmem:[%s18028_s7 + $0x3cc] sm:$0xf]  ;;  %539 = vst [vmem:[#allocation2 + $0x3d4] sm:$0xf] %v538_v38  ;;  %v544_v41 = vld [vmem:[%s18028_s7 + $0x3d0] sm:$0xf] }
  0x97   :  { %v542_v40 = vld [vmem:[%s18028_s7 + $0x3ec] sm:$0xf]  ;;  %541 = vst [vmem:[#allocation2 + $0x3d8] sm:$0xf] %v540_v39  ;;  %v546_v42 = vld [vmem:[%s18028_s7 + $0x3f0] sm:$0xf] }
  0x98   :  { %543 = vst [vmem:[#allocation2 + $0x3dc] sm:$0xf] %v542_v40  ;;  %v548_v43 = vld [vmem:[%s18028_s7 + $0x3d4] sm:$0xf]  ;;  %545 = vst [vmem:[#allocation2 + $0x3e0] sm:$0xf] %v544_v41 }
  0x99   :  { %547 = vst [vmem:[#allocation2 + $0x3e4] sm:$0xf] %v546_v42  ;;  %549 = vst [vmem:[#allocation2 + $0x3e8] sm:$0xf] %v548_v43  ;;  %v550_v44 = vld [vmem:[%s18028_s7 + $0x3f4] sm:$0xf] }
  0x9a   :  { %v552_v45 = vld [vmem:[%s18028_s7 + $0x3d8] sm:$0xf]  ;;  %551 = vst [vmem:[#allocation2 + $0x3ec] sm:$0xf] %v550_v44  ;;  %v556_v47 = vld [vmem:[%s18028_s7 + $0x3dc] sm:$0xf] }
  0x9b   :  { %v554_v46 = vld [vmem:[%s18028_s7 + $0x3f8] sm:$0xf]  ;;  %553 = vst [vmem:[#allocation2 + $0x3f0] sm:$0xf] %v552_v45  ;;  %v562_v49 = vld [vmem:[%s18028_s7 + $0x420] sm:$0xf] }
  0x9c   :  { %555 = vst [vmem:[#allocation2 + $0x3f4] sm:$0xf] %v554_v46  ;;  %557 = vst [vmem:[#allocation2 + $0x3f8] sm:$0xf] %v556_v47  ;;  %v564_v50 = vld [vmem:[%s18028_s7 + $0x404] sm:$0xf] }
  0x9d   :  { %559 = vst [vmem:[#allocation2 + $0x3fc] sm:$0xff] %v558_v48   ;;  %563 = vst [vmem:[#allocation2 + $0x404] sm:$0xf] %v562_v49  ;;  %v566_v51 = vld [vmem:[%s18028_s7 + $0x424] sm:$0xf]  ;;  %v590_v63 = vld [vmem:[%s18028_s7 + $0x43c] sm:$0xff]  }
  0x9e   :  { %v568_v52 = vld [vmem:[%s18028_s7 + $0x408] sm:$0xf]  ;;  %565 = vst [vmem:[#allocation2 + $0x408] sm:$0xf] %v564_v50  ;;  %567 = vst [vmem:[#allocation2 + $0x40c] sm:$0xf] %v566_v51 }
  0x9f   :  { %569 = vst [vmem:[#allocation2 + $0x410] sm:$0xf] %v568_v52  ;;  %v570_v53 = vld [vmem:[%s18028_s7 + $0x428] sm:$0xf]  ;;  %v572_v54 = vld [vmem:[%s18028_s7 + $0x40c] sm:$0xf] }
  0xa0   :  { %v574_v55 = vld [vmem:[%s18028_s7 + $0x42c] sm:$0xf]  ;;  %571 = vst [vmem:[#allocation2 + $0x414] sm:$0xf] %v570_v53  ;;  %573 = vst [vmem:[#allocation2 + $0x418] sm:$0xf] %v572_v54 }
  0xa1   :  { %575 = vst [vmem:[#allocation2 + $0x41c] sm:$0xf] %v574_v55  ;;  %v576_v56 = vld [vmem:[%s18028_s7 + $0x410] sm:$0xf]  ;;  %v580_v58 = vld [vmem:[%s18028_s7 + $0x414] sm:$0xf] }
  0xa2   :  { %v578_v57 = vld [vmem:[%s18028_s7 + $0x430] sm:$0xf]  ;;  %577 = vst [vmem:[#allocation2 + $0x420] sm:$0xf] %v576_v56  ;;  %581 = vst [vmem:[#allocation2 + $0x428] sm:$0xf] %v580_v58 }
  0xa3   :  { %579 = vst [vmem:[#allocation2 + $0x424] sm:$0xf] %v578_v57  ;;  %v582_v59 = vld [vmem:[%s18028_s7 + $0x434] sm:$0xf]  ;;  %v584_v60 = vld [vmem:[%s18028_s7 + $0x418] sm:$0xf] }
  0xa4   :  { %v586_v61 = vld [vmem:[%s18028_s7 + $0x438] sm:$0xf]  ;;  %583 = vst [vmem:[#allocation2 + $0x42c] sm:$0xf] %v582_v59  ;;  %585 = vst [vmem:[#allocation2 + $0x430] sm:$0xf] %v584_v60 }
  0xa5   :  { %587 = vst [vmem:[#allocation2 + $0x434] sm:$0xf] %v586_v61  ;;  %v588_v62 = vld [vmem:[%s18028_s7 + $0x41c] sm:$0xf]  ;;  %v594_v0 = vld [vmem:[%s18028_s7 + $0x460] sm:$0xf] }
  0xa6   :  { %589 = vst [vmem:[#allocation2 + $0x438] sm:$0xf] %v588_v62  ;;  %591 = vst [vmem:[#allocation2 + $0x43c] sm:$0xff] %v590_v63   ;;  %v596_v1 = vld [vmem:[%s18028_s7 + $0x444] sm:$0xf]  ;;  %v622_v14 = vld [vmem:[%s18028_s7 + $0x47c] sm:$0xff]  }
  0xa7   :  { %595 = vst [vmem:[#allocation2 + $0x444] sm:$0xf] %v594_v0  ;;  %v598_v2 = vld [vmem:[%s18028_s7 + $0x464] sm:$0xf]  ;;  %v600_v3 = vld [vmem:[%s18028_s7 + $0x448] sm:$0xf] }
  0xa8   :  { %597 = vst [vmem:[#allocation2 + $0x448] sm:$0xf] %v596_v1  ;;  %599 = vst [vmem:[#allocation2 + $0x44c] sm:$0xf] %v598_v2  ;;  %v602_v4 = vld [vmem:[%s18028_s7 + $0x468] sm:$0xf] }
  0xa9   :  { %601 = vst [vmem:[#allocation2 + $0x450] sm:$0xf] %v600_v3  ;;  %v604_v5 = vld [vmem:[%s18028_s7 + $0x44c] sm:$0xf]  ;;  %603 = vst [vmem:[#allocation2 + $0x454] sm:$0xf] %v602_v4 }
  0xaa   :  { %v606_v6 = vld [vmem:[%s18028_s7 + $0x46c] sm:$0xf]  ;;  %605 = vst [vmem:[#allocation2 + $0x458] sm:$0xf] %v604_v5  ;;  %v608_v7 = vld [vmem:[%s18028_s7 + $0x450] sm:$0xf] }
  0xab   :  { %607 = vst [vmem:[#allocation2 + $0x45c] sm:$0xf] %v606_v6  ;;  %v610_v8 = vld [vmem:[%s18028_s7 + $0x470] sm:$0xf]  ;;  %v612_v9 = vld [vmem:[%s18028_s7 + $0x454] sm:$0xf] }
  0xac   :  { %609 = vst [vmem:[#allocation2 + $0x460] sm:$0xf] %v608_v7  ;;  %611 = vst [vmem:[#allocation2 + $0x464] sm:$0xf] %v610_v8  ;;  %v614_v10 = vld [vmem:[%s18028_s7 + $0x474] sm:$0xf] }
  0xad   :  { %613 = vst [vmem:[#allocation2 + $0x468] sm:$0xf] %v612_v9  ;;  %v616_v11 = vld [vmem:[%s18028_s7 + $0x458] sm:$0xf]  ;;  %615 = vst [vmem:[#allocation2 + $0x46c] sm:$0xf] %v614_v10 }
  0xae   :  { %v618_v12 = vld [vmem:[%s18028_s7 + $0x478] sm:$0xf]  ;;  %617 = vst [vmem:[#allocation2 + $0x470] sm:$0xf] %v616_v11  ;;  %v620_v13 = vld [vmem:[%s18028_s7 + $0x45c] sm:$0xf] }
  0xaf   :  { %619 = vst [vmem:[#allocation2 + $0x474] sm:$0xf] %v618_v12  ;;  %v626_v15 = vld [vmem:[%s18028_s7 + $0x4a0] sm:$0xf]  ;;  %621 = vst [vmem:[#allocation2 + $0x478] sm:$0xf] %v620_v13 }
  0xb0   :  { %623 = vst [vmem:[#allocation2 + $0x47c] sm:$0xff] %v622_v14   ;;  %627 = vst [vmem:[#allocation2 + $0x484] sm:$0xf] %v626_v15  ;;  %v628_v16 = vld [vmem:[%s18028_s7 + $0x484] sm:$0xf]  ;;  %v654_v29 = vld [vmem:[%s18028_s7 + $0x4bc] sm:$0xff]  }
  0xb1   :  { %v630_v17 = vld [vmem:[%s18028_s7 + $0x4a4] sm:$0xf]  ;;  %v632_v18 = vld [vmem:[%s18028_s7 + $0x488] sm:$0xf]  ;;  %629 = vst [vmem:[#allocation2 + $0x488] sm:$0xf] %v628_v16 }
  0xb2   :  { %631 = vst [vmem:[#allocation2 + $0x48c] sm:$0xf] %v630_v17  ;;  %633 = vst [vmem:[#allocation2 + $0x490] sm:$0xf] %v632_v18  ;;  %v634_v19 = vld [vmem:[%s18028_s7 + $0x4a8] sm:$0xf] }
  0xb3   :  { %v636_v20 = vld [vmem:[%s18028_s7 + $0x48c] sm:$0xf]  ;;  %635 = vst [vmem:[#allocation2 + $0x494] sm:$0xf] %v634_v19  ;;  %v640_v22 = vld [vmem:[%s18028_s7 + $0x490] sm:$0xf] }
  0xb4   :  { %v638_v21 = vld [vmem:[%s18028_s7 + $0x4ac] sm:$0xf]  ;;  %637 = vst [vmem:[#allocation2 + $0x498] sm:$0xf] %v636_v20  ;;  %v642_v23 = vld [vmem:[%s18028_s7 + $0x4b0] sm:$0xf] }
  0xb5   :  { %639 = vst [vmem:[#allocation2 + $0x49c] sm:$0xf] %v638_v21  ;;  %v644_v24 = vld [vmem:[%s18028_s7 + $0x494] sm:$0xf]  ;;  %641 = vst [vmem:[#allocation2 + $0x4a0] sm:$0xf] %v640_v22 }
  0xb6   :  { %643 = vst [vmem:[#allocation2 + $0x4a4] sm:$0xf] %v642_v23  ;;  %645 = vst [vmem:[#allocation2 + $0x4a8] sm:$0xf] %v644_v24  ;;  %v646_v25 = vld [vmem:[%s18028_s7 + $0x4b4] sm:$0xf] }
  0xb7   :  { %v648_v26 = vld [vmem:[%s18028_s7 + $0x498] sm:$0xf]  ;;  %647 = vst [vmem:[#allocation2 + $0x4ac] sm:$0xf] %v646_v25  ;;  %v652_v28 = vld [vmem:[%s18028_s7 + $0x49c] sm:$0xf] }
  0xb8   :  { %v650_v27 = vld [vmem:[%s18028_s7 + $0x4b8] sm:$0xf]  ;;  %649 = vst [vmem:[#allocation2 + $0x4b0] sm:$0xf] %v648_v26  ;;  %v658_v30 = vld [vmem:[%s18028_s7 + $0x4e0] sm:$0xf] }
  0xb9   :  { %651 = vst [vmem:[#allocation2 + $0x4b4] sm:$0xf] %v650_v27  ;;  %653 = vst [vmem:[#allocation2 + $0x4b8] sm:$0xf] %v652_v28  ;;  %v660_v31 = vld [vmem:[%s18028_s7 + $0x4c4] sm:$0xf] }
  0xba   :  { %655 = vst [vmem:[#allocation2 + $0x4bc] sm:$0xff] %v654_v29   ;;  %659 = vst [vmem:[#allocation2 + $0x4c4] sm:$0xf] %v658_v30  ;;  %v662_v32 = vld [vmem:[%s18028_s7 + $0x4e4] sm:$0xf]  ;;  %v686_v44 = vld [vmem:[%s18028_s7 + $0x4fc] sm:$0xff]  }
  0xbb   :  { %v664_v33 = vld [vmem:[%s18028_s7 + $0x4c8] sm:$0xf]  ;;  %661 = vst [vmem:[#allocation2 + $0x4c8] sm:$0xf] %v660_v31  ;;  %663 = vst [vmem:[#allocation2 + $0x4cc] sm:$0xf] %v662_v32 }
  0xbc   :  { %665 = vst [vmem:[#allocation2 + $0x4d0] sm:$0xf] %v664_v33  ;;  %v666_v34 = vld [vmem:[%s18028_s7 + $0x4e8] sm:$0xf]  ;;  %v668_v35 = vld [vmem:[%s18028_s7 + $0x4cc] sm:$0xf] }
  0xbd   :  { %v670_v36 = vld [vmem:[%s18028_s7 + $0x4ec] sm:$0xf]  ;;  %667 = vst [vmem:[#allocation2 + $0x4d4] sm:$0xf] %v666_v34  ;;  %669 = vst [vmem:[#allocation2 + $0x4d8] sm:$0xf] %v668_v35 }
  0xbe   :  { %671 = vst [vmem:[#allocation2 + $0x4dc] sm:$0xf] %v670_v36  ;;  %v672_v37 = vld [vmem:[%s18028_s7 + $0x4d0] sm:$0xf]  ;;  %v676_v39 = vld [vmem:[%s18028_s7 + $0x4d4] sm:$0xf] }
  0xbf   :  { %v674_v38 = vld [vmem:[%s18028_s7 + $0x4f0] sm:$0xf]  ;;  %673 = vst [vmem:[#allocation2 + $0x4e0] sm:$0xf] %v672_v37  ;;  %677 = vst [vmem:[#allocation2 + $0x4e8] sm:$0xf] %v676_v39 }
  0xc0   :  { %675 = vst [vmem:[#allocation2 + $0x4e4] sm:$0xf] %v674_v38  ;;  %v678_v40 = vld [vmem:[%s18028_s7 + $0x4f4] sm:$0xf]  ;;  %v680_v41 = vld [vmem:[%s18028_s7 + $0x4d8] sm:$0xf] }
  0xc1   :  { %v682_v42 = vld [vmem:[%s18028_s7 + $0x4f8] sm:$0xf]  ;;  %679 = vst [vmem:[#allocation2 + $0x4ec] sm:$0xf] %v678_v40  ;;  %681 = vst [vmem:[#allocation2 + $0x4f0] sm:$0xf] %v680_v41 }
  0xc2   :  { %683 = vst [vmem:[#allocation2 + $0x4f4] sm:$0xf] %v682_v42  ;;  %v684_v43 = vld [vmem:[%s18028_s7 + $0x4dc] sm:$0xf]  ;;  %v690_v45 = vld [vmem:[%s18028_s7 + $0x520] sm:$0xf] }
  0xc3   :  { %685 = vst [vmem:[#allocation2 + $0x4f8] sm:$0xf] %v684_v43  ;;  %687 = vst [vmem:[#allocation2 + $0x4fc] sm:$0xff] %v686_v44   ;;  %v692_v46 = vld [vmem:[%s18028_s7 + $0x504] sm:$0xf]  ;;  %v718_v59 = vld [vmem:[%s18028_s7 + $0x53c] sm:$0xff]  }
  0xc4   :  { %691 = vst [vmem:[#allocation2 + $0x504] sm:$0xf] %v690_v45  ;;  %v694_v47 = vld [vmem:[%s18028_s7 + $0x524] sm:$0xf]  ;;  %v696_v48 = vld [vmem:[%s18028_s7 + $0x508] sm:$0xf] }
  0xc5   :  { %693 = vst [vmem:[#allocation2 + $0x508] sm:$0xf] %v692_v46  ;;  %695 = vst [vmem:[#allocation2 + $0x50c] sm:$0xf] %v694_v47  ;;  %v698_v49 = vld [vmem:[%s18028_s7 + $0x528] sm:$0xf] }
  0xc6   :  { %697 = vst [vmem:[#allocation2 + $0x510] sm:$0xf] %v696_v48  ;;  %v700_v50 = vld [vmem:[%s18028_s7 + $0x50c] sm:$0xf]  ;;  %699 = vst [vmem:[#allocation2 + $0x514] sm:$0xf] %v698_v49 }
  0xc7   :  { %v702_v51 = vld [vmem:[%s18028_s7 + $0x52c] sm:$0xf]  ;;  %701 = vst [vmem:[#allocation2 + $0x518] sm:$0xf] %v700_v50  ;;  %v704_v52 = vld [vmem:[%s18028_s7 + $0x510] sm:$0xf] }
  0xc8   :  { %703 = vst [vmem:[#allocation2 + $0x51c] sm:$0xf] %v702_v51  ;;  %v706_v53 = vld [vmem:[%s18028_s7 + $0x530] sm:$0xf]  ;;  %v708_v54 = vld [vmem:[%s18028_s7 + $0x514] sm:$0xf] }
  0xc9   :  { %705 = vst [vmem:[#allocation2 + $0x520] sm:$0xf] %v704_v52  ;;  %707 = vst [vmem:[#allocation2 + $0x524] sm:$0xf] %v706_v53  ;;  %v710_v55 = vld [vmem:[%s18028_s7 + $0x534] sm:$0xf] }
  0xca   :  { %709 = vst [vmem:[#allocation2 + $0x528] sm:$0xf] %v708_v54  ;;  %v712_v56 = vld [vmem:[%s18028_s7 + $0x518] sm:$0xf]  ;;  %711 = vst [vmem:[#allocation2 + $0x52c] sm:$0xf] %v710_v55 }
  0xcb   :  { %v714_v57 = vld [vmem:[%s18028_s7 + $0x538] sm:$0xf]  ;;  %713 = vst [vmem:[#allocation2 + $0x530] sm:$0xf] %v712_v56  ;;  %v716_v58 = vld [vmem:[%s18028_s7 + $0x51c] sm:$0xf] }
  0xcc   :  { %715 = vst [vmem:[#allocation2 + $0x534] sm:$0xf] %v714_v57  ;;  %v722_v60 = vld [vmem:[%s18028_s7 + $0x560] sm:$0xf]  ;;  %717 = vst [vmem:[#allocation2 + $0x538] sm:$0xf] %v716_v58 }
  0xcd   :  { %719 = vst [vmem:[#allocation2 + $0x53c] sm:$0xff] %v718_v59   ;;  %723 = vst [vmem:[#allocation2 + $0x544] sm:$0xf] %v722_v60  ;;  %v724_v61 = vld [vmem:[%s18028_s7 + $0x544] sm:$0xf]  ;;  %v750_v10 = vld [vmem:[%s18028_s7 + $0x57c] sm:$0xff]  }
  0xce   :  { %v726_v62 = vld [vmem:[%s18028_s7 + $0x564] sm:$0xf]  ;;  %v728_v63 = vld [vmem:[%s18028_s7 + $0x548] sm:$0xf]  ;;  %725 = vst [vmem:[#allocation2 + $0x548] sm:$0xf] %v724_v61 }
  0xcf   :  { %727 = vst [vmem:[#allocation2 + $0x54c] sm:$0xf] %v726_v62  ;;  %729 = vst [vmem:[#allocation2 + $0x550] sm:$0xf] %v728_v63  ;;  %v730_v0 = vld [vmem:[%s18028_s7 + $0x568] sm:$0xf] }
  0xd0   :  { %v732_v1 = vld [vmem:[%s18028_s7 + $0x54c] sm:$0xf]  ;;  %731 = vst [vmem:[#allocation2 + $0x554] sm:$0xf] %v730_v0  ;;  %v736_v3 = vld [vmem:[%s18028_s7 + $0x550] sm:$0xf] }
  0xd1   :  { %v734_v2 = vld [vmem:[%s18028_s7 + $0x56c] sm:$0xf]  ;;  %733 = vst [vmem:[#allocation2 + $0x558] sm:$0xf] %v732_v1  ;;  %v738_v4 = vld [vmem:[%s18028_s7 + $0x570] sm:$0xf] }
  0xd2   :  { %735 = vst [vmem:[#allocation2 + $0x55c] sm:$0xf] %v734_v2  ;;  %v740_v5 = vld [vmem:[%s18028_s7 + $0x554] sm:$0xf]  ;;  %737 = vst [vmem:[#allocation2 + $0x560] sm:$0xf] %v736_v3 }
  0xd3   :  { %739 = vst [vmem:[#allocation2 + $0x564] sm:$0xf] %v738_v4  ;;  %741 = vst [vmem:[#allocation2 + $0x568] sm:$0xf] %v740_v5  ;;  %v742_v6 = vld [vmem:[%s18028_s7 + $0x574] sm:$0xf] }
  0xd4   :  { %v744_v7 = vld [vmem:[%s18028_s7 + $0x558] sm:$0xf]  ;;  %743 = vst [vmem:[#allocation2 + $0x56c] sm:$0xf] %v742_v6  ;;  %v748_v9 = vld [vmem:[%s18028_s7 + $0x55c] sm:$0xf] }
  0xd5   :  { %v746_v8 = vld [vmem:[%s18028_s7 + $0x578] sm:$0xf]  ;;  %745 = vst [vmem:[#allocation2 + $0x570] sm:$0xf] %v744_v7  ;;  %v754_v11 = vld [vmem:[%s18028_s7 + $0x5a0] sm:$0xf] }
  0xd6   :  { %747 = vst [vmem:[#allocation2 + $0x574] sm:$0xf] %v746_v8  ;;  %749 = vst [vmem:[#allocation2 + $0x578] sm:$0xf] %v748_v9  ;;  %v756_v12 = vld [vmem:[%s18028_s7 + $0x584] sm:$0xf] }
  0xd7   :  { %751 = vst [vmem:[#allocation2 + $0x57c] sm:$0xff] %v750_v10   ;;  %755 = vst [vmem:[#allocation2 + $0x584] sm:$0xf] %v754_v11  ;;  %v758_v13 = vld [vmem:[%s18028_s7 + $0x5a4] sm:$0xf]  ;;  %v782_v25 = vld [vmem:[%s18028_s7 + $0x5bc] sm:$0xff]  }
  0xd8   :  { %v760_v14 = vld [vmem:[%s18028_s7 + $0x588] sm:$0xf]  ;;  %757 = vst [vmem:[#allocation2 + $0x588] sm:$0xf] %v756_v12  ;;  %759 = vst [vmem:[#allocation2 + $0x58c] sm:$0xf] %v758_v13 }
  0xd9   :  { %761 = vst [vmem:[#allocation2 + $0x590] sm:$0xf] %v760_v14  ;;  %v762_v15 = vld [vmem:[%s18028_s7 + $0x5a8] sm:$0xf]  ;;  %v764_v16 = vld [vmem:[%s18028_s7 + $0x58c] sm:$0xf] }
  0xda   :  { %v766_v17 = vld [vmem:[%s18028_s7 + $0x5ac] sm:$0xf]  ;;  %763 = vst [vmem:[#allocation2 + $0x594] sm:$0xf] %v762_v15  ;;  %765 = vst [vmem:[#allocation2 + $0x598] sm:$0xf] %v764_v16 }
  0xdb   :  { %767 = vst [vmem:[#allocation2 + $0x59c] sm:$0xf] %v766_v17  ;;  %v768_v18 = vld [vmem:[%s18028_s7 + $0x590] sm:$0xf]  ;;  %v772_v20 = vld [vmem:[%s18028_s7 + $0x594] sm:$0xf] }
  0xdc   :  { %v770_v19 = vld [vmem:[%s18028_s7 + $0x5b0] sm:$0xf]  ;;  %769 = vst [vmem:[#allocation2 + $0x5a0] sm:$0xf] %v768_v18  ;;  %773 = vst [vmem:[#allocation2 + $0x5a8] sm:$0xf] %v772_v20 }
  0xdd   :  { %771 = vst [vmem:[#allocation2 + $0x5a4] sm:$0xf] %v770_v19  ;;  %v774_v21 = vld [vmem:[%s18028_s7 + $0x5b4] sm:$0xf]  ;;  %v776_v22 = vld [vmem:[%s18028_s7 + $0x598] sm:$0xf] }
  0xde   :  { %v778_v23 = vld [vmem:[%s18028_s7 + $0x5b8] sm:$0xf]  ;;  %775 = vst [vmem:[#allocation2 + $0x5ac] sm:$0xf] %v774_v21  ;;  %777 = vst [vmem:[#allocation2 + $0x5b0] sm:$0xf] %v776_v22 }
  0xdf   :  { %779 = vst [vmem:[#allocation2 + $0x5b4] sm:$0xf] %v778_v23  ;;  %v780_v24 = vld [vmem:[%s18028_s7 + $0x59c] sm:$0xf]  ;;  %v786_v26 = vld [vmem:[%s18028_s7 + $0x5e0] sm:$0xf] }
  0xe0   :  { %781 = vst [vmem:[#allocation2 + $0x5b8] sm:$0xf] %v780_v24  ;;  %783 = vst [vmem:[#allocation2 + $0x5bc] sm:$0xff] %v782_v25   ;;  %v788_v27 = vld [vmem:[%s18028_s7 + $0x5c4] sm:$0xf]  ;;  %v814_v40 = vld [vmem:[%s18028_s7 + $0x5fc] sm:$0xff]  }
  0xe1   :  { %787 = vst [vmem:[#allocation2 + $0x5c4] sm:$0xf] %v786_v26  ;;  %v790_v28 = vld [vmem:[%s18028_s7 + $0x5e4] sm:$0xf]  ;;  %v792_v29 = vld [vmem:[%s18028_s7 + $0x5c8] sm:$0xf] }
  0xe2   :  { %789 = vst [vmem:[#allocation2 + $0x5c8] sm:$0xf] %v788_v27  ;;  %791 = vst [vmem:[#allocation2 + $0x5cc] sm:$0xf] %v790_v28  ;;  %v794_v30 = vld [vmem:[%s18028_s7 + $0x5e8] sm:$0xf] }
  0xe3   :  { %793 = vst [vmem:[#allocation2 + $0x5d0] sm:$0xf] %v792_v29  ;;  %v796_v31 = vld [vmem:[%s18028_s7 + $0x5cc] sm:$0xf]  ;;  %795 = vst [vmem:[#allocation2 + $0x5d4] sm:$0xf] %v794_v30 }
  0xe4   :  { %v798_v32 = vld [vmem:[%s18028_s7 + $0x5ec] sm:$0xf]  ;;  %797 = vst [vmem:[#allocation2 + $0x5d8] sm:$0xf] %v796_v31  ;;  %v800_v33 = vld [vmem:[%s18028_s7 + $0x5d0] sm:$0xf] }
  0xe5   :  { %799 = vst [vmem:[#allocation2 + $0x5dc] sm:$0xf] %v798_v32  ;;  %v802_v34 = vld [vmem:[%s18028_s7 + $0x5f0] sm:$0xf]  ;;  %v804_v35 = vld [vmem:[%s18028_s7 + $0x5d4] sm:$0xf] }
  0xe6   :  { %801 = vst [vmem:[#allocation2 + $0x5e0] sm:$0xf] %v800_v33  ;;  %803 = vst [vmem:[#allocation2 + $0x5e4] sm:$0xf] %v802_v34  ;;  %v806_v36 = vld [vmem:[%s18028_s7 + $0x5f4] sm:$0xf] }
  0xe7   :  { %805 = vst [vmem:[#allocation2 + $0x5e8] sm:$0xf] %v804_v35  ;;  %v808_v37 = vld [vmem:[%s18028_s7 + $0x5d8] sm:$0xf]  ;;  %807 = vst [vmem:[#allocation2 + $0x5ec] sm:$0xf] %v806_v36 }
  0xe8   :  { %v810_v38 = vld [vmem:[%s18028_s7 + $0x5f8] sm:$0xf]  ;;  %809 = vst [vmem:[#allocation2 + $0x5f0] sm:$0xf] %v808_v37  ;;  %v812_v39 = vld [vmem:[%s18028_s7 + $0x5dc] sm:$0xf] }
  0xe9   :  { %811 = vst [vmem:[#allocation2 + $0x5f4] sm:$0xf] %v810_v38  ;;  %v818_v41 = vld [vmem:[%s18028_s7 + $0x620] sm:$0xf]  ;;  %813 = vst [vmem:[#allocation2 + $0x5f8] sm:$0xf] %v812_v39 }
  0xea   :  { %815 = vst [vmem:[#allocation2 + $0x5fc] sm:$0xff] %v814_v40   ;;  %819 = vst [vmem:[#allocation2 + $0x604] sm:$0xf] %v818_v41  ;;  %v820_v42 = vld [vmem:[%s18028_s7 + $0x604] sm:$0xf]  ;;  %v846_v55 = vld [vmem:[%s18028_s7 + $0x63c] sm:$0xff]  }
  0xeb   :  { %v822_v43 = vld [vmem:[%s18028_s7 + $0x624] sm:$0xf]  ;;  %v824_v44 = vld [vmem:[%s18028_s7 + $0x608] sm:$0xf]  ;;  %821 = vst [vmem:[#allocation2 + $0x608] sm:$0xf] %v820_v42 }
  0xec   :  { %823 = vst [vmem:[#allocation2 + $0x60c] sm:$0xf] %v822_v43  ;;  %825 = vst [vmem:[#allocation2 + $0x610] sm:$0xf] %v824_v44  ;;  %v826_v45 = vld [vmem:[%s18028_s7 + $0x628] sm:$0xf] }
  0xed   :  { %v828_v46 = vld [vmem:[%s18028_s7 + $0x60c] sm:$0xf]  ;;  %827 = vst [vmem:[#allocation2 + $0x614] sm:$0xf] %v826_v45  ;;  %v832_v48 = vld [vmem:[%s18028_s7 + $0x610] sm:$0xf] }
  0xee   :  { %v830_v47 = vld [vmem:[%s18028_s7 + $0x62c] sm:$0xf]  ;;  %829 = vst [vmem:[#allocation2 + $0x618] sm:$0xf] %v828_v46  ;;  %v834_v49 = vld [vmem:[%s18028_s7 + $0x630] sm:$0xf] }
  0xef   :  { %831 = vst [vmem:[#allocation2 + $0x61c] sm:$0xf] %v830_v47  ;;  %v836_v50 = vld [vmem:[%s18028_s7 + $0x614] sm:$0xf]  ;;  %833 = vst [vmem:[#allocation2 + $0x620] sm:$0xf] %v832_v48 }
  0xf0   :  { %835 = vst [vmem:[#allocation2 + $0x624] sm:$0xf] %v834_v49  ;;  %837 = vst [vmem:[#allocation2 + $0x628] sm:$0xf] %v836_v50  ;;  %v838_v51 = vld [vmem:[%s18028_s7 + $0x634] sm:$0xf] }
  0xf1   :  { %v840_v52 = vld [vmem:[%s18028_s7 + $0x618] sm:$0xf]  ;;  %839 = vst [vmem:[#allocation2 + $0x62c] sm:$0xf] %v838_v51  ;;  %v844_v54 = vld [vmem:[%s18028_s7 + $0x61c] sm:$0xf] }
  0xf2   :  { %v842_v53 = vld [vmem:[%s18028_s7 + $0x638] sm:$0xf]  ;;  %841 = vst [vmem:[#allocation2 + $0x630] sm:$0xf] %v840_v52  ;;  %v850_v56 = vld [vmem:[%s18028_s7 + $0x660] sm:$0xf] }
  0xf3   :  { %843 = vst [vmem:[#allocation2 + $0x634] sm:$0xf] %v842_v53  ;;  %845 = vst [vmem:[#allocation2 + $0x638] sm:$0xf] %v844_v54  ;;  %v852_v57 = vld [vmem:[%s18028_s7 + $0x644] sm:$0xf] }
  0xf4   :  { %847 = vst [vmem:[#allocation2 + $0x63c] sm:$0xff] %v846_v55   ;;  %851 = vst [vmem:[#allocation2 + $0x644] sm:$0xf] %v850_v56  ;;  %v854_v58 = vld [vmem:[%s18028_s7 + $0x664] sm:$0xf]  ;;  %v878_v6 = vld [vmem:[%s18028_s7 + $0x67c] sm:$0xff]  }
  0xf5   :  { %v856_v59 = vld [vmem:[%s18028_s7 + $0x648] sm:$0xf]  ;;  %853 = vst [vmem:[#allocation2 + $0x648] sm:$0xf] %v852_v57  ;;  %855 = vst [vmem:[#allocation2 + $0x64c] sm:$0xf] %v854_v58 }
  0xf6   :  { %857 = vst [vmem:[#allocation2 + $0x650] sm:$0xf] %v856_v59  ;;  %v858_v60 = vld [vmem:[%s18028_s7 + $0x668] sm:$0xf]  ;;  %v860_v61 = vld [vmem:[%s18028_s7 + $0x64c] sm:$0xf] }
  0xf7   :  { %v862_v62 = vld [vmem:[%s18028_s7 + $0x66c] sm:$0xf]  ;;  %859 = vst [vmem:[#allocation2 + $0x654] sm:$0xf] %v858_v60  ;;  %861 = vst [vmem:[#allocation2 + $0x658] sm:$0xf] %v860_v61 }
  0xf8   :  { %863 = vst [vmem:[#allocation2 + $0x65c] sm:$0xf] %v862_v62  ;;  %v864_v63 = vld [vmem:[%s18028_s7 + $0x650] sm:$0xf]  ;;  %v868_v1 = vld [vmem:[%s18028_s7 + $0x654] sm:$0xf] }
  0xf9   :  { %v866_v0 = vld [vmem:[%s18028_s7 + $0x670] sm:$0xf]  ;;  %865 = vst [vmem:[#allocation2 + $0x660] sm:$0xf] %v864_v63  ;;  %869 = vst [vmem:[#allocation2 + $0x668] sm:$0xf] %v868_v1 }
  0xfa   :  { %867 = vst [vmem:[#allocation2 + $0x664] sm:$0xf] %v866_v0  ;;  %v870_v2 = vld [vmem:[%s18028_s7 + $0x674] sm:$0xf]  ;;  %v872_v3 = vld [vmem:[%s18028_s7 + $0x658] sm:$0xf] }
  0xfb   :  { %v874_v4 = vld [vmem:[%s18028_s7 + $0x678] sm:$0xf]  ;;  %871 = vst [vmem:[#allocation2 + $0x66c] sm:$0xf] %v870_v2  ;;  %873 = vst [vmem:[#allocation2 + $0x670] sm:$0xf] %v872_v3 }
  0xfc   :  { %875 = vst [vmem:[#allocation2 + $0x674] sm:$0xf] %v874_v4  ;;  %v876_v5 = vld [vmem:[%s18028_s7 + $0x65c] sm:$0xf]  ;;  %v882_v7 = vld [vmem:[%s18028_s7 + $0x6a0] sm:$0xf] }
  0xfd   :  { %877 = vst [vmem:[#allocation2 + $0x678] sm:$0xf] %v876_v5  ;;  %879 = vst [vmem:[#allocation2 + $0x67c] sm:$0xff] %v878_v6   ;;  %v884_v8 = vld [vmem:[%s18028_s7 + $0x684] sm:$0xf]  ;;  %v910_v21 = vld [vmem:[%s18028_s7 + $0x6bc] sm:$0xff]  }
  0xfe   :  { %883 = vst [vmem:[#allocation2 + $0x684] sm:$0xf] %v882_v7  ;;  %v886_v9 = vld [vmem:[%s18028_s7 + $0x6a4] sm:$0xf]  ;;  %v888_v10 = vld [vmem:[%s18028_s7 + $0x688] sm:$0xf] }
  0xff   :  { %885 = vst [vmem:[#allocation2 + $0x688] sm:$0xf] %v884_v8  ;;  %887 = vst [vmem:[#allocation2 + $0x68c] sm:$0xf] %v886_v9  ;;  %v890_v11 = vld [vmem:[%s18028_s7 + $0x6a8] sm:$0xf] }
 0x100   :  { %889 = vst [vmem:[#allocation2 + $0x690] sm:$0xf] %v888_v10  ;;  %v892_v12 = vld [vmem:[%s18028_s7 + $0x68c] sm:$0xf]  ;;  %891 = vst [vmem:[#allocation2 + $0x694] sm:$0xf] %v890_v11 }
 0x101   :  { %v894_v13 = vld [vmem:[%s18028_s7 + $0x6ac] sm:$0xf]  ;;  %893 = vst [vmem:[#allocation2 + $0x698] sm:$0xf] %v892_v12  ;;  %v896_v14 = vld [vmem:[%s18028_s7 + $0x690] sm:$0xf] }
 0x102   :  { %895 = vst [vmem:[#allocation2 + $0x69c] sm:$0xf] %v894_v13  ;;  %v898_v15 = vld [vmem:[%s18028_s7 + $0x6b0] sm:$0xf]  ;;  %v900_v16 = vld [vmem:[%s18028_s7 + $0x694] sm:$0xf] }
 0x103   :  { %897 = vst [vmem:[#allocation2 + $0x6a0] sm:$0xf] %v896_v14  ;;  %899 = vst [vmem:[#allocation2 + $0x6a4] sm:$0xf] %v898_v15  ;;  %v902_v17 = vld [vmem:[%s18028_s7 + $0x6b4] sm:$0xf] }
 0x104   :  { %901 = vst [vmem:[#allocation2 + $0x6a8] sm:$0xf] %v900_v16  ;;  %v904_v18 = vld [vmem:[%s18028_s7 + $0x698] sm:$0xf]  ;;  %903 = vst [vmem:[#allocation2 + $0x6ac] sm:$0xf] %v902_v17 }
 0x105   :  { %v906_v19 = vld [vmem:[%s18028_s7 + $0x6b8] sm:$0xf]  ;;  %905 = vst [vmem:[#allocation2 + $0x6b0] sm:$0xf] %v904_v18  ;;  %v908_v20 = vld [vmem:[%s18028_s7 + $0x69c] sm:$0xf] }
 0x106   :  { %907 = vst [vmem:[#allocation2 + $0x6b4] sm:$0xf] %v906_v19  ;;  %v914_v22 = vld [vmem:[%s18028_s7 + $0x6e0] sm:$0xf]  ;;  %909 = vst [vmem:[#allocation2 + $0x6b8] sm:$0xf] %v908_v20 }
 0x107   :  { %911 = vst [vmem:[#allocation2 + $0x6bc] sm:$0xff] %v910_v21   ;;  %915 = vst [vmem:[#allocation2 + $0x6c4] sm:$0xf] %v914_v22  ;;  %v916_v23 = vld [vmem:[%s18028_s7 + $0x6c4] sm:$0xf]  ;;  %v942_v36 = vld [vmem:[%s18028_s7 + $0x6fc] sm:$0xff]  }
 0x108   :  { %v918_v24 = vld [vmem:[%s18028_s7 + $0x6e4] sm:$0xf]  ;;  %v920_v25 = vld [vmem:[%s18028_s7 + $0x6c8] sm:$0xf]  ;;  %917 = vst [vmem:[#allocation2 + $0x6c8] sm:$0xf] %v916_v23 }
 0x109   :  { %919 = vst [vmem:[#allocation2 + $0x6cc] sm:$0xf] %v918_v24  ;;  %921 = vst [vmem:[#allocation2 + $0x6d0] sm:$0xf] %v920_v25  ;;  %v922_v26 = vld [vmem:[%s18028_s7 + $0x6e8] sm:$0xf] }
 0x10a   :  { %v924_v27 = vld [vmem:[%s18028_s7 + $0x6cc] sm:$0xf]  ;;  %923 = vst [vmem:[#allocation2 + $0x6d4] sm:$0xf] %v922_v26  ;;  %v928_v29 = vld [vmem:[%s18028_s7 + $0x6d0] sm:$0xf] }
 0x10b   :  { %v926_v28 = vld [vmem:[%s18028_s7 + $0x6ec] sm:$0xf]  ;;  %925 = vst [vmem:[#allocation2 + $0x6d8] sm:$0xf] %v924_v27  ;;  %v930_v30 = vld [vmem:[%s18028_s7 + $0x6f0] sm:$0xf] }
 0x10c   :  { %927 = vst [vmem:[#allocation2 + $0x6dc] sm:$0xf] %v926_v28  ;;  %v932_v31 = vld [vmem:[%s18028_s7 + $0x6d4] sm:$0xf]  ;;  %929 = vst [vmem:[#allocation2 + $0x6e0] sm:$0xf] %v928_v29 }
 0x10d   :  { %931 = vst [vmem:[#allocation2 + $0x6e4] sm:$0xf] %v930_v30  ;;  %933 = vst [vmem:[#allocation2 + $0x6e8] sm:$0xf] %v932_v31  ;;  %v934_v32 = vld [vmem:[%s18028_s7 + $0x6f4] sm:$0xf] }
 0x10e   :  { %v936_v33 = vld [vmem:[%s18028_s7 + $0x6d8] sm:$0xf]  ;;  %935 = vst [vmem:[#allocation2 + $0x6ec] sm:$0xf] %v934_v32  ;;  %v940_v35 = vld [vmem:[%s18028_s7 + $0x6dc] sm:$0xf] }
 0x10f   :  { %v938_v34 = vld [vmem:[%s18028_s7 + $0x6f8] sm:$0xf]  ;;  %937 = vst [vmem:[#allocation2 + $0x6f0] sm:$0xf] %v936_v33  ;;  %v946_v37 = vld [vmem:[%s18028_s7 + $0x720] sm:$0xf] }
 0x110   :  { %939 = vst [vmem:[#allocation2 + $0x6f4] sm:$0xf] %v938_v34  ;;  %941 = vst [vmem:[#allocation2 + $0x6f8] sm:$0xf] %v940_v35  ;;  %v948_v38 = vld [vmem:[%s18028_s7 + $0x704] sm:$0xf] }
 0x111   :  { %943 = vst [vmem:[#allocation2 + $0x6fc] sm:$0xff] %v942_v36   ;;  %947 = vst [vmem:[#allocation2 + $0x704] sm:$0xf] %v946_v37  ;;  %v950_v39 = vld [vmem:[%s18028_s7 + $0x724] sm:$0xf]  ;;  %v974_v51 = vld [vmem:[%s18028_s7 + $0x73c] sm:$0xff]  }
 0x112   :  { %v952_v40 = vld [vmem:[%s18028_s7 + $0x708] sm:$0xf]  ;;  %949 = vst [vmem:[#allocation2 + $0x708] sm:$0xf] %v948_v38  ;;  %951 = vst [vmem:[#allocation2 + $0x70c] sm:$0xf] %v950_v39 }
 0x113   :  { %953 = vst [vmem:[#allocation2 + $0x710] sm:$0xf] %v952_v40  ;;  %v954_v41 = vld [vmem:[%s18028_s7 + $0x728] sm:$0xf]  ;;  %v956_v42 = vld [vmem:[%s18028_s7 + $0x70c] sm:$0xf] }
 0x114   :  { %v958_v43 = vld [vmem:[%s18028_s7 + $0x72c] sm:$0xf]  ;;  %955 = vst [vmem:[#allocation2 + $0x714] sm:$0xf] %v954_v41  ;;  %957 = vst [vmem:[#allocation2 + $0x718] sm:$0xf] %v956_v42 }
 0x115   :  { %959 = vst [vmem:[#allocation2 + $0x71c] sm:$0xf] %v958_v43  ;;  %v960_v44 = vld [vmem:[%s18028_s7 + $0x710] sm:$0xf]  ;;  %v964_v46 = vld [vmem:[%s18028_s7 + $0x714] sm:$0xf] }
 0x116   :  { %v962_v45 = vld [vmem:[%s18028_s7 + $0x730] sm:$0xf]  ;;  %961 = vst [vmem:[#allocation2 + $0x720] sm:$0xf] %v960_v44  ;;  %965 = vst [vmem:[#allocation2 + $0x728] sm:$0xf] %v964_v46 }
 0x117   :  { %963 = vst [vmem:[#allocation2 + $0x724] sm:$0xf] %v962_v45  ;;  %v966_v47 = vld [vmem:[%s18028_s7 + $0x734] sm:$0xf]  ;;  %v968_v48 = vld [vmem:[%s18028_s7 + $0x718] sm:$0xf] }
 0x118   :  { %v970_v49 = vld [vmem:[%s18028_s7 + $0x738] sm:$0xf]  ;;  %967 = vst [vmem:[#allocation2 + $0x72c] sm:$0xf] %v966_v47  ;;  %969 = vst [vmem:[#allocation2 + $0x730] sm:$0xf] %v968_v48 }
 0x119   :  { %971 = vst [vmem:[#allocation2 + $0x734] sm:$0xf] %v970_v49  ;;  %v972_v50 = vld [vmem:[%s18028_s7 + $0x71c] sm:$0xf]  ;;  %v978_v52 = vld [vmem:[%s18028_s7 + $0x760] sm:$0xf] }
 0x11a   :  { %973 = vst [vmem:[#allocation2 + $0x738] sm:$0xf] %v972_v50  ;;  %975 = vst [vmem:[#allocation2 + $0x73c] sm:$0xff] %v974_v51   ;;  %v980_v53 = vld [vmem:[%s18028_s7 + $0x744] sm:$0xf]  ;;  %v1006_v2 = vld [vmem:[%s18028_s7 + $0x77c] sm:$0xff]  }
 0x11b   :  { %979 = vst [vmem:[#allocation2 + $0x744] sm:$0xf] %v978_v52  ;;  %v982_v54 = vld [vmem:[%s18028_s7 + $0x764] sm:$0xf]  ;;  %v984_v55 = vld [vmem:[%s18028_s7 + $0x748] sm:$0xf] }
 0x11c   :  { %981 = vst [vmem:[#allocation2 + $0x748] sm:$0xf] %v980_v53  ;;  %983 = vst [vmem:[#allocation2 + $0x74c] sm:$0xf] %v982_v54  ;;  %v986_v56 = vld [vmem:[%s18028_s7 + $0x768] sm:$0xf] }
 0x11d   :  { %985 = vst [vmem:[#allocation2 + $0x750] sm:$0xf] %v984_v55  ;;  %v988_v57 = vld [vmem:[%s18028_s7 + $0x74c] sm:$0xf]  ;;  %987 = vst [vmem:[#allocation2 + $0x754] sm:$0xf] %v986_v56 }
 0x11e   :  { %v990_v58 = vld [vmem:[%s18028_s7 + $0x76c] sm:$0xf]  ;;  %989 = vst [vmem:[#allocation2 + $0x758] sm:$0xf] %v988_v57  ;;  %v992_v59 = vld [vmem:[%s18028_s7 + $0x750] sm:$0xf] }
 0x11f   :  { %991 = vst [vmem:[#allocation2 + $0x75c] sm:$0xf] %v990_v58  ;;  %v994_v60 = vld [vmem:[%s18028_s7 + $0x770] sm:$0xf]  ;;  %v996_v61 = vld [vmem:[%s18028_s7 + $0x754] sm:$0xf] }
 0x120   :  { %993 = vst [vmem:[#allocation2 + $0x760] sm:$0xf] %v992_v59  ;;  %995 = vst [vmem:[#allocation2 + $0x764] sm:$0xf] %v994_v60  ;;  %v998_v62 = vld [vmem:[%s18028_s7 + $0x774] sm:$0xf] }
 0x121   :  { %997 = vst [vmem:[#allocation2 + $0x768] sm:$0xf] %v996_v61  ;;  %v1000_v63 = vld [vmem:[%s18028_s7 + $0x758] sm:$0xf]  ;;  %999 = vst [vmem:[#allocation2 + $0x76c] sm:$0xf] %v998_v62 }
 0x122   :  { %v1002_v0 = vld [vmem:[%s18028_s7 + $0x778] sm:$0xf]  ;;  %1001 = vst [vmem:[#allocation2 + $0x770] sm:$0xf] %v1000_v63  ;;  %v1004_v1 = vld [vmem:[%s18028_s7 + $0x75c] sm:$0xf] }
 0x123   :  { %1003 = vst [vmem:[#allocation2 + $0x774] sm:$0xf] %v1002_v0  ;;  %v1010_v3 = vld [vmem:[%s18028_s7 + $0x7a0] sm:$0xf]  ;;  %1005 = vst [vmem:[#allocation2 + $0x778] sm:$0xf] %v1004_v1 }
 0x124   :  { %1007 = vst [vmem:[#allocation2 + $0x77c] sm:$0xff] %v1006_v2   ;;  %1011 = vst [vmem:[#allocation2 + $0x784] sm:$0xf] %v1010_v3  ;;  %v1012_v4 = vld [vmem:[%s18028_s7 + $0x784] sm:$0xf]  ;;  %v1038_v17 = vld [vmem:[%s18028_s7 + $0x7bc] sm:$0xff]  }
 0x125   :  { %v1014_v5 = vld [vmem:[%s18028_s7 + $0x7a4] sm:$0xf]  ;;  %v1016_v6 = vld [vmem:[%s18028_s7 + $0x788] sm:$0xf]  ;;  %1013 = vst [vmem:[#allocation2 + $0x788] sm:$0xf] %v1012_v4 }
 0x126   :  { %1015 = vst [vmem:[#allocation2 + $0x78c] sm:$0xf] %v1014_v5  ;;  %1017 = vst [vmem:[#allocation2 + $0x790] sm:$0xf] %v1016_v6  ;;  %v1018_v7 = vld [vmem:[%s18028_s7 + $0x7a8] sm:$0xf] }
 0x127   :  { %v1020_v8 = vld [vmem:[%s18028_s7 + $0x78c] sm:$0xf]  ;;  %1019 = vst [vmem:[#allocation2 + $0x794] sm:$0xf] %v1018_v7  ;;  %v1024_v10 = vld [vmem:[%s18028_s7 + $0x790] sm:$0xf] }
 0x128   :  { %v1022_v9 = vld [vmem:[%s18028_s7 + $0x7ac] sm:$0xf]  ;;  %1021 = vst [vmem:[#allocation2 + $0x798] sm:$0xf] %v1020_v8  ;;  %v1026_v11 = vld [vmem:[%s18028_s7 + $0x7b0] sm:$0xf] }
 0x129   :  { %1023 = vst [vmem:[#allocation2 + $0x79c] sm:$0xf] %v1022_v9  ;;  %v1028_v12 = vld [vmem:[%s18028_s7 + $0x794] sm:$0xf]  ;;  %1025 = vst [vmem:[#allocation2 + $0x7a0] sm:$0xf] %v1024_v10 }
 0x12a   :  { %1027 = vst [vmem:[#allocation2 + $0x7a4] sm:$0xf] %v1026_v11  ;;  %1029 = vst [vmem:[#allocation2 + $0x7a8] sm:$0xf] %v1028_v12  ;;  %v1030_v13 = vld [vmem:[%s18028_s7 + $0x7b4] sm:$0xf] }
 0x12b   :  { %v1032_v14 = vld [vmem:[%s18028_s7 + $0x798] sm:$0xf]  ;;  %1031 = vst [vmem:[#allocation2 + $0x7ac] sm:$0xf] %v1030_v13  ;;  %v1036_v16 = vld [vmem:[%s18028_s7 + $0x79c] sm:$0xf] }
 0x12c   :  { %v1034_v15 = vld [vmem:[%s18028_s7 + $0x7b8] sm:$0xf]  ;;  %1033 = vst [vmem:[#allocation2 + $0x7b0] sm:$0xf] %v1032_v14  ;;  %v1042_v18 = vld [vmem:[%s18028_s7 + $0x7e0] sm:$0xf] }
 0x12d   :  { %1035 = vst [vmem:[#allocation2 + $0x7b4] sm:$0xf] %v1034_v15  ;;  %1037 = vst [vmem:[#allocation2 + $0x7b8] sm:$0xf] %v1036_v16  ;;  %v1044_v19 = vld [vmem:[%s18028_s7 + $0x7c4] sm:$0xf] }
 0x12e   :  { %1039 = vst [vmem:[#allocation2 + $0x7bc] sm:$0xff] %v1038_v17   ;;  %1043 = vst [vmem:[#allocation2 + $0x7c4] sm:$0xf] %v1042_v18  ;;  %v1046_v20 = vld [vmem:[%s18028_s7 + $0x7e4] sm:$0xf] }
 0x12f   :  { %v1048_v21 = vld [vmem:[%s18028_s7 + $0x7c8] sm:$0xf]  ;;  %1045 = vst [vmem:[#allocation2 + $0x7c8] sm:$0xf] %v1044_v19  ;;  %1047 = vst [vmem:[#allocation2 + $0x7cc] sm:$0xf] %v1046_v20 }
 0x130   :  { %1049 = vst [vmem:[#allocation2 + $0x7d0] sm:$0xf] %v1048_v21  ;;  %v1050_v22 = vld [vmem:[%s18028_s7 + $0x7e8] sm:$0xf]  ;;  %v1052_v23 = vld [vmem:[%s18028_s7 + $0x7cc] sm:$0xf] }
 0x131   :  { %v1054_v24 = vld [vmem:[%s18028_s7 + $0x7ec] sm:$0xf]  ;;  %1051 = vst [vmem:[#allocation2 + $0x7d4] sm:$0xf] %v1050_v22  ;;  %1053 = vst [vmem:[#allocation2 + $0x7d8] sm:$0xf] %v1052_v23 }
 0x132   :  { %1055 = vst [vmem:[#allocation2 + $0x7dc] sm:$0xf] %v1054_v24  ;;  %v1056_v25 = vld [vmem:[%s18028_s7 + $0x7d0] sm:$0xf]  ;;  %v1060_v27 = vld [vmem:[%s18028_s7 + $0x7d4] sm:$0xf] }
 0x133   :  { %v1058_v26 = vld [vmem:[%s18028_s7 + $0x7f0] sm:$0xf]  ;;  %1057 = vst [vmem:[#allocation2 + $0x7e0] sm:$0xf] %v1056_v25  ;;  %1061 = vst [vmem:[#allocation2 + $0x7e8] sm:$0xf] %v1060_v27 }
 0x134   :  { %1059 = vst [vmem:[#allocation2 + $0x7e4] sm:$0xf] %v1058_v26  ;;  %v1062_v28 = vld [vmem:[%s18028_s7 + $0x7f4] sm:$0xf]  ;;  %v1064_v29 = vld [vmem:[%s18028_s7 + $0x7d8] sm:$0xf] }
 0x135   :  { %v1066_v30 = vld [vmem:[%s18028_s7 + $0x7f8] sm:$0xf]  ;;  %1063 = vst [vmem:[#allocation2 + $0x7ec] sm:$0xf] %v1062_v28  ;;  %1065 = vst [vmem:[#allocation2 + $0x7f0] sm:$0xf] %v1064_v29 }
 0x136   :  { %1067 = vst [vmem:[#allocation2 + $0x7f4] sm:$0xf] %v1066_v30  ;;  %v1068_v31 = vld [vmem:[%s18028_s7 + $0x7dc] sm:$0xf] }
 0x137   :  { %v1070_v32 = vld [vmem:[%s18028_s7 + $0x7fc] sm:$0xf]  ;;  %1069 = vst [vmem:[#allocation2 + $0x7f8] sm:$0xf] %v1068_v31 }
 0x138   :  { %1071 = vst [vmem:[#allocation2 + $0x7fc] sm:$0xf] %v1070_v32 }
 0x139   :  { %4207 = vsyncadd [#allocation6], 32768  ;;  %v15025_v33 = vld [vmem:[%s18029_s8] sm:$0xff]  ;;  %v15030_v34 = vld [vmem:[%s18029_s8 + $0x8] sm:$0xff] }
 0x13a   :  { %v15035_v35 = vld [vmem:[%s18029_s8 + $0x10] sm:$0xff]  ;;  %v15040_v36 = vld [vmem:[%s18029_s8 + $0x18] sm:$0xff]  ;;  %v15045_v37 = vld [vmem:[%s18029_s8 + $0x20] sm:$0xff] }
 0x13b   :  { %v15050_v38 = vld [vmem:[%s18029_s8 + $0x28] sm:$0xff]  ;;  %v15055_v39 = vld [vmem:[%s18029_s8 + $0x30] sm:$0xff]  ;;  %v15060_v40 = vld [vmem:[%s18029_s8 + $0x38] sm:$0xff] }
 0x13c   :  { %v15065_v41 = vld [vmem:[%s18029_s8 + $0x40] sm:$0xff]  ;;  %v15070_v42 = vld [vmem:[%s18029_s8 + $0x48] sm:$0xff]  ;;  %v15075_v43 = vld [vmem:[%s18029_s8 + $0x50] sm:$0xff] }
 0x13d   :  { %18273 = vst [vmem:[#allocation16_spill] sm:$0xff] %v15070_v42  ;;  %v15080_v44 = vld [vmem:[%s18029_s8 + $0x58] sm:$0xff]  ;;  %v15085_v45 = vld [vmem:[%s18029_s8 + $0x60] sm:$0xff]  ;;  %v15090_v46 = vld [vmem:[%s18029_s8 + $0x68] sm:$0xff] }
 0x13e   :  { %18274 = vst [vmem:[#allocation17_spill] sm:$0xff] %v15085_v45  ;;  %18275 = vst [vmem:[#allocation18_spill] sm:$0xff] %v15090_v46  ;;  %v15095_v47 = vld [vmem:[%s18029_s8 + $0x70] sm:$0xff]  ;;  %v15100_v48 = vld [vmem:[%s18029_s8 + $0x78] sm:$0xff] }
 0x13f   :  { %18276 = vst [vmem:[#allocation19_spill] sm:$0xff] %v15095_v47  ;;  %18277 = vst [vmem:[#allocation20_spill] sm:$0xff] %v15100_v48  ;;  %v15105_v49 = vld [vmem:[%s18029_s8 + $0x80] sm:$0xff]  ;;  %v15110_v50 = vld [vmem:[%s18029_s8 + $0x88] sm:$0xff] }
 0x140   :  { %18278 = vst [vmem:[#allocation21_spill] sm:$0xff] %v15105_v49  ;;  %18279 = vst [vmem:[#allocation22_spill] sm:$0xff] %v15110_v50  ;;  %v15115_v51 = vld [vmem:[%s18029_s8 + $0x90] sm:$0xff]  ;;  %v15120_v52 = vld [vmem:[%s18029_s8 + $0x98] sm:$0xff] }
 0x141   :  { %18280 = vst [vmem:[#allocation23_spill] sm:$0xff] %v15115_v51  ;;  %18281 = vst [vmem:[#allocation24_spill] sm:$0xff] %v15120_v52  ;;  %v15125_v53 = vld [vmem:[%s18029_s8 + $0xa0] sm:$0xff]  ;;  %v15130_v54 = vld [vmem:[%s18029_s8 + $0xa8] sm:$0xff] }
 0x142   :  { %18282 = vst [vmem:[#allocation25_spill] sm:$0xff] %v15125_v53  ;;  %18283 = vst [vmem:[#allocation26_spill] sm:$0xff] %v15130_v54  ;;  %v15135_v55 = vld [vmem:[%s18029_s8 + $0xb0] sm:$0xff]  ;;  %v15140_v56 = vld [vmem:[%s18029_s8 + $0xb8] sm:$0xff] }
 0x143   :  { %18284 = vst [vmem:[#allocation27_spill] sm:$0xff] %v15135_v55  ;;  %18285 = vst [vmem:[#allocation28_spill] sm:$0xff] %v15140_v56  ;;  %v15145_v57 = vld [vmem:[%s18029_s8 + $0xc0] sm:$0xff]  ;;  %v15150_v58 = vld [vmem:[%s18029_s8 + $0xc8] sm:$0xff] }
 0x144   :  { %18286 = vst [vmem:[#allocation29_spill] sm:$0xff] %v15145_v57  ;;  %18287 = vst [vmem:[#allocation30_spill] sm:$0xff] %v15150_v58  ;;  %v15155_v59 = vld [vmem:[%s18029_s8 + $0xd0] sm:$0xff]  ;;  %v15160_v60 = vld [vmem:[%s18029_s8 + $0xd8] sm:$0xff] }
 0x145   :  { %18288 = vst [vmem:[#allocation31_spill] sm:$0xff] %v15155_v59  ;;  %18289 = vst [vmem:[#allocation32_spill] sm:$0xff] %v15160_v60  ;;  %v15165_v61 = vld [vmem:[%s18029_s8 + $0xe0] sm:$0xff]  ;;  %v15170_v62 = vld [vmem:[%s18029_s8 + $0xe8] sm:$0xff] }
 0x146   :  { %18290 = vst [vmem:[#allocation33_spill] sm:$0xff] %v15165_v61  ;;  %18291 = vst [vmem:[#allocation34_spill] sm:$0xff] %v15170_v62  ;;  %v15175_v63 = vld [vmem:[%s18029_s8 + $0xf0] sm:$0xff]  ;;  %v15180_v0 = vld [vmem:[%s18029_s8 + $0xf8] sm:$0xff] }
 0x147   :  { %18292 = vst [vmem:[#allocation35_spill] sm:$0xff] %v15175_v63  ;;  %18293 = vst [vmem:[#allocation36_spill] sm:$0xff] %v15180_v0  ;;  %v15185_v1 = vld [vmem:[%s18029_s8 + $0x100] sm:$0xff]  ;;  %v15190_v2 = vld [vmem:[%s18029_s8 + $0x108] sm:$0xff] }
 0x148   :  { %18294 = vst [vmem:[#allocation37_spill] sm:$0xff] %v15185_v1  ;;  %18295 = vst [vmem:[#allocation38_spill] sm:$0xff] %v15190_v2  ;;  %v15195_v3 = vld [vmem:[%s18029_s8 + $0x110] sm:$0xff]  ;;  %v15200_v4 = vld [vmem:[%s18029_s8 + $0x118] sm:$0xff] }
 0x149   :  { %18296 = vst [vmem:[#allocation39_spill] sm:$0xff] %v15195_v3  ;;  %18297 = vst [vmem:[#allocation40_spill] sm:$0xff] %v15200_v4  ;;  %v15205_v5 = vld [vmem:[%s18029_s8 + $0x120] sm:$0xff]  ;;  %v15210_v6 = vld [vmem:[%s18029_s8 + $0x128] sm:$0xff] }
 0x14a   :  { %18298 = vst [vmem:[#allocation41_spill] sm:$0xff] %v15205_v5  ;;  %18299 = vst [vmem:[#allocation42_spill] sm:$0xff] %v15210_v6  ;;  %v15215_v7 = vld [vmem:[%s18029_s8 + $0x130] sm:$0xff]  ;;  %v15220_v8 = vld [vmem:[%s18029_s8 + $0x138] sm:$0xff] }
 0x14b   :  { %18300 = vst [vmem:[#allocation43_spill] sm:$0xff] %v15215_v7  ;;  %18301 = vst [vmem:[#allocation44_spill] sm:$0xff] %v15220_v8  ;;  %v15225_v9 = vld [vmem:[%s18029_s8 + $0x140] sm:$0xff]  ;;  %v15230_v10 = vld [vmem:[%s18029_s8 + $0x148] sm:$0xff] }
 0x14c   :  { %18302 = vst [vmem:[#allocation45_spill] sm:$0xff] %v15225_v9  ;;  %18303 = vst [vmem:[#allocation46_spill] sm:$0xff] %v15230_v10  ;;  %v15235_v11 = vld [vmem:[%s18029_s8 + $0x150] sm:$0xff]  ;;  %v15240_v12 = vld [vmem:[%s18029_s8 + $0x158] sm:$0xff] }
 0x14d   :  { %18304 = vst [vmem:[#allocation47_spill] sm:$0xff] %v15235_v11  ;;  %18305 = vst [vmem:[#allocation48_spill] sm:$0xff] %v15240_v12  ;;  %v15245_v13 = vld [vmem:[%s18029_s8 + $0x160] sm:$0xff]  ;;  %v15250_v14 = vld [vmem:[%s18029_s8 + $0x168] sm:$0xff] }
 0x14e   :  { %18306 = vst [vmem:[#allocation49_spill] sm:$0xff] %v15245_v13  ;;  %18307 = vst [vmem:[#allocation50_spill] sm:$0xff] %v15250_v14  ;;  %v15255_v15 = vld [vmem:[%s18029_s8 + $0x170] sm:$0xff]  ;;  %v15260_v16 = vld [vmem:[%s18029_s8 + $0x178] sm:$0xff] }
 0x14f   :  { %18308 = vst [vmem:[#allocation51_spill] sm:$0xff] %v15255_v15  ;;  %18309 = vst [vmem:[#allocation52_spill] sm:$0xff] %v15260_v16  ;;  %v15265_v17 = vld [vmem:[%s18029_s8 + $0x180] sm:$0xff]  ;;  %v15270_v18 = vld [vmem:[%s18029_s8 + $0x188] sm:$0xff] }
 0x150   :  { %18310 = vst [vmem:[#allocation53_spill] sm:$0xff] %v15265_v17  ;;  %18311 = vst [vmem:[#allocation54_spill] sm:$0xff] %v15270_v18  ;;  %v15275_v19 = vld [vmem:[%s18029_s8 + $0x190] sm:$0xff]  ;;  %v15280_v20 = vld [vmem:[%s18029_s8 + $0x198] sm:$0xff] }
 0x151   :  { %18312 = vst [vmem:[#allocation55_spill] sm:$0xff] %v15275_v19  ;;  %18313 = vst [vmem:[#allocation56_spill] sm:$0xff] %v15280_v20  ;;  %v15285_v21 = vld [vmem:[%s18029_s8 + $0x1a0] sm:$0xff]  ;;  %v15290_v22 = vld [vmem:[%s18029_s8 + $0x1a8] sm:$0xff] }
 0x152   :  { %18314 = vst [vmem:[#allocation57_spill] sm:$0xff] %v15285_v21  ;;  %18315 = vst [vmem:[#allocation58_spill] sm:$0xff] %v15290_v22  ;;  %v15295_v23 = vld [vmem:[%s18029_s8 + $0x1b0] sm:$0xff]  ;;  %v15300_v24 = vld [vmem:[%s18029_s8 + $0x1b8] sm:$0xff] }
 0x153   :  { %18316 = vst [vmem:[#allocation59_spill] sm:$0xff] %v15295_v23  ;;  %18317 = vst [vmem:[#allocation60_spill] sm:$0xff] %v15300_v24  ;;  %v15305_v25 = vld [vmem:[%s18029_s8 + $0x1c0] sm:$0xff]  ;;  %v15310_v26 = vld [vmem:[%s18029_s8 + $0x1c8] sm:$0xff] }
 0x154   :  { %18318 = vst [vmem:[#allocation61_spill] sm:$0xff] %v15305_v25  ;;  %18319 = vst [vmem:[#allocation62_spill] sm:$0xff] %v15310_v26  ;;  %v15315_v27 = vld [vmem:[%s18029_s8 + $0x1d0] sm:$0xff]  ;;  %v15320_v28 = vld [vmem:[%s18029_s8 + $0x1d8] sm:$0xff] }
 0x155   :  { %18320 = vst [vmem:[#allocation63_spill] sm:$0xff] %v15315_v27  ;;  %18321 = vst [vmem:[#allocation64_spill] sm:$0xff] %v15320_v28  ;;  %v15325_v29 = vld [vmem:[%s18029_s8 + $0x1e0] sm:$0xff]  ;;  %v15330_v30 = vld [vmem:[%s18029_s8 + $0x1e8] sm:$0xff] }
 0x156   :  { %18322 = vst [vmem:[#allocation65_spill] sm:$0xff] %v15325_v29  ;;  %18323 = vst [vmem:[#allocation66_spill] sm:$0xff] %v15330_v30  ;;  %v15335_v31 = vld [vmem:[%s18029_s8 + $0x1f0] sm:$0xff]  ;;  %v15340_v32 = vld [vmem:[%s18029_s8 + $0x1f8] sm:$0xff] }
 0x157   :  { %18324 = vst [vmem:[#allocation67_spill] sm:$0xff] %v15335_v31  ;;  %18325 = vst [vmem:[#allocation68_spill] sm:$0xff] %v15340_v32  ;;  %v15345_v26 = vld [vmem:[%s18029_s8 + $0x200] sm:$0xff]  ;;  %v15350_v29 = vld [vmem:[%s18029_s8 + $0x208] sm:$0xff] }
 0x158   :  { %18326 = vst [vmem:[#allocation69_spill] sm:$0xff] %v15345_v26  ;;  %18327 = vst [vmem:[#allocation70_spill] sm:$0xff] %v15350_v29  ;;  %v15355_v30 = vld [vmem:[%s18029_s8 + $0x210] sm:$0xff]  ;;  %v15360_v31 = vld [vmem:[%s18029_s8 + $0x218] sm:$0xff] }
 0x159   :  { %18328 = vst [vmem:[#allocation71_spill] sm:$0xff] %v15355_v30  ;;  %18329 = vst [vmem:[#allocation72_spill] sm:$0xff] %v15360_v31  ;;  %v15365_v32 = vld [vmem:[%s18029_s8 + $0x220] sm:$0xff]  ;;  %v15370_v26 = vld [vmem:[%s18029_s8 + $0x228] sm:$0xff] }
 0x15a   :  { %18330 = vst [vmem:[#allocation73_spill] sm:$0xff] %v15365_v32  ;;  %18331 = vst [vmem:[#allocation74_spill] sm:$0xff] %v15370_v26  ;;  %v15375_v29 = vld [vmem:[%s18029_s8 + $0x230] sm:$0xff]  ;;  %v15380_v30 = vld [vmem:[%s18029_s8 + $0x238] sm:$0xff] }
 0x15b   :  { %18332 = vst [vmem:[#allocation75_spill] sm:$0xff] %v15375_v29  ;;  %18333 = vst [vmem:[#allocation76_spill] sm:$0xff] %v15380_v30  ;;  %v15385_v31 = vld [vmem:[%s18029_s8 + $0x240] sm:$0xff]  ;;  %v15390_v32 = vld [vmem:[%s18029_s8 + $0x248] sm:$0xff] }
 0x15c   :  { %18334 = vst [vmem:[#allocation77_spill] sm:$0xff] %v15385_v31  ;;  %18335 = vst [vmem:[#allocation78_spill] sm:$0xff] %v15390_v32  ;;  %v15395_v26 = vld [vmem:[%s18029_s8 + $0x250] sm:$0xff]  ;;  %v15400_v29 = vld [vmem:[%s18029_s8 + $0x258] sm:$0xff] }
 0x15d   :  { %18336 = vst [vmem:[#allocation79_spill] sm:$0xff] %v15395_v26  ;;  %18337 = vst [vmem:[#allocation80_spill] sm:$0xff] %v15400_v29  ;;  %v15405_v30 = vld [vmem:[%s18029_s8 + $0x260] sm:$0xff]  ;;  %v15410_v31 = vld [vmem:[%s18029_s8 + $0x268] sm:$0xff] }
 0x15e   :  { %18338 = vst [vmem:[#allocation81_spill] sm:$0xff] %v15405_v30  ;;  %18339 = vst [vmem:[#allocation82_spill] sm:$0xff] %v15410_v31  ;;  %v15415_v32 = vld [vmem:[%s18029_s8 + $0x270] sm:$0xff]  ;;  %v15420_v26 = vld [vmem:[%s18029_s8 + $0x278] sm:$0xff] }
 0x15f   :  { %18340 = vst [vmem:[#allocation83_spill] sm:$0xff] %v15415_v32  ;;  %18341 = vst [vmem:[#allocation84_spill] sm:$0xff] %v15420_v26  ;;  %v15425_v29 = vld [vmem:[%s18029_s8 + $0x280] sm:$0xff]  ;;  %v15430_v30 = vld [vmem:[%s18029_s8 + $0x288] sm:$0xff] }
 0x160   :  { %18342 = vst [vmem:[#allocation85_spill] sm:$0xff] %v15425_v29  ;;  %18343 = vst [vmem:[#allocation86_spill] sm:$0xff] %v15430_v30  ;;  %v15435_v31 = vld [vmem:[%s18029_s8 + $0x290] sm:$0xff]  ;;  %v15440_v32 = vld [vmem:[%s18029_s8 + $0x298] sm:$0xff] }
 0x161   :  { %18344 = vst [vmem:[#allocation87_spill] sm:$0xff] %v15435_v31  ;;  %18345 = vst [vmem:[#allocation88_spill] sm:$0xff] %v15440_v32  ;;  %v15445_v26 = vld [vmem:[%s18029_s8 + $0x2a0] sm:$0xff]  ;;  %v15450_v29 = vld [vmem:[%s18029_s8 + $0x2a8] sm:$0xff] }
 0x162   :  { %18346 = vst [vmem:[#allocation89_spill] sm:$0xff] %v15445_v26  ;;  %18347 = vst [vmem:[#allocation90_spill] sm:$0xff] %v15450_v29  ;;  %v15455_v30 = vld [vmem:[%s18029_s8 + $0x2b0] sm:$0xff]  ;;  %v15460_v31 = vld [vmem:[%s18029_s8 + $0x2b8] sm:$0xff] }
 0x163   :  { %18348 = vst [vmem:[#allocation91_spill] sm:$0xff] %v15455_v30  ;;  %18349 = vst [vmem:[#allocation92_spill] sm:$0xff] %v15460_v31  ;;  %v15465_v32 = vld [vmem:[%s18029_s8 + $0x2c0] sm:$0xff]  ;;  %v15470_v26 = vld [vmem:[%s18029_s8 + $0x2c8] sm:$0xff] }
 0x164   :  { %18350 = vst [vmem:[#allocation93_spill] sm:$0xff] %v15465_v32  ;;  %18351 = vst [vmem:[#allocation94_spill] sm:$0xff] %v15470_v26  ;;  %v15475_v29 = vld [vmem:[%s18029_s8 + $0x2d0] sm:$0xff]  ;;  %v15480_v30 = vld [vmem:[%s18029_s8 + $0x2d8] sm:$0xff] }
 0x165   :  { %18352 = vst [vmem:[#allocation95_spill] sm:$0xff] %v15475_v29  ;;  %18353 = vst [vmem:[#allocation96_spill] sm:$0xff] %v15480_v30  ;;  %v15485_v31 = vld [vmem:[%s18029_s8 + $0x2e0] sm:$0xff]  ;;  %v15490_v32 = vld [vmem:[%s18029_s8 + $0x2e8] sm:$0xff] }
 0x166   :  { %18354 = vst [vmem:[#allocation97_spill] sm:$0xff] %v15485_v31  ;;  %18355 = vst [vmem:[#allocation98_spill] sm:$0xff] %v15490_v32  ;;  %v15495_v26 = vld [vmem:[%s18029_s8 + $0x2f0] sm:$0xff]  ;;  %v15500_v29 = vld [vmem:[%s18029_s8 + $0x2f8] sm:$0xff] }
 0x167   :  { %18356 = vst [vmem:[#allocation99_spill] sm:$0xff] %v15495_v26  ;;  %18357 = vst [vmem:[#allocation100_spill] sm:$0xff] %v15500_v29  ;;  %v15505_v30 = vld [vmem:[%s18029_s8 + $0x300] sm:$0xff]  ;;  %v15510_v31 = vld [vmem:[%s18029_s8 + $0x308] sm:$0xff] }
 0x168   :  { %18358 = vst [vmem:[#allocation101_spill] sm:$0xff] %v15505_v30  ;;  %18359 = vst [vmem:[#allocation102_spill] sm:$0xff] %v15510_v31  ;;  %v15515_v32 = vld [vmem:[%s18029_s8 + $0x310] sm:$0xff]  ;;  %v15520_v26 = vld [vmem:[%s18029_s8 + $0x318] sm:$0xff] }
 0x169   :  { %18360 = vst [vmem:[#allocation103_spill] sm:$0xff] %v15515_v32  ;;  %18361 = vst [vmem:[#allocation104_spill] sm:$0xff] %v15520_v26  ;;  %v15525_v29 = vld [vmem:[%s18029_s8 + $0x320] sm:$0xff]  ;;  %v15530_v30 = vld [vmem:[%s18029_s8 + $0x328] sm:$0xff] }
 0x16a   :  { %18362 = vst [vmem:[#allocation105_spill] sm:$0xff] %v15525_v29  ;;  %18363 = vst [vmem:[#allocation106_spill] sm:$0xff] %v15530_v30  ;;  %v15535_v31 = vld [vmem:[%s18029_s8 + $0x330] sm:$0xff]  ;;  %v15540_v32 = vld [vmem:[%s18029_s8 + $0x338] sm:$0xff] }
 0x16b   :  { %18364 = vst [vmem:[#allocation107_spill] sm:$0xff] %v15535_v31  ;;  %18365 = vst [vmem:[#allocation108_spill] sm:$0xff] %v15540_v32  ;;  %v15545_v26 = vld [vmem:[%s18029_s8 + $0x340] sm:$0xff]  ;;  %v15550_v29 = vld [vmem:[%s18029_s8 + $0x348] sm:$0xff] }
 0x16c   :  { %18366 = vst [vmem:[#allocation109_spill] sm:$0xff] %v15545_v26  ;;  %18367 = vst [vmem:[#allocation110_spill] sm:$0xff] %v15550_v29  ;;  %v15555_v30 = vld [vmem:[%s18029_s8 + $0x350] sm:$0xff]  ;;  %v15560_v31 = vld [vmem:[%s18029_s8 + $0x358] sm:$0xff] }
 0x16d   :  { %18368 = vst [vmem:[#allocation111_spill] sm:$0xff] %v15555_v30  ;;  %18369 = vst [vmem:[#allocation112_spill] sm:$0xff] %v15560_v31  ;;  %v15565_v32 = vld [vmem:[%s18029_s8 + $0x360] sm:$0xff]  ;;  %v15570_v26 = vld [vmem:[%s18029_s8 + $0x368] sm:$0xff] }
 0x16e   :  { %18370 = vst [vmem:[#allocation113_spill] sm:$0xff] %v15565_v32  ;;  %18371 = vst [vmem:[#allocation114_spill] sm:$0xff] %v15570_v26  ;;  %v15575_v29 = vld [vmem:[%s18029_s8 + $0x370] sm:$0xff]  ;;  %v15580_v30 = vld [vmem:[%s18029_s8 + $0x378] sm:$0xff] }
 0x16f   :  { %18372 = vst [vmem:[#allocation115_spill] sm:$0xff] %v15575_v29  ;;  %18373 = vst [vmem:[#allocation116_spill] sm:$0xff] %v15580_v30  ;;  %v15585_v31 = vld [vmem:[%s18029_s8 + $0x380] sm:$0xff]  ;;  %v15590_v32 = vld [vmem:[%s18029_s8 + $0x388] sm:$0xff] }
 0x170   :  { %18374 = vst [vmem:[#allocation117_spill] sm:$0xff] %v15585_v31  ;;  %18375 = vst [vmem:[#allocation118_spill] sm:$0xff] %v15590_v32  ;;  %v15595_v26 = vld [vmem:[%s18029_s8 + $0x390] sm:$0xff]  ;;  %v15600_v29 = vld [vmem:[%s18029_s8 + $0x398] sm:$0xff] }
 0x171   :  { %18376 = vst [vmem:[#allocation119_spill] sm:$0xff] %v15595_v26  ;;  %18377 = vst [vmem:[#allocation120_spill] sm:$0xff] %v15600_v29  ;;  %v15605_v30 = vld [vmem:[%s18029_s8 + $0x3a0] sm:$0xff]  ;;  %v15610_v31 = vld [vmem:[%s18029_s8 + $0x3a8] sm:$0xff] }
 0x172   :  { %18378 = vst [vmem:[#allocation121_spill] sm:$0xff] %v15605_v30  ;;  %18379 = vst [vmem:[#allocation122_spill] sm:$0xff] %v15610_v31  ;;  %v15615_v32 = vld [vmem:[%s18029_s8 + $0x3b0] sm:$0xff]  ;;  %v15620_v26 = vld [vmem:[%s18029_s8 + $0x3b8] sm:$0xff] }
 0x173   :  { %18380 = vst [vmem:[#allocation123_spill] sm:$0xff] %v15615_v32  ;;  %18381 = vst [vmem:[#allocation124_spill] sm:$0xff] %v15620_v26  ;;  %v15625_v29 = vld [vmem:[%s18029_s8 + $0x3c0] sm:$0xff]  ;;  %v15630_v30 = vld [vmem:[%s18029_s8 + $0x3c8] sm:$0xff] }
 0x174   :  { %18382 = vst [vmem:[#allocation125_spill] sm:$0xff] %v15625_v29  ;;  %18383 = vst [vmem:[#allocation126_spill] sm:$0xff] %v15630_v30  ;;  %v15635_v31 = vld [vmem:[%s18029_s8 + $0x3d0] sm:$0xff]  ;;  %v15640_v32 = vld [vmem:[%s18029_s8 + $0x3d8] sm:$0xff] }
 0x175   :  { %18384 = vst [vmem:[#allocation127_spill] sm:$0xff] %v15635_v31  ;;  %18385 = vst [vmem:[#allocation128_spill] sm:$0xff] %v15640_v32  ;;  %v15645_v26 = vld [vmem:[%s18029_s8 + $0x3e0] sm:$0xff]  ;;  %v15650_v29 = vld [vmem:[%s18029_s8 + $0x3e8] sm:$0xff] }
 0x176   :  { %18386 = vst [vmem:[#allocation129_spill] sm:$0xff] %v15645_v26  ;;  %18387 = vst [vmem:[#allocation130_spill] sm:$0xff] %v15650_v29  ;;  %v15655_v30 = vld [vmem:[%s18029_s8 + $0x3f0] sm:$0xff]  ;;  %v15660_v31 = vld [vmem:[%s18029_s8 + $0x3f8] sm:$0xff] }
 0x177   :  { %18388 = vst [vmem:[#allocation131_spill] sm:$0xff] %v15655_v30  ;;  %18389 = vst [vmem:[#allocation132_spill] sm:$0xff] %v15660_v31  ;;  %v15665_v32 = vld [vmem:[%s18029_s8 + $0x400] sm:$0xff]  ;;  %v15670_v26 = vld [vmem:[%s18029_s8 + $0x408] sm:$0xff] }
 0x178   :  { %18390 = vst [vmem:[#allocation133_spill] sm:$0xff] %v15665_v32  ;;  %18391 = vst [vmem:[#allocation134_spill] sm:$0xff] %v15670_v26  ;;  %v15675_v29 = vld [vmem:[%s18029_s8 + $0x410] sm:$0xff]  ;;  %v15680_v30 = vld [vmem:[%s18029_s8 + $0x418] sm:$0xff] }
 0x179   :  { %18392 = vst [vmem:[#allocation135_spill] sm:$0xff] %v15675_v29  ;;  %18393 = vst [vmem:[#allocation136_spill] sm:$0xff] %v15680_v30  ;;  %v15685_v31 = vld [vmem:[%s18029_s8 + $0x420] sm:$0xff]  ;;  %v15690_v32 = vld [vmem:[%s18029_s8 + $0x428] sm:$0xff] }
 0x17a   :  { %18394 = vst [vmem:[#allocation137_spill] sm:$0xff] %v15685_v31  ;;  %18395 = vst [vmem:[#allocation138_spill] sm:$0xff] %v15690_v32  ;;  %v15695_v26 = vld [vmem:[%s18029_s8 + $0x430] sm:$0xff]  ;;  %v15700_v29 = vld [vmem:[%s18029_s8 + $0x438] sm:$0xff] }
 0x17b   :  { %18396 = vst [vmem:[#allocation139_spill] sm:$0xff] %v15695_v26  ;;  %18397 = vst [vmem:[#allocation140_spill] sm:$0xff] %v15700_v29  ;;  %v15705_v30 = vld [vmem:[%s18029_s8 + $0x440] sm:$0xff]  ;;  %v15710_v31 = vld [vmem:[%s18029_s8 + $0x448] sm:$0xff] }
 0x17c   :  { %18398 = vst [vmem:[#allocation141_spill] sm:$0xff] %v15705_v30  ;;  %18399 = vst [vmem:[#allocation142_spill] sm:$0xff] %v15710_v31  ;;  %v15715_v32 = vld [vmem:[%s18029_s8 + $0x450] sm:$0xff]  ;;  %v15720_v26 = vld [vmem:[%s18029_s8 + $0x458] sm:$0xff] }
 0x17d   :  { %18400 = vst [vmem:[#allocation143_spill] sm:$0xff] %v15715_v32  ;;  %18401 = vst [vmem:[#allocation144_spill] sm:$0xff] %v15720_v26  ;;  %v15725_v29 = vld [vmem:[%s18029_s8 + $0x460] sm:$0xff]  ;;  %v15730_v30 = vld [vmem:[%s18029_s8 + $0x468] sm:$0xff] }
 0x17e   :  { %18402 = vst [vmem:[#allocation145_spill] sm:$0xff] %v15725_v29  ;;  %18403 = vst [vmem:[#allocation146_spill] sm:$0xff] %v15730_v30  ;;  %v15735_v31 = vld [vmem:[%s18029_s8 + $0x470] sm:$0xff]  ;;  %v15740_v32 = vld [vmem:[%s18029_s8 + $0x478] sm:$0xff] }
 0x17f   :  { %18404 = vst [vmem:[#allocation147_spill] sm:$0xff] %v15735_v31  ;;  %18405 = vst [vmem:[#allocation148_spill] sm:$0xff] %v15740_v32  ;;  %v15745_v26 = vld [vmem:[%s18029_s8 + $0x480] sm:$0xff]  ;;  %v15750_v29 = vld [vmem:[%s18029_s8 + $0x488] sm:$0xff] }
 0x180   :  { %18406 = vst [vmem:[#allocation149_spill] sm:$0xff] %v15745_v26  ;;  %18407 = vst [vmem:[#allocation150_spill] sm:$0xff] %v15750_v29  ;;  %v15755_v30 = vld [vmem:[%s18029_s8 + $0x490] sm:$0xff]  ;;  %v15760_v31 = vld [vmem:[%s18029_s8 + $0x498] sm:$0xff] }
 0x181   :  { %18408 = vst [vmem:[#allocation151_spill] sm:$0xff] %v15755_v30  ;;  %18409 = vst [vmem:[#allocation152_spill] sm:$0xff] %v15760_v31  ;;  %v15765_v32 = vld [vmem:[%s18029_s8 + $0x4a0] sm:$0xff]  ;;  %v15770_v26 = vld [vmem:[%s18029_s8 + $0x4a8] sm:$0xff] }
 0x182   :  { %18410 = vst [vmem:[#allocation153_spill] sm:$0xff] %v15765_v32  ;;  %18411 = vst [vmem:[#allocation154_spill] sm:$0xff] %v15770_v26  ;;  %v15775_v29 = vld [vmem:[%s18029_s8 + $0x4b0] sm:$0xff]  ;;  %v15780_v30 = vld [vmem:[%s18029_s8 + $0x4b8] sm:$0xff] }
 0x183   :  { %18412 = vst [vmem:[#allocation155_spill] sm:$0xff] %v15775_v29  ;;  %18413 = vst [vmem:[#allocation156_spill] sm:$0xff] %v15780_v30  ;;  %v15785_v31 = vld [vmem:[%s18029_s8 + $0x4c0] sm:$0xff]  ;;  %v15790_v32 = vld [vmem:[%s18029_s8 + $0x4c8] sm:$0xff] }
 0x184   :  { %18414 = vst [vmem:[#allocation157_spill] sm:$0xff] %v15785_v31  ;;  %18415 = vst [vmem:[#allocation158_spill] sm:$0xff] %v15790_v32  ;;  %v15795_v26 = vld [vmem:[%s18029_s8 + $0x4d0] sm:$0xff]  ;;  %v15800_v29 = vld [vmem:[%s18029_s8 + $0x4d8] sm:$0xff] }
 0x185   :  { %18416 = vst [vmem:[#allocation159_spill] sm:$0xff] %v15795_v26  ;;  %18417 = vst [vmem:[#allocation160_spill] sm:$0xff] %v15800_v29  ;;  %v15805_v30 = vld [vmem:[%s18029_s8 + $0x4e0] sm:$0xff]  ;;  %v15810_v31 = vld [vmem:[%s18029_s8 + $0x4e8] sm:$0xff] }
 0x186   :  { %18418 = vst [vmem:[#allocation161_spill] sm:$0xff] %v15805_v30  ;;  %18419 = vst [vmem:[#allocation162_spill] sm:$0xff] %v15810_v31  ;;  %v15815_v32 = vld [vmem:[%s18029_s8 + $0x4f0] sm:$0xff]  ;;  %v15820_v26 = vld [vmem:[%s18029_s8 + $0x4f8] sm:$0xff] }
 0x187   :  { %18420 = vst [vmem:[#allocation163_spill] sm:$0xff] %v15815_v32  ;;  %18421 = vst [vmem:[#allocation164_spill] sm:$0xff] %v15820_v26  ;;  %v15825_v29 = vld [vmem:[%s18029_s8 + $0x500] sm:$0xff]  ;;  %v15830_v30 = vld [vmem:[%s18029_s8 + $0x508] sm:$0xff] }
 0x188   :  { %18422 = vst [vmem:[#allocation165_spill] sm:$0xff] %v15825_v29  ;;  %18423 = vst [vmem:[#allocation166_spill] sm:$0xff] %v15830_v30  ;;  %v15835_v31 = vld [vmem:[%s18029_s8 + $0x510] sm:$0xff]  ;;  %v15840_v32 = vld [vmem:[%s18029_s8 + $0x518] sm:$0xff] }
 0x189   :  { %18424 = vst [vmem:[#allocation167_spill] sm:$0xff] %v15835_v31  ;;  %18425 = vst [vmem:[#allocation168_spill] sm:$0xff] %v15840_v32  ;;  %v15845_v26 = vld [vmem:[%s18029_s8 + $0x520] sm:$0xff]  ;;  %v15850_v29 = vld [vmem:[%s18029_s8 + $0x528] sm:$0xff] }
 0x18a   :  { %18426 = vst [vmem:[#allocation169_spill] sm:$0xff] %v15845_v26  ;;  %18427 = vst [vmem:[#allocation170_spill] sm:$0xff] %v15850_v29  ;;  %v15855_v30 = vld [vmem:[%s18029_s8 + $0x530] sm:$0xff]  ;;  %v15860_v31 = vld [vmem:[%s18029_s8 + $0x538] sm:$0xff] }
 0x18b   :  { %18428 = vst [vmem:[#allocation171_spill] sm:$0xff] %v15855_v30  ;;  %18429 = vst [vmem:[#allocation172_spill] sm:$0xff] %v15860_v31  ;;  %v15865_v32 = vld [vmem:[%s18029_s8 + $0x540] sm:$0xff]  ;;  %v15870_v26 = vld [vmem:[%s18029_s8 + $0x548] sm:$0xff] }
 0x18c   :  { %18430 = vst [vmem:[#allocation173_spill] sm:$0xff] %v15865_v32  ;;  %18431 = vst [vmem:[#allocation174_spill] sm:$0xff] %v15870_v26  ;;  %v15875_v29 = vld [vmem:[%s18029_s8 + $0x550] sm:$0xff]  ;;  %v15880_v30 = vld [vmem:[%s18029_s8 + $0x558] sm:$0xff] }
 0x18d   :  { %18432 = vst [vmem:[#allocation175_spill] sm:$0xff] %v15875_v29  ;;  %18433 = vst [vmem:[#allocation176_spill] sm:$0xff] %v15880_v30  ;;  %v15885_v31 = vld [vmem:[%s18029_s8 + $0x560] sm:$0xff]  ;;  %v15890_v32 = vld [vmem:[%s18029_s8 + $0x568] sm:$0xff] }
 0x18e   :  { %18434 = vst [vmem:[#allocation177_spill] sm:$0xff] %v15885_v31  ;;  %18435 = vst [vmem:[#allocation178_spill] sm:$0xff] %v15890_v32  ;;  %v15895_v26 = vld [vmem:[%s18029_s8 + $0x570] sm:$0xff]  ;;  %v15900_v29 = vld [vmem:[%s18029_s8 + $0x578] sm:$0xff] }
 0x18f   :  { %18436 = vst [vmem:[#allocation179_spill] sm:$0xff] %v15895_v26  ;;  %18437 = vst [vmem:[#allocation180_spill] sm:$0xff] %v15900_v29  ;;  %v15905_v30 = vld [vmem:[%s18029_s8 + $0x580] sm:$0xff]  ;;  %v15910_v31 = vld [vmem:[%s18029_s8 + $0x588] sm:$0xff] }
 0x190   :  { %18438 = vst [vmem:[#allocation181_spill] sm:$0xff] %v15905_v30  ;;  %18439 = vst [vmem:[#allocation182_spill] sm:$0xff] %v15910_v31  ;;  %v15915_v32 = vld [vmem:[%s18029_s8 + $0x590] sm:$0xff]  ;;  %v15920_v26 = vld [vmem:[%s18029_s8 + $0x598] sm:$0xff] }
 0x191   :  { %18440 = vst [vmem:[#allocation183_spill] sm:$0xff] %v15915_v32  ;;  %18441 = vst [vmem:[#allocation184_spill] sm:$0xff] %v15920_v26  ;;  %v15925_v29 = vld [vmem:[%s18029_s8 + $0x5a0] sm:$0xff]  ;;  %v15930_v30 = vld [vmem:[%s18029_s8 + $0x5a8] sm:$0xff] }
 0x192   :  { %18442 = vst [vmem:[#allocation185_spill] sm:$0xff] %v15925_v29  ;;  %18443 = vst [vmem:[#allocation186_spill] sm:$0xff] %v15930_v30  ;;  %v15935_v31 = vld [vmem:[%s18029_s8 + $0x5b0] sm:$0xff]  ;;  %v15940_v32 = vld [vmem:[%s18029_s8 + $0x5b8] sm:$0xff] }
 0x193   :  { %18444 = vst [vmem:[#allocation187_spill] sm:$0xff] %v15935_v31  ;;  %18445 = vst [vmem:[#allocation188_spill] sm:$0xff] %v15940_v32  ;;  %v15945_v26 = vld [vmem:[%s18029_s8 + $0x5c0] sm:$0xff]  ;;  %v15950_v29 = vld [vmem:[%s18029_s8 + $0x5c8] sm:$0xff] }
 0x194   :  { %18446 = vst [vmem:[#allocation189_spill] sm:$0xff] %v15945_v26  ;;  %18447 = vst [vmem:[#allocation190_spill] sm:$0xff] %v15950_v29  ;;  %v15955_v30 = vld [vmem:[%s18029_s8 + $0x5d0] sm:$0xff]  ;;  %v15960_v31 = vld [vmem:[%s18029_s8 + $0x5d8] sm:$0xff] }
 0x195   :  { %18448 = vst [vmem:[#allocation191_spill] sm:$0xff] %v15955_v30  ;;  %18449 = vst [vmem:[#allocation192_spill] sm:$0xff] %v15960_v31  ;;  %v15965_v32 = vld [vmem:[%s18029_s8 + $0x5e0] sm:$0xff]  ;;  %v15970_v26 = vld [vmem:[%s18029_s8 + $0x5e8] sm:$0xff] }
 0x196   :  { %18450 = vst [vmem:[#allocation193_spill] sm:$0xff] %v15965_v32  ;;  %18451 = vst [vmem:[#allocation194_spill] sm:$0xff] %v15970_v26  ;;  %v15975_v29 = vld [vmem:[%s18029_s8 + $0x5f0] sm:$0xff]  ;;  %v15980_v30 = vld [vmem:[%s18029_s8 + $0x5f8] sm:$0xff] }
 0x197   :  { %18452 = vst [vmem:[#allocation195_spill] sm:$0xff] %v15975_v29  ;;  %18453 = vst [vmem:[#allocation196_spill] sm:$0xff] %v15980_v30  ;;  %v15985_v31 = vld [vmem:[%s18029_s8 + $0x600] sm:$0xff]  ;;  %v15990_v32 = vld [vmem:[%s18029_s8 + $0x608] sm:$0xff] }
 0x198   :  { %18454 = vst [vmem:[#allocation197_spill] sm:$0xff] %v15985_v31  ;;  %18455 = vst [vmem:[#allocation198_spill] sm:$0xff] %v15990_v32  ;;  %v15995_v26 = vld [vmem:[%s18029_s8 + $0x610] sm:$0xff]  ;;  %v16000_v29 = vld [vmem:[%s18029_s8 + $0x618] sm:$0xff] }
 0x199   :  { %18456 = vst [vmem:[#allocation199_spill] sm:$0xff] %v15995_v26  ;;  %18457 = vst [vmem:[#allocation200_spill] sm:$0xff] %v16000_v29  ;;  %v16005_v30 = vld [vmem:[%s18029_s8 + $0x620] sm:$0xff]  ;;  %v16010_v31 = vld [vmem:[%s18029_s8 + $0x628] sm:$0xff] }
 0x19a   :  { %18458 = vst [vmem:[#allocation201_spill] sm:$0xff] %v16005_v30  ;;  %18459 = vst [vmem:[#allocation202_spill] sm:$0xff] %v16010_v31  ;;  %v16015_v32 = vld [vmem:[%s18029_s8 + $0x630] sm:$0xff]  ;;  %v16020_v26 = vld [vmem:[%s18029_s8 + $0x638] sm:$0xff] }
 0x19b   :  { %18460 = vst [vmem:[#allocation203_spill] sm:$0xff] %v16015_v32  ;;  %18461 = vst [vmem:[#allocation204_spill] sm:$0xff] %v16020_v26  ;;  %v16025_v29 = vld [vmem:[%s18029_s8 + $0x640] sm:$0xff]  ;;  %v16030_v30 = vld [vmem:[%s18029_s8 + $0x648] sm:$0xff] }
 0x19c   :  { %18462 = vst [vmem:[#allocation205_spill] sm:$0xff] %v16025_v29  ;;  %18463 = vst [vmem:[#allocation206_spill] sm:$0xff] %v16030_v30  ;;  %v16035_v31 = vld [vmem:[%s18029_s8 + $0x650] sm:$0xff]  ;;  %v16040_v32 = vld [vmem:[%s18029_s8 + $0x658] sm:$0xff] }
 0x19d   :  { %18464 = vst [vmem:[#allocation207_spill] sm:$0xff] %v16035_v31  ;;  %18465 = vst [vmem:[#allocation208_spill] sm:$0xff] %v16040_v32  ;;  %v16045_v26 = vld [vmem:[%s18029_s8 + $0x660] sm:$0xff]  ;;  %v16050_v29 = vld [vmem:[%s18029_s8 + $0x668] sm:$0xff] }
 0x19e   :  { %18466 = vst [vmem:[#allocation209_spill] sm:$0xff] %v16045_v26  ;;  %18467 = vst [vmem:[#allocation210_spill] sm:$0xff] %v16050_v29  ;;  %v16055_v30 = vld [vmem:[%s18029_s8 + $0x670] sm:$0xff]  ;;  %v16060_v31 = vld [vmem:[%s18029_s8 + $0x678] sm:$0xff] }
 0x19f   :  { %18468 = vst [vmem:[#allocation211_spill] sm:$0xff] %v16055_v30  ;;  %18469 = vst [vmem:[#allocation212_spill] sm:$0xff] %v16060_v31  ;;  %v16065_v32 = vld [vmem:[%s18029_s8 + $0x680] sm:$0xff]  ;;  %v16070_v26 = vld [vmem:[%s18029_s8 + $0x688] sm:$0xff] }
 0x1a0   :  { %18470 = vst [vmem:[#allocation213_spill] sm:$0xff] %v16065_v32  ;;  %18471 = vst [vmem:[#allocation214_spill] sm:$0xff] %v16070_v26  ;;  %v16075_v29 = vld [vmem:[%s18029_s8 + $0x690] sm:$0xff]  ;;  %v16080_v30 = vld [vmem:[%s18029_s8 + $0x698] sm:$0xff] }
 0x1a1   :  { %18472 = vst [vmem:[#allocation215_spill] sm:$0xff] %v16075_v29  ;;  %18473 = vst [vmem:[#allocation216_spill] sm:$0xff] %v16080_v30  ;;  %v16085_v31 = vld [vmem:[%s18029_s8 + $0x6a0] sm:$0xff]  ;;  %v16090_v32 = vld [vmem:[%s18029_s8 + $0x6a8] sm:$0xff] }
 0x1a2   :  { %18474 = vst [vmem:[#allocation217_spill] sm:$0xff] %v16085_v31  ;;  %18475 = vst [vmem:[#allocation218_spill] sm:$0xff] %v16090_v32  ;;  %v16095_v26 = vld [vmem:[%s18029_s8 + $0x6b0] sm:$0xff]  ;;  %v16100_v29 = vld [vmem:[%s18029_s8 + $0x6b8] sm:$0xff] }
 0x1a3   :  { %18476 = vst [vmem:[#allocation219_spill] sm:$0xff] %v16095_v26  ;;  %18477 = vst [vmem:[#allocation220_spill] sm:$0xff] %v16100_v29  ;;  %v16105_v30 = vld [vmem:[%s18029_s8 + $0x6c0] sm:$0xff]  ;;  %v16110_v31 = vld [vmem:[%s18029_s8 + $0x6c8] sm:$0xff] }
 0x1a4   :  { %18478 = vst [vmem:[#allocation221_spill] sm:$0xff] %v16105_v30  ;;  %18479 = vst [vmem:[#allocation222_spill] sm:$0xff] %v16110_v31  ;;  %v16115_v32 = vld [vmem:[%s18029_s8 + $0x6d0] sm:$0xff]  ;;  %v16120_v26 = vld [vmem:[%s18029_s8 + $0x6d8] sm:$0xff] }
 0x1a5   :  { %18480 = vst [vmem:[#allocation223_spill] sm:$0xff] %v16115_v32  ;;  %18481 = vst [vmem:[#allocation224_spill] sm:$0xff] %v16120_v26  ;;  %v16125_v29 = vld [vmem:[%s18029_s8 + $0x6e0] sm:$0xff]  ;;  %v16130_v30 = vld [vmem:[%s18029_s8 + $0x6e8] sm:$0xff] }
 0x1a6   :  { %18482 = vst [vmem:[#allocation225_spill] sm:$0xff] %v16125_v29  ;;  %18483 = vst [vmem:[#allocation226_spill] sm:$0xff] %v16130_v30  ;;  %v16135_v31 = vld [vmem:[%s18029_s8 + $0x6f0] sm:$0xff]  ;;  %v16140_v32 = vld [vmem:[%s18029_s8 + $0x6f8] sm:$0xff] }
 0x1a7   :  { %18484 = vst [vmem:[#allocation227_spill] sm:$0xff] %v16135_v31  ;;  %18485 = vst [vmem:[#allocation228_spill] sm:$0xff] %v16140_v32  ;;  %v16145_v26 = vld [vmem:[%s18029_s8 + $0x700] sm:$0xff]  ;;  %v16150_v29 = vld [vmem:[%s18029_s8 + $0x708] sm:$0xff] }
 0x1a8   :  { %18486 = vst [vmem:[#allocation229_spill] sm:$0xff] %v16145_v26  ;;  %18487 = vst [vmem:[#allocation230_spill] sm:$0xff] %v16150_v29  ;;  %v16155_v30 = vld [vmem:[%s18029_s8 + $0x710] sm:$0xff]  ;;  %v16160_v31 = vld [vmem:[%s18029_s8 + $0x718] sm:$0xff] }
 0x1a9   :  { %18488 = vst [vmem:[#allocation231_spill] sm:$0xff] %v16155_v30  ;;  %18489 = vst [vmem:[#allocation232_spill] sm:$0xff] %v16160_v31  ;;  %v16165_v32 = vld [vmem:[%s18029_s8 + $0x720] sm:$0xff]  ;;  %v16170_v26 = vld [vmem:[%s18029_s8 + $0x728] sm:$0xff] }
 0x1aa   :  { %18490 = vst [vmem:[#allocation233_spill] sm:$0xff] %v16165_v32  ;;  %18491 = vst [vmem:[#allocation234_spill] sm:$0xff] %v16170_v26  ;;  %v16175_v29 = vld [vmem:[%s18029_s8 + $0x730] sm:$0xff]  ;;  %v16180_v30 = vld [vmem:[%s18029_s8 + $0x738] sm:$0xff] }
 0x1ab   :  { %18492 = vst [vmem:[#allocation235_spill] sm:$0xff] %v16175_v29  ;;  %18493 = vst [vmem:[#allocation236_spill] sm:$0xff] %v16180_v30  ;;  %v16185_v31 = vld [vmem:[%s18029_s8 + $0x740] sm:$0xff]  ;;  %v16190_v32 = vld [vmem:[%s18029_s8 + $0x748] sm:$0xff] }
 0x1ac   :  { %18494 = vst [vmem:[#allocation237_spill] sm:$0xff] %v16185_v31  ;;  %18495 = vst [vmem:[#allocation238_spill] sm:$0xff] %v16190_v32  ;;  %v16195_v26 = vld [vmem:[%s18029_s8 + $0x750] sm:$0xff]  ;;  %v16200_v29 = vld [vmem:[%s18029_s8 + $0x758] sm:$0xff] }
 0x1ad   :  { %18496 = vst [vmem:[#allocation239_spill] sm:$0xff] %v16195_v26  ;;  %18497 = vst [vmem:[#allocation240_spill] sm:$0xff] %v16200_v29  ;;  %v16205_v30 = vld [vmem:[%s18029_s8 + $0x760] sm:$0xff]  ;;  %v16210_v31 = vld [vmem:[%s18029_s8 + $0x768] sm:$0xff] }
 0x1ae   :  { %18498 = vst [vmem:[#allocation241_spill] sm:$0xff] %v16205_v30  ;;  %18499 = vst [vmem:[#allocation242_spill] sm:$0xff] %v16210_v31  ;;  %v16215_v32 = vld [vmem:[%s18029_s8 + $0x770] sm:$0xff]  ;;  %v16220_v26 = vld [vmem:[%s18029_s8 + $0x778] sm:$0xff] }
 0x1af   :  { %18500 = vst [vmem:[#allocation243_spill] sm:$0xff] %v16215_v32  ;;  %18501 = vst [vmem:[#allocation244_spill] sm:$0xff] %v16220_v26  ;;  %v16225_v29 = vld [vmem:[%s18029_s8 + $0x780] sm:$0xff]  ;;  %v16230_v30 = vld [vmem:[%s18029_s8 + $0x788] sm:$0xff] }
 0x1b0   :  { %18502 = vst [vmem:[#allocation245_spill] sm:$0xff] %v16225_v29  ;;  %18503 = vst [vmem:[#allocation246_spill] sm:$0xff] %v16230_v30  ;;  %v16235_v31 = vld [vmem:[%s18029_s8 + $0x790] sm:$0xff]  ;;  %v16240_v32 = vld [vmem:[%s18029_s8 + $0x798] sm:$0xff] }
 0x1b1   :  { %18504 = vst [vmem:[#allocation247_spill] sm:$0xff] %v16235_v31  ;;  %18505 = vst [vmem:[#allocation248_spill] sm:$0xff] %v16240_v32  ;;  %v16245_v26 = vld [vmem:[%s18029_s8 + $0x7a0] sm:$0xff]  ;;  %v16250_v29 = vld [vmem:[%s18029_s8 + $0x7a8] sm:$0xff] }
 0x1b2   :  { %18506 = vst [vmem:[#allocation249_spill] sm:$0xff] %v16245_v26  ;;  %18507 = vst [vmem:[#allocation250_spill] sm:$0xff] %v16250_v29  ;;  %v16255_v30 = vld [vmem:[%s18029_s8 + $0x7b0] sm:$0xff]  ;;  %v16260_v31 = vld [vmem:[%s18029_s8 + $0x7b8] sm:$0xff] }
 0x1b3   :  { %18508 = vst [vmem:[#allocation251_spill] sm:$0xff] %v16255_v30  ;;  %18509 = vst [vmem:[#allocation252_spill] sm:$0xff] %v16260_v31  ;;  %v16265_v32 = vld [vmem:[%s18029_s8 + $0x7c0] sm:$0xff]  ;;  %v16270_v26 = vld [vmem:[%s18029_s8 + $0x7c8] sm:$0xff] }
 0x1b4   :  { %18510 = vst [vmem:[#allocation253_spill] sm:$0xff] %v16265_v32  ;;  %18511 = vst [vmem:[#allocation254_spill] sm:$0xff] %v16270_v26 }
 0x1b5   :  { %4748 = vsyncadd [#allocation6 + $0x1], 32000  ;;  %v4782_v29 = vld [vmem:[%s18030_s9] sm:$0xff]  ;;  %v4784_v30 = vld [vmem:[%s18030_s9 + $0x8] sm:$0xff] }
 0x1b6   :  { %4783 = vst [vmem:[#allocation4] sm:$0xff] %v4782_v29  ;;  %4785 = vst [vmem:[#allocation4 + $0x8] sm:$0xff] %v4784_v30  ;;  %v4786_v32 = vld [vmem:[%s18030_s9 + $0x10] sm:$0xff]  ;;  %v4788_v31 = vld [vmem:[%s18030_s9 + $0x18] sm:$0xff] }
 0x1b7   :  { %v4790_v26 = vld [vmem:[%s18030_s9 + $0x20] sm:$0xff]  ;;  %4787 = vst [vmem:[#allocation4 + $0x10] sm:$0xff] %v4786_v32  ;;  %4789 = vst [vmem:[#allocation4 + $0x18] sm:$0xff] %v4788_v31  ;;  %v4792_v29 = vld [vmem:[%s18030_s9 + $0x28] sm:$0xff] }
 0x1b8   :  { %4791 = vst [vmem:[#allocation4 + $0x20] sm:$0xff] %v4790_v26  ;;  %v4794_v30 = vld [vmem:[%s18030_s9 + $0x30] sm:$0xff]  ;;  %v4796_v28 = vld [vmem:[%s18030_s9 + $0x38] sm:$0xff]  ;;  %4793 = vst [vmem:[#allocation4 + $0x28] sm:$0xff] %v4792_v29 }
 0x1b9   :  { %4795 = vst [vmem:[#allocation4 + $0x30] sm:$0xff] %v4794_v30  ;;  %4797 = vst [vmem:[#allocation4 + $0x38] sm:$0xff] %v4796_v28  ;;  %v4798_v31 = vld [vmem:[%s18030_s9 + $0x40] sm:$0xff]  ;;  %v4800_v26 = vld [vmem:[%s18030_s9 + $0x48] sm:$0xff] }
 0x1ba   :  { %v4802_v32 = vld [vmem:[%s18030_s9 + $0x50] sm:$0xff]  ;;  %4799 = vst [vmem:[#allocation4 + $0x40] sm:$0xff] %v4798_v31  ;;  %4801 = vst [vmem:[#allocation4 + $0x48] sm:$0xff] %v4800_v26  ;;  %v4804_v29 = vld [vmem:[%s18030_s9 + $0x58] sm:$0xff] }
 0x1bb   :  { %4803 = vst [vmem:[#allocation4 + $0x50] sm:$0xff] %v4802_v32  ;;  %v4806_v28 = vld [vmem:[%s18030_s9 + $0x60] sm:$0xff]  ;;  %v4808_v30 = vld [vmem:[%s18030_s9 + $0x68] sm:$0xff]  ;;  %4805 = vst [vmem:[#allocation4 + $0x58] sm:$0xff] %v4804_v29 }
 0x1bc   :  { %4807 = vst [vmem:[#allocation4 + $0x60] sm:$0xff] %v4806_v28  ;;  %4809 = vst [vmem:[#allocation4 + $0x68] sm:$0xff] %v4808_v30  ;;  %v4810_v31 = vld [vmem:[%s18030_s9 + $0x70] sm:$0xff]  ;;  %v4812_v26 = vld [vmem:[%s18030_s9 + $0x78] sm:$0xff] }
 0x1bd   :  { %v4814_v32 = vld [vmem:[%s18030_s9 + $0x80] sm:$0xff]  ;;  %4811 = vst [vmem:[#allocation4 + $0x70] sm:$0xff] %v4810_v31  ;;  %4813 = vst [vmem:[#allocation4 + $0x78] sm:$0xff] %v4812_v26  ;;  %v4816_v29 = vld [vmem:[%s18030_s9 + $0x88] sm:$0xff] }
 0x1be   :  { %4815 = vst [vmem:[#allocation4 + $0x80] sm:$0xff] %v4814_v32  ;;  %v4818_v28 = vld [vmem:[%s18030_s9 + $0x90] sm:$0xff]  ;;  %v4820_v30 = vld [vmem:[%s18030_s9 + $0x98] sm:$0xff]  ;;  %4817 = vst [vmem:[#allocation4 + $0x88] sm:$0xff] %v4816_v29 }
 0x1bf   :  { %4819 = vst [vmem:[#allocation4 + $0x90] sm:$0xff] %v4818_v28  ;;  %4821 = vst [vmem:[#allocation4 + $0x98] sm:$0xff] %v4820_v30  ;;  %v4822_v31 = vld [vmem:[%s18030_s9 + $0xa0] sm:$0xff]  ;;  %v4824_v26 = vld [vmem:[%s18030_s9 + $0xa8] sm:$0xff] }
 0x1c0   :  { %v4826_v32 = vld [vmem:[%s18030_s9 + $0xb0] sm:$0xff]  ;;  %4823 = vst [vmem:[#allocation4 + $0xa0] sm:$0xff] %v4822_v31  ;;  %4825 = vst [vmem:[#allocation4 + $0xa8] sm:$0xff] %v4824_v26  ;;  %v4828_v29 = vld [vmem:[%s18030_s9 + $0xb8] sm:$0xff] }
 0x1c1   :  { %4827 = vst [vmem:[#allocation4 + $0xb0] sm:$0xff] %v4826_v32  ;;  %v4830_v28 = vld [vmem:[%s18030_s9 + $0xc0] sm:$0xff]  ;;  %v4832_v30 = vld [vmem:[%s18030_s9 + $0xc8] sm:$0xff]  ;;  %4829 = vst [vmem:[#allocation4 + $0xb8] sm:$0xff] %v4828_v29 }
 0x1c2   :  { %4831 = vst [vmem:[#allocation4 + $0xc0] sm:$0xff] %v4830_v28  ;;  %4833 = vst [vmem:[#allocation4 + $0xc8] sm:$0xff] %v4832_v30  ;;  %v4834_v31 = vld [vmem:[%s18030_s9 + $0xd0] sm:$0xff]  ;;  %v4836_v26 = vld [vmem:[%s18030_s9 + $0xd8] sm:$0xff] }
 0x1c3   :  { %v4838_v32 = vld [vmem:[%s18030_s9 + $0xe0] sm:$0xff]  ;;  %4835 = vst [vmem:[#allocation4 + $0xd0] sm:$0xff] %v4834_v31  ;;  %4837 = vst [vmem:[#allocation4 + $0xd8] sm:$0xff] %v4836_v26  ;;  %v4840_v29 = vld [vmem:[%s18030_s9 + $0xe8] sm:$0xff] }
 0x1c4   :  { %4839 = vst [vmem:[#allocation4 + $0xe0] sm:$0xff] %v4838_v32  ;;  %v4842_v28 = vld [vmem:[%s18030_s9 + $0xf0] sm:$0xff]  ;;  %v4844_v30 = vld [vmem:[%s18030_s9 + $0xf8] sm:$0xff]  ;;  %4841 = vst [vmem:[#allocation4 + $0xe8] sm:$0xff] %v4840_v29 }
 0x1c5   :  { %4843 = vst [vmem:[#allocation4 + $0xf0] sm:$0xff] %v4842_v28  ;;  %4845 = vst [vmem:[#allocation4 + $0xf8] sm:$0xff] %v4844_v30  ;;  %v4846_v31 = vld [vmem:[%s18030_s9 + $0x100] sm:$0xff]  ;;  %v4848_v26 = vld [vmem:[%s18030_s9 + $0x108] sm:$0xff] }
 0x1c6   :  { %v4850_v32 = vld [vmem:[%s18030_s9 + $0x110] sm:$0xff]  ;;  %4847 = vst [vmem:[#allocation4 + $0x100] sm:$0xff] %v4846_v31  ;;  %4849 = vst [vmem:[#allocation4 + $0x108] sm:$0xff] %v4848_v26  ;;  %v4852_v29 = vld [vmem:[%s18030_s9 + $0x118] sm:$0xff] }
 0x1c7   :  { %4851 = vst [vmem:[#allocation4 + $0x110] sm:$0xff] %v4850_v32  ;;  %v4854_v28 = vld [vmem:[%s18030_s9 + $0x120] sm:$0xff]  ;;  %v4856_v30 = vld [vmem:[%s18030_s9 + $0x128] sm:$0xff]  ;;  %4853 = vst [vmem:[#allocation4 + $0x118] sm:$0xff] %v4852_v29 }
 0x1c8   :  { %4855 = vst [vmem:[#allocation4 + $0x120] sm:$0xff] %v4854_v28  ;;  %4857 = vst [vmem:[#allocation4 + $0x128] sm:$0xff] %v4856_v30  ;;  %v4858_v31 = vld [vmem:[%s18030_s9 + $0x130] sm:$0xff]  ;;  %v4860_v26 = vld [vmem:[%s18030_s9 + $0x138] sm:$0xff] }
 0x1c9   :  { %v4862_v32 = vld [vmem:[%s18030_s9 + $0x140] sm:$0xff]  ;;  %4859 = vst [vmem:[#allocation4 + $0x130] sm:$0xff] %v4858_v31  ;;  %4861 = vst [vmem:[#allocation4 + $0x138] sm:$0xff] %v4860_v26  ;;  %v4864_v29 = vld [vmem:[%s18030_s9 + $0x148] sm:$0xff] }
 0x1ca   :  { %4863 = vst [vmem:[#allocation4 + $0x140] sm:$0xff] %v4862_v32  ;;  %v4866_v28 = vld [vmem:[%s18030_s9 + $0x150] sm:$0xff]  ;;  %v4868_v30 = vld [vmem:[%s18030_s9 + $0x158] sm:$0xff]  ;;  %4865 = vst [vmem:[#allocation4 + $0x148] sm:$0xff] %v4864_v29 }
 0x1cb   :  { %4867 = vst [vmem:[#allocation4 + $0x150] sm:$0xff] %v4866_v28  ;;  %4869 = vst [vmem:[#allocation4 + $0x158] sm:$0xff] %v4868_v30  ;;  %v4870_v31 = vld [vmem:[%s18030_s9 + $0x160] sm:$0xff]  ;;  %v4872_v26 = vld [vmem:[%s18030_s9 + $0x168] sm:$0xff] }
 0x1cc   :  { %v4874_v32 = vld [vmem:[%s18030_s9 + $0x170] sm:$0xff]  ;;  %4871 = vst [vmem:[#allocation4 + $0x160] sm:$0xff] %v4870_v31  ;;  %4873 = vst [vmem:[#allocation4 + $0x168] sm:$0xff] %v4872_v26  ;;  %v4876_v29 = vld [vmem:[%s18030_s9 + $0x178] sm:$0xff] }
 0x1cd   :  { %4875 = vst [vmem:[#allocation4 + $0x170] sm:$0xff] %v4874_v32  ;;  %v4878_v28 = vld [vmem:[%s18030_s9 + $0x180] sm:$0xff]  ;;  %v4880_v30 = vld [vmem:[%s18030_s9 + $0x188] sm:$0xff]  ;;  %4877 = vst [vmem:[#allocation4 + $0x178] sm:$0xff] %v4876_v29 }
 0x1ce   :  { %4879 = vst [vmem:[#allocation4 + $0x180] sm:$0xff] %v4878_v28  ;;  %4881 = vst [vmem:[#allocation4 + $0x188] sm:$0xff] %v4880_v30  ;;  %v4882_v31 = vld [vmem:[%s18030_s9 + $0x190] sm:$0xff]  ;;  %v4884_v26 = vld [vmem:[%s18030_s9 + $0x198] sm:$0xff] }
 0x1cf   :  { %v4886_v32 = vld [vmem:[%s18030_s9 + $0x1a0] sm:$0xff]  ;;  %4883 = vst [vmem:[#allocation4 + $0x190] sm:$0xff] %v4882_v31  ;;  %4885 = vst [vmem:[#allocation4 + $0x198] sm:$0xff] %v4884_v26  ;;  %v4888_v29 = vld [vmem:[%s18030_s9 + $0x1a8] sm:$0xff] }
 0x1d0   :  { %4887 = vst [vmem:[#allocation4 + $0x1a0] sm:$0xff] %v4886_v32  ;;  %v4890_v28 = vld [vmem:[%s18030_s9 + $0x1b0] sm:$0xff]  ;;  %v4892_v30 = vld [vmem:[%s18030_s9 + $0x1b8] sm:$0xff]  ;;  %4889 = vst [vmem:[#allocation4 + $0x1a8] sm:$0xff] %v4888_v29 }
 0x1d1   :  { %4891 = vst [vmem:[#allocation4 + $0x1b0] sm:$0xff] %v4890_v28  ;;  %4893 = vst [vmem:[#allocation4 + $0x1b8] sm:$0xff] %v4892_v30  ;;  %v4894_v31 = vld [vmem:[%s18030_s9 + $0x1c0] sm:$0xff]  ;;  %v4896_v26 = vld [vmem:[%s18030_s9 + $0x1c8] sm:$0xff] }
 0x1d2   :  { %v4898_v32 = vld [vmem:[%s18030_s9 + $0x1d0] sm:$0xff]  ;;  %4895 = vst [vmem:[#allocation4 + $0x1c0] sm:$0xff] %v4894_v31  ;;  %4897 = vst [vmem:[#allocation4 + $0x1c8] sm:$0xff] %v4896_v26  ;;  %v4900_v29 = vld [vmem:[%s18030_s9 + $0x1d8] sm:$0xff] }
 0x1d3   :  { %4899 = vst [vmem:[#allocation4 + $0x1d0] sm:$0xff] %v4898_v32  ;;  %v4902_v28 = vld [vmem:[%s18030_s9 + $0x1e0] sm:$0xff]  ;;  %v4904_v30 = vld [vmem:[%s18030_s9 + $0x1e8] sm:$0xff]  ;;  %4901 = vst [vmem:[#allocation4 + $0x1d8] sm:$0xff] %v4900_v29 }
 0x1d4   :  { %4903 = vst [vmem:[#allocation4 + $0x1e0] sm:$0xff] %v4902_v28  ;;  %4905 = vst [vmem:[#allocation4 + $0x1e8] sm:$0xff] %v4904_v30  ;;  %v4906_v31 = vld [vmem:[%s18030_s9 + $0x1f0] sm:$0xff]  ;;  %v4908_v26 = vld [vmem:[%s18030_s9 + $0x1f8] sm:$0xff] }
 0x1d5   :  { %v4910_v32 = vld [vmem:[%s18030_s9 + $0x200] sm:$0xff]  ;;  %4907 = vst [vmem:[#allocation4 + $0x1f0] sm:$0xff] %v4906_v31  ;;  %4909 = vst [vmem:[#allocation4 + $0x1f8] sm:$0xff] %v4908_v26  ;;  %v4912_v29 = vld [vmem:[%s18030_s9 + $0x208] sm:$0xff] }
 0x1d6   :  { %4911 = vst [vmem:[#allocation4 + $0x200] sm:$0xff] %v4910_v32  ;;  %v4914_v28 = vld [vmem:[%s18030_s9 + $0x210] sm:$0xff]  ;;  %v4916_v30 = vld [vmem:[%s18030_s9 + $0x218] sm:$0xff]  ;;  %4913 = vst [vmem:[#allocation4 + $0x208] sm:$0xff] %v4912_v29 }
 0x1d7   :  { %4915 = vst [vmem:[#allocation4 + $0x210] sm:$0xff] %v4914_v28  ;;  %4917 = vst [vmem:[#allocation4 + $0x218] sm:$0xff] %v4916_v30  ;;  %v4918_v31 = vld [vmem:[%s18030_s9 + $0x220] sm:$0xff]  ;;  %v4920_v26 = vld [vmem:[%s18030_s9 + $0x228] sm:$0xff] }
 0x1d8   :  { %v4922_v32 = vld [vmem:[%s18030_s9 + $0x230] sm:$0xff]  ;;  %4919 = vst [vmem:[#allocation4 + $0x220] sm:$0xff] %v4918_v31  ;;  %4921 = vst [vmem:[#allocation4 + $0x228] sm:$0xff] %v4920_v26  ;;  %v4924_v29 = vld [vmem:[%s18030_s9 + $0x238] sm:$0xff] }
 0x1d9   :  { %4923 = vst [vmem:[#allocation4 + $0x230] sm:$0xff] %v4922_v32  ;;  %v4926_v28 = vld [vmem:[%s18030_s9 + $0x240] sm:$0xff]  ;;  %v4928_v30 = vld [vmem:[%s18030_s9 + $0x248] sm:$0xff]  ;;  %4925 = vst [vmem:[#allocation4 + $0x238] sm:$0xff] %v4924_v29 }
 0x1da   :  { %4927 = vst [vmem:[#allocation4 + $0x240] sm:$0xff] %v4926_v28  ;;  %4929 = vst [vmem:[#allocation4 + $0x248] sm:$0xff] %v4928_v30  ;;  %v4930_v31 = vld [vmem:[%s18030_s9 + $0x250] sm:$0xff]  ;;  %v4932_v26 = vld [vmem:[%s18030_s9 + $0x258] sm:$0xff] }
 0x1db   :  { %v4934_v32 = vld [vmem:[%s18030_s9 + $0x260] sm:$0xff]  ;;  %4931 = vst [vmem:[#allocation4 + $0x250] sm:$0xff] %v4930_v31  ;;  %4933 = vst [vmem:[#allocation4 + $0x258] sm:$0xff] %v4932_v26  ;;  %v4936_v29 = vld [vmem:[%s18030_s9 + $0x268] sm:$0xff] }
 0x1dc   :  { %4935 = vst [vmem:[#allocation4 + $0x260] sm:$0xff] %v4934_v32  ;;  %v4938_v28 = vld [vmem:[%s18030_s9 + $0x270] sm:$0xff]  ;;  %v4940_v30 = vld [vmem:[%s18030_s9 + $0x278] sm:$0xff]  ;;  %4937 = vst [vmem:[#allocation4 + $0x268] sm:$0xff] %v4936_v29 }
 0x1dd   :  { %4939 = vst [vmem:[#allocation4 + $0x270] sm:$0xff] %v4938_v28  ;;  %4941 = vst [vmem:[#allocation4 + $0x278] sm:$0xff] %v4940_v30  ;;  %v4942_v31 = vld [vmem:[%s18030_s9 + $0x280] sm:$0xff]  ;;  %v4944_v26 = vld [vmem:[%s18030_s9 + $0x288] sm:$0xff] }
 0x1de   :  { %v4946_v32 = vld [vmem:[%s18030_s9 + $0x290] sm:$0xff]  ;;  %4943 = vst [vmem:[#allocation4 + $0x280] sm:$0xff] %v4942_v31  ;;  %4945 = vst [vmem:[#allocation4 + $0x288] sm:$0xff] %v4944_v26  ;;  %v4948_v29 = vld [vmem:[%s18030_s9 + $0x298] sm:$0xff] }
 0x1df   :  { %4947 = vst [vmem:[#allocation4 + $0x290] sm:$0xff] %v4946_v32  ;;  %v4950_v28 = vld [vmem:[%s18030_s9 + $0x2a0] sm:$0xff]  ;;  %v4952_v30 = vld [vmem:[%s18030_s9 + $0x2a8] sm:$0xff]  ;;  %4949 = vst [vmem:[#allocation4 + $0x298] sm:$0xff] %v4948_v29 }
 0x1e0   :  { %4951 = vst [vmem:[#allocation4 + $0x2a0] sm:$0xff] %v4950_v28  ;;  %4953 = vst [vmem:[#allocation4 + $0x2a8] sm:$0xff] %v4952_v30  ;;  %v4954_v31 = vld [vmem:[%s18030_s9 + $0x2b0] sm:$0xff]  ;;  %v4956_v26 = vld [vmem:[%s18030_s9 + $0x2b8] sm:$0xff] }
 0x1e1   :  { %v4958_v32 = vld [vmem:[%s18030_s9 + $0x2c0] sm:$0xff]  ;;  %4955 = vst [vmem:[#allocation4 + $0x2b0] sm:$0xff] %v4954_v31  ;;  %4957 = vst [vmem:[#allocation4 + $0x2b8] sm:$0xff] %v4956_v26  ;;  %v4960_v29 = vld [vmem:[%s18030_s9 + $0x2c8] sm:$0xff] }
 0x1e2   :  { %4959 = vst [vmem:[#allocation4 + $0x2c0] sm:$0xff] %v4958_v32  ;;  %v4962_v28 = vld [vmem:[%s18030_s9 + $0x2d0] sm:$0xff]  ;;  %4961 = vst [vmem:[#allocation4 + $0x2c8] sm:$0xff] %v4960_v29  ;;  %v4972_v30 = vld [vmem:[%s18021_s0] sm:$0xff] }
 0x1e3   :  { %4963 = vst [vmem:[#allocation4 + $0x2d0] sm:$0xff] %v4962_v28 }
 0x1e4   :  { %4971 = vsyncadd [#allocation6 + $0x2], 11648  ;;  %v13506_v25 = vmov 0   ;;  %v4988_v31 = vld [vmem:[%s18022_s1] sm:$0xff]  ;;  %v4989_v26 = vld [vmem:[%s18022_s1 + $0x8] sm:$0xff]  ;;  %vm4995_vm0 = vcmask 457728  }
 0x1e5   :  { %13391 = vset.pattern.permute.xlu0 %v13506_v25  ;;  %v4990_v32 = vld [vmem:[%s18022_s1 + $0x10] sm:$0xff]  ;;  %v13015_v29 = vpack.c.bf16 %v4989_v26, %v4988_v31  ;;  %v4991_v28 = vld [vmem:[%s18022_s1 + $0x18] sm:$0xff]  ;;  %v4973_v25 = vld [vmem:[%s18021_s0 + $0x8] sm:$0xff]  ;;  %v4974_v26 = vlaneseq  ;;  %vm5112_vm6 = vcmask 130048   ;;  %s13509_s15 = smov 64   ;;  %s13510_s16 = smov 32  }
 0x1e6   :  { %4977 = vperm.xlu0 %13391, %v4972_v30   ;;  %v13019_v27 = vpack.c.bf16 %v4991_v28, %v4990_v32  ;;  %v4992_v22 = vld [vmem:[%s18022_s1 + $0x20] sm:$0xff]  ;;  %v4993_v24 = vld [vmem:[%s18022_s1 + $0x28] sm:$0xff]  ;;  %v4994_v31 = vld [vmem:[%s18022_s1 + $0x30] sm:$0xff]  ;;  %s13512_s8 = smov 88   ;;  %s13513_s19 = smov 80  }
 0x1e7   :  { %13016 = vmatprep.subr.bf16.mxu0 %v13015_v29  ;;  %v13023_v30 = vpack.c.bf16 %v4993_v24, %v4992_v22  ;;  %v16572_v32 = vand.u32 127, %v4974_v26  ;;  %s13514_s20 = smov 120   ;;  %s13515_s21 = smov 72  }
 0x1e8   :  { %13018 = vmatpush3.bf16.msra.mxu0 %v13015_v29  ;;  %v18231_v29 = vmov 0.0   ;;  %s13516_s7 = smov 112   ;;  %s13517_s22 = smov 104  }
 0x1e9   :  { %13020 = vmatprep.subr.bf16.mxu0 %v13019_v27  ;;  %s13518_s9 = smov 56   ;;  %s13519_s23 = smov 40  }
 0x1ea   :  { %4980 = vperm.xlu0 %13391, %v4973_v25   ;;  %s13520_s24 = smov 48  }
 0x1ec   :  { %13022 = vmatpush3.bf16.msra.mxu0 %v13019_v27  ;;  %v5194_v27 = vld [vmem:[%s18023_s2] sm:$0xff] }
 0x1ed   :  { %13024 = vmatprep.subr.bf16.mxu0 %v13023_v30 }
 0x1f0   :  { %13026 = vmatpush3.bf16.msra.mxu0 %v13023_v30  ;;  %v5195_v30 = vld [vmem:[%s18023_s2 + $0x8] sm:$0xff] }
 0x1f1   :  { %12755 = vmatprep.subr.mxu0 %v4994_v31 }
 0x1f4   :  { %12756 = vmatpush3.msra.mxu0 %v4994_v31  ;;  %v13031_v31 = vpack.c.bf16 %v5195_v30, %v5194_v27 }
 0x1f6   :  { %13032 = vmatprep.subr.bf16.mxu1 %v13031_v31 }
 0x1f7   :  { %13034 = vmatpush3.bf16.msra.mxu1 %v13031_v31 }
 0x265   :  { %v4978_v28 = vpop.permute.xlu0 %4977 }
 0x266   :  { %vm4982_vm1 = vcmp.eq.s32.totalorder %v16572_v32, %v4978_v28  ;;  %v16584_v28 = vshrl.u32 %v4974_v26, 7 }
 0x267   :  { %v12198_v25 = vsel %vm4982_vm1, 1.0, %v18231_v29 }
 0x268   :  { %12757 = vmatprep.mubr.msk.f32.mxu0 %vm4995_vm0, %v12198_v25  ;;  %v5094_v25 = vadd.s32 4294967294, %v16584_v28  ;;  %v5643_v30 = vadd.s32 1, %v16584_v28  ;;  %vm5469_vm10 = vcmp.eq.s32.totalorder %v16572_v32, %v16584_v28 }
 0x269   :  { %v4981_v22 = vpop.permute.xlu0 %4980 }
 0x26a   :  { %vm4983_vm2 = vcmp.eq.s32.totalorder %v16572_v32, %v4981_v22  ;;  %vm5096_vm3 = vcmp.ge.s32.totalorder %v5094_v25, 0  ;;  %vm5104_vm4 = vcmp.eq.s32.totalorder %v16572_v32, %v5094_v25  ;;  %vm5647_vm11 = vcmp.lt.s32.totalorder %v5643_v30, 8 }
 0x26b   :  { %v12199_v24 = vsel %vm4983_vm2, 1.0, %v18231_v29  ;;  %vm5106_vm5 = vmand %vm5104_vm4, %vm5096_vm3  ;;  %vm5653_vm12 = vcmp.eq.s32.totalorder %v16572_v32, %v5643_v30 }
 0x26c   :  { %12758 = vmatmul.mubr.msk.f32.vlgmr.msra.gmra.mrb[0].mxu0 %vm4995_vm0, %v12199_v24  ;;  %v12204_v22 = vsel %vm5106_vm5, 1.0, %v18231_v29  ;;  %v5079_v24 = vadd.s32 8, %v16584_v28  ;;  %vm5655_vm14 = vmand %vm5653_vm12, %vm5647_vm11 }
 0x26d   :  { %12764 = vmatprep.mubr.msk.f32.mxu0 %vm5112_vm6, %v12204_v22 }
 0x26e   :  { %v12202_v21 = vadd.s32 4294967288, %v5079_v24  ;;  %v5103_v27 = vadd.s32 4294967294, %v5079_v24  ;;  %v5652_v29 = vadd.s32 1, %v5079_v24  ;;  %vm5470_vm13 = vcmp.eq.s32.totalorder %v16572_v32, %v5079_v24 }
 0x26f   :  { %v5288_v20 = vadd.s32 4294967295, %v5079_v24 }
 0x270   :  { %v5095_v23 = vadd.s32 4294967294, %v12202_v21  ;;  %vm5105_vm8 = vcmp.eq.s32.totalorder %v16572_v32, %v5103_v27  ;;  %v5644_v25 = vadd.s32 1, %v12202_v21  ;;  %vm5654_vm0 = vcmp.eq.s32.totalorder %v16572_v32, %v5652_v29 }
 0x271   :  { %v5827_v29 = vadd.s32 2, %v16584_v28 }
 0x272   :  { %vm5097_vm7 = vcmp.ge.s32.totalorder %v5095_v23, 0  ;;  %v18512_v23 = vmov 0.0   ;;  %vm5648_vm15 = vcmp.lt.s32.totalorder %v5644_v25, 8  ;;  %v5828_v25 = vadd.s32 2, %v12202_v21 }
 0x273   :  { %vm5107_vm9 = vmand %vm5105_vm8, %vm5097_vm7  ;;  %v12216_v27 = vsel %vm5469_vm10, 1.0, %v18512_v23  ;;  %v12222_v30 = vsel %vm5655_vm14, 1.0, %v18512_v23  ;;  %vm5831_vm2 = vcmp.lt.s32.totalorder %v5827_v29, 8  ;;  %vm5837_vm3 = vcmp.eq.s32.totalorder %v16572_v32, %v5827_v29  ;;  %v5378_v29 = vld [vmem:[%s18023_s2 + $0x10] sm:$0xff] }
 0x274   :  { %v12205_v22 = vsel %vm5107_vm9, 1.0, %v18512_v23  ;;  %vm5656_vm1 = vmand %vm5654_vm0, %vm5648_vm15  ;;  %vm5832_vm4 = vcmp.lt.s32.totalorder %v5828_v25, 8  ;;  %v5379_v25 = vld [vmem:[%s18023_s2 + $0x18] sm:$0xff]  ;;  %vm13511_vm15 = vmmov 0   ;;  %vm6138_vm0 = vcmask 64512  }
 0x275   :  { %vm5839_vm7 = vmand %vm5837_vm3, %vm5831_vm2  ;;  %vm8175_vm2 = vcmp.lt.s32.totalorder %v16572_v32, 96  ;;  %vm8171_vm3 = vcmp.lt.s32.totalorder %v16572_v32, 32 }
 0x33f   :  { %v12759_v26 = vpop.f32.mrb[0].mxu0 }
 0x340   :  { %v5068_v31 = vpop.f32.mrb[1].mxu0 }
 0x341   :  { %v13027_v18 = vpack.c.bf16 %v12759_v26, %v5068_v31  ;;  %v12217_v26 = vsel %vm5470_vm13, 1.0, %v18512_v23  ;;  %v12223_v31 = vsel %vm5656_vm1, 1.0, %v18512_v23  ;;  %vm5290_vm13 = vcmp.eq.s32.totalorder %v16572_v32, %v5288_v20 }
 0x342   :  { %vm8173_vm1 = vcmp.ge.s32.totalorder %v16572_v32, 64 }
 0x343   :  { %13028 = vmatprep.subr.bf16.mxu0 %v13027_v18  ;;  %13036 = vmatprep.subr.bf16.mxu1 %v13027_v18 }
 0x344   :  { %13030 = vmatpush3.bf16.msra.mxu0 %v13027_v18 }
 0x345   :  { %13044 = vmatprep.subr.bf16.mxu0 %v13027_v18 }
 0x347   :  { %12765 = vmatmul.mubr.msk.f32.vlgmr.msra.gmra.mrb[2].mxu0 %vm5112_vm6, %v12205_v22  ;;  %v5836_v22 = vadd.s32 2, %v5079_v24  ;;  %v13039_v24 = vpack.c.bf16 %v5379_v25, %v5378_v29 }
 0x348   :  { %13046 = vmatpush3.bf16.msra.mxu0 %v13027_v18  ;;  %12792 = vmatprep.mubr.msk.f32.mxu0 %vm5112_vm6, %v12216_v27  ;;  %v12228_v27 = vsel %vm5839_vm7, 1.0, %v18512_v23 }
 0x349   :  { %13052 = vmatprep.subr.bf16.mxu0 %v13027_v18  ;;  %vm5838_vm5 = vcmp.eq.s32.totalorder %v16572_v32, %v5836_v22 }
 0x34a   :  { %vm5840_vm8 = vmand %vm5838_vm5, %vm5832_vm4  ;;  %vm8195_vm5 = vcmask 1040384  }
 0x34b   :  { %12793 = vmatmul.mubr.msk.f32.vlgmr.msra.gmra.mrb[4].mxu0 %vm5112_vm6, %v12217_v26  ;;  %v12229_v26 = vsel %vm5840_vm8, 1.0, %v18512_v23  ;;  %vm8177_vm4 = vmand %vm8173_vm1, %vm8175_vm2 }
 0x34c   :  { %13054 = vmatpush3.bf16.msra.mxu0 %v13027_v18  ;;  %12806 = vmatprep.mubr.msk.f32.mxu0 %vm5112_vm6, %v12222_v30  ;;  %v5279_v30 = vadd.s32 4294967295, %v16584_v28  ;;  %vm17073_vm8 = vmor %vm8171_vm3, %vm8177_vm4 }
 0x34d   :  { %13060 = vmatprep.subr.bf16.mxu0 %v13027_v18 }
 0x34e   :  { %vm5281_vm9 = vcmp.ge.s32.totalorder %v5279_v30, 0  ;;  %vm5289_vm10 = vcmp.eq.s32.totalorder %v16572_v32, %v5279_v30  ;;  %v5559_v30 = vld [vmem:[%s18023_s2 + $0x28] sm:$0xff] }
 0x34f   :  { %12807 = vmatmul.mubr.msk.f32.vlgmr.msra.gmra.mrb[6].mxu0 %vm5112_vm6, %v12223_v31  ;;  %v5280_v31 = vadd.s32 4294967295, %v12202_v21  ;;  %vm5291_vm11 = vmand %vm5289_vm10, %vm5281_vm9  ;;  %vm8329_vm9 = vcmask 1042176   ;;  %vm8223_vm10 = vcmask 523264  }
 0x350   :  { %13062 = vmatpush3.bf16.msra.mxu0 %v13027_v18  ;;  %12820 = vmatprep.mubr.msk.f32.mxu0 %vm5112_vm6, %v12228_v27  ;;  %v12210_v21 = vsel %vm5291_vm11, 1.0, %v18512_v23  ;;  %vm8327_vm11 = vcmask 254976  }
 0x351   :  { %vm5282_vm12 = vcmp.ge.s32.totalorder %v5280_v31, 0 }
 0x352   :  { %vm5292_vm14 = vmand %vm5290_vm13, %vm5282_vm12  ;;  %vm8442_vm12 = vcmask 779776   ;;  %vm8455_vm13 = vcmask 517376  }
 0x353   :  { %12821 = vmatmul.mubr.msk.f32.vlgmr.msra.gmra.mrb[8].mxu0 %vm5112_vm6, %v12229_v26  ;;  %v12211_v20 = vsel %vm5292_vm14, 1.0, %v18512_v23  ;;  %v5558_v26 = vld [vmem:[%s18023_s2 + $0x20] sm:$0xff] }
 0x354   :  { %v13047_v31 = vpack.c.bf16 %v5559_v30, %v5558_v26  ;;  %v5926_v26 = vld [vmem:[%s18023_s2 + $0x40] sm:$0xff]  ;;  %v5927_v30 = vld [vmem:[%s18023_s2 + $0x48] sm:$0xff] }
 0x355   :  { %v13063_v16 = vpack.c.bf16 %v5927_v30, %v5926_v26 }
 0x41a   :  { %v12766_v22 = vpop.f32.mrb[2].mxu0 }
 0x41b   :  { %v5185_v27 = vpop.f32.mrb[3].mxu0 }
 0x41c   :  { %12771 = vmatprep.mubr.msk.f32.mxu1 %vm5112_vm6, %v5185_v27 }
 0x41d   :  { %12772 = vmatmul.mubr.msk.f32.vlgmr.msra.gmra.mrb[0].mxu1 %vm5112_vm6, %v12766_v22 }
 0x41e   :  { %13038 = vmatpush3.bf16.msra.mxu1 %v13027_v18  ;;  %12778 = vmatprep.mubr.msk.f32.mxu1 %vm5112_vm6, %v12210_v21  ;;  %v12794_v29 = vpop.f32.mrb[4].mxu0 }
 0x41f   :  { %13040 = vmatprep.subr.bf16.mxu1 %v13039_v24  ;;  %v5549_v25 = vpop.f32.mrb[5].mxu0 }
 0x421   :  { %12779 = vmatmul.mubr.msk.f32.vlgmr.msra.gmra.mrb[2].mxu1 %vm5112_vm6, %v12211_v20  ;;  %v5743_v20 = vld [vmem:[%s18023_s2 + $0x38] sm:$0xff] }
 0x422   :  { %13042 = vmatpush3.bf16.msra.mxu1 %v13039_v24  ;;  %v12808_v18 = vpop.f32.mrb[6].mxu0  ;;  %v5742_v24 = vld [vmem:[%s18023_s2 + $0x30] sm:$0xff] }
 0x423   :  { %13048 = vmatprep.subr.bf16.mxu1 %v13047_v31  ;;  %v5733_v22 = vpop.f32.mrb[7].mxu0  ;;  %v13055_v14 = vpack.c.bf16 %v5743_v20, %v5742_v24 }
 0x426   :  { %v12822_v27 = vpop.f32.mrb[8].mxu0 }
 0x427   :  { %v5917_v21 = vpop.f32.mrb[9].mxu0 }
 0x4f4   :  { %v12780_v17 = vpop.f32.mrb[2].mxu1 }
 0x4f5   :  { %v5369_v19 = vpop.f32.mrb[3].mxu1 }
 0x4f6   :  { %12785 = vmatprep.mubr.msk.f32.mxu1 %vm5112_vm6, %v5369_v19 }
 0x4f7   :  { %12786 = vmatmul.mubr.msk.f32.vlgmr.msra.gmra.mrb[0].mxu1 %vm5112_vm6, %v12780_v17  ;;  %v6039_v17 = vld [vmem:[%s18024_s3] sm:$0xff] }
 0x4f8   :  { %13050 = vmatpush3.bf16.msra.mxu1 %v13047_v31  ;;  %12799 = vmatprep.mubr.msk.f32.mxu1 %vm5112_vm6, %v5549_v25  ;;  %v12203_v31 = vld [vmem:[%s18023_s2 + $0x50] ss:$0 sm:$0xff]  ;;  %v6042_v25 = vld [vmem:[%s18024_s3 + $0x18] sm:$0xff]  ;;  %s13508_s2 = smov 96  }
 0x4f9   :  { %13056 = vmatprep.subr.bf16.mxu1 %v13055_v14 }
 0x4ff   :  { %12800 = vmatmul.mubr.msk.f32.vlgmr.msra.gmra.mrb[0].mxu1 %vm5112_vm6, %v12794_v29  ;;  %v6041_v29 = vld [vmem:[%s18024_s3 + $0x10] sm:$0xff] }
 0x500   :  { %13058 = vmatpush3.bf16.msra.mxu1 %v13055_v14  ;;  %12813 = vmatprep.mubr.msk.f32.mxu1 %vm5112_vm6, %v5733_v22  ;;  %v6040_v14 = vld [vmem:[%s18024_s3 + $0x8] sm:$0xff] }
 0x501   :  { %13064 = vmatprep.subr.bf16.mxu1 %v13063_v16  ;;  %v13067_v19 = vpack.c.bf16 %v6040_v14, %v6039_v17 }
 0x503   :  { %13068 = vmatprep.subr.bf16.mxu0 %v13067_v19 }
 0x504   :  { %13070 = vmatpush3.bf16.msra.mxu0 %v13067_v19 }
 0x507   :  { %12814 = vmatmul.mubr.msk.f32.vlgmr.msra.gmra.mrb[0].mxu1 %vm5112_vm6, %v12808_v18 }
 0x508   :  { %13066 = vmatpush3.bf16.msra.mxu1 %v13063_v16  ;;  %12827 = vmatprep.mubr.msk.f32.mxu1 %vm5112_vm6, %v5917_v21 }
 0x509   :  { %12841 = vmatprep.subr.mxu1 %v18512_v23 }
 0x50f   :  { %12828 = vmatmul.mubr.msk.f32.vlgmr.msra.gmra.mrb[0].mxu1 %vm5112_vm6, %v12822_v27  ;;  %v13071_v27 = vpack.c.bf16 %v6042_v25, %v6041_v29  ;;  %vm6053_vm6 = vcmask 261120  }
 0x510   :  { %12843 = vmatprep.mubr.msk.f32.mxu1 %vm13511_vm15, %v18512_v23 }
 0x511   :  { %13072 = vmatprep.subr.bf16.mxu0 %v13071_v27 }
 0x512   :  { %13074 = vmatpush3.bf16.msra.mxu0 %v13071_v27 }
 0x513   :  { %12851 = vmatprep.subr.mxu0 %v18512_v23 }
 0x5e2   :  { %v12829_v16 = vpop.f32.mrb[0].mxu1 }
 0x5e3   :  { %v13311_v18 = vadd.f32 %v12829_v16, %v12203_v31  ;;  %v6000_v22 = vpop.f32.mrb[1].mxu1 }
 0x5e4   :  { %v13312_v21 = vadd.f32 %v12203_v31, %v6000_v22 }
 0x5e5   :  { %v6012_v24 = vmax.f32 %v13311_v18, 0.0 }
 0x5e6   :  { %v6011_v20 = vmax.f32 %v13312_v21, 0.0  ;;  %v12234_v21 = vld [vmem:[%s18024_s3 + $0x20] ss:$0 sm:$0xff] }
 0x5e7   :  { %6017 = vrot.lane.b32.xlu1 %v6012_v24, %s13508_s2 }
 0x5e8   :  { %6023 = vrot.lane.b32.xlu0 %v6011_v20, %s13509_s15 }
 0x5eb   :  { %6015 = vrot.lane.b32.xlu1 %v6011_v20, %s13508_s2 }
 0x5ec   :  { %6031 = vrot.lane.b32.xlu0 %v6011_v20, %s13510_s16 }
 0x5ef   :  { %6025 = vrot.lane.b32.xlu1 %v6012_v24, %s13509_s15 }
 0x5f3   :  { %6033 = vrot.lane.b32.xlu1 %v6012_v24, %s13510_s16 }
 0x659   :  { %v6018_v26 = vpop.permute.xlu1 %6017 }
 0x65a   :  { %v6024_v30 = vpop.permute.xlu0 %6023  ;;  %v6022_v29 = vadd.f32 %v6018_v26, %v6012_v24 }
 0x65d   :  { %v6016_v17 = vpop.permute.xlu1 %6015 }
 0x65e   :  { %v6021_v14 = vadd.f32 %v6016_v17, %v6011_v20  ;;  %v6032_v31 = vpop.permute.xlu0 %6031 }
 0x660   :  { %v6029_v19 = vadd.f32 %v6024_v30, %v6021_v14 }
 0x661   :  { %v6026_v16 = vpop.permute.xlu1 %6025 }
 0x662   :  { %v6037_v25 = vadd.f32 %v6032_v31, %v6029_v19  ;;  %v6030_v18 = vadd.f32 %v6026_v16, %v6022_v29 }
 0x664   :  { %12838 = vmatprep.mubr.msk.f32.mxu0 %vm6053_vm6, %v6037_v25 }
 0x665   :  { %v6034_v22 = vpop.permute.xlu1 %6033 }
 0x666   :  { %v6038_v27 = vadd.f32 %v6034_v22, %v6030_v18 }
 0x668   :  { %12839 = vmatmul.mubr.msk.f32.vlgmr.msra.gmra.mrb[10].mxu0 %vm6053_vm6, %v6038_v27 }
 0x669   :  { %12853 = vmatprep.mubr.msk.f32.mxu0 %vm13511_vm15, %v18512_v23 }
 0x73b   :  { %v12840_v24 = vpop.f32.mrb[10].mxu0 }
 0x73c   :  { %v6126_v20 = vpop.f32.mrb[11].mxu0  ;;  %v16701_v30 = vadd.f32 %v12840_v24, %v12234_v21 }
 0x73d   :  { %v16686_v26 = vadd.f32 %v12234_v21, %v6126_v20 }
 0x73f   :  { %6215 = vrot.lane.b32.xlu1 %v16686_v26, %s13512_s8  ;;  %6136 = vrot.lane.b32.xlu0 %v16686_v26, %s13508_s2 }
 0x743   :  { %6293 = vrot.lane.b32.xlu1 %v16686_v26, %s13513_s19  ;;  %6213 = vrot.lane.b32.xlu0 %v16686_v26, %s13514_s20 }
 0x747   :  { %6371 = vrot.lane.b32.xlu1 %v16686_v26, %s13515_s21  ;;  %6291 = vrot.lane.b32.xlu0 %v16686_v26, %s13516_s7 }
 0x74b   :  { %6369 = vrot.lane.b32.xlu0 %v16686_v26, %s13517_s22 }
 0x74f   :  { %6526 = vrot.lane.b32.xlu0 %v16701_v30, %s13512_s8 }
 0x7b1   :  { %v6216_v17 = vpop.permute.xlu1 %6215  ;;  %v6137_v14 = vpop.permute.xlu0 %6136 }
 0x7b2   :  { %12842 = vmatpush3.xpose.msk.msra.mxu1 %vm6138_vm0, %v6137_v14 }
 0x7b3   :  { %12846 = vmatprep.subr.mxu1 %v18512_v23 }
 0x7b5   :  { %v6294_v19 = vpop.permute.xlu1 %6293  ;;  %12844 = vmatmul.mubr.msk.f32.vlgmr.msra.gmra.mrb[4].mxu1 %vm6138_vm0, %v16686_v26  ;;  %v6214_v31 = vpop.permute.xlu0 %6213 }
 0x7b6   :  { %12847 = vmatpush3.xpose.msk.msra.mxu1 %vm6138_vm0, %v6216_v17  ;;  %12852 = vmatpush3.xpose.msk.msra.mxu0 %vm6138_vm0, %v6294_v19 }
 0x7b7   :  { %12848 = vmatprep.mubr.msk.f32.mxu1 %vm13511_vm15, %v18512_v23  ;;  %12856 = vmatprep.subr.mxu1 %v18512_v23 }
 0x7b8   :  { %12861 = vmatprep.subr.mxu0 %v18512_v23 }
 0x7b9   :  { %v6372_v16 = vpop.permute.xlu1 %6371  ;;  %12849 = vmatmul.mubr.msk.f32.vlgmr.msra.gmra.mrb[6].mxu1 %vm6138_vm0, %v6214_v31  ;;  %v6292_v29 = vpop.permute.xlu0 %6291 }
 0x7ba   :  { %12854 = vmatmul.mubr.msk.f32.vlgmr.msra.gmra.mrb[12].mxu0 %vm6138_vm0, %v6292_v29  ;;  %12857 = vmatpush3.xpose.msk.msra.mxu1 %vm6138_vm0, %v6372_v16 }
 0x7bb   :  { %12858 = vmatprep.mubr.msk.f32.mxu1 %vm13511_vm15, %v18512_v23  ;;  %12866 = vmatprep.subr.mxu1 %v18512_v23 }
 0x7bc   :  { %12863 = vmatprep.mubr.msk.f32.mxu0 %vm13511_vm15, %v18512_v23 }
 0x7bd   :  { %v6370_v25 = vpop.permute.xlu0 %6369 }
 0x7be   :  { %12859 = vmatmul.mubr.msk.f32.vlgmr.msra.gmra.mrb[8].mxu1 %vm6138_vm0, %v6370_v25 }
 0x7bf   :  { %12868 = vmatprep.mubr.msk.f32.mxu1 %vm13511_vm15, %v18512_v23 }
 0x7c1   :  { %v6527_v18 = vpop.permute.xlu0 %6526 }
 0x7c2   :  { %12867 = vmatpush3.xpose.msk.msra.mxu1 %vm6138_vm0, %v6527_v18 }
 0x7c3   :  { %12876 = vmatprep.subr.mxu1 %v18512_v23 }
 0x888   :  { %v6209_v22 = vpop.f32.mrb[4].mxu1 }
 0x889   :  { %v12845_v27 = vpop.f32.mrb[5].mxu1 }
 0x88c   :  { %v6287_v21 = vpop.f32.mrb[6].mxu1 }
 0x88d   :  { %v12850_v24 = vpop.f32.mrb[7].mxu1  ;;  %v6365_v20 = vpop.f32.mrb[12].mxu0  ;;  %v6761_v17 = vsel %vm6138_vm0, %v6287_v21, -inf }
 0x88e   :  { %6762 = vmax.xlane.f32.xlu1 %v6761_v17  ;;  %v12855_v14 = vpop.f32.mrb[13].mxu0  ;;  %v6764_v16 = vsel %vm6138_vm0, %v6365_v20, -inf }
 0x891   :  { %v16728_v19 = vpop.f32.mrb[8].mxu1 }
 0x892   :  { %v12860_v31 = vpop.f32.mrb[9].mxu1 }
 0x89f   :  { %6524 = vrot.lane.b32.xlu1 %v16701_v30, %s13514_s20 }
 0x8a3   :  { %6682 = vrot.lane.b32.xlu1 %v16701_v30, %s13515_s21 }
 0x8a7   :  { %6922 = vrot.lane.b32.xlu1 %v16686_v26, %s13518_s9 }
 0x8cb   :  { %6765 = vmax.xlane.f32.xlu1 %v6764_v16 }
 0x91b   :  { %v6763_v29 = vpop.xlane.xlu1 %6762 }
 0x91c   :  { %v6783_v25 = vsub.f32 %v6287_v21, %v6763_v29 }
 0x91e   :  { %v6792_v18 = vmul.f32 1.442695, %v6783_v25  ;;  %v6758_v25 = vsel %vm6138_vm0, %v6209_v22, -inf }
 0x91f   :  { %v6525_v27 = vpop.permute.xlu1 %6524 }
 0x920   :  { %13392 = vpow2.f32 %v6792_v18  ;;  %12869 = vmatmul.mubr.msk.f32.vlgmr.msra.gmra.mrb[10].mxu1 %vm6138_vm0, %v6525_v27  ;;  %v6767_v18 = vsel %vm6138_vm0, %v16728_v19, -inf }
 0x921   :  { %12878 = vmatprep.mubr.msk.f32.mxu1 %vm13511_vm15, %v18512_v23 }
 0x923   :  { %v6683_v24 = vpop.permute.xlu1 %6682 }
 0x924   :  { %12877 = vmatpush3.xpose.msk.msra.mxu1 %vm6138_vm0, %v6683_v24 }
 0x925   :  { %12886 = vmatprep.subr.mxu1 %v18512_v23 }
 0x927   :  { %v6923_v21 = vpop.permute.xlu1 %6922 }
 0x92a   :  { %v13393_v17 = vpop.eup %13392 }
 0x92b   :  { %v6809_v14 = vsel %vm6138_vm0, %v13393_v17, 0.0 }
 0x92c   :  { %6810 = vadd.xlane.f32.xlu0 %v6809_v14 }
 0x942   :  { %6680 = vrot.lane.b32.xlu0 %v16701_v30, %s13517_s22 }
 0x958   :  { %v6766_v31 = vpop.xlane.xlu1 %6765 }
 0x959   :  { %v6784_v16 = vsub.f32 %v6365_v20, %v6766_v31 }
 0x95b   :  { %v6794_v29 = vmul.f32 1.442695, %v6784_v16 }
 0x95d   :  { %13394 = vpow2.f32 %v6794_v29 }
 0x961   :  { %6759 = vmax.xlane.f32.xlu0 %v6758_v25 }
 0x965   :  { %6768 = vmax.xlane.f32.xlu0 %v6767_v18 }
 0x967   :  { %v16748_v27 = vpop.eup %13394 }
 0x968   :  { %v6812_v24 = vsel %vm6138_vm0, %v16748_v27, 0.0 }
 0x969   :  { %6813 = vadd.xlane.f32.xlu1 %v6812_v24 }
 0x97a   :  { %6448 = vrot.lane.b32.xlu1 %v16701_v30, %s13508_s2 }
 0x97e   :  { %6602 = vrot.lane.b32.xlu1 %v16701_v30, %s13516_s7 }
 0x982   :  { %6846 = vrot.lane.b32.xlu1 %v16686_v26, %s13509_s15 }
 0x986   :  { %7294 = vrot.lane.b32.xlu1 %v16686_v26, %s13519_s23 }
 0x9b9   :  { %v6811_v20 = vpop.xlane.xlu0 %6810 }
 0x9ba   :  { %13396 = vrcp.f32 %v6811_v20 }
 0x9bd   :  { %v6681_v14 = vpop.permute.xlu0 %6680 }
 0x9be   :  { %12879 = vmatmul.mubr.msk.f32.vlgmr.msra.gmra.mrb[12].mxu1 %vm6138_vm0, %v6681_v14 }
 0x9bf   :  { %12887 = vmatpush3.msra.mxu1 %v6923_v21  ;;  %12888 = vmatprep.mubr.msk.f32.mxu1 %vm13511_vm15, %v18512_v23 }
 0x9c0   :  { %12896 = vmatprep.subr.mxu1 %v18512_v23 }
 0x9c4   :  { %v13397_v31 = vpop.eup %13396 }
 0x9c5   :  { %v6833_v16 = vmul.f32 %v13397_v31, %v13393_v17 }
 0x9c7   :  { %12889 = vmatmul.mubr.msk.f32.vlgmr.msra.gmra.mrb[14].mxu1 %vm6138_vm0, %v6833_v16 }
 0x9c8   :  { %12898 = vmatprep.mubr.msk.f32.mxu1 %vm13511_vm15, %v18512_v23 }
 0x9ee   :  { %v6760_v29 = vpop.xlane.xlu0 %6759 }
 0x9ef   :  { %v6782_v25 = vsub.f32 %v6209_v22, %v6760_v29 }
 0x9f1   :  { %v6790_v18 = vmul.f32 1.442695, %v6782_v25 }
 0x9f2   :  { %v6769_v22 = vpop.xlane.xlu0 %6768 }
 0x9f3   :  { %13398 = vpow2.f32 %v6790_v18  ;;  %v16767_v24 = vpop.f32.mrb[10].mxu1  ;;  %v6785_v31 = vsub.f32 %v16728_v19, %v6769_v22 }
 0x9f4   :  { %v12870_v20 = vpop.f32.mrb[11].mxu1  ;;  %v6773_v18 = vsel %vm6138_vm0, %v16767_v24, -inf }
 0x9f5   :  { %v6796_v16 = vmul.f32 1.442695, %v6785_v31 }
 0x9f6   :  { %v6814_v21 = vpop.xlane.xlu1 %6813 }
 0x9f7   :  { %13400 = vpow2.f32 %v6796_v16 }
 0x9fa   :  { %v6449_v14 = vpop.permute.xlu1 %6448 }
 0x9fb   :  { %12862 = vmatpush3.xpose.msk.msra.mxu0 %vm6138_vm0, %v6449_v14 }
 0x9fc   :  { %12871 = vmatprep.subr.mxu0 %v18512_v23 }
 0x9fd   :  { %v13399_v13 = vpop.eup %13398 }
 0x9fe   :  { %12864 = vmatmul.mubr.msk.f32.vlgmr.msra.gmra.mrb[14].mxu0 %vm6138_vm0, %v16701_v30  ;;  %v6806_v17 = vsel %vm6138_vm0, %v13399_v13, 0.0  ;;  %v6603_v19 = vpop.permute.xlu1 %6602 }
 0x9ff   :  { %6807 = vadd.xlane.f32.xlu0 %v6806_v17  ;;  %12873 = vmatprep.mubr.msk.f32.mxu0 %vm13511_vm15, %v18512_v23 }
 0xa01   :  { %v13401_v29 = vpop.eup %13400 }
 0xa02   :  { %v6815_v25 = vsel %vm6138_vm0, %v13401_v29, 0.0  ;;  %v6847_v31 = vpop.permute.xlu1 %6846 }
 0xa15   :  { %6604 = vrot.lane.b32.xlu0 %v16701_v30, %s13513_s19 }
 0xa34   :  { %6816 = vadd.xlane.f32.xlu0 %v6815_v25  ;;  %v16797_v25 = vld [vmem:[%s18024_s3 + $0x30] sm:$0xff] }
 0xa4a   :  { %7144 = vrot.lane.b32.xlu0 %v16686_v26, %s13520_s24 }
 0xa69   :  { %6774 = vmax.xlane.f32.xlu0 %v6773_v18 }
 0xa7f   :  { %7520 = vrot.lane.b32.xlu0 %v16701_v30, %s13518_s9 }
 0xa8c   :  { %v6808_v20 = vpop.xlane.xlu0 %6807 }
 0xa8d   :  { %13402 = vrcp.f32 %v6808_v20 }
 0xa8e   :  { %13404 = vrcp.f32 %v6814_v21 }
 0xa90   :  { %v6605_v14 = vpop.permute.xlu0 %6604 }
 0xa91   :  { %12872 = vmatpush3.xpose.msk.msra.mxu0 %vm6138_vm0, %v6605_v14  ;;  %v16787_v17 = vpop.f32.mrb[12].mxu1 }
 0xa92   :  { %v12880_v22 = vpop.f32.mrb[13].mxu1  ;;  %12881 = vmatprep.subr.mxu0 %v18512_v23 }
 0xa94   :  { %12874 = vmatmul.mubr.msk.f32.vlgmr.msra.gmra.mrb[16].mxu0 %vm6138_vm0, %v6603_v19 }
 0xa95   :  { %12882 = vmatpush3.msra.mxu0 %v6847_v31  ;;  %12883 = vmatprep.mubr.msk.f32.mxu0 %vm13511_vm15, %v18512_v23  ;;  %v7295_v31 = vpop.permute.xlu1 %7294 }
 0xa96   :  { %12891 = vmatprep.subr.mxu0 %v18512_v23 }
 0xa97   :  { %v13403_v26 = vpop.eup %13402 }
 0xa98   :  { %v6831_v16 = vmul.f32 %v13403_v26, %v13399_v13  ;;  %v13405_v19 = vpop.eup %13404 }
 0xa99   :  { %v6835_v14 = vmul.f32 %v13405_v19, %v16748_v27 }
 0xa9a   :  { %12884 = vmatmul.mubr.msk.f32.vlgmr.msra.gmra.mrb[18].mxu0 %vm6138_vm0, %v6831_v16  ;;  %v6994_v18 = vpop.f32.mrb[14].mxu1 }
 0xa9b   :  { %v12890_v20 = vpop.f32.mrb[15].mxu1  ;;  %12892 = vmatpush3.msra.mxu0 %v16797_v25  ;;  %12893 = vmatprep.mubr.msk.f32.mxu0 %vm13511_vm15, %v18512_v23 }
 0xa9c   :  { %12901 = vmatprep.subr.mxu0 %v18512_v23 }
 0xa9e   :  { %12894 = vmatmul.mubr.msk.f32.vlgmr.msra.gmra.mrb[20].mxu0 %vm6138_vm0, %v6994_v18  ;;  %v6044_v18 = vld [vmem:[%s18024_s3 + $0x28] sm:$0xff] }
 0xa9f   :  { %12903 = vmatprep.mubr.msk.f32.mxu0 %vm13511_vm15, %v18512_v23  ;;  %12897 = vmatpush3.msra.mxu1 %v6044_v18 }
 0xaa0   :  { %12906 = vmatprep.subr.mxu1 %v18512_v23 }
 0xac1   :  { %v6817_v13 = vpop.xlane.xlu0 %6816 }
 0xac2   :  { %13406 = vrcp.f32 %v6817_v13 }
 0xac5   :  { %v7145_v22 = vpop.permute.xlu0 %7144 }
 0xac6   :  { %12902 = vmatpush3.msra.mxu0 %v7145_v22 }
 0xac7   :  { %12904 = vmatmul.mubr.msk.f32.vlgmr.msra.gmra.mrb[22].mxu0 %vm6138_vm0, %v6835_v14  ;;  %12911 = vmatprep.subr.mxu0 %v18512_v23 }
 0xac8   :  { %12912 = vmatpush3.msra.mxu0 %v7295_v31  ;;  %12913 = vmatprep.mubr.msk.f32.mxu0 %vm13511_vm15, %v18512_v23 }
 0xac9   :  { %12921 = vmatprep.subr.mxu0 %v18512_v23 }
 0xacc   :  { %v13407_v26 = vpop.eup %13406 }
 0xacd   :  { %v6837_v21 = vmul.f32 %v13407_v26, %v13401_v29 }
 0xacf   :  { %12914 = vmatmul.mubr.msk.f32.vlgmr.msra.gmra.mrb[24].mxu0 %vm6138_vm0, %v6837_v21 }
 0xad0   :  { %12923 = vmatprep.mubr.msk.f32.mxu0 %vm13511_vm15, %v18512_v23 }
 0xad1   :  { %v6520_v27 = vpop.f32.mrb[14].mxu0 }
 0xad2   :  { %v12865_v16 = vpop.f32.mrb[15].mxu0  ;;  %v6770_v22 = vsel %vm6138_vm0, %v6520_v27, -inf }
 0xad3   :  { %v6779_v16 = vsel %vm6138_vm0, %v16787_v17, -inf }
 0xaf6   :  { %v6775_v20 = vpop.xlane.xlu0 %6774 }
 0xaf7   :  { %v6787_v13 = vsub.f32 %v16767_v24, %v6775_v20  ;;  %v16829_v24 = vld [vmem:[%s18024_s3 + $0x38] sm:$0xff] }
 0xaf9   :  { %v6800_v19 = vmul.f32 1.442695, %v6787_v13 }
 0xafb   :  { %13408 = vpow2.f32 %v6800_v19 }
 0xb05   :  { %v13409_v29 = vpop.eup %13408 }
 0xb06   :  { %v6821_v14 = vsel %vm6138_vm0, %v13409_v29, 0.0 }
 0xb07   :  { %6822 = vadd.xlane.f32.xlu1 %v6821_v14 }
 0xb0b   :  { %6771 = vmax.xlane.f32.xlu1 %v6770_v22 }
 0xb67   :  { %v6676_v31 = vpop.f32.mrb[16].mxu0 }
 0xb68   :  { %v12875_v26 = vpop.f32.mrb[17].mxu0  ;;  %v6776_v21 = vsel %vm6138_vm0, %v6676_v31, -inf }
 0xb69   :  { %6777 = vmax.xlane.f32.xlu1 %v6776_v21 }
 0xb6d   :  { %v6918_v20 = vpop.f32.mrb[18].mxu0  ;;  %6780 = vmax.xlane.f32.xlu1 %v6779_v16  ;;  %v16839_v16 = vld [vmem:[%s18024_s3 + $0x40] sm:$0xff] }
 0xb6e   :  { %v12885_v13 = vpop.f32.mrb[19].mxu0  ;;  %12899 = vmatmul.mubr.msk.f32.vlgmr.msra.gmra.mrb[16].mxu1 %vm6138_vm0, %v6918_v20 }
 0xb6f   :  { %12907 = vmatpush3.msra.mxu1 %v16829_v24  ;;  %12908 = vmatprep.mubr.msk.f32.mxu1 %vm13511_vm15, %v18512_v23 }
 0xb70   :  { %12916 = vmatprep.subr.mxu1 %v18512_v23 }
 0xb71   :  { %v7067_v19 = vpop.f32.mrb[20].mxu0 }
 0xb72   :  { %v12895_v14 = vpop.f32.mrb[21].mxu0 }
 0xb94   :  { %v6823_v22 = vpop.xlane.xlu1 %6822 }
 0xb95   :  { %13410 = vrcp.f32 %v6823_v22  ;;  %v7521_v22 = vpop.permute.xlu0 %7520 }
 0xb98   :  { %v6772_v26 = vpop.xlane.xlu1 %6771 }
 0xb99   :  { %v6786_v21 = vsub.f32 %v6520_v27, %v6772_v26 }
 0xb9a   :  { %v7216_v13 = vpop.f32.mrb[22].mxu0 }
 0xb9b   :  { %v6798_v20 = vmul.f32 1.442695, %v6786_v21  ;;  %v12905_v15 = vpop.f32.mrb[23].mxu0  ;;  %12909 = vmatmul.mubr.msk.f32.vlgmr.msra.gmra.mrb[18].mxu1 %vm6138_vm0, %v7216_v13 }
 0xb9c   :  { %12917 = vmatpush3.msra.mxu1 %v16839_v16  ;;  %12918 = vmatprep.mubr.msk.f32.mxu1 %vm13511_vm15, %v18512_v23 }
 0xb9d   :  { %13412 = vpow2.f32 %v6798_v20  ;;  %12926 = vmatprep.subr.mxu1 %v18512_v23 }
 0xb9f   :  { %v13411_v14 = vpop.eup %13410 }
 0xba0   :  { %v6841_v15 = vmul.f32 %v13411_v14, %v13409_v29 }
 0xba2   :  { %v7366_v27 = vpop.f32.mrb[24].mxu0 }
 0xba3   :  { %v12915_v26 = vpop.f32.mrb[25].mxu0  ;;  %12919 = vmatmul.mubr.msk.f32.vlgmr.msra.gmra.mrb[20].mxu1 %vm6138_vm0, %v7366_v27 }
 0xba4   :  { %12927 = vmatpush3.msra.mxu1 %v7521_v22  ;;  %12928 = vmatprep.mubr.msk.f32.mxu1 %vm13511_vm15, %v18512_v23 }
 0xba5   :  { %12936 = vmatprep.subr.mxu1 %v18512_v23 }
 0xba7   :  { %v13413_v21 = vpop.eup %13412  ;;  %12929 = vmatmul.mubr.msk.f32.vlgmr.msra.gmra.mrb[22].mxu1 %vm6138_vm0, %v6841_v15 }
 0xba8   :  { %v6818_v13 = vsel %vm6138_vm0, %v13413_v21, 0.0  ;;  %12937 = vmatpush3.msra.mxu1 %v6044_v18  ;;  %12938 = vmatprep.mubr.msk.f32.mxu1 %vm13511_vm15, %v18512_v23 }
 0xba9   :  { %6819 = vadd.xlane.f32.xlu1 %v6818_v13  ;;  %12946 = vmatprep.subr.mxu1 %v18512_v23 }
 0xbf6   :  { %v6778_v20 = vpop.xlane.xlu1 %6777 }
 0xbf7   :  { %v6788_v27 = vsub.f32 %v6676_v31, %v6778_v20 }
 0xbf9   :  { %v6802_v22 = vmul.f32 1.442695, %v6788_v27 }
 0xbfa   :  { %v6781_v26 = vpop.xlane.xlu1 %6780 }
 0xbfb   :  { %13414 = vpow2.f32 %v6802_v22  ;;  %v6789_v29 = vsub.f32 %v16787_v17, %v6781_v26 }
 0xbfd   :  { %v6804_v14 = vmul.f32 1.442695, %v6789_v29 }
 0xbff   :  { %13416 = vpow2.f32 %v6804_v14 }
 0xc05   :  { %v13415_v10 = vpop.eup %13414 }
 0xc06   :  { %v6824_v15 = vsel %vm6138_vm0, %v13415_v10, 0.0 }
 0xc07   :  { %6825 = vadd.xlane.f32.xlu1 %v6824_v15 }
 0xc09   :  { %v13417_v18 = vpop.eup %13416 }
 0xc0a   :  { %v6827_v12 = vsel %vm6138_vm0, %v13417_v18, 0.0 }
 0xc0b   :  { %6828 = vadd.xlane.f32.xlu0 %v6827_v12 }
 0xc18   :  { %7444 = vrot.lane.b32.xlu1 %v16701_v30, %s13509_s15 }
 0xc1c   :  { %7742 = vrot.lane.b32.xlu1 %v16701_v30, %s13520_s24 }
 0xc20   :  { %7892 = vrot.lane.b32.xlu1 %v16701_v30, %s13519_s23 }
 0xc36   :  { %v6820_v9 = vpop.xlane.xlu1 %6819 }
 0xc37   :  { %13418 = vrcp.f32 %v6820_v9 }
 0xc41   :  { %v7140_v17 = vpop.f32.mrb[16].mxu1  ;;  %v13419_v6 = vpop.eup %13418 }
 0xc42   :  { %v7141_v31 = vadd.f32 %v7140_v17, %v7067_v19  ;;  %v12900_v13 = vpop.f32.mrb[17].mxu1  ;;  %v6839_v8 = vmul.f32 %v13419_v6, %v13413_v21  ;;  %v8049_v6 = vld [vmem:[%s18025_s4 + $0x8] sm:$0xff]  ;;  %v8050_v19 = vld [vmem:[%s18025_s4 + $0x10] sm:$0xff] }
 0xc43   :  { %v8053_v21 = vld [vmem:[%s18025_s4 + $0x28] sm:$0xff] }
 0xc6e   :  { %v7289_v20 = vpop.f32.mrb[18].mxu1 }
 0xc6f   :  { %v7293_v27 = vadd.f32 %v7289_v20, %v7141_v31  ;;  %v12910_v22 = vpop.f32.mrb[19].mxu1 }
 0xc70   :  { %v8054_v22 = vld [vmem:[%s18025_s4 + $0x30] sm:$0xff] }
 0xc76   :  { %v7439_v26 = vpop.f32.mrb[20].mxu1 }
 0xc77   :  { %v7443_v29 = vadd.f32 %v7439_v26, %v7293_v27  ;;  %v12920_v14 = vpop.f32.mrb[21].mxu1  ;;  %v8052_v27 = vld [vmem:[%s18025_s4 + $0x20] sm:$0xff] }
 0xc78   :  { %v13081_v26 = vpack.c.bf16 %v8054_v22, %v8052_v27  ;;  %v8062_v27 = vld [vmem:[%s18025_s4 + $0x70] sm:$0xff] }
 0xc7a   :  { %v7592_v15 = vpop.f32.mrb[22].mxu1 }
 0xc7b   :  { %v12930_v12 = vpop.f32.mrb[23].mxu1 }
 0xc94   :  { %v6826_v11 = vpop.xlane.xlu1 %6825 }
 0xc95   :  { %13420 = vrcp.f32 %v6826_v11 }
 0xc98   :  { %v7445_v5 = vpop.permute.xlu1 %7444  ;;  %v6829_v7 = vpop.xlane.xlu0 %6828 }
 0xc99   :  { %13422 = vrcp.f32 %v6829_v7  ;;  %12922 = vmatpush3.msra.mxu0 %v7445_v5  ;;  %v8051_v5 = vld [vmem:[%s18025_s4 + $0x18] sm:$0xff] }
 0xc9a   :  { %12924 = vmatmul.mubr.msk.f32.vlgmr.msra.gmra.mrb[26].mxu0 %vm6138_vm0, %v6839_v8  ;;  %12931 = vmatprep.subr.mxu0 %v18512_v23  ;;  %v13075_v11 = vpack.c.bf16 %v8051_v5, %v8049_v6 }
 0xc9b   :  { %12932 = vmatpush3.msra.mxu0 %v16797_v25  ;;  %12933 = vmatprep.mubr.msk.f32.mxu0 %vm13511_vm15, %v18512_v23  ;;  %v8048_v25 = vld [vmem:[%s18025_s4] sm:$0xff] }
 0xc9c   :  { %v7743_v30 = vpop.permute.xlu1 %7742  ;;  %12941 = vmatprep.subr.mxu0 %v18512_v23  ;;  %v13077_v31 = vpack.c.bf16 %v8050_v19, %v8048_v25  ;;  %v8056_v25 = vld [vmem:[%s18025_s4 + $0x40] sm:$0xff] }
 0xc9e   :  { %12934 = vmatmul.mubr.msk.f32.vlgmr.msra.gmra.mrb[28].mxu0 %vm6138_vm0, %v7592_v15 }
 0xc9f   :  { %v13421_v7 = vpop.eup %13420  ;;  %12942 = vmatpush3.msra.mxu0 %v7743_v30  ;;  %12943 = vmatprep.mubr.msk.f32.mxu0 %vm13511_vm15, %v18512_v23 }
 0xca0   :  { %v6843_v8 = vmul.f32 %v13421_v7, %v13415_v10  ;;  %v7893_v9 = vpop.permute.xlu1 %7892  ;;  %12951 = vmatprep.subr.mxu0 %v18512_v23  ;;  %v8055_v10 = vld [vmem:[%s18025_s4 + $0x38] sm:$0xff] }
 0xca1   :  { %v13079_v20 = vpack.c.bf16 %v8055_v10, %v8053_v21  ;;  %v8058_v21 = vld [vmem:[%s18025_s4 + $0x50] sm:$0xff] }
 0xca2   :  { %12944 = vmatmul.mubr.msk.f32.vlgmr.msra.gmra.mrb[30].mxu0 %vm6138_vm0, %v6843_v8  ;;  %v16942_v10 = vpack.c.bf16 %v8058_v21, %v8056_v25 }
 0xca3   :  { %v13423_v17 = vpop.eup %13422  ;;  %12952 = vmatpush3.msra.mxu0 %v7893_v9  ;;  %12953 = vmatprep.mubr.msk.f32.mxu0 %vm13511_vm15, %v18512_v23 }
 0xca4   :  { %v6845_v13 = vmul.f32 %v13423_v17, %v13417_v18  ;;  %13076 = vmatprep.subr.bf16.mxu0 %v13075_v11  ;;  %v16906_v18 = vld [vmem:[%s18024_s3 + $0x48] ss:$0 sm:$0xff] }
 0xca5   :  { %v8046_v14 = vadd.f32 %v16906_v18, %v7443_v29  ;;  %v8057_v11 = vld [vmem:[%s18025_s4 + $0x48] sm:$0xff] }
 0xca6   :  { %12954 = vmatmul.mubr.msk.f32.vlgmr.msra.gmra.mrb[32].mxu0 %vm6138_vm0, %v6845_v13  ;;  %v8061_v17 = vld [vmem:[%s18025_s4 + $0x68] sm:$0xff] }
 0xca7   :  { %13078 = vmatpush1.bf16.msra.mxu0 %v13077_v31  ;;  %8157 = vmatprep.mubr.f32.mxu0 %v18512_v23  ;;  %v8063_v31 = vld [vmem:[%s18025_s4 + $0x78] sm:$0xff] }
 0xca8   :  { %13080 = vmatprep.subr.bf16.mxu0 %v13079_v20  ;;  %v16954_v13 = vpack.c.bf16 %v8063_v31, %v8061_v17  ;;  %v8060_v20 = vld [vmem:[%s18025_s4 + $0x60] sm:$0xff] }
 0xca9   :  { %v16962_v22 = vpack.c.bf16 %v8062_v27, %v8060_v20 }
 0xcab   :  { %13082 = vmatpush1.bf16.msra.mxu0 %v13081_v26  ;;  %v8065_v26 = vld [vmem:[%s18025_s4 + $0x88] sm:$0xff] }
 0xcae   :  { %12272 = vmatmul.mubr.msk.f32.vlgmr.msra.gmra.mrb[34].mxu0 %vm6053_vm6, %v8046_v14  ;;  %v8067_v14 = vld [vmem:[%s18025_s4 + $0x98] sm:$0xff] }
 0xcaf   :  { %8163 = vmatprep.mubr.f32.mxu0 %v18512_v23 }
 0xd6d   :  { %v7516_v15 = vpop.f32.mrb[26].mxu0 }
 0xd6e   :  { %v12925_v12 = vpop.f32.mrb[27].mxu0  ;;  %12939 = vmatmul.mubr.msk.f32.vlgmr.msra.gmra.mrb[24].mxu1 %vm6138_vm0, %v7516_v15  ;;  %v16974_v15 = vpack.c.bf16 %v8067_v14, %v8065_v26 }
 0xd6f   :  { %12947 = vmatpush3.msra.mxu1 %v16829_v24  ;;  %12948 = vmatprep.mubr.msk.f32.mxu1 %vm13511_vm15, %v18512_v23  ;;  %v8064_v12 = vld [vmem:[%s18025_s4 + $0x80] sm:$0xff] }
 0xd70   :  { %12956 = vmatprep.subr.mxu1 %v18512_v23 }
 0xd71   :  { %v16916_v30 = vpop.f32.mrb[28].mxu0 }
 0xd72   :  { %v12935_v6 = vpop.f32.mrb[29].mxu0 }
 0xd73   :  { %v8066_v6 = vld [vmem:[%s18025_s4 + $0x90] sm:$0xff] }
 0xd75   :  { %v7814_v5 = vpop.f32.mrb[30].mxu0 }
 0xd76   :  { %v12945_v29 = vpop.f32.mrb[31].mxu0  ;;  %12949 = vmatmul.mubr.msk.f32.vlgmr.msra.gmra.mrb[26].mxu1 %vm6138_vm0, %v7814_v5  ;;  %v16982_v5 = vpack.c.bf16 %v8066_v6, %v8064_v12 }
 0xd77   :  { %12957 = vmatpush3.msra.mxu1 %v16839_v16  ;;  %12958 = vmatprep.mubr.msk.f32.mxu1 %vm13511_vm15, %v18512_v23  ;;  %v8059_v16 = vld [vmem:[%s18025_s4 + $0x58] sm:$0xff]  ;;  %v8069_v29 = vld [vmem:[%s18025_s4 + $0xa8] sm:$0xff] }
 0xd78   :  { %v16937_v19 = vpack.c.bf16 %v8059_v16, %v8057_v11  ;;  %v8068_v11 = vld [vmem:[%s18025_s4 + $0xa0] sm:$0xff]  ;;  %v8070_v16 = vld [vmem:[%s18025_s4 + $0xb0] sm:$0xff] }
 0xd79   :  { %v7964_v7 = vpop.f32.mrb[32].mxu0  ;;  %v17002_v25 = vpack.c.bf16 %v8070_v16, %v8068_v11  ;;  %v17027_v16 = vsub.s32 0, %v16584_v28 }
 0xd7a   :  { %v12955_v8 = vpop.f32.mrb[33].mxu0  ;;  %12959 = vmatmul.mubr.msk.f32.vlgmr.msra.gmra.mrb[28].mxu1 %vm6138_vm0, %v7964_v7  ;;  %13084 = vmatprep.subr.bf16.mxu1 %v16937_v19  ;;  %v8071_v7 = vld [vmem:[%s18025_s4 + $0xb8] sm:$0xff] }
 0xd7b   :  { %8291 = vmatprep.mubr.f32.mxu1 %v18512_v23  ;;  %13100 = vmatprep.subr.bf16.mxu0 %v16937_v19  ;;  %v16994_v8 = vpack.c.bf16 %v8071_v7, %v8069_v29 }
 0xd7c   :  { %13086 = vmatpush1.bf16.msra.mxu1 %v16942_v10  ;;  %13102 = vmatpush1.bf16.msra.mxu0 %v16942_v10 }
 0xd7d   :  { %13088 = vmatprep.subr.bf16.mxu1 %v16954_v13  ;;  %13104 = vmatprep.subr.bf16.mxu0 %v16954_v13 }
 0xd80   :  { %13090 = vmatpush1.bf16.msra.mxu1 %v16962_v22  ;;  %13106 = vmatpush1.bf16.msra.mxu0 %v16962_v22 }
 0xd81   :  { %v16924_v24 = vpop.f32.mrb[34].mxu0  ;;  %13092 = vmatprep.subr.bf16.mxu1 %v16974_v15  ;;  %13108 = vmatprep.subr.bf16.mxu0 %v16974_v15 }
 0xd82   :  { %v16926_v9 = vpop.f32.mrb[35].mxu0 }
 0xd84   :  { %13094 = vmatpush1.bf16.msra.mxu1 %v16982_v5  ;;  %13110 = vmatpush1.bf16.msra.mxu0 %v16982_v5 }
 0xd85   :  { %13096 = vmatprep.subr.bf16.mxu1 %v16994_v8  ;;  %13112 = vmatprep.subr.bf16.mxu0 %v16994_v8 }
 0xd88   :  { %13098 = vmatpush1.bf16.msra.mxu1 %v17002_v25  ;;  %13114 = vmatpush1.bf16.msra.mxu0 %v17002_v25 }
 0xd89   :  { %13116 = vmatprep.subr.bf16.mxu1 %v16937_v19  ;;  %13132 = vmatprep.subr.bf16.mxu0 %v16937_v19 }
 0xd8b   :  { %8292 = vmatmul.mubr.f32.vlgmr.msra.gmra.mrb[30].mxu1 %v18512_v23 }
 0xd8c   :  { %13118 = vmatpush1.bf16.msra.mxu1 %v16942_v10  ;;  %8547 = vmatprep.mubr.f32.mxu1 %v18512_v23 }
 0xd8d   :  { %13120 = vmatprep.subr.bf16.mxu1 %v16954_v13 }
 0xd90   :  { %13122 = vmatpush1.bf16.msra.mxu1 %v16962_v22 }
 0xd91   :  { %13124 = vmatprep.subr.bf16.mxu1 %v16974_v15 }
 0xd94   :  { %13126 = vmatpush1.bf16.msra.mxu1 %v16982_v5 }
 0xd95   :  { %13128 = vmatprep.subr.bf16.mxu1 %v16994_v8 }
 0xd98   :  { %13130 = vmatpush1.bf16.msra.mxu1 %v17002_v25 }
 0xd99   :  { %13148 = vmatprep.subr.bf16.mxu1 %v16937_v19 }
 0xe41   :  { %v7738_v21 = vpop.f32.mrb[24].mxu1 }
 0xe42   :  { %v7739_v17 = vadd.f32 %v7738_v21, %v16916_v30  ;;  %v12940_v31 = vpop.f32.mrb[25].mxu1  ;;  %v12270_v30 = vld [vmem:[%s18025_s4 + $0xc0] ss:$8 sm:$0x3]  ;;  %v17033_v21 = vsub.s32 1, %v16584_v28 }
 0xe43   :  { %v17040_v31 = vld [vmem:[%s18025_s4 + $0xd0] ss:$8 sm:$0x3] }
 0xe49   :  { %v7887_v20 = vpop.f32.mrb[26].mxu1 }
 0xe4a   :  { %v7891_v27 = vadd.f32 %v7887_v20, %v7739_v17  ;;  %v12950_v26 = vpop.f32.mrb[27].mxu1  ;;  %v8080_v17 = vrot.slane %v12270_v30, %v17027_v16 }
 0xe4b   :  { %v17050_v26 = vrot.slane %v17040_v31, %v17027_v16 }
 0xe4c   :  { %v17043_v20 = vadd.f32 %v16924_v24, %v8080_v17 }
 0xe4d   :  { %v8037_v14 = vpop.f32.mrb[28].mxu1 }
 0xe4e   :  { %v8041_v12 = vadd.f32 %v8037_v14, %v7891_v27  ;;  %v12960_v6 = vpop.f32.mrb[29].mxu1  ;;  %v8200_v14 = vrot.slane %v17043_v20, 7  ;;  %v8337_v24 = vrot.slane %v17043_v20, 6  ;;  %v8457_v2 = vrot.slane %v17043_v20, 2 }
 0xe4f   :  { %v8331_v6 = vrot.slane %v17043_v20, 1  ;;  %v8467_v1 = vrot.slane %v17043_v20, 5  ;;  %v8585_v63 = vrot.slane %v17043_v20, 3  ;;  %v8595_v58 = vrot.slane %v17043_v20, 4 }
 0xe50   :  { %v8047_v29 = vadd.f32 %v16906_v18, %v8041_v12  ;;  %v8084_v18 = vrot.slane %v12270_v30, %v17033_v21  ;;  %v17056_v12 = vadd.s32 128, %v16572_v32 }
 0xe52   :  { %12273 = vmatmul.mubr.msk.f32.gmra.mrb[36].mxu0 %vm6053_vm6, %v8047_v29  ;;  %v17046_v27 = vadd.f32 %v16926_v9, %v8084_v18  ;;  %vm8184_vm7 = vcmp.lt.s32.totalorder %v17056_v12, 160 }
 0xe53   :  { %8417 = vmatprep.mubr.f32.mxu0 %v18512_v23 }
 0xe54   :  { %v8201_v9 = vrot.slane %v17046_v27, 7  ;;  %v8332_v29 = vrot.slane %v17046_v27, 1  ;;  %v8338_v30 = vrot.slane %v17046_v27, 6  ;;  %v8458_v3 = vrot.slane %v17046_v27, 2 }
 0xe55   :  { %v8468_v61 = vrot.slane %v17046_v27, 5  ;;  %v8586_v32 = vrot.slane %v17046_v27, 3 }
 0xe5e   :  { %v8293_v7 = vpop.f32.mrb[30].mxu1 }
 0xe5f   :  { %v17024_v11 = vpop.f32.mrb[31].mxu1  ;;  %v8294_v57 = vadd.f32 %v8293_v7, %v17050_v26 }
 0xf25   :  { %v8165_v4 = vpop.f32.mrb[36].mxu0 }
 0xf26   :  { %v8166_v62 = vadd.f32 %v8165_v4, %v8080_v17  ;;  %v8167_v0 = vpop.f32.mrb[37].mxu0 }
 0xf27   :  { %v8168_v60 = vadd.f32 %v8167_v0, %v8084_v18 }
 0xf28   :  { %v8191_v54 = vrot.slane %v8166_v62, 7  ;;  %v8204_v4 = vrot.slane %v8166_v62, 6  ;;  %v17078_v17 = vsel %vm8195_vm5, %v8331_v6, %v8166_v62  ;;  %v8341_v56 = vrot.slane %v8166_v62, 5 }
 0xf29   :  { %v8192_v53 = vrot.slane %v8168_v60, 7  ;;  %v8205_v55 = vrot.slane %v8168_v60, 6  ;;  %v8336_v0 = vsel %vm8195_vm5, %v8332_v29, %v8168_v60  ;;  %v8342_v18 = vrot.slane %v8168_v60, 5 }
 0xf2a   :  { %v17083_v7 = vsel %vm8195_vm5, %v17043_v20, %v8191_v54  ;;  %v17086_v50 = vsel %vm8195_vm5, %v8200_v14, %v8204_v4  ;;  %v17089_v52 = vsel %vm8195_vm5, %v8337_v24, %v8341_v56  ;;  %v8461_v49 = vrot.slane %v8166_v62, 1 }
 0xf2b   :  { %v8210_v6 = vsel %vm17073_vm8, %v17083_v7, %v17086_v50  ;;  %v8197_v29 = vsel %vm8195_vm5, %v17046_v27, %v8192_v53  ;;  %v8596_v20 = vrot.slane %v17046_v27, 4  ;;  %v8209_v56 = vsel %vm8195_vm5, %v8201_v9, %v8205_v55 }
 0xf2c   :  { %v8298_v14 = vadd.f32 %v8294_v57, %v8210_v6  ;;  %v8346_v24 = vsel %vm8195_vm5, %v8338_v30, %v8342_v18  ;;  %v17105_v4 = vsel %vm8195_vm5, %v8457_v2, %v8461_v49  ;;  %v8471_v53 = vrot.slane %v8166_v62, 4 }
 0xf2d   :  { %v17109_v51 = vsel %vm8184_vm7, %v8336_v0, %v8346_v24  ;;  %v8462_v46 = vrot.slane %v8168_v60, 1  ;;  %v8472_v48 = vrot.slane %v8168_v60, 4  ;;  %v8589_v47 = vrot.slane %v8166_v62, 2 }
 0xf2e   :  { %v8299_v45 = vsub.f32 0.0, %v8298_v14  ;;  %v8599_v54 = vrot.slane %v8166_v62, 3  ;;  %v8590_v42 = vrot.slane %v8168_v60, 2  ;;  %v17112_v57 = vsel %vm8195_vm5, %v8467_v1, %v8471_v53 }
 0xf2f   :  { %v8466_v55 = vsel %vm8195_vm5, %v8458_v3, %v8462_v46  ;;  %v8476_v27 = vsel %vm8195_vm5, %v8468_v61, %v8472_v48  ;;  %v8600_v49 = vrot.slane %v8168_v60, 3  ;;  %v8477_v9 = vsel %vm17073_vm8, %v17105_v4, %v17112_v57 }
 0xf30   :  { %v8300_v2 = vmul.f32 1.442695, %v8299_v45  ;;  %v17122_v30 = vsel %vm8184_vm7, %v8466_v55, %v8476_v27  ;;  %v17125_v62 = vsel %vm8195_vm5, %v8585_v63, %v8589_v47  ;;  %v17128_v1 = vsel %vm8195_vm5, %v8595_v58, %v8599_v54 }
 0xf31   :  { %v8594_v46 = vsel %vm8195_vm5, %v8586_v32, %v8590_v42  ;;  %v8604_v48 = vsel %vm8195_vm5, %v8596_v20, %v8600_v49  ;;  %v8821_v45 = vsel %vm17073_vm8, %v17112_v57, %v17105_v4  ;;  %v8605_v60 = vsel %vm17073_vm8, %v17125_v62, %v17128_v1 }
 0xf32   :  { %13424 = vpow2.f32 %v8300_v2  ;;  %v17142_v47 = vsel %vm8184_vm7, %v8594_v46, %v8604_v48  ;;  %v8713_v42 = vsel %vm17073_vm8, %v17128_v1, %v17125_v62  ;;  %v17150_v58 = vsel %vm8184_vm7, %v8604_v48, %v8594_v46 }
 0xf33   :  { %v17154_v61 = vsel %vm8184_vm7, %v8476_v27, %v8466_v55  ;;  %v8929_v63 = vsel %vm17073_vm8, %v17089_v52, %v17078_v17  ;;  %v17162_v3 = vsel %vm8184_vm7, %v8346_v24, %v8336_v0  ;;  %v9037_v32 = vsel %vm17073_vm8, %v17086_v50, %v17083_v7 }
 0xf34   :  { %v17170_v18 = vsel %vm8184_vm7, %v8209_v56, %v8197_v29  ;;  %v17174_v20 = vrot.slane %v17040_v31, %v17033_v21  ;;  %v8211_v53 = vsel %vm8184_vm7, %v8197_v29, %v8209_v56 }
 0xf36   :  { %v8296_v0 = vadd.f32 %v17024_v11, %v17174_v20 }
 0xf3c   :  { %v13425_v6 = vpop.eup %13424 }
 0xf3d   :  { %v8302_v54 = vadd.f32 1.0, %v13425_v6  ;;  %v18515_v6 = vsel %vm17073_vm8, %v17078_v17, %v17089_v52 }
 0xf3f   :  { %13426 = vrcp.f32 %v8302_v54 }
 0xf49   :  { %v13427_v14 = vpop.eup %13426 }
 0xf4a   :  { %v8305_v24 = vmul.f32 %v13427_v14, %v8296_v0  ;;  %v8308_v49 = vsub.f32 1.0, %v13427_v14  ;;  %v8314_v46 = vmul.f32 0.0, %v13427_v14 }
 0xf4c   :  { %v8306_v55 = vadd.f32 %v8305_v24, %v8211_v53 }
 0xf4e   :  { %13428 = vtanh.f32 %v8306_v55 }
 0xf58   :  { %v13429_v27 = vpop.eup %13428 }
 0xf59   :  { %8310 = vrot.lane.b32.xlu1 %v13429_v27, %s13509_s15 }
 0xfcb   :  { %v8311_v2 = vpop.permute.xlu1 %8310 }
 0xfcc   :  { %v8313_v48 = vmul.f32 %v8311_v2, %v8308_v49 }
 0xfce   :  { %v17181_v31 = vadd.f32 %v8314_v46, %v8313_v48 }
 0xfd0   :  { %8349 = vrot.lane.b32.xlu0 %v17181_v31, %s13509_s15  ;;  %8330 = vst.msk [vmem:[#allocation5 + $0x6] sm:$0x3] %vm8329_vm9, %v17181_v31 }
0x1042   :  { %v8350_v11 = vpop.permute.xlu0 %8349 }
0x1043   :  { %12274 = vmatmul.mubr.msk.f32.vlgmr.msra.gmra.mrb[38].mxu0 %vm8223_vm10, %v8350_v11 }
0x1044   :  { %13134 = vmatpush1.bf16.msra.mxu0 %v16942_v10  ;;  %8675 = vmatprep.mubr.f32.mxu0 %v18512_v23 }
0x1045   :  { %13136 = vmatprep.subr.bf16.mxu0 %v16954_v13 }
0x1048   :  { %13138 = vmatpush1.bf16.msra.mxu0 %v16962_v22 }
0x1049   :  { %13140 = vmatprep.subr.bf16.mxu0 %v16974_v15 }
0x104c   :  { %13142 = vmatpush1.bf16.msra.mxu0 %v16982_v5 }
0x104d   :  { %13144 = vmatprep.subr.bf16.mxu0 %v16994_v8 }
0x1050   :  { %13146 = vmatpush1.bf16.msra.mxu0 %v17002_v25 }
0x1051   :  { %13164 = vmatprep.subr.bf16.mxu0 %v16937_v19 }
0x1116   :  { %v8419_v12 = vpop.f32.mrb[38].mxu0 }
0x1117   :  { %v8420_v29 = vadd.f32 %v8419_v12, %v17050_v26  ;;  %v8421_v56 = vpop.f32.mrb[39].mxu0 }
0x1118   :  { %v8422_v55 = vadd.f32 %v8421_v56, %v17174_v20 }
0x1119   :  { %v8424_v54 = vadd.f32 %v8420_v29, %v18515_v6 }
0x111b   :  { %v8425_v0 = vsub.f32 0.0, %v8424_v54 }
0x111d   :  { %v8426_v14 = vmul.f32 1.442695, %v8425_v0 }
0x111f   :  { %13430 = vpow2.f32 %v8426_v14 }
0x1129   :  { %v13431_v24 = vpop.eup %13430 }
0x112a   :  { %v8428_v53 = vadd.f32 1.0, %v13431_v24 }
0x112c   :  { %13432 = vrcp.f32 %v8428_v53 }
0x1136   :  { %v13433_v27 = vpop.eup %13432 }
0x1137   :  { %v8431_v49 = vmul.f32 %v13433_v27, %v8422_v55  ;;  %v8434_v48 = vsub.f32 1.0, %v13433_v27  ;;  %v8440_v12 = vmul.f32 %v13433_v27, %v17181_v31 }
0x1139   :  { %v8432_v2 = vadd.f32 %v8431_v49, %v17109_v51 }
0x113b   :  { %13434 = vtanh.f32 %v8432_v2 }
0x1145   :  { %v13435_v46 = vpop.eup %13434 }
0x1146   :  { %8436 = vrot.lane.b32.xlu1 %v13435_v46, %s13509_s15 }
0x11b8   :  { %v8437_v11 = vpop.permute.xlu1 %8436 }
0x11b9   :  { %v8439_v29 = vmul.f32 %v8437_v11, %v8434_v48 }
0x11bb   :  { %v17207_v6 = vadd.f32 %v8440_v12, %v8439_v29 }
0x11bd   :  { %8479 = vrot.lane.b32.xlu1 %v17207_v6, %s13509_s15 }
0x122f   :  { %v8480_v54 = vpop.permute.xlu1 %8479 }
0x1230   :  { %12275 = vmatmul.mubr.msk.f32.vlgmr.msra.gmra.mrb[32].mxu1 %vm8223_vm10, %v8480_v54 }
0x1231   :  { %13150 = vmatpush1.bf16.msra.mxu1 %v16942_v10  ;;  %8783 = vmatprep.mubr.f32.mxu1 %v18512_v23 }
0x1232   :  { %13152 = vmatprep.subr.bf16.mxu1 %v16954_v13 }
0x1235   :  { %13154 = vmatpush1.bf16.msra.mxu1 %v16962_v22 }
0x1236   :  { %13156 = vmatprep.subr.bf16.mxu1 %v16974_v15 }
0x1239   :  { %13158 = vmatpush1.bf16.msra.mxu1 %v16982_v5 }
0x123a   :  { %13160 = vmatprep.subr.bf16.mxu1 %v16994_v8 }
0x123d   :  { %13162 = vmatpush1.bf16.msra.mxu1 %v17002_v25 }
0x123e   :  { %13180 = vmatprep.subr.bf16.mxu1 %v16937_v19 }
0x1303   :  { %v8549_v51 = vpop.f32.mrb[32].mxu1 }
0x1304   :  { %v8550_v56 = vadd.f32 %v8549_v51, %v17050_v26  ;;  %v8551_v0 = vpop.f32.mrb[33].mxu1 }
0x1305   :  { %v8552_v49 = vadd.f32 %v8551_v0, %v17174_v20 }
0x1306   :  { %v8554_v14 = vadd.f32 %v8550_v56, %v8477_v9 }
0x1308   :  { %v8555_v24 = vsub.f32 0.0, %v8554_v14 }
0x130a   :  { %v8556_v53 = vmul.f32 1.442695, %v8555_v24 }
0x130c   :  { %13436 = vpow2.f32 %v8556_v53 }
0x1316   :  { %v13437_v55 = vpop.eup %13436 }
0x1317   :  { %v8558_v27 = vadd.f32 1.0, %v13437_v55 }
0x1319   :  { %13438 = vrcp.f32 %v8558_v27 }
0x1323   :  { %v13439_v2 = vpop.eup %13438 }
0x1324   :  { %v8561_v46 = vmul.f32 %v13439_v2, %v8552_v49  ;;  %v8564_v12 = vsub.f32 1.0, %v13439_v2  ;;  %v8570_v9 = vmul.f32 %v13439_v2, %v17207_v6 }
0x1326   :  { %v8562_v48 = vadd.f32 %v8561_v46, %v17122_v30 }
0x1328   :  { %13440 = vtanh.f32 %v8562_v48 }
0x1332   :  { %v13441_v11 = vpop.eup %13440 }
0x1333   :  { %8566 = vrot.lane.b32.xlu1 %v13441_v11, %s13509_s15 }
0x13a5   :  { %v8567_v29 = vpop.permute.xlu1 %8566 }
0x13a6   :  { %v8569_v54 = vmul.f32 %v8567_v29, %v8564_v12 }
0x13a8   :  { %v17231_v51 = vadd.f32 %v8570_v9, %v8569_v54 }
0x13aa   :  { %8607 = vrot.lane.b32.xlu1 %v17231_v51, %s13509_s15  ;;  %8584 = vst.msk [vmem:[#allocation5 + $0x4] sm:$0x3] %vm8329_vm9, %v17231_v51 }
0x141c   :  { %v8608_v56 = vpop.permute.xlu1 %8607 }
0x141d   :  { %12276 = vmatmul.mubr.msk.f32.vlgmr.msra.gmra.mrb[40].mxu0 %vm8223_vm10, %v8608_v56 }
0x141e   :  { %13166 = vmatpush1.bf16.msra.mxu0 %v16942_v10  ;;  %8891 = vmatprep.mubr.f32.mxu0 %v18512_v23 }
0x141f   :  { %13168 = vmatprep.subr.bf16.mxu0 %v16954_v13 }
0x1422   :  { %13170 = vmatpush1.bf16.msra.mxu0 %v16962_v22 }
0x1423   :  { %13172 = vmatprep.subr.bf16.mxu0 %v16974_v15 }
0x1426   :  { %13174 = vmatpush1.bf16.msra.mxu0 %v16982_v5 }
0x1427   :  { %13176 = vmatprep.subr.bf16.mxu0 %v16994_v8 }
0x142a   :  { %13178 = vmatpush1.bf16.msra.mxu0 %v17002_v25 }
0x142b   :  { %13196 = vmatprep.subr.bf16.mxu0 %v16937_v19 }
0x14f0   :  { %v8677_v30 = vpop.f32.mrb[40].mxu0 }
0x14f1   :  { %v8678_v0 = vadd.f32 %v8677_v30, %v17050_v26  ;;  %v8679_v14 = vpop.f32.mrb[41].mxu0 }
0x14f2   :  { %v8680_v2 = vadd.f32 %v8679_v14, %v17174_v20 }
0x14f3   :  { %v8682_v24 = vadd.f32 %v8678_v0, %v8605_v60 }
0x14f5   :  { %v8683_v53 = vsub.f32 0.0, %v8682_v24 }
0x14f7   :  { %v8684_v55 = vmul.f32 1.442695, %v8683_v53 }
0x14f9   :  { %13442 = vpow2.f32 %v8684_v55 }
0x1503   :  { %v13443_v27 = vpop.eup %13442 }
0x1504   :  { %v8686_v49 = vadd.f32 1.0, %v13443_v27 }
0x1506   :  { %13444 = vrcp.f32 %v8686_v49 }
0x1510   :  { %v13445_v46 = vpop.eup %13444 }
0x1511   :  { %v8689_v19 = vmul.f32 %v13445_v46, %v8680_v2  ;;  %v8692_v12 = vsub.f32 1.0, %v13445_v46  ;;  %v8698_v60 = vmul.f32 %v13445_v46, %v17231_v51 }
0x1513   :  { %v8690_v48 = vadd.f32 %v8689_v19, %v17142_v47 }
0x1515   :  { %13446 = vtanh.f32 %v8690_v48 }
0x151f   :  { %v13447_v11 = vpop.eup %13446 }
0x1520   :  { %8694 = vrot.lane.b32.xlu1 %v13447_v11, %s13509_s15 }
0x1592   :  { %v8695_v29 = vpop.permute.xlu1 %8694 }
0x1593   :  { %v8697_v9 = vmul.f32 %v8695_v29, %v8692_v12 }
0x1595   :  { %v17257_v54 = vadd.f32 %v8698_v60, %v8697_v9 }
0x1597   :  { %8715 = vrot.lane.b32.xlu1 %v17257_v54, %s13509_s15 }
0x1609   :  { %v8716_v56 = vpop.permute.xlu1 %8715 }
0x160a   :  { %12277 = vmatmul.mubr.msk.f32.vlgmr.msra.gmra.mrb[34].mxu1 %vm8223_vm10, %v8716_v56 }
0x160b   :  { %13182 = vmatpush1.bf16.msra.mxu1 %v16942_v10  ;;  %8999 = vmatprep.mubr.f32.mxu1 %v18512_v23 }
0x160c   :  { %13184 = vmatprep.subr.bf16.mxu1 %v16954_v13 }
0x160f   :  { %13186 = vmatpush1.bf16.msra.mxu1 %v16962_v22 }
0x1610   :  { %13188 = vmatprep.subr.bf16.mxu1 %v16974_v15 }
0x1613   :  { %13190 = vmatpush1.bf16.msra.mxu1 %v16982_v5 }
0x1614   :  { %13192 = vmatprep.subr.bf16.mxu1 %v16994_v8 }
0x1617   :  { %13194 = vmatpush1.bf16.msra.mxu1 %v17002_v25 }
0x16dd   :  { %v8785_v47 = vpop.f32.mrb[34].mxu1 }
0x16de   :  { %v8786_v30 = vadd.f32 %v8785_v47, %v17050_v26  ;;  %v8787_v0 = vpop.f32.mrb[35].mxu1 }
0x16df   :  { %v8788_v49 = vadd.f32 %v8787_v0, %v17174_v20 }
0x16e0   :  { %v8790_v14 = vadd.f32 %v8786_v30, %v8713_v42 }
0x16e2   :  { %v8791_v24 = vsub.f32 0.0, %v8790_v14 }
0x16e4   :  { %v8792_v53 = vmul.f32 1.442695, %v8791_v24 }
0x16e6   :  { %13448 = vpow2.f32 %v8792_v53 }
0x16f0   :  { %v13449_v55 = vpop.eup %13448 }
0x16f1   :  { %v8794_v27 = vadd.f32 1.0, %v13449_v55 }
0x16f3   :  { %13450 = vrcp.f32 %v8794_v27 }
0x16fd   :  { %v13451_v2 = vpop.eup %13450 }
0x16fe   :  { %v8797_v46 = vmul.f32 %v13451_v2, %v8788_v49  ;;  %v8800_v11 = vsub.f32 1.0, %v13451_v2  ;;  %v8806_v62 = vmul.f32 %v13451_v2, %v17257_v54 }
0x1700   :  { %v8798_v19 = vadd.f32 %v8797_v46, %v17150_v58 }
0x1702   :  { %13452 = vtanh.f32 %v8798_v19 }
0x170c   :  { %v13453_v48 = vpop.eup %13452 }
0x170d   :  { %8802 = vrot.lane.b32.xlu0 %v13453_v48, %s13509_s15 }
0x177f   :  { %v8803_v12 = vpop.permute.xlu0 %8802 }
0x1780   :  { %v8805_v1 = vmul.f32 %v8803_v12, %v8800_v11 }
0x1782   :  { %v17280_v42 = vadd.f32 %v8806_v62, %v8805_v1 }
0x1784   :  { %8823 = vrot.lane.b32.xlu1 %v17280_v42, %s13509_s15 }
0x17f6   :  { %v8824_v29 = vpop.permute.xlu1 %8823 }
0x17f7   :  { %12278 = vmatmul.mubr.msk.f32.vlgmr.msra.gmra.mrb[42].mxu0 %vm8223_vm10, %v8824_v29  ;;  %v13521_v29 = vmov 1983009808  }
0x17f8   :  { %13198 = vmatpush1.bf16.msra.mxu0 %v16942_v10  ;;  %9107 = vmatprep.mubr.f32.mxu0 %v18512_v23 }
0x17f9   :  { %13200 = vmatprep.subr.bf16.mxu0 %v16954_v13 }
0x17fc   :  { %13202 = vmatpush1.bf16.msra.mxu0 %v16962_v22 }
0x17fd   :  { %13204 = vmatprep.subr.bf16.mxu0 %v16974_v15 }
0x1800   :  { %13206 = vmatpush1.bf16.msra.mxu0 %v16982_v5 }
0x1801   :  { %13208 = vmatprep.subr.bf16.mxu0 %v16994_v8 }
0x1804   :  { %13210 = vmatpush1.bf16.msra.mxu0 %v17002_v25 }
0x18ca   :  { %v8893_v58 = vpop.f32.mrb[42].mxu0 }
0x18cb   :  { %v8894_v60 = vadd.f32 %v8893_v58, %v17050_v26  ;;  %v8895_v9 = vpop.f32.mrb[43].mxu0  ;;  %v8318_v58 = vunpack.c.l.s4 %v13521_v29 }
0x18cc   :  { %v8896_v5 = vadd.f32 %v8895_v9, %v17174_v20 }
0x18cd   :  { %v8898_v10 = vadd.f32 %v8894_v60, %v8821_v45  ;;  %v8319_v17 = vunpack.c.0.s8 %v8318_v58 }
0x18cf   :  { %v8899_v13 = vsub.f32 0.0, %v8898_v10 }
0x18d1   :  { %v8900_v22 = vmul.f32 1.442695, %v8899_v13  ;;  %v17319_v13 = vsub.s32 %v8319_v17, %v16584_v28 }
0x18d3   :  { %13454 = vpow2.f32 %v8900_v22  ;;  %v8451_v22 = vrot.slane %v17207_v6, %v17319_v13  ;;  %v8579_v50 = vrot.slane %v17231_v51, %v17319_v13  ;;  %v8708_v59 = vrot.slane %v17257_v54, %v17319_v13 }
0x18dd   :  { %v13455_v15 = vpop.eup %13454 }
0x18de   :  { %v8902_v56 = vadd.f32 1.0, %v13455_v15  ;;  %v8815_v15 = vrot.slane %v17280_v42, %v17319_v13 }
0x18e0   :  { %13456 = vrcp.f32 %v8902_v56 }
0x18ea   :  { %v13457_v8 = vpop.eup %13456 }
0x18eb   :  { %v8905_v25 = vmul.f32 %v13457_v8, %v8896_v5  ;;  %v8908_v0 = vsub.f32 1.0, %v13457_v8  ;;  %v8914_v4 = vmul.f32 %v13457_v8, %v17280_v42 }
0x18ed   :  { %v8906_v47 = vadd.f32 %v8905_v25, %v17154_v61 }
0x18ef   :  { %13458 = vtanh.f32 %v8906_v47 }
0x18f9   :  { %v13459_v30 = vpop.eup %13458 }
0x18fa   :  { %8910 = vrot.lane.b32.xlu0 %v13459_v30, %s13509_s15 }
0x196c   :  { %v8911_v14 = vpop.permute.xlu0 %8910 }
0x196d   :  { %v8913_v57 = vmul.f32 %v8911_v14, %v8908_v0 }
0x196f   :  { %v17303_v45 = vadd.f32 %v8914_v4, %v8913_v57 }
0x1971   :  { %8931 = vrot.lane.b32.xlu1 %v17303_v45, %s13509_s15  ;;  %v8924_v56 = vrot.slane %v17303_v45, %v17319_v13 }
0x19e3   :  { %v8932_v24 = vpop.permute.xlu1 %8931 }
0x19e4   :  { %12279 = vmatmul.mubr.msk.f32.vlgmr.msra.gmra.mrb[36].mxu1 %vm8223_vm10, %v8932_v24 }
0x1ab7   :  { %v9001_v53 = vpop.f32.mrb[36].mxu1 }
0x1ab8   :  { %v9002_v61 = vadd.f32 %v9001_v53, %v17050_v26  ;;  %v9003_v55 = vpop.f32.mrb[37].mxu1 }
0x1ab9   :  { %v9004_v48 = vadd.f32 %v9003_v55, %v17174_v20 }
0x1aba   :  { %v9006_v27 = vadd.f32 %v9002_v61, %v8929_v63 }
0x1abc   :  { %v9007_v49 = vsub.f32 0.0, %v9006_v27 }
0x1abe   :  { %v9008_v2 = vmul.f32 1.442695, %v9007_v49 }
0x1ac0   :  { %13460 = vpow2.f32 %v9008_v2 }
0x1aca   :  { %v13461_v46 = vpop.eup %13460 }
0x1acb   :  { %v9010_v19 = vadd.f32 1.0, %v13461_v46 }
0x1acd   :  { %13462 = vrcp.f32 %v9010_v19 }
0x1ad7   :  { %v13463_v11 = vpop.eup %13462 }
0x1ad8   :  { %v9013_v12 = vmul.f32 %v13463_v11, %v9004_v48  ;;  %v9016_v52 = vsub.f32 1.0, %v13463_v11  ;;  %v9022_v60 = vmul.f32 %v13463_v11, %v17303_v45 }
0x1ada   :  { %v9014_v62 = vadd.f32 %v9013_v12, %v17162_v3  ;;  %v8323_v3 = vrot.slane %v17181_v31, %v17319_v13 }
0x1adc   :  { %13464 = vtanh.f32 %v9014_v62 }
0x1ae6   :  { %v13465_v1 = vpop.eup %13464 }
0x1ae7   :  { %9018 = vrot.lane.b32.xlu0 %v13465_v1, %s13509_s15 }
0x1b59   :  { %v9019_v63 = vpop.permute.xlu0 %9018 }
0x1b5a   :  { %v9021_v9 = vmul.f32 %v9019_v63, %v9016_v52 }
0x1b5c   :  { %v9023_v10 = vadd.f32 %v9022_v60, %v9021_v9 }
0x1b5e   :  { %9039 = vrot.lane.b32.xlu1 %v9023_v10, %s13509_s15  ;;  %v9031_v7 = vrot.slane %v9023_v10, %v17319_v13 }
0x1b62   :  { %8324 = vrot.lane.b32.xlu1 %v8323_v3, %s13509_s15 }
0x1b66   :  { %8452 = vrot.lane.b32.xlu1 %v8451_v22, %s13509_s15 }
0x1b6a   :  { %8816 = vrot.lane.b32.xlu1 %v8815_v15, %s13509_s15 }
0x1b6e   :  { %8925 = vrot.lane.b32.xlu1 %v8924_v56, %s13509_s15 }
0x1bd0   :  { %v9040_v5 = vpop.permute.xlu1 %9039 }
0x1bd1   :  { %12280 = vmatmul.mubr.msk.f32.vlgmr.msra.gmra.mrb[44].mxu0 %vm8223_vm10, %v9040_v5 }
0x1bd4   :  { %v8325_v31 = vpop.permute.xlu1 %8324 }
0x1bd5   :  { %8328 = vst.msk [vmem:[#allocation5] sm:$0x3] %vm8327_vm11, %v8325_v31 }
0x1bd6   :  { %8443 = vst.msk [vmem:[#allocation5] sm:$0x3] %vm8442_vm12, %v17207_v6 }
0x1bd7   :  { %9036 = vst.msk [vmem:[#allocation5] sm:$0x3] %vm8329_vm9, %v9023_v10 }
0x1bd8   :  { %v8453_v8 = vpop.permute.xlu1 %8452 }
0x1bd9   :  { %8456 = vst.msk [vmem:[#allocation5 + $0x6] sm:$0x3] %vm8455_vm13, %v8453_v8 }
0x1ca4   :  { %v9109_v25 = vpop.f32.mrb[44].mxu0 }
0x1ca5   :  { %v9110_v47 = vadd.f32 %v9109_v25, %v17050_v26  ;;  %v9111_v30 = vpop.f32.mrb[45].mxu0 }
0x1ca6   :  { %v9112_v24 = vadd.f32 %v9111_v30, %v17174_v20  ;;  %v8817_v20 = vpop.permute.xlu1 %8816 }
0x1ca7   :  { %v9114_v0 = vadd.f32 %v9110_v47, %v9037_v32 }
0x1ca9   :  { %v9115_v14 = vsub.f32 0.0, %v9114_v0 }
0x1caa   :  { %v8926_v19 = vpop.permute.xlu1 %8925 }
0x1cab   :  { %v9116_v4 = vmul.f32 1.442695, %v9115_v14 }
0x1cad   :  { %13466 = vpow2.f32 %v9116_v4 }
0x1cb7   :  { %v13467_v6 = vpop.eup %13466 }
0x1cb8   :  { %v9118_v57 = vadd.f32 1.0, %v13467_v6 }
0x1cba   :  { %13468 = vrcp.f32 %v9118_v57 }
0x1cc4   :  { %v13469_v53 = vpop.eup %13468 }
0x1cc5   :  { %v9121_v61 = vmul.f32 %v13469_v53, %v9112_v24  ;;  %v9124_v32 = vsub.f32 1.0, %v13469_v53  ;;  %v9130_v27 = vmul.f32 %v13469_v53, %v9023_v10 }
0x1cc7   :  { %v9122_v55 = vadd.f32 %v9121_v61, %v17170_v18 }
0x1cc9   :  { %13470 = vtanh.f32 %v9122_v55 }
0x1cd3   :  { %v13471_v26 = vpop.eup %13470 }
0x1cd4   :  { %9126 = vrot.lane.b32.xlu0 %v13471_v26, %s13509_s15 }
0x1cd8   :  { %8580 = vrot.lane.b32.xlu0 %v8579_v50, %s13509_s15 }
0x1cdc   :  { %8709 = vrot.lane.b32.xlu0 %v8708_v59, %s13509_s15 }
0x1ce0   :  { %9032 = vrot.lane.b32.xlu0 %v9031_v7, %s13509_s15 }
0x1d46   :  { %v9127_v18 = vpop.permute.xlu0 %9126 }
0x1d47   :  { %v9129_v49 = vmul.f32 %v9127_v18, %v9124_v32 }
0x1d49   :  { %v9131_v2 = vadd.f32 %v9130_v27, %v9129_v49 }
0x1d4a   :  { %v8581_v46 = vpop.permute.xlu0 %8580 }
0x1d4b   :  { %8583 = vst.msk [vmem:[#allocation5 + $0x2] sm:$0x3] %vm8327_vm11, %v8581_v46  ;;  %v9140_v51 = vrot.slane %v9131_v2, %v17319_v13 }
0x1d4c   :  { %8700 = vst.msk [vmem:[#allocation5 + $0x2] sm:$0x3] %vm8442_vm12, %v17257_v54 }
0x1d4d   :  { %8820 = vst.msk [vmem:[#allocation5 + $0x2] sm:$0x3] %vm8329_vm9, %v17280_v42  ;;  %9141 = vrot.lane.b32.xlu0 %v9140_v51, %s13509_s15 }
0x1d4e   :  { %8928 = vst.msk [vmem:[#allocation5 + $0x2] sm:$0x3] %vm8455_vm13, %v8926_v19  ;;  %v8710_v48 = vpop.permute.xlu0 %8709 }
0x1d4f   :  { %8712 = vst.msk [vmem:[#allocation5 + $0x4] sm:$0x3] %vm8455_vm13, %v8710_v48 }
0x1d50   :  { %8819 = vst.msk [vmem:[#allocation5 + $0x4] sm:$0x3] %vm8327_vm11, %v8817_v20 }
0x1d51   :  { %8916 = vst.msk [vmem:[#allocation5 + $0x4] sm:$0x3] %vm8442_vm12, %v17303_v45 }
0x1d52   :  { %v9033_v11 = vpop.permute.xlu0 %9032 }
0x1d53   :  { %9035 = vst.msk [vmem:[#allocation5 + $0x6] sm:$0x3] %vm8327_vm11, %v9033_v11 }
0x1d54   :  { %9132 = vst.msk [vmem:[#allocation5 + $0x6] sm:$0x3] %vm8442_vm12, %v9131_v2 }
0x1dbf   :  { %v9142_v54 = vpop.permute.xlu0 %9141 }
0x1dc0   :  { %9144 = vst.msk [vmem:[#allocation5] sm:$0x3] %vm8455_vm13, %v9142_v54 }
0x1dc7   :  { %v17372_v42 = vld [vmem:[#allocation5] sm:$0xff] }
0x1dc8   :  { %13498 = dma.done.wait [#allocation6], 32768 }
0x1dc9   :  { %13499 = vsyncadd [#allocation6], 4294934528  ;;  %v17376_v12 = vrot.slane %v17372_v42, %v17319_v13  ;;  %v9177_v1 = vld [vmem:[#allocation2 + $0x8] sm:$0xff]  ;;  %v9179_v29 = vld [vmem:[#allocation2 + $0x18] sm:$0xff] }
0x1dca   :  { %v9176_v58 = vld [vmem:[#allocation2] sm:$0xff]  ;;  %9474 = vmatprep.subr.bf16.mxu1 %v9177_v1  ;;  %9556 = vmatprep.subr.bf16.mxu0 %v9179_v29  ;;  %v9178_v52 = vld [vmem:[#allocation2 + $0x10] sm:$0xff]  ;;  %v9185_v17 = vld [vmem:[#allocation2 + $0x48] sm:$0xff] }
0x1dcb   :  { %v9166_v62 = vcombine.high %v17376_v12, %v17376_v12  ;;  %v9187_v63 = vld [vmem:[#allocation2 + $0x58] sm:$0xff]  ;;  %9475 = vmatpush1.bf16.msra.mxu1 %v9176_v58  ;;  %9557 = vmatpush1.bf16.msra.mxu0 %v9178_v52  ;;  %v9184_v60 = vld [vmem:[#allocation2 + $0x40] sm:$0xff]  ;;  %v9186_v9 = vld [vmem:[#allocation2 + $0x50] sm:$0xff] }
0x1dcc   :  { %9476 = vmatprep.subr.bf16.mxu1 %v9185_v17  ;;  %9558 = vmatprep.subr.bf16.mxu0 %v9187_v63  ;;  %v9193_v10 = vld [vmem:[#allocation2 + $0x88] sm:$0xff]  ;;  %v9195_v3 = vld [vmem:[#allocation2 + $0x98] sm:$0xff]  ;;  %v9192_v22 = vld [vmem:[#allocation2 + $0x80] sm:$0xff] }
0x1dcd   :  { %v17380_v45 = vpack.c.bf16 %v9166_v62, %v9166_v62  ;;  %v9194_v15 = vld [vmem:[#allocation2 + $0x90] sm:$0xff]  ;;  %v9201_v56 = vld [vmem:[#allocation2 + $0xc8] sm:$0xff]  ;;  %v9203_v5 = vld [vmem:[#allocation2 + $0xd8] sm:$0xff] }
0x1dce   :  { %v9200_v31 = vld [vmem:[#allocation2 + $0xc0] sm:$0xff]  ;;  %v9202_v8 = vld [vmem:[#allocation2 + $0xd0] sm:$0xff]  ;;  %v9209_v25 = vld [vmem:[#allocation2 + $0x108] sm:$0xff] }
0x1dcf   :  { %9506 = vmatprep.mubr.bf16.mxu1 %v17380_v45  ;;  %9588 = vmatprep.mubr.bf16.mxu0 %v17380_v45  ;;  %v9211_v47 = vld [vmem:[#allocation2 + $0x118] sm:$0xff]  ;;  %v9208_v30 = vld [vmem:[#allocation2 + $0x100] sm:$0xff]  ;;  %v9210_v0 = vld [vmem:[#allocation2 + $0x110] sm:$0xff] }
0x1dd0   :  { %9477 = vmatpush1.bf16.msra.mxu1 %v9184_v60  ;;  %9559 = vmatpush1.bf16.msra.mxu0 %v9186_v9  ;;  %v9217_v14 = vld [vmem:[#allocation2 + $0x148] sm:$0xff]  ;;  %v9219_v4 = vld [vmem:[#allocation2 + $0x158] sm:$0xff]  ;;  %v9216_v6 = vld [vmem:[#allocation2 + $0x140] sm:$0xff] }
0x1dd1   :  { %9478 = vmatprep.subr.bf16.mxu1 %v9193_v10  ;;  %9560 = vmatprep.subr.bf16.mxu0 %v9195_v3  ;;  %v9218_v57 = vld [vmem:[#allocation2 + $0x150] sm:$0xff]  ;;  %v9225_v24 = vld [vmem:[#allocation2 + $0x188] sm:$0xff]  ;;  %v9227_v53 = vld [vmem:[#allocation2 + $0x198] sm:$0xff] }
0x1dd2   :  { %v9224_v61 = vld [vmem:[#allocation2 + $0x180] sm:$0xff]  ;;  %v9226_v55 = vld [vmem:[#allocation2 + $0x190] sm:$0xff]  ;;  %v9233_v26 = vld [vmem:[#allocation2 + $0x1c8] sm:$0xff] }
0x1dd3   :  { %v9235_v50 = vld [vmem:[#allocation2 + $0x1d8] sm:$0xff]  ;;  %v9232_v59 = vld [vmem:[#allocation2 + $0x1c0] sm:$0xff]  ;;  %v9234_v7 = vld [vmem:[#allocation2 + $0x1d0] sm:$0xff] }
0x1dd4   :  { %9479 = vmatpush1.bf16.msra.mxu1 %v9192_v22  ;;  %9561 = vmatpush1.bf16.msra.mxu0 %v9194_v15  ;;  %v9241_v32 = vld [vmem:[#allocation2 + $0x208] sm:$0xff]  ;;  %v9243_v18 = vld [vmem:[#allocation2 + $0x218] sm:$0xff]  ;;  %v9240_v20 = vld [vmem:[#allocation2 + $0x200] sm:$0xff] }
0x1dd5   :  { %9480 = vmatprep.subr.bf16.mxu1 %v9201_v56  ;;  %9562 = vmatprep.subr.bf16.mxu0 %v9203_v5  ;;  %v9242_v27 = vld [vmem:[#allocation2 + $0x210] sm:$0xff]  ;;  %v9249_v49 = vld [vmem:[#allocation2 + $0x248] sm:$0xff]  ;;  %v9251_v2 = vld [vmem:[#allocation2 + $0x258] sm:$0xff]  ;;  %v9151_v5 = vcombine.high %v17372_v42, %v17372_v42 }
0x1dd6   :  { %v9248_v46 = vld [vmem:[#allocation2 + $0x240] sm:$0xff]  ;;  %v9250_v51 = vld [vmem:[#allocation2 + $0x250] sm:$0xff]  ;;  %v9257_v19 = vld [vmem:[#allocation2 + $0x288] sm:$0xff] }
0x1dd7   :  { %v9259_v48 = vld [vmem:[#allocation2 + $0x298] sm:$0xff]  ;;  %v9256_v11 = vld [vmem:[#allocation2 + $0x280] sm:$0xff]  ;;  %v9258_v54 = vld [vmem:[#allocation2 + $0x290] sm:$0xff] }
0x1dd8   :  { %9481 = vmatpush1.bf16.msra.mxu1 %v9200_v31  ;;  %9563 = vmatpush1.bf16.msra.mxu0 %v9202_v8  ;;  %v9265_v62 = vld [vmem:[#allocation2 + $0x2c8] sm:$0xff]  ;;  %v9267_v1 = vld [vmem:[#allocation2 + $0x2d8] sm:$0xff]  ;;  %v9264_v29 = vld [vmem:[#allocation2 + $0x2c0] sm:$0xff] }
0x1dd9   :  { %9482 = vmatprep.subr.bf16.mxu1 %v9209_v25  ;;  %9564 = vmatprep.subr.bf16.mxu0 %v9211_v47  ;;  %v9266_v58 = vld [vmem:[#allocation2 + $0x2d0] sm:$0xff]  ;;  %v9273_v52 = vld [vmem:[#allocation2 + $0x308] sm:$0xff]  ;;  %v9275_v17 = vld [vmem:[#allocation2 + $0x318] sm:$0xff] }
0x1dda   :  { %v9272_v63 = vld [vmem:[#allocation2 + $0x300] sm:$0xff]  ;;  %v9274_v60 = vld [vmem:[#allocation2 + $0x310] sm:$0xff]  ;;  %v9281_v9 = vld [vmem:[#allocation2 + $0x348] sm:$0xff] }
0x1ddb   :  { %v9283_v10 = vld [vmem:[#allocation2 + $0x358] sm:$0xff]  ;;  %v9280_v3 = vld [vmem:[#allocation2 + $0x340] sm:$0xff]  ;;  %v9282_v22 = vld [vmem:[#allocation2 + $0x350] sm:$0xff] }
0x1ddc   :  { %9483 = vmatpush1.bf16.msra.mxu1 %v9208_v30  ;;  %9565 = vmatpush1.bf16.msra.mxu0 %v9210_v0  ;;  %v9289_v15 = vld [vmem:[#allocation2 + $0x388] sm:$0xff]  ;;  %v9291_v56 = vld [vmem:[#allocation2 + $0x398] sm:$0xff]  ;;  %v9288_v31 = vld [vmem:[#allocation2 + $0x380] sm:$0xff]  ;;  %v17387_v30 = vrot.slane %v9151_v5, %v17319_v13 }
0x1ddd   :  { %9484 = vmatprep.subr.bf16.mxu1 %v9217_v14  ;;  %9566 = vmatprep.subr.bf16.mxu0 %v9219_v4  ;;  %v9290_v8 = vld [vmem:[#allocation2 + $0x390] sm:$0xff]  ;;  %v9297_v25 = vld [vmem:[#allocation2 + $0x3c8] sm:$0xff]  ;;  %v9299_v47 = vld [vmem:[#allocation2 + $0x3d8] sm:$0xff] }
0x1dde   :  { %v9296_v0 = vld [vmem:[#allocation2 + $0x3c0] sm:$0xff]  ;;  %v9298_v14 = vld [vmem:[#allocation2 + $0x3d0] sm:$0xff]  ;;  %v9305_v4 = vld [vmem:[#allocation2 + $0x408] sm:$0xff]  ;;  %v9167_v42 = vcombine.high %v17387_v30, %v17387_v30 }
0x1ddf   :  { %v9304_v13 = vld [vmem:[#allocation2 + $0x400] sm:$0xff]  ;;  %v9379_v5 = vld [vmem:[#allocation2 + $0x658] sm:$0xff] }
0x1de0   :  { %9485 = vmatpush1.bf16.msra.mxu1 %v9216_v6  ;;  %9567 = vmatpush1.bf16.msra.mxu0 %v9218_v57  ;;  %v9307_v6 = vld [vmem:[#allocation2 + $0x418] sm:$0xff]  ;;  %v17393_v57 = vpack.c.bf16 %v17376_v12, %v17376_v12  ;;  %v9312_v12 = vld [vmem:[#allocation2 + $0x440] sm:$0xff] }
0x1de1   :  { %9486 = vmatprep.subr.bf16.mxu1 %v9225_v24  ;;  %9568 = vmatprep.subr.bf16.mxu0 %v9227_v53  ;;  %v9306_v24 = vld [vmem:[#allocation2 + $0x410] sm:$0xff]  ;;  %v9313_v53 = vld [vmem:[#allocation2 + $0x448] sm:$0xff] }
0x1de4   :  { %9487 = vmatpush1.bf16.msra.mxu1 %v9224_v61  ;;  %9569 = vmatpush1.bf16.msra.mxu0 %v9226_v55  ;;  %v9315_v61 = vld [vmem:[#allocation2 + $0x458] sm:$0xff]  ;;  %v17395_v55 = vpack.c.bf16 %v9167_v42, %v9167_v42  ;;  %v9392_v42 = vld [vmem:[#allocation2 + $0x6c0] sm:$0xff] }
0x1de5   :  { %9488 = vmatprep.subr.bf16.mxu1 %v9233_v26  ;;  %9570 = vmatprep.subr.bf16.mxu0 %v9235_v50  ;;  %v9314_v26 = vld [vmem:[#allocation2 + $0x450] sm:$0xff]  ;;  %v9321_v50 = vld [vmem:[#allocation2 + $0x488] sm:$0xff] }
0x1de8   :  { %9489 = vmatpush1.bf16.msra.mxu1 %v9232_v59  ;;  %9571 = vmatpush1.bf16.msra.mxu0 %v9234_v7  ;;  %v9323_v59 = vld [vmem:[#allocation2 + $0x498] sm:$0xff]  ;;  %v9320_v7 = vld [vmem:[#allocation2 + $0x480] sm:$0xff] }
0x1de9   :  { %9490 = vmatprep.subr.bf16.mxu1 %v9241_v32  ;;  %9572 = vmatprep.subr.bf16.mxu0 %v9243_v18  ;;  %v9322_v32 = vld [vmem:[#allocation2 + $0x490] sm:$0xff]  ;;  %v9329_v18 = vld [vmem:[#allocation2 + $0x4c8] sm:$0xff] }
0x1dec   :  { %9491 = vmatpush1.bf16.msra.mxu1 %v9240_v20  ;;  %9573 = vmatpush1.bf16.msra.mxu0 %v9242_v27  ;;  %v9331_v20 = vld [vmem:[#allocation2 + $0x4d8] sm:$0xff]  ;;  %v9328_v27 = vld [vmem:[#allocation2 + $0x4c0] sm:$0xff] }
0x1ded   :  { %9492 = vmatprep.subr.bf16.mxu1 %v9249_v49  ;;  %9574 = vmatprep.subr.bf16.mxu0 %v9251_v2  ;;  %v9330_v49 = vld [vmem:[#allocation2 + $0x4d0] sm:$0xff]  ;;  %v9337_v2 = vld [vmem:[#allocation2 + $0x508] sm:$0xff] }
0x1df0   :  { %9493 = vmatpush1.bf16.msra.mxu1 %v9248_v46  ;;  %9575 = vmatpush1.bf16.msra.mxu0 %v9250_v51  ;;  %v9339_v46 = vld [vmem:[#allocation2 + $0x518] sm:$0xff]  ;;  %v9336_v51 = vld [vmem:[#allocation2 + $0x500] sm:$0xff] }
0x1df1   :  { %9494 = vmatprep.subr.bf16.mxu1 %v9257_v19  ;;  %9576 = vmatprep.subr.bf16.mxu0 %v9259_v48  ;;  %v9338_v19 = vld [vmem:[#allocation2 + $0x510] sm:$0xff]  ;;  %v9345_v48 = vld [vmem:[#allocation2 + $0x548] sm:$0xff] }
0x1df4   :  { %9495 = vmatpush1.bf16.msra.mxu1 %v9256_v11  ;;  %9577 = vmatpush1.bf16.msra.mxu0 %v9258_v54  ;;  %v9347_v11 = vld [vmem:[#allocation2 + $0x558] sm:$0xff]  ;;  %v9344_v54 = vld [vmem:[#allocation2 + $0x540] sm:$0xff] }
0x1df5   :  { %9496 = vmatprep.subr.bf16.mxu1 %v9265_v62  ;;  %9578 = vmatprep.subr.bf16.mxu0 %v9267_v1  ;;  %v9346_v62 = vld [vmem:[#allocation2 + $0x550] sm:$0xff]  ;;  %v9353_v1 = vld [vmem:[#allocation2 + $0x588] sm:$0xff] }
0x1df8   :  { %9497 = vmatpush1.bf16.msra.mxu1 %v9264_v29  ;;  %9579 = vmatpush1.bf16.msra.mxu0 %v9266_v58  ;;  %v9355_v29 = vld [vmem:[#allocation2 + $0x598] sm:$0xff]  ;;  %v9352_v58 = vld [vmem:[#allocation2 + $0x580] sm:$0xff] }
0x1df9   :  { %9498 = vmatprep.subr.bf16.mxu1 %v9273_v52  ;;  %9580 = vmatprep.subr.bf16.mxu0 %v9275_v17  ;;  %v9354_v52 = vld [vmem:[#allocation2 + $0x590] sm:$0xff]  ;;  %v9361_v17 = vld [vmem:[#allocation2 + $0x5c8] sm:$0xff] }
0x1dfc   :  { %9499 = vmatpush1.bf16.msra.mxu1 %v9272_v63  ;;  %9581 = vmatpush1.bf16.msra.mxu0 %v9274_v60  ;;  %v9363_v63 = vld [vmem:[#allocation2 + $0x5d8] sm:$0xff]  ;;  %v9360_v60 = vld [vmem:[#allocation2 + $0x5c0] sm:$0xff] }
0x1dfd   :  { %9500 = vmatprep.subr.bf16.mxu1 %v9281_v9  ;;  %9582 = vmatprep.subr.bf16.mxu0 %v9283_v10  ;;  %v9362_v9 = vld [vmem:[#allocation2 + $0x5d0] sm:$0xff]  ;;  %v9369_v10 = vld [vmem:[#allocation2 + $0x608] sm:$0xff] }
0x1e00   :  { %9501 = vmatpush1.bf16.msra.mxu1 %v9280_v3  ;;  %9583 = vmatpush1.bf16.msra.mxu0 %v9282_v22  ;;  %v9371_v3 = vld [vmem:[#allocation2 + $0x618] sm:$0xff]  ;;  %v9368_v22 = vld [vmem:[#allocation2 + $0x600] sm:$0xff] }
0x1e01   :  { %9502 = vmatprep.subr.bf16.mxu1 %v9289_v15  ;;  %9584 = vmatprep.subr.bf16.mxu0 %v9291_v56  ;;  %v9370_v15 = vld [vmem:[#allocation2 + $0x610] sm:$0xff]  ;;  %v9377_v56 = vld [vmem:[#allocation2 + $0x648] sm:$0xff] }
0x1e04   :  { %9503 = vmatpush1.bf16.msra.mxu1 %v9288_v31  ;;  %9585 = vmatpush1.bf16.msra.mxu0 %v9290_v8  ;;  %v9376_v31 = vld [vmem:[#allocation2 + $0x640] sm:$0xff]  ;;  %v9378_v8 = vld [vmem:[#allocation2 + $0x650] sm:$0xff] }
0x1e05   :  { %9504 = vmatprep.subr.bf16.mxu1 %v9297_v25  ;;  %9586 = vmatprep.subr.bf16.mxu0 %v9299_v47  ;;  %v9385_v25 = vld [vmem:[#allocation2 + $0x688] sm:$0xff]  ;;  %v9387_v47 = vld [vmem:[#allocation2 + $0x698] sm:$0xff] }
0x1e08   :  { %9505 = vmatpush1.bf16.msra.mxu1 %v9296_v0  ;;  %9587 = vmatpush1.bf16.msra.mxu0 %v9298_v14  ;;  %v9384_v0 = vld [vmem:[#allocation2 + $0x680] sm:$0xff]  ;;  %v9386_v14 = vld [vmem:[#allocation2 + $0x690] sm:$0xff] }
0x1e09   :  { %9515 = vmatprep.subr.bf16.mxu1 %v9305_v4  ;;  %9597 = vmatprep.subr.bf16.mxu0 %v9307_v6  ;;  %v9393_v4 = vld [vmem:[#allocation2 + $0x6c8] sm:$0xff]  ;;  %v9395_v6 = vld [vmem:[#allocation2 + $0x6d8] sm:$0xff] }
0x1e0b   :  { %9507 = vmatmul.mubr.bf16.vlgmr.msra.gmra.mrb[40].mxu1 %v17393_v57  ;;  %9589 = vmatmul.mubr.bf16.vlgmr.msra.gmra.mrb[48].mxu0 %v17393_v57 }
0x1e0c   :  { %9516 = vmatpush1.bf16.msra.mxu1 %v9304_v13  ;;  %9598 = vmatpush1.bf16.msra.mxu0 %v9306_v24  ;;  %v9394_v13 = vld [vmem:[#allocation2 + $0x6d0] sm:$0xff]  ;;  %v9401_v24 = vld [vmem:[#allocation2 + $0x708] sm:$0xff] }
0x1e0d   :  { %9517 = vmatprep.subr.bf16.mxu1 %v9313_v53  ;;  %9599 = vmatprep.subr.bf16.mxu0 %v9315_v61  ;;  %v9403_v53 = vld [vmem:[#allocation2 + $0x718] sm:$0xff]  ;;  %v9400_v61 = vld [vmem:[#allocation2 + $0x700] sm:$0xff] }
0x1e0e   :  { %9547 = vmatprep.mubr.bf16.mxu1 %v17395_v55  ;;  %9629 = vmatprep.mubr.bf16.mxu0 %v17395_v55 }
0x1e10   :  { %9518 = vmatpush1.bf16.msra.mxu1 %v9312_v12  ;;  %9600 = vmatpush1.bf16.msra.mxu0 %v9314_v26  ;;  %v9402_v12 = vld [vmem:[#allocation2 + $0x710] sm:$0xff]  ;;  %v9409_v26 = vld [vmem:[#allocation2 + $0x748] sm:$0xff] }
0x1e11   :  { %9519 = vmatprep.subr.bf16.mxu1 %v9321_v50  ;;  %9601 = vmatprep.subr.bf16.mxu0 %v9323_v59  ;;  %v9411_v50 = vld [vmem:[#allocation2 + $0x758] sm:$0xff]  ;;  %v9408_v59 = vld [vmem:[#allocation2 + $0x740] sm:$0xff] }
0x1e14   :  { %9520 = vmatpush1.bf16.msra.mxu1 %v9320_v7  ;;  %9602 = vmatpush1.bf16.msra.mxu0 %v9322_v32  ;;  %v9410_v7 = vld [vmem:[#allocation2 + $0x750] sm:$0xff]  ;;  %v9417_v32 = vld [vmem:[#allocation2 + $0x788] sm:$0xff] }
0x1e15   :  { %9521 = vmatprep.subr.bf16.mxu1 %v9329_v18  ;;  %9603 = vmatprep.subr.bf16.mxu0 %v9331_v20  ;;  %v9419_v18 = vld [vmem:[#allocation2 + $0x798] sm:$0xff]  ;;  %v9416_v20 = vld [vmem:[#allocation2 + $0x780] sm:$0xff] }
0x1e18   :  { %9522 = vmatpush1.bf16.msra.mxu1 %v9328_v27  ;;  %9604 = vmatpush1.bf16.msra.mxu0 %v9330_v49  ;;  %v9418_v27 = vld [vmem:[#allocation2 + $0x790] sm:$0xff]  ;;  %v9425_v49 = vld [vmem:[#allocation2 + $0x7c8] sm:$0xff] }
0x1e19   :  { %9523 = vmatprep.subr.bf16.mxu1 %v9337_v2  ;;  %9605 = vmatprep.subr.bf16.mxu0 %v9339_v46  ;;  %v9427_v2 = vld [vmem:[#allocation2 + $0x7d8] sm:$0xff]  ;;  %v9424_v46 = vld [vmem:[#allocation2 + $0x7c0] sm:$0xff] }
0x1e1c   :  { %9524 = vmatpush1.bf16.msra.mxu1 %v9336_v51  ;;  %9606 = vmatpush1.bf16.msra.mxu0 %v9338_v19  ;;  %v9426_v51 = vld [vmem:[#allocation2 + $0x7d0] sm:$0xff]  ;;  %v9181_v19 = vld [vmem:[#allocation2 + $0x28] sm:$0xff] }
0x1e1d   :  { %9525 = vmatprep.subr.bf16.mxu1 %v9345_v48  ;;  %9607 = vmatprep.subr.bf16.mxu0 %v9347_v11  ;;  %v9183_v48 = vld [vmem:[#allocation2 + $0x38] sm:$0xff]  ;;  %v17403_v11 = vpack.c.bf16 %v17387_v30, %v17387_v30  ;;  %v9197_v30 = vld [vmem:[#allocation2 + $0xa8] sm:$0xff] }
0x1e20   :  { %9526 = vmatpush1.bf16.msra.mxu1 %v9344_v54  ;;  %9608 = vmatpush1.bf16.msra.mxu0 %v9346_v62  ;;  %v9180_v54 = vld [vmem:[#allocation2 + $0x20] sm:$0xff]  ;;  %v9182_v62 = vld [vmem:[#allocation2 + $0x30] sm:$0xff] }
0x1e21   :  { %9527 = vmatprep.subr.bf16.mxu1 %v9353_v1  ;;  %9609 = vmatprep.subr.bf16.mxu0 %v9355_v29  ;;  %v9189_v1 = vld [vmem:[#allocation2 + $0x68] sm:$0xff]  ;;  %v9191_v29 = vld [vmem:[#allocation2 + $0x78] sm:$0xff] }
0x1e24   :  { %9528 = vmatpush1.bf16.msra.mxu1 %v9352_v58  ;;  %9610 = vmatpush1.bf16.msra.mxu0 %v9354_v52  ;;  %v9188_v58 = vld [vmem:[#allocation2 + $0x60] sm:$0xff]  ;;  %v9190_v52 = vld [vmem:[#allocation2 + $0x70] sm:$0xff] }
0x1e25   :  { %9529 = vmatprep.subr.bf16.mxu1 %v9361_v17  ;;  %9611 = vmatprep.subr.bf16.mxu0 %v9363_v63  ;;  %v9199_v17 = vld [vmem:[#allocation2 + $0xb8] sm:$0xff]  ;;  %v9196_v63 = vld [vmem:[#allocation2 + $0xa0] sm:$0xff] }
0x1e28   :  { %9530 = vmatpush1.bf16.msra.mxu1 %v9360_v60  ;;  %9612 = vmatpush1.bf16.msra.mxu0 %v9362_v9  ;;  %v9198_v60 = vld [vmem:[#allocation2 + $0xb0] sm:$0xff]  ;;  %v9205_v9 = vld [vmem:[#allocation2 + $0xe8] sm:$0xff] }
0x1e29   :  { %9531 = vmatprep.subr.bf16.mxu1 %v9369_v10  ;;  %9613 = vmatprep.subr.bf16.mxu0 %v9371_v3  ;;  %v9207_v10 = vld [vmem:[#allocation2 + $0xf8] sm:$0xff]  ;;  %v9204_v3 = vld [vmem:[#allocation2 + $0xe0] sm:$0xff] }
0x1e2c   :  { %9532 = vmatpush1.bf16.msra.mxu1 %v9368_v22  ;;  %9614 = vmatpush1.bf16.msra.mxu0 %v9370_v15  ;;  %v9206_v22 = vld [vmem:[#allocation2 + $0xf0] sm:$0xff]  ;;  %v9213_v15 = vld [vmem:[#allocation2 + $0x128] sm:$0xff] }
0x1e2d   :  { %9533 = vmatprep.subr.bf16.mxu1 %v9377_v56  ;;  %9615 = vmatprep.subr.bf16.mxu0 %v9379_v5  ;;  %v9215_v56 = vld [vmem:[#allocation2 + $0x138] sm:$0xff]  ;;  %v9214_v5 = vld [vmem:[#allocation2 + $0x130] sm:$0xff] }
0x1e30   :  { %9534 = vmatpush1.bf16.msra.mxu1 %v9376_v31  ;;  %9616 = vmatpush1.bf16.msra.mxu0 %v9378_v8  ;;  %v9221_v31 = vld [vmem:[#allocation2 + $0x168] sm:$0xff]  ;;  %v9223_v8 = vld [vmem:[#allocation2 + $0x178] sm:$0xff] }
0x1e31   :  { %9535 = vmatprep.subr.bf16.mxu1 %v9385_v25  ;;  %9617 = vmatprep.subr.bf16.mxu0 %v9387_v47  ;;  %v9220_v25 = vld [vmem:[#allocation2 + $0x160] sm:$0xff]  ;;  %v9222_v47 = vld [vmem:[#allocation2 + $0x170] sm:$0xff] }
0x1e34   :  { %9536 = vmatpush1.bf16.msra.mxu1 %v9384_v0  ;;  %9618 = vmatpush1.bf16.msra.mxu0 %v9386_v14  ;;  %v9229_v0 = vld [vmem:[#allocation2 + $0x1a8] sm:$0xff]  ;;  %v9231_v14 = vld [vmem:[#allocation2 + $0x1b8] sm:$0xff] }
0x1e35   :  { %9537 = vmatprep.subr.bf16.mxu1 %v9393_v4  ;;  %9619 = vmatprep.subr.bf16.mxu0 %v9395_v6  ;;  %v9228_v4 = vld [vmem:[#allocation2 + $0x1a0] sm:$0xff]  ;;  %v9230_v6 = vld [vmem:[#allocation2 + $0x1b0] sm:$0xff] }
0x1e38   :  { %9538 = vmatpush1.bf16.msra.mxu1 %v9392_v42  ;;  %9620 = vmatpush1.bf16.msra.mxu0 %v9394_v13  ;;  %v9237_v42 = vld [vmem:[#allocation2 + $0x1e8] sm:$0xff]  ;;  %v9239_v13 = vld [vmem:[#allocation2 + $0x1f8] sm:$0xff] }
0x1e39   :  { %9539 = vmatprep.subr.bf16.mxu1 %v9401_v24  ;;  %9621 = vmatprep.subr.bf16.mxu0 %v9403_v53  ;;  %v9236_v24 = vld [vmem:[#allocation2 + $0x1e0] sm:$0xff]  ;;  %v9238_v53 = vld [vmem:[#allocation2 + $0x1f0] sm:$0xff] }
0x1e3c   :  { %9540 = vmatpush1.bf16.msra.mxu1 %v9400_v61  ;;  %9622 = vmatpush1.bf16.msra.mxu0 %v9402_v12  ;;  %v9245_v61 = vld [vmem:[#allocation2 + $0x228] sm:$0xff]  ;;  %v9247_v12 = vld [vmem:[#allocation2 + $0x238] sm:$0xff] }
0x1e3d   :  { %9541 = vmatprep.subr.bf16.mxu1 %v9409_v26  ;;  %9623 = vmatprep.subr.bf16.mxu0 %v9411_v50  ;;  %v9244_v26 = vld [vmem:[#allocation2 + $0x220] sm:$0xff]  ;;  %v9246_v50 = vld [vmem:[#allocation2 + $0x230] sm:$0xff] }
0x1e40   :  { %9542 = vmatpush1.bf16.msra.mxu1 %v9408_v59  ;;  %9624 = vmatpush1.bf16.msra.mxu0 %v9410_v7  ;;  %v9253_v59 = vld [vmem:[#allocation2 + $0x268] sm:$0xff]  ;;  %v9255_v7 = vld [vmem:[#allocation2 + $0x278] sm:$0xff] }
0x1e41   :  { %9543 = vmatprep.subr.bf16.mxu1 %v9417_v32  ;;  %9625 = vmatprep.subr.bf16.mxu0 %v9419_v18  ;;  %v9252_v32 = vld [vmem:[#allocation2 + $0x260] sm:$0xff]  ;;  %v9254_v18 = vld [vmem:[#allocation2 + $0x270] sm:$0xff] }
0x1e44   :  { %9544 = vmatpush1.bf16.msra.mxu1 %v9416_v20  ;;  %9626 = vmatpush1.bf16.msra.mxu0 %v9418_v27  ;;  %v9261_v20 = vld [vmem:[#allocation2 + $0x2a8] sm:$0xff]  ;;  %v9263_v27 = vld [vmem:[#allocation2 + $0x2b8] sm:$0xff] }
0x1e45   :  { %9545 = vmatprep.subr.bf16.mxu1 %v9425_v49  ;;  %9627 = vmatprep.subr.bf16.mxu0 %v9427_v2  ;;  %v9260_v49 = vld [vmem:[#allocation2 + $0x2a0] sm:$0xff]  ;;  %v9262_v2 = vld [vmem:[#allocation2 + $0x2b0] sm:$0xff] }
0x1e48   :  { %9546 = vmatpush1.bf16.msra.mxu1 %v9424_v46  ;;  %9628 = vmatpush1.bf16.msra.mxu0 %v9426_v51  ;;  %v9269_v46 = vld [vmem:[#allocation2 + $0x2e8] sm:$0xff]  ;;  %v9271_v51 = vld [vmem:[#allocation2 + $0x2f8] sm:$0xff] }
0x1e49   :  { %9638 = vmatprep.subr.bf16.mxu1 %v9181_v19  ;;  %9720 = vmatprep.subr.bf16.mxu0 %v9183_v48  ;;  %v9268_v19 = vld [vmem:[#allocation2 + $0x2e0] sm:$0xff]  ;;  %v9270_v48 = vld [vmem:[#allocation2 + $0x2f0] sm:$0xff] }
0x1e4b   :  { %9548 = vmatmul.mubr.bf16.vlgmr.msra.gmra.mrb[40].mxu1 %v17403_v11  ;;  %9630 = vmatmul.mubr.bf16.vlgmr.msra.gmra.mrb[48].mxu0 %v17403_v11 }
0x1e4c   :  { %9639 = vmatpush1.bf16.msra.mxu1 %v9180_v54  ;;  %9721 = vmatpush1.bf16.msra.mxu0 %v9182_v62  ;;  %v9277_v54 = vld [vmem:[#allocation2 + $0x328] sm:$0xff]  ;;  %v9279_v62 = vld [vmem:[#allocation2 + $0x338] sm:$0xff] }
0x1e4d   :  { %9640 = vmatprep.subr.bf16.mxu1 %v9189_v1  ;;  %9722 = vmatprep.subr.bf16.mxu0 %v9191_v29  ;;  %v9276_v1 = vld [vmem:[#allocation2 + $0x320] sm:$0xff]  ;;  %v9278_v29 = vld [vmem:[#allocation2 + $0x330] sm:$0xff] }
0x1e4e   :  { %9670 = vmatprep.mubr.bf16.mxu1 %v17380_v45  ;;  %9752 = vmatprep.mubr.bf16.mxu0 %v17380_v45  ;;  %v9212_v45 = vld [vmem:[#allocation2 + $0x120] sm:$0xff] }
0x1e50   :  { %9641 = vmatpush1.bf16.msra.mxu1 %v9188_v58  ;;  %9723 = vmatpush1.bf16.msra.mxu0 %v9190_v52  ;;  %v9285_v58 = vld [vmem:[#allocation2 + $0x368] sm:$0xff]  ;;  %v9287_v52 = vld [vmem:[#allocation2 + $0x378] sm:$0xff] }
0x1e51   :  { %9642 = vmatprep.subr.bf16.mxu1 %v9197_v30  ;;  %9724 = vmatprep.subr.bf16.mxu0 %v9199_v17  ;;  %v9284_v30 = vld [vmem:[#allocation2 + $0x360] sm:$0xff]  ;;  %v9286_v17 = vld [vmem:[#allocation2 + $0x370] sm:$0xff] }
0x1e54   :  { %9643 = vmatpush1.bf16.msra.mxu1 %v9196_v63  ;;  %9725 = vmatpush1.bf16.msra.mxu0 %v9198_v60  ;;  %v9293_v63 = vld [vmem:[#allocation2 + $0x3a8] sm:$0xff]  ;;  %v9295_v60 = vld [vmem:[#allocation2 + $0x3b8] sm:$0xff] }
0x1e55   :  { %9644 = vmatprep.subr.bf16.mxu1 %v9205_v9  ;;  %9726 = vmatprep.subr.bf16.mxu0 %v9207_v10  ;;  %v9292_v9 = vld [vmem:[#allocation2 + $0x3a0] sm:$0xff]  ;;  %v9294_v10 = vld [vmem:[#allocation2 + $0x3b0] sm:$0xff] }
0x1e58   :  { %9645 = vmatpush1.bf16.msra.mxu1 %v9204_v3  ;;  %9727 = vmatpush1.bf16.msra.mxu0 %v9206_v22  ;;  %v9301_v3 = vld [vmem:[#allocation2 + $0x3e8] sm:$0xff]  ;;  %v9303_v22 = vld [vmem:[#allocation2 + $0x3f8] sm:$0xff] }
0x1e59   :  { %9646 = vmatprep.subr.bf16.mxu1 %v9213_v15  ;;  %9728 = vmatprep.subr.bf16.mxu0 %v9215_v56  ;;  %v9300_v15 = vld [vmem:[#allocation2 + $0x3e0] sm:$0xff]  ;;  %v9302_v56 = vld [vmem:[#allocation2 + $0x3f0] sm:$0xff] }
0x1e5c   :  { %9647 = vmatpush1.bf16.msra.mxu1 %v9212_v45  ;;  %9729 = vmatpush1.bf16.msra.mxu0 %v9214_v5  ;;  %v9309_v45 = vld [vmem:[#allocation2 + $0x428] sm:$0xff]  ;;  %v9311_v5 = vld [vmem:[#allocation2 + $0x438] sm:$0xff] }
0x1e5d   :  { %9648 = vmatprep.subr.bf16.mxu1 %v9221_v31  ;;  %9730 = vmatprep.subr.bf16.mxu0 %v9223_v8  ;;  %v9308_v31 = vld [vmem:[#allocation2 + $0x420] sm:$0xff]  ;;  %v9310_v8 = vld [vmem:[#allocation2 + $0x430] sm:$0xff] }
0x1e60   :  { %9649 = vmatpush1.bf16.msra.mxu1 %v9220_v25  ;;  %9731 = vmatpush1.bf16.msra.mxu0 %v9222_v47  ;;  %v9317_v25 = vld [vmem:[#allocation2 + $0x468] sm:$0xff]  ;;  %v9319_v47 = vld [vmem:[#allocation2 + $0x478] sm:$0xff] }
0x1e61   :  { %9650 = vmatprep.subr.bf16.mxu1 %v9229_v0  ;;  %9732 = vmatprep.subr.bf16.mxu0 %v9231_v14  ;;  %v9316_v0 = vld [vmem:[#allocation2 + $0x460] sm:$0xff]  ;;  %v9318_v14 = vld [vmem:[#allocation2 + $0x470] sm:$0xff] }
0x1e64   :  { %9651 = vmatpush1.bf16.msra.mxu1 %v9228_v4  ;;  %9733 = vmatpush1.bf16.msra.mxu0 %v9230_v6  ;;  %v9325_v4 = vld [vmem:[#allocation2 + $0x4a8] sm:$0xff]  ;;  %v9327_v6 = vld [vmem:[#allocation2 + $0x4b8] sm:$0xff] }
0x1e65   :  { %9652 = vmatprep.subr.bf16.mxu1 %v9237_v42  ;;  %9734 = vmatprep.subr.bf16.mxu0 %v9239_v13  ;;  %v9324_v42 = vld [vmem:[#allocation2 + $0x4a0] sm:$0xff]  ;;  %v9326_v13 = vld [vmem:[#allocation2 + $0x4b0] sm:$0xff] }
0x1e68   :  { %9653 = vmatpush1.bf16.msra.mxu1 %v9236_v24  ;;  %9735 = vmatpush1.bf16.msra.mxu0 %v9238_v53  ;;  %v9333_v24 = vld [vmem:[#allocation2 + $0x4e8] sm:$0xff]  ;;  %v9332_v53 = vld [vmem:[#allocation2 + $0x4e0] sm:$0xff] }
0x1e69   :  { %9654 = vmatprep.subr.bf16.mxu1 %v9245_v61  ;;  %9736 = vmatprep.subr.bf16.mxu0 %v9247_v12  ;;  %v9334_v61 = vld [vmem:[#allocation2 + $0x4f0] sm:$0xff]  ;;  %v9341_v12 = vld [vmem:[#allocation2 + $0x528] sm:$0xff] }
0x1e6c   :  { %9655 = vmatpush1.bf16.msra.mxu1 %v9244_v26  ;;  %9737 = vmatpush1.bf16.msra.mxu0 %v9246_v50  ;;  %v9343_v26 = vld [vmem:[#allocation2 + $0x538] sm:$0xff]  ;;  %v9342_v50 = vld [vmem:[#allocation2 + $0x530] sm:$0xff] }
0x1e6d   :  { %9656 = vmatprep.subr.bf16.mxu1 %v9253_v59  ;;  %9738 = vmatprep.subr.bf16.mxu0 %v9255_v7  ;;  %v9349_v59 = vld [vmem:[#allocation2 + $0x568] sm:$0xff]  ;;  %v9351_v7 = vld [vmem:[#allocation2 + $0x578] sm:$0xff] }
0x1e70   :  { %9657 = vmatpush1.bf16.msra.mxu1 %v9252_v32  ;;  %9739 = vmatpush1.bf16.msra.mxu0 %v9254_v18  ;;  %v9348_v32 = vld [vmem:[#allocation2 + $0x560] sm:$0xff]  ;;  %v9350_v18 = vld [vmem:[#allocation2 + $0x570] sm:$0xff] }
0x1e71   :  { %9658 = vmatprep.subr.bf16.mxu1 %v9261_v20  ;;  %9740 = vmatprep.subr.bf16.mxu0 %v9263_v27  ;;  %v9357_v20 = vld [vmem:[#allocation2 + $0x5a8] sm:$0xff]  ;;  %v9359_v27 = vld [vmem:[#allocation2 + $0x5b8] sm:$0xff] }
0x1e74   :  { %9659 = vmatpush1.bf16.msra.mxu1 %v9260_v49  ;;  %9741 = vmatpush1.bf16.msra.mxu0 %v9262_v2  ;;  %v9356_v49 = vld [vmem:[#allocation2 + $0x5a0] sm:$0xff]  ;;  %v9358_v2 = vld [vmem:[#allocation2 + $0x5b0] sm:$0xff] }
0x1e75   :  { %9660 = vmatprep.subr.bf16.mxu1 %v9269_v46  ;;  %9742 = vmatprep.subr.bf16.mxu0 %v9271_v51  ;;  %v9365_v46 = vld [vmem:[#allocation2 + $0x5e8] sm:$0xff]  ;;  %v9367_v51 = vld [vmem:[#allocation2 + $0x5f8] sm:$0xff] }
0x1e78   :  { %9661 = vmatpush1.bf16.msra.mxu1 %v9268_v19  ;;  %9743 = vmatpush1.bf16.msra.mxu0 %v9270_v48  ;;  %v9364_v19 = vld [vmem:[#allocation2 + $0x5e0] sm:$0xff]  ;;  %v9366_v48 = vld [vmem:[#allocation2 + $0x5f0] sm:$0xff] }
0x1e79   :  { %9662 = vmatprep.subr.bf16.mxu1 %v9277_v54  ;;  %9744 = vmatprep.subr.bf16.mxu0 %v9279_v62  ;;  %v9373_v54 = vld [vmem:[#allocation2 + $0x628] sm:$0xff]  ;;  %v9375_v62 = vld [vmem:[#allocation2 + $0x638] sm:$0xff] }
0x1e7c   :  { %9663 = vmatpush1.bf16.msra.mxu1 %v9276_v1  ;;  %9745 = vmatpush1.bf16.msra.mxu0 %v9278_v29  ;;  %v9372_v1 = vld [vmem:[#allocation2 + $0x620] sm:$0xff]  ;;  %v9374_v29 = vld [vmem:[#allocation2 + $0x630] sm:$0xff] }
0x1e7d   :  { %9664 = vmatprep.subr.bf16.mxu1 %v9285_v58  ;;  %9746 = vmatprep.subr.bf16.mxu0 %v9287_v52  ;;  %v9381_v58 = vld [vmem:[#allocation2 + $0x668] sm:$0xff]  ;;  %v9383_v52 = vld [vmem:[#allocation2 + $0x678] sm:$0xff] }
0x1e80   :  { %9665 = vmatpush1.bf16.msra.mxu1 %v9284_v30  ;;  %9747 = vmatpush1.bf16.msra.mxu0 %v9286_v17  ;;  %v9380_v30 = vld [vmem:[#allocation2 + $0x660] sm:$0xff]  ;;  %v9382_v17 = vld [vmem:[#allocation2 + $0x670] sm:$0xff] }
0x1e81   :  { %9666 = vmatprep.subr.bf16.mxu1 %v9293_v63  ;;  %9748 = vmatprep.subr.bf16.mxu0 %v9295_v60  ;;  %v9389_v63 = vld [vmem:[#allocation2 + $0x6a8] sm:$0xff]  ;;  %v9391_v60 = vld [vmem:[#allocation2 + $0x6b8] sm:$0xff] }
0x1e84   :  { %9667 = vmatpush1.bf16.msra.mxu1 %v9292_v9  ;;  %9749 = vmatpush1.bf16.msra.mxu0 %v9294_v10  ;;  %v9388_v9 = vld [vmem:[#allocation2 + $0x6a0] sm:$0xff]  ;;  %v9390_v10 = vld [vmem:[#allocation2 + $0x6b0] sm:$0xff] }
0x1e85   :  { %9668 = vmatprep.subr.bf16.mxu1 %v9301_v3  ;;  %9750 = vmatprep.subr.bf16.mxu0 %v9303_v22  ;;  %v9397_v3 = vld [vmem:[#allocation2 + $0x6e8] sm:$0xff]  ;;  %v9399_v22 = vld [vmem:[#allocation2 + $0x6f8] sm:$0xff] }
0x1e88   :  { %9669 = vmatpush1.bf16.msra.mxu1 %v9300_v15  ;;  %9751 = vmatpush1.bf16.msra.mxu0 %v9302_v56  ;;  %v9396_v15 = vld [vmem:[#allocation2 + $0x6e0] sm:$0xff]  ;;  %v9398_v56 = vld [vmem:[#allocation2 + $0x6f0] sm:$0xff] }
0x1e89   :  { %9679 = vmatprep.subr.bf16.mxu1 %v9309_v45  ;;  %9761 = vmatprep.subr.bf16.mxu0 %v9311_v5  ;;  %v9405_v45 = vld [vmem:[#allocation2 + $0x728] sm:$0xff]  ;;  %v9407_v5 = vld [vmem:[#allocation2 + $0x738] sm:$0xff] }
0x1e8b   :  { %9671 = vmatmul.mubr.bf16.vlgmr.msra.gmra.mrb[44].mxu1 %v17393_v57  ;;  %9753 = vmatmul.mubr.bf16.vlgmr.msra.gmra.mrb[52].mxu0 %v17393_v57  ;;  %v9335_v57 = vld [vmem:[#allocation2 + $0x4f8] sm:$0xff] }
0x1e8c   :  { %9680 = vmatpush1.bf16.msra.mxu1 %v9308_v31  ;;  %9762 = vmatpush1.bf16.msra.mxu0 %v9310_v8  ;;  %v9404_v31 = vld [vmem:[#allocation2 + $0x720] sm:$0xff]  ;;  %v9406_v8 = vld [vmem:[#allocation2 + $0x730] sm:$0xff] }
0x1e8d   :  { %9681 = vmatprep.subr.bf16.mxu1 %v9317_v25  ;;  %9763 = vmatprep.subr.bf16.mxu0 %v9319_v47  ;;  %v9413_v25 = vld [vmem:[#allocation2 + $0x768] sm:$0xff]  ;;  %v9415_v47 = vld [vmem:[#allocation2 + $0x778] sm:$0xff] }
0x1e8e   :  { %9711 = vmatprep.mubr.bf16.mxu1 %v17395_v55  ;;  %9793 = vmatprep.mubr.bf16.mxu0 %v17395_v55  ;;  %v9340_v55 = vld [vmem:[#allocation2 + $0x520] sm:$0xff] }
0x1e90   :  { %9682 = vmatpush1.bf16.msra.mxu1 %v9316_v0  ;;  %9764 = vmatpush1.bf16.msra.mxu0 %v9318_v14  ;;  %v9412_v0 = vld [vmem:[#allocation2 + $0x760] sm:$0xff]  ;;  %v9414_v14 = vld [vmem:[#allocation2 + $0x770] sm:$0xff] }
0x1e91   :  { %9683 = vmatprep.subr.bf16.mxu1 %v9325_v4  ;;  %9765 = vmatprep.subr.bf16.mxu0 %v9327_v6  ;;  %v9421_v4 = vld [vmem:[#allocation2 + $0x7a8] sm:$0xff]  ;;  %v9423_v6 = vld [vmem:[#allocation2 + $0x7b8] sm:$0xff] }
0x1e94   :  { %9684 = vmatpush1.bf16.msra.mxu1 %v9324_v42  ;;  %9766 = vmatpush1.bf16.msra.mxu0 %v9326_v13  ;;  %v9420_v42 = vld [vmem:[#allocation2 + $0x7a0] sm:$0xff]  ;;  %v9422_v13 = vld [vmem:[#allocation2 + $0x7b0] sm:$0xff] }
0x1e95   :  { %9685 = vmatprep.subr.bf16.mxu1 %v9333_v24  ;;  %9767 = vmatprep.subr.bf16.mxu0 %v9335_v57  ;;  %v9429_v24 = vld [vmem:[#allocation2 + $0x7e8] sm:$0xff]  ;;  %v9431_v57 = vld [vmem:[#allocation2 + $0x7f8] sm:$0xff] }
0x1e98   :  { %9686 = vmatpush1.bf16.msra.mxu1 %v9332_v53  ;;  %9768 = vmatpush1.bf16.msra.mxu0 %v9334_v61  ;;  %v9428_v53 = vld [vmem:[#allocation2 + $0x7e0] sm:$0xff]  ;;  %v9430_v61 = vld [vmem:[#allocation2 + $0x7f0] sm:$0xff] }
0x1e99   :  { %9687 = vmatprep.subr.bf16.mxu1 %v9341_v12  ;;  %9769 = vmatprep.subr.bf16.mxu0 %v9343_v26  ;;  %v9444_v12 = vsub.s32 2, %v16584_v28  ;;  %v9432_v26 = vld [vmem:[%s18026_s5] sm:$0xff] }
0x1e9c   :  { %9688 = vmatpush1.bf16.msra.mxu1 %v9340_v55  ;;  %9770 = vmatpush1.bf16.msra.mxu0 %v9342_v50  ;;  %v9448_v55 = vsub.s32 3, %v16584_v28  ;;  %v9437_v50 = vrot.slane %v9432_v26, %v17027_v16 }
0x1e9d   :  { %9689 = vmatprep.subr.bf16.mxu1 %v9349_v59  ;;  %9771 = vmatprep.subr.bf16.mxu0 %v9351_v7  ;;  %v9445_v59 = vrot.slane %v9432_v26, %v9444_v12  ;;  %v9441_v7 = vrot.slane %v9432_v26, %v17033_v21 }
0x1ea0   :  { %9690 = vmatpush1.bf16.msra.mxu1 %v9348_v32  ;;  %9772 = vmatpush1.bf16.msra.mxu0 %v9350_v18  ;;  %v9449_v32 = vrot.slane %v9432_v26, %v9448_v55 }
0x1ea1   :  { %9691 = vmatprep.subr.bf16.mxu1 %v9357_v20  ;;  %9773 = vmatprep.subr.bf16.mxu0 %v9359_v27 }
0x1ea4   :  { %9692 = vmatpush1.bf16.msra.mxu1 %v9356_v49  ;;  %9774 = vmatpush1.bf16.msra.mxu0 %v9358_v2 }
0x1ea5   :  { %9693 = vmatprep.subr.bf16.mxu1 %v9365_v46  ;;  %9775 = vmatprep.subr.bf16.mxu0 %v9367_v51 }
0x1ea8   :  { %9694 = vmatpush1.bf16.msra.mxu1 %v9364_v19  ;;  %9776 = vmatpush1.bf16.msra.mxu0 %v9366_v48 }
0x1ea9   :  { %9695 = vmatprep.subr.bf16.mxu1 %v9373_v54  ;;  %9777 = vmatprep.subr.bf16.mxu0 %v9375_v62 }
0x1eac   :  { %9696 = vmatpush1.bf16.msra.mxu1 %v9372_v1  ;;  %9778 = vmatpush1.bf16.msra.mxu0 %v9374_v29 }
0x1ead   :  { %9697 = vmatprep.subr.bf16.mxu1 %v9381_v58  ;;  %9779 = vmatprep.subr.bf16.mxu0 %v9383_v52 }
0x1eb0   :  { %9698 = vmatpush1.bf16.msra.mxu1 %v9380_v30  ;;  %9780 = vmatpush1.bf16.msra.mxu0 %v9382_v17  ;;  %v9452_v30 = vsub.s32 4, %v16584_v28  ;;  %v9460_v17 = vsub.s32 6, %v16584_v28 }
0x1eb1   :  { %9699 = vmatprep.subr.bf16.mxu1 %v9389_v63  ;;  %9781 = vmatprep.subr.bf16.mxu0 %v9391_v60  ;;  %v9456_v63 = vsub.s32 5, %v16584_v28  ;;  %v9464_v60 = vsub.s32 7, %v16584_v28 }
0x1eb4   :  { %9700 = vmatpush1.bf16.msra.mxu1 %v9388_v9  ;;  %9782 = vmatpush1.bf16.msra.mxu0 %v9390_v10  ;;  %v9453_v9 = vrot.slane %v9432_v26, %v9452_v30  ;;  %v9461_v10 = vrot.slane %v9432_v26, %v9460_v17 }
0x1eb5   :  { %9701 = vmatprep.subr.bf16.mxu1 %v9397_v3  ;;  %9783 = vmatprep.subr.bf16.mxu0 %v9399_v22  ;;  %v9457_v3 = vrot.slane %v9432_v26, %v9456_v63  ;;  %v9465_v22 = vrot.slane %v9432_v26, %v9464_v60  ;;  %v12281_v26 = vcombine.low %v15025_v33, %v15035_v35 }
0x1eb8   :  { %9702 = vmatpush1.bf16.msra.mxu1 %v9396_v15  ;;  %9784 = vmatpush1.bf16.msra.mxu0 %v9398_v56 }
0x1eb9   :  { %9703 = vmatprep.subr.bf16.mxu1 %v9405_v45  ;;  %9785 = vmatprep.subr.bf16.mxu0 %v9407_v5 }
0x1ebc   :  { %9704 = vmatpush1.bf16.msra.mxu1 %v9404_v31  ;;  %9786 = vmatpush1.bf16.msra.mxu0 %v9406_v8 }
0x1ebd   :  { %9705 = vmatprep.subr.bf16.mxu1 %v9413_v25  ;;  %9787 = vmatprep.subr.bf16.mxu0 %v9415_v47 }
0x1ec0   :  { %9706 = vmatpush1.bf16.msra.mxu1 %v9412_v0  ;;  %9788 = vmatpush1.bf16.msra.mxu0 %v9414_v14 }
0x1ec1   :  { %9707 = vmatprep.subr.bf16.mxu1 %v9421_v4  ;;  %9789 = vmatprep.subr.bf16.mxu0 %v9423_v6 }
0x1ec4   :  { %9708 = vmatpush1.bf16.msra.mxu1 %v9420_v42  ;;  %9790 = vmatpush1.bf16.msra.mxu0 %v9422_v13 }
0x1ec5   :  { %9709 = vmatprep.subr.bf16.mxu1 %v9429_v24  ;;  %9791 = vmatprep.subr.bf16.mxu0 %v9431_v57 }
0x1ec8   :  { %9710 = vmatpush1.bf16.msra.mxu1 %v9428_v53  ;;  %9792 = vmatpush1.bf16.msra.mxu0 %v9430_v61  ;;  %v12282_v53 = vcombine.high %v15025_v33, %v15035_v35  ;;  %v12284_v61 = vcombine.high %v15030_v34, %v15040_v36 }
0x1ecb   :  { %9712 = vmatmul.mubr.bf16.vlgmr.msra.gmra.mrb[44].mxu1 %v17403_v11  ;;  %9794 = vmatmul.mubr.bf16.vlgmr.msra.gmra.mrb[52].mxu0 %v17403_v11 }
0x1f1e   :  { %v9549_v18 = vpop.f32.mrb[40].mxu1  ;;  %v9631_v11 = vpop.f32.mrb[48].mxu0 }
0x1f1f   :  { %v17426_v20 = vadd.f32 %v9549_v18, %v9437_v50  ;;  %v17428_v27 = vadd.f32 %v9631_v11, %v9445_v59  ;;  %v9551_v49 = vpop.f32.mrb[41].mxu1  ;;  %v9633_v2 = vpop.f32.mrb[49].mxu0  ;;  %v12283_v50 = vcombine.low %v15030_v34, %v15040_v36 }
0x1f20   :  { %v17430_v46 = vadd.f32 %v9551_v49, %v9441_v7  ;;  %v17432_v51 = vadd.f32 %v9633_v2, %v9449_v32  ;;  %v9553_v19 = vpop.f32.mrb[42].mxu1  ;;  %v9635_v48 = vpop.f32.mrb[50].mxu0 }
0x1f21   :  { %v9802_v54 = vmax.f32 %v17426_v20, 0.0  ;;  %v9804_v62 = vmax.f32 %v17428_v27, 0.0  ;;  %v9554_v1 = vpop.f32.mrb[43].mxu1  ;;  %v9636_v29 = vpop.f32.mrb[51].mxu0 }
0x1f22   :  { %v9803_v58 = vmax.f32 %v17430_v46, 0.0  ;;  %v9805_v52 = vmax.f32 %v17432_v51, 0.0 }
0x1f9e   :  { %v9713_v15 = vpop.f32.mrb[44].mxu1  ;;  %v9795_v56 = vpop.f32.mrb[52].mxu0 }
0x1f9f   :  { %v17442_v45 = vadd.f32 %v9713_v15, %v9453_v9  ;;  %v17444_v5 = vadd.f32 %v9795_v56, %v9461_v10  ;;  %v9715_v31 = vpop.f32.mrb[45].mxu1  ;;  %v9797_v8 = vpop.f32.mrb[53].mxu0 }
0x1fa0   :  { %v17446_v25 = vadd.f32 %v9715_v31, %v9457_v3  ;;  %v17448_v47 = vadd.f32 %v9797_v8, %v9465_v22  ;;  %v9717_v0 = vpop.f32.mrb[46].mxu1  ;;  %v9799_v14 = vpop.f32.mrb[54].mxu0 }
0x1fa1   :  { %v9806_v4 = vmax.f32 %v17442_v45, 0.0  ;;  %v9808_v6 = vmax.f32 %v17444_v5, 0.0  ;;  %v9718_v42 = vpop.f32.mrb[47].mxu1  ;;  %v9800_v13 = vpop.f32.mrb[55].mxu0 }
0x1fa2   :  { %v9807_v24 = vmax.f32 %v17446_v25, 0.0  ;;  %v9809_v57 = vmax.f32 %v17448_v47, 0.0 }
0x1fa3   :  { %13500 = dma.done.wait [#allocation6 + $0x1], 32000 }
0x1fa4   :  { %13501 = vsyncadd [#allocation6 + $0x1], 4294935296  ;;  %v12286_v59 = vcombine.high %v15045_v37, %v15055_v39  ;;  %v12288_v7 = vcombine.high %v15050_v38, %v15060_v40  ;;  %11361 = vmatprep.subr.bf16.mxu1 %v12282_v53  ;;  %11525 = vmatprep.subr.bf16.mxu0 %v12284_v61  ;;  %v12285_v32 = vcombine.low %v15045_v37, %v15055_v39  ;;  %v18516_v35 = vld [vmem:[#allocation16_spill] sm:$0xff]  ;;  %v18517_v37 = vld [vmem:[#allocation19_spill] sm:$0xff]  ;;  %vm11344_vm14 = vcmask 850944  }
0x1fa5   :  { %11362 = vmatpush1.bf16.msra.mxu1 %v12281_v26  ;;  %11526 = vmatpush1.bf16.msra.mxu0 %v12283_v50  ;;  %v12287_v33 = vcombine.low %v15050_v38, %v15060_v40  ;;  %v12290_v34 = vcombine.high %v15065_v41, %v15075_v43  ;;  %v12292_v36 = vcombine.high %v18516_v35, %v15080_v44  ;;  %v18518_v38 = vld [vmem:[#allocation17_spill] sm:$0xff]  ;;  %v18519_v40 = vld [vmem:[#allocation20_spill] sm:$0xff]  ;;  %v18520_v49 = vld [vmem:[#allocation18_spill] sm:$0xff]  ;;  %vm11348_vm6 = vcmask 1043456  }
0x1fa6   :  { %11363 = vmatprep.subr.bf16.mxu1 %v12286_v59  ;;  %11527 = vmatprep.subr.bf16.mxu0 %v12288_v7  ;;  %v12289_v18 = vcombine.low %v15065_v41, %v15075_v43  ;;  %v12291_v11 = vcombine.low %v18516_v35, %v15080_v44  ;;  %v12294_v39 = vcombine.high %v18518_v38, %v18517_v37  ;;  %v18521_v41 = vld [vmem:[#allocation23_spill] sm:$0xff]  ;;  %v18522_v43 = vld [vmem:[#allocation21_spill] sm:$0xff]  ;;  %v18523_v1 = vld [vmem:[#allocation24_spill] sm:$0xff] }
0x1fa7   :  { %v12296_v2 = vcombine.high %v18520_v49, %v18519_v40  ;;  %v12293_v19 = vcombine.low %v18518_v38, %v18517_v37  ;;  %v12295_v48 = vcombine.low %v18520_v49, %v18519_v40  ;;  %v12298_v44 = vcombine.high %v18522_v43, %v18521_v41  ;;  %v18524_v29 = vld [vmem:[#allocation22_spill] sm:$0xff]  ;;  %v18525_v60 = vld [vmem:[#allocation27_spill] sm:$0xff]  ;;  %v18526_v9 = vld [vmem:[#allocation25_spill] sm:$0xff] }
0x1fa8   :  { %v12300_v30 = vcombine.high %v18524_v29, %v18523_v1  ;;  %v12297_v17 = vcombine.low %v18522_v43, %v18521_v41  ;;  %v12299_v63 = vcombine.low %v18524_v29, %v18523_v1  ;;  %v12302_v10 = vcombine.high %v18526_v9, %v18525_v60  ;;  %v18527_v3 = vld [vmem:[#allocation28_spill] sm:$0xff]  ;;  %v18528_v22 = vld [vmem:[#allocation26_spill] sm:$0xff]  ;;  %v18529_v0 = vld [vmem:[#allocation31_spill] sm:$0xff] }
0x1fa9   :  { %11364 = vmatpush1.bf16.msra.mxu1 %v12285_v32  ;;  %11528 = vmatpush1.bf16.msra.mxu0 %v12287_v33  ;;  %v12304_v15 = vcombine.high %v18528_v22, %v18527_v3  ;;  %v9815_v56 = vpack.c.bf16 %v9803_v58, %v9803_v58  ;;  %v12301_v31 = vcombine.low %v18526_v9, %v18525_v60  ;;  %v18530_v14 = vld [vmem:[#allocation29_spill] sm:$0xff]  ;;  %v18531_v13 = vld [vmem:[#allocation32_spill] sm:$0xff]  ;;  %v18532_v53 = vld [vmem:[#allocation30_spill] sm:$0xff] }
0x1faa   :  { %11365 = vmatprep.subr.bf16.mxu1 %v12290_v34  ;;  %11529 = vmatprep.subr.bf16.mxu0 %v12292_v36  ;;  %v12303_v8 = vcombine.low %v18528_v22, %v18527_v3  ;;  %v12306_v42 = vcombine.high %v18530_v14, %v18529_v0  ;;  %v12308_v61 = vcombine.high %v18532_v53, %v18531_v13  ;;  %v18533_v26 = vld [vmem:[#allocation35_spill] sm:$0xff]  ;;  %v18534_v50 = vld [vmem:[#allocation33_spill] sm:$0xff]  ;;  %v18535_v7 = vld [vmem:[#allocation36_spill] sm:$0xff] }
0x1fab   :  { %11393 = vmatprep.mubr.bf16.mxu1 %v9815_v56  ;;  %11557 = vmatprep.mubr.bf16.mxu0 %v9815_v56  ;;  %v12305_v46 = vcombine.low %v18530_v14, %v18529_v0  ;;  %v12307_v58 = vcombine.low %v18532_v53, %v18531_v13  ;;  %v12310_v59 = vcombine.high %v18534_v50, %v18533_v26  ;;  %v18536_v32 = vld [vmem:[#allocation34_spill] sm:$0xff]  ;;  %v18537_v36 = vld [vmem:[#allocation39_spill] sm:$0xff]  ;;  %v18539_v37 = vld [vmem:[#allocation40_spill] sm:$0xff] }
0x1fac   :  { %v12312_v33 = vcombine.high %v18536_v32, %v18535_v7  ;;  %v12309_v34 = vcombine.low %v18534_v50, %v18533_v26  ;;  %v12311_v35 = vcombine.low %v18536_v32, %v18535_v7  ;;  %v18540_v38 = vld [vmem:[#allocation38_spill] sm:$0xff]  ;;  %v18543_v41 = vld [vmem:[#allocation44_spill] sm:$0xff]  ;;  %v18550_v56 = vld [vmem:[#allocation49_spill] sm:$0xff]  ;;  %v9817_v20 = vpack.c.bf16 %v9805_v52, %v9805_v52 }
0x1fad   :  { %11366 = vmatpush1.bf16.msra.mxu1 %v12289_v18  ;;  %11530 = vmatpush1.bf16.msra.mxu0 %v12291_v11  ;;  %v18538_v18 = vld [vmem:[#allocation37_spill] sm:$0xff]  ;;  %v12315_v49 = vcombine.low %v18540_v38, %v18539_v37  ;;  %v18544_v43 = vld [vmem:[#allocation42_spill] sm:$0xff]  ;;  %v18547_v60 = vld [vmem:[#allocation48_spill] sm:$0xff]  ;;  %v9819_v27 = vpack.c.bf16 %v9807_v24, %v9807_v24  ;;  %v9821_v45 = vpack.c.bf16 %v9809_v57, %v9809_v57 }
0x1fae   :  { %11367 = vmatprep.subr.bf16.mxu1 %v12294_v39  ;;  %11531 = vmatprep.subr.bf16.mxu0 %v12296_v2  ;;  %v12314_v11 = vcombine.high %v18538_v18, %v18537_v36  ;;  %v12316_v39 = vcombine.high %v18540_v38, %v18539_v37  ;;  %v12313_v40 = vcombine.low %v18538_v18, %v18537_v36  ;;  %v18541_v2 = vld [vmem:[#allocation43_spill] sm:$0xff]  ;;  %v18548_v9 = vld [vmem:[#allocation46_spill] sm:$0xff] }
0x1faf   :  { %v12319_v29 = vcombine.low %v18544_v43, %v18543_v41  ;;  %v12323_v22 = vcombine.low %v18548_v9, %v18547_v60  ;;  %v18552_v0 = vld [vmem:[#allocation50_spill] sm:$0xff]  ;;  %v18553_v53 = vld [vmem:[#allocation55_spill] sm:$0xff] }
0x1fb0   :  { %v18556_v26 = vld [vmem:[#allocation54_spill] sm:$0xff]  ;;  %v18557_v32 = vld [vmem:[#allocation59_spill] sm:$0xff] }
0x1fb1   :  { %11368 = vmatpush1.bf16.msra.mxu1 %v12293_v19  ;;  %11532 = vmatpush1.bf16.msra.mxu0 %v12295_v48  ;;  %v18542_v19 = vld [vmem:[#allocation41_spill] sm:$0xff]  ;;  %v18560_v36 = vld [vmem:[#allocation58_spill] sm:$0xff]  ;;  %v18561_v38 = vld [vmem:[#allocation63_spill] sm:$0xff] }
0x1fb2   :  { %11369 = vmatprep.subr.bf16.mxu1 %v12298_v44  ;;  %11533 = vmatprep.subr.bf16.mxu0 %v12300_v30  ;;  %v12318_v48 = vcombine.high %v18542_v19, %v18541_v2  ;;  %v12320_v44 = vcombine.high %v18544_v43, %v18543_v41  ;;  %v12317_v1 = vcombine.low %v18542_v19, %v18541_v2  ;;  %v18545_v30 = vld [vmem:[#allocation47_spill] sm:$0xff]  ;;  %v18564_v2 = vld [vmem:[#allocation62_spill] sm:$0xff] }
0x1fb3   :  { %v18565_v43 = vld [vmem:[#allocation67_spill] sm:$0xff]  ;;  %v18708_v47 = vld [vmem:[#allocation206_spill] sm:$0xff] }
0x1fb5   :  { %11370 = vmatpush1.bf16.msra.mxu1 %v12297_v17  ;;  %11534 = vmatpush1.bf16.msra.mxu0 %v12299_v63  ;;  %v18546_v17 = vld [vmem:[#allocation45_spill] sm:$0xff] }
0x1fb6   :  { %11371 = vmatprep.subr.bf16.mxu1 %v12302_v10  ;;  %11535 = vmatprep.subr.bf16.mxu0 %v12304_v15  ;;  %v12322_v63 = vcombine.high %v18546_v17, %v18545_v30  ;;  %v12324_v10 = vcombine.high %v18548_v9, %v18547_v60  ;;  %v12321_v3 = vcombine.low %v18546_v17, %v18545_v30  ;;  %v18549_v15 = vld [vmem:[#allocation51_spill] sm:$0xff]  ;;  %v18568_v30 = vld [vmem:[#allocation66_spill] sm:$0xff] }
0x1fb7   :  { %v18569_v9 = vld [vmem:[#allocation71_spill] sm:$0xff] }
0x1fb9   :  { %11372 = vmatpush1.bf16.msra.mxu1 %v12301_v31  ;;  %11536 = vmatpush1.bf16.msra.mxu0 %v12303_v8  ;;  %v12326_v31 = vcombine.high %v18550_v56, %v18549_v15  ;;  %v18551_v8 = vld [vmem:[#allocation52_spill] sm:$0xff] }
0x1fba   :  { %11373 = vmatprep.subr.bf16.mxu1 %v12306_v42  ;;  %11537 = vmatprep.subr.bf16.mxu0 %v12308_v61  ;;  %v12328_v14 = vcombine.high %v18552_v0, %v18551_v8  ;;  %v12325_v42 = vcombine.low %v18550_v56, %v18549_v15  ;;  %v12327_v13 = vcombine.low %v18552_v0, %v18551_v8  ;;  %v18554_v61 = vld [vmem:[#allocation53_spill] sm:$0xff]  ;;  %v18572_v15 = vld [vmem:[#allocation70_spill] sm:$0xff] }
0x1fbd   :  { %11374 = vmatpush1.bf16.msra.mxu1 %v12305_v46  ;;  %11538 = vmatpush1.bf16.msra.mxu0 %v12307_v58  ;;  %v12330_v46 = vcombine.high %v18554_v61, %v18553_v53  ;;  %v18555_v58 = vld [vmem:[#allocation56_spill] sm:$0xff] }
0x1fbe   :  { %11375 = vmatprep.subr.bf16.mxu1 %v12310_v59  ;;  %11539 = vmatprep.subr.bf16.mxu0 %v12312_v33  ;;  %v12332_v50 = vcombine.high %v18556_v26, %v18555_v58  ;;  %v12329_v59 = vcombine.low %v18554_v61, %v18553_v53  ;;  %v12331_v7 = vcombine.low %v18556_v26, %v18555_v58  ;;  %v18558_v33 = vld [vmem:[#allocation57_spill] sm:$0xff]  ;;  %v18575_v53 = vld [vmem:[#allocation76_spill] sm:$0xff]  ;;  %v18576_v61 = vld [vmem:[#allocation74_spill] sm:$0xff] }
0x1fbf   :  { %v12351_v58 = vcombine.low %v18576_v61, %v18575_v53  ;;  %v18577_v26 = vld [vmem:[#allocation79_spill] sm:$0xff] }
0x1fc1   :  { %11376 = vmatpush1.bf16.msra.mxu1 %v12309_v34  ;;  %11540 = vmatpush1.bf16.msra.mxu0 %v12311_v35  ;;  %v12334_v34 = vcombine.high %v18558_v33, %v18557_v32  ;;  %v18559_v35 = vld [vmem:[#allocation60_spill] sm:$0xff] }
0x1fc2   :  { %11377 = vmatprep.subr.bf16.mxu1 %v12314_v11  ;;  %11541 = vmatprep.subr.bf16.mxu0 %v12316_v39  ;;  %v12336_v18 = vcombine.high %v18560_v36, %v18559_v35  ;;  %v12333_v11 = vcombine.low %v18558_v33, %v18557_v32  ;;  %v12335_v37 = vcombine.low %v18560_v36, %v18559_v35  ;;  %v18562_v39 = vld [vmem:[#allocation61_spill] sm:$0xff]  ;;  %v18580_v32 = vld [vmem:[#allocation78_spill] sm:$0xff] }
0x1fc3   :  { %v18582_v35 = vld [vmem:[#allocation81_spill] sm:$0xff] }
0x1fc5   :  { %11378 = vmatpush1.bf16.msra.mxu1 %v12313_v40  ;;  %11542 = vmatpush1.bf16.msra.mxu0 %v12315_v49  ;;  %v12338_v40 = vcombine.high %v18562_v39, %v18561_v38  ;;  %v18563_v49 = vld [vmem:[#allocation64_spill] sm:$0xff] }
0x1fc6   :  { %11379 = vmatprep.subr.bf16.mxu1 %v12318_v48  ;;  %11543 = vmatprep.subr.bf16.mxu0 %v12320_v44  ;;  %v12340_v19 = vcombine.high %v18564_v2, %v18563_v49  ;;  %v12337_v48 = vcombine.low %v18562_v39, %v18561_v38  ;;  %v12339_v41 = vcombine.low %v18564_v2, %v18563_v49  ;;  %v18566_v44 = vld [vmem:[#allocation65_spill] sm:$0xff] }
0x1fc7   :  { %v18586_v49 = vld [vmem:[#allocation85_spill] sm:$0xff] }
0x1fc9   :  { %11380 = vmatpush1.bf16.msra.mxu1 %v12317_v1  ;;  %11544 = vmatpush1.bf16.msra.mxu0 %v12319_v29  ;;  %v12342_v1 = vcombine.high %v18566_v44, %v18565_v43  ;;  %v18567_v29 = vld [vmem:[#allocation68_spill] sm:$0xff] }
0x1fca   :  { %11381 = vmatprep.subr.bf16.mxu1 %v12322_v63  ;;  %11545 = vmatprep.subr.bf16.mxu0 %v12324_v10  ;;  %v12344_v17 = vcombine.high %v18568_v30, %v18567_v29  ;;  %v12341_v63 = vcombine.low %v18566_v44, %v18565_v43  ;;  %v12343_v60 = vcombine.low %v18568_v30, %v18567_v29  ;;  %v18570_v10 = vld [vmem:[#allocation69_spill] sm:$0xff] }
0x1fcb   :  { %v12345_v8 = vcombine.low %v18570_v10, %v18569_v9  ;;  %v18590_v29 = vld [vmem:[#allocation89_spill] sm:$0xff] }
0x1fcd   :  { %11382 = vmatpush1.bf16.msra.mxu1 %v12321_v3  ;;  %11546 = vmatpush1.bf16.msra.mxu0 %v12323_v22  ;;  %v12346_v3 = vcombine.high %v18570_v10, %v18569_v9  ;;  %v18571_v22 = vld [vmem:[#allocation72_spill] sm:$0xff] }
0x1fce   :  { %11383 = vmatprep.subr.bf16.mxu1 %v12326_v31  ;;  %11547 = vmatprep.subr.bf16.mxu0 %v12328_v14  ;;  %v12348_v56 = vcombine.high %v18572_v15, %v18571_v22  ;;  %v9814_v31 = vpack.c.bf16 %v9802_v54, %v9802_v54  ;;  %v12347_v0 = vcombine.low %v18572_v15, %v18571_v22  ;;  %v18573_v14 = vld [vmem:[#allocation75_spill] sm:$0xff]  ;;  %v18594_v22 = vld [vmem:[#allocation93_spill] sm:$0xff] }
0x1fd1   :  { %11384 = vmatpush1.bf16.msra.mxu1 %v12325_v42  ;;  %11548 = vmatpush1.bf16.msra.mxu0 %v12327_v13  ;;  %v18574_v42 = vld [vmem:[#allocation73_spill] sm:$0xff] }
0x1fd2   :  { %11385 = vmatprep.subr.bf16.mxu1 %v12330_v46  ;;  %11549 = vmatprep.subr.bf16.mxu0 %v12332_v50  ;;  %v12350_v13 = vcombine.high %v18574_v42, %v18573_v14  ;;  %v12352_v46 = vcombine.high %v18576_v61, %v18575_v53  ;;  %v12349_v54 = vcombine.low %v18574_v42, %v18573_v14  ;;  %v18578_v50 = vld [vmem:[#allocation77_spill] sm:$0xff]  ;;  %v18597_v42 = vld [vmem:[#allocation99_spill] sm:$0xff]  ;;  %v18599_v61 = vld [vmem:[#allocation100_spill] sm:$0xff] }
0x1fd3   :  { %v12353_v52 = vcombine.low %v18578_v50, %v18577_v26 }
0x1fd5   :  { %11386 = vmatpush1.bf16.msra.mxu1 %v12329_v59  ;;  %11550 = vmatpush1.bf16.msra.mxu0 %v12331_v7  ;;  %v12354_v59 = vcombine.high %v18578_v50, %v18577_v26  ;;  %v18579_v7 = vld [vmem:[#allocation80_spill] sm:$0xff]  ;;  %v18601_v26 = vld [vmem:[#allocation103_spill] sm:$0xff]  ;;  %v18602_v50 = vld [vmem:[#allocation101_spill] sm:$0xff] }
0x1fd6   :  { %11387 = vmatprep.subr.bf16.mxu1 %v12334_v34  ;;  %11551 = vmatprep.subr.bf16.mxu0 %v12336_v18  ;;  %v12356_v51 = vcombine.high %v18580_v32, %v18579_v7  ;;  %v12355_v33 = vcombine.low %v18580_v32, %v18579_v7  ;;  %v18581_v34 = vld [vmem:[#allocation83_spill] sm:$0xff]  ;;  %v18583_v18 = vld [vmem:[#allocation84_spill] sm:$0xff]  ;;  %v18604_v32 = vld [vmem:[#allocation102_spill] sm:$0xff] }
0x1fd7   :  { %v12358_v36 = vcombine.high %v18582_v35, %v18581_v34  ;;  %v12357_v38 = vcombine.low %v18582_v35, %v18581_v34  ;;  %v18603_v7 = vld [vmem:[#allocation104_spill] sm:$0xff]  ;;  %v18605_v34 = vld [vmem:[#allocation107_spill] sm:$0xff]  ;;  %v18606_v35 = vld [vmem:[#allocation105_spill] sm:$0xff] }
0x1fd9   :  { %11388 = vmatpush1.bf16.msra.mxu1 %v12333_v11  ;;  %11552 = vmatpush1.bf16.msra.mxu0 %v12335_v37  ;;  %v18584_v11 = vld [vmem:[#allocation82_spill] sm:$0xff] }
0x1fda   :  { %11389 = vmatprep.subr.bf16.mxu1 %v12338_v40  ;;  %11553 = vmatprep.subr.bf16.mxu0 %v12340_v19  ;;  %v12360_v37 = vcombine.high %v18584_v11, %v18583_v18  ;;  %v12359_v39 = vcombine.low %v18584_v11, %v18583_v18  ;;  %v18585_v40 = vld [vmem:[#allocation87_spill] sm:$0xff]  ;;  %v18587_v19 = vld [vmem:[#allocation88_spill] sm:$0xff]  ;;  %v18608_v11 = vld [vmem:[#allocation106_spill] sm:$0xff] }
0x1fdb   :  { %v12362_v2 = vcombine.high %v18586_v49, %v18585_v40  ;;  %v12361_v43 = vcombine.low %v18586_v49, %v18585_v40  ;;  %v18607_v18 = vld [vmem:[#allocation108_spill] sm:$0xff]  ;;  %v18609_v40 = vld [vmem:[#allocation111_spill] sm:$0xff]  ;;  %v18610_v49 = vld [vmem:[#allocation109_spill] sm:$0xff] }
0x1fdd   :  { %11390 = vmatpush1.bf16.msra.mxu1 %v12337_v48  ;;  %11554 = vmatpush1.bf16.msra.mxu0 %v12339_v41  ;;  %v18588_v48 = vld [vmem:[#allocation86_spill] sm:$0xff] }
0x1fde   :  { %11391 = vmatprep.subr.bf16.mxu1 %v12342_v1  ;;  %11555 = vmatprep.subr.bf16.mxu0 %v12344_v17  ;;  %v12364_v41 = vcombine.high %v18588_v48, %v18587_v19  ;;  %v12363_v44 = vcombine.low %v18588_v48, %v18587_v19  ;;  %v18589_v1 = vld [vmem:[#allocation91_spill] sm:$0xff]  ;;  %v18591_v17 = vld [vmem:[#allocation92_spill] sm:$0xff]  ;;  %v18612_v48 = vld [vmem:[#allocation110_spill] sm:$0xff] }
0x1fdf   :  { %v12366_v30 = vcombine.high %v18590_v29, %v18589_v1  ;;  %v12365_v9 = vcombine.low %v18590_v29, %v18589_v1  ;;  %v18611_v19 = vld [vmem:[#allocation112_spill] sm:$0xff]  ;;  %v18613_v1 = vld [vmem:[#allocation115_spill] sm:$0xff]  ;;  %v18614_v29 = vld [vmem:[#allocation113_spill] sm:$0xff] }
0x1fe1   :  { %11392 = vmatpush1.bf16.msra.mxu1 %v12341_v63  ;;  %11556 = vmatpush1.bf16.msra.mxu0 %v12343_v60  ;;  %v18592_v63 = vld [vmem:[#allocation90_spill] sm:$0xff] }
0x1fe2   :  { %11402 = vmatprep.subr.bf16.mxu1 %v12346_v3  ;;  %11566 = vmatprep.subr.bf16.mxu0 %v12348_v56  ;;  %v12368_v60 = vcombine.high %v18592_v63, %v18591_v17  ;;  %v12367_v10 = vcombine.low %v18592_v63, %v18591_v17  ;;  %v18593_v3 = vld [vmem:[#allocation95_spill] sm:$0xff]  ;;  %v18595_v56 = vld [vmem:[#allocation96_spill] sm:$0xff]  ;;  %v18616_v63 = vld [vmem:[#allocation114_spill] sm:$0xff] }
0x1fe3   :  { %v12370_v15 = vcombine.high %v18594_v22, %v18593_v3  ;;  %v18615_v17 = vld [vmem:[#allocation116_spill] sm:$0xff] }
0x1fe4   :  { %11394 = vmatmul.mubr.bf16.vlgmr.msra.gmra.mrb[48].mxu1 %v9814_v31  ;;  %11558 = vmatmul.mubr.bf16.vlgmr.msra.gmra.mrb[56].mxu0 %v9814_v31  ;;  %v18596_v31 = vld [vmem:[#allocation94_spill] sm:$0xff] }
0x1fe5   :  { %11403 = vmatpush1.bf16.msra.mxu1 %v12345_v8  ;;  %11567 = vmatpush1.bf16.msra.mxu0 %v12347_v0  ;;  %v12372_v8 = vcombine.high %v18596_v31, %v18595_v56  ;;  %v12369_v0 = vcombine.low %v18594_v22, %v18593_v3  ;;  %v12371_v14 = vcombine.low %v18596_v31, %v18595_v56  ;;  %v18617_v3 = vld [vmem:[#allocation119_spill] sm:$0xff]  ;;  %v18618_v22 = vld [vmem:[#allocation117_spill] sm:$0xff]  ;;  %v18619_v56 = vld [vmem:[#allocation120_spill] sm:$0xff] }
0x1fe6   :  { %11404 = vmatprep.subr.bf16.mxu1 %v12350_v13  ;;  %11568 = vmatprep.subr.bf16.mxu0 %v12352_v46  ;;  %v18598_v13 = vld [vmem:[#allocation97_spill] sm:$0xff]  ;;  %v18600_v46 = vld [vmem:[#allocation98_spill] sm:$0xff] }
0x1fe7   :  { %11434 = vmatprep.mubr.bf16.mxu1 %v9817_v20  ;;  %11598 = vmatprep.mubr.bf16.mxu0 %v9817_v20  ;;  %v12374_v53 = vcombine.high %v18598_v13, %v18597_v42  ;;  %v12376_v20 = vcombine.high %v18600_v46, %v18599_v61  ;;  %v18620_v31 = vld [vmem:[#allocation118_spill] sm:$0xff] }
0x1fe9   :  { %11405 = vmatpush1.bf16.msra.mxu1 %v12349_v54  ;;  %11569 = vmatpush1.bf16.msra.mxu0 %v12351_v58  ;;  %v12373_v54 = vcombine.low %v18598_v13, %v18597_v42  ;;  %v12375_v58 = vcombine.low %v18600_v46, %v18599_v61  ;;  %v18621_v42 = vld [vmem:[#allocation123_spill] sm:$0xff]  ;;  %v18622_v13 = vld [vmem:[#allocation121_spill] sm:$0xff]  ;;  %v18623_v61 = vld [vmem:[#allocation124_spill] sm:$0xff] }
0x1fea   :  { %11406 = vmatprep.subr.bf16.mxu1 %v12354_v59  ;;  %11570 = vmatprep.subr.bf16.mxu0 %v12356_v51  ;;  %v12378_v59 = vcombine.high %v18602_v50, %v18601_v26  ;;  %v12380_v51 = vcombine.high %v18604_v32, %v18603_v7  ;;  %v18624_v46 = vld [vmem:[#allocation122_spill] sm:$0xff] }
0x1fed   :  { %11407 = vmatpush1.bf16.msra.mxu1 %v12353_v52  ;;  %11571 = vmatpush1.bf16.msra.mxu0 %v12355_v33  ;;  %v12377_v52 = vcombine.low %v18602_v50, %v18601_v26  ;;  %v12379_v33 = vcombine.low %v18604_v32, %v18603_v7  ;;  %v18625_v26 = vld [vmem:[#allocation127_spill] sm:$0xff]  ;;  %v18626_v50 = vld [vmem:[#allocation125_spill] sm:$0xff]  ;;  %v18627_v7 = vld [vmem:[#allocation128_spill] sm:$0xff] }
0x1fee   :  { %11408 = vmatprep.subr.bf16.mxu1 %v12358_v36  ;;  %11572 = vmatprep.subr.bf16.mxu0 %v12360_v37  ;;  %v12382_v36 = vcombine.high %v18606_v35, %v18605_v34  ;;  %v12384_v37 = vcombine.high %v18608_v11, %v18607_v18  ;;  %v18628_v32 = vld [vmem:[#allocation126_spill] sm:$0xff] }
0x1ff1   :  { %11409 = vmatpush1.bf16.msra.mxu1 %v12357_v38  ;;  %11573 = vmatpush1.bf16.msra.mxu0 %v12359_v39  ;;  %v12381_v38 = vcombine.low %v18606_v35, %v18605_v34  ;;  %v12383_v39 = vcombine.low %v18608_v11, %v18607_v18  ;;  %v18629_v34 = vld [vmem:[#allocation131_spill] sm:$0xff]  ;;  %v18630_v35 = vld [vmem:[#allocation129_spill] sm:$0xff]  ;;  %v18631_v18 = vld [vmem:[#allocation132_spill] sm:$0xff] }
0x1ff2   :  { %11410 = vmatprep.subr.bf16.mxu1 %v12362_v2  ;;  %11574 = vmatprep.subr.bf16.mxu0 %v12364_v41  ;;  %v12386_v2 = vcombine.high %v18610_v49, %v18609_v40  ;;  %v12388_v41 = vcombine.high %v18612_v48, %v18611_v19  ;;  %v18632_v11 = vld [vmem:[#allocation130_spill] sm:$0xff] }
0x1ff5   :  { %11411 = vmatpush1.bf16.msra.mxu1 %v12361_v43  ;;  %11575 = vmatpush1.bf16.msra.mxu0 %v12363_v44  ;;  %v12385_v43 = vcombine.low %v18610_v49, %v18609_v40  ;;  %v12387_v44 = vcombine.low %v18612_v48, %v18611_v19  ;;  %v18633_v40 = vld [vmem:[#allocation135_spill] sm:$0xff]  ;;  %v18634_v49 = vld [vmem:[#allocation133_spill] sm:$0xff]  ;;  %v18635_v19 = vld [vmem:[#allocation136_spill] sm:$0xff] }
0x1ff6   :  { %11412 = vmatprep.subr.bf16.mxu1 %v12366_v30  ;;  %11576 = vmatprep.subr.bf16.mxu0 %v12368_v60  ;;  %v12390_v30 = vcombine.high %v18614_v29, %v18613_v1  ;;  %v12392_v60 = vcombine.high %v18616_v63, %v18615_v17  ;;  %v18636_v48 = vld [vmem:[#allocation134_spill] sm:$0xff] }
0x1ff9   :  { %11413 = vmatpush1.bf16.msra.mxu1 %v12365_v9  ;;  %11577 = vmatpush1.bf16.msra.mxu0 %v12367_v10  ;;  %v12389_v9 = vcombine.low %v18614_v29, %v18613_v1  ;;  %v12391_v10 = vcombine.low %v18616_v63, %v18615_v17  ;;  %v12411_v1 = vcombine.low %v18636_v48, %v18635_v19  ;;  %v18637_v29 = vld [vmem:[#allocation139_spill] sm:$0xff]  ;;  %v18639_v63 = vld [vmem:[#allocation140_spill] sm:$0xff] }
0x1ffa   :  { %11414 = vmatprep.subr.bf16.mxu1 %v12370_v15  ;;  %11578 = vmatprep.subr.bf16.mxu0 %v12372_v8  ;;  %v12394_v15 = vcombine.high %v18618_v22, %v18617_v3  ;;  %v12396_v8 = vcombine.high %v18620_v31, %v18619_v56 }
0x1ffd   :  { %11415 = vmatpush1.bf16.msra.mxu1 %v12369_v0  ;;  %11579 = vmatpush1.bf16.msra.mxu0 %v12371_v14  ;;  %v12393_v0 = vcombine.low %v18618_v22, %v18617_v3  ;;  %v12395_v14 = vcombine.low %v18620_v31, %v18619_v56  ;;  %v18641_v3 = vld [vmem:[#allocation143_spill] sm:$0xff]  ;;  %v18642_v22 = vld [vmem:[#allocation141_spill] sm:$0xff]  ;;  %v18643_v56 = vld [vmem:[#allocation144_spill] sm:$0xff] }
0x1ffe   :  { %11416 = vmatprep.subr.bf16.mxu1 %v12374_v53  ;;  %11580 = vmatprep.subr.bf16.mxu0 %v12376_v20  ;;  %v12398_v53 = vcombine.high %v18622_v13, %v18621_v42  ;;  %v12400_v20 = vcombine.high %v18624_v46, %v18623_v61  ;;  %v18644_v31 = vld [vmem:[#allocation142_spill] sm:$0xff]  ;;  %v12417_v24 = vcombine.low %v18642_v22, %v18641_v3 }
0x1fff   :  { %v12420_v25 = vcombine.high %v18644_v31, %v18643_v56 }
0x2001   :  { %11417 = vmatpush1.bf16.msra.mxu1 %v12373_v54  ;;  %11581 = vmatpush1.bf16.msra.mxu0 %v12375_v58  ;;  %v12397_v54 = vcombine.low %v18622_v13, %v18621_v42  ;;  %v12399_v58 = vcombine.low %v18624_v46, %v18623_v61  ;;  %v18647_v13 = vld [vmem:[#allocation148_spill] sm:$0xff] }
0x2002   :  { %11418 = vmatprep.subr.bf16.mxu1 %v12378_v59  ;;  %11582 = vmatprep.subr.bf16.mxu0 %v12380_v51  ;;  %v12402_v59 = vcombine.high %v18626_v50, %v18625_v26  ;;  %v12404_v51 = vcombine.high %v18628_v32, %v18627_v7 }
0x2005   :  { %11419 = vmatpush1.bf16.msra.mxu1 %v12377_v52  ;;  %11583 = vmatpush1.bf16.msra.mxu0 %v12379_v33  ;;  %v12401_v52 = vcombine.low %v18626_v50, %v18625_v26  ;;  %v12403_v33 = vcombine.low %v18628_v32, %v18627_v7  ;;  %v18651_v50 = vld [vmem:[#allocation152_spill] sm:$0xff] }
0x2006   :  { %11420 = vmatprep.subr.bf16.mxu1 %v12382_v36  ;;  %11584 = vmatprep.subr.bf16.mxu0 %v12384_v37  ;;  %v12406_v36 = vcombine.high %v18630_v35, %v18629_v34  ;;  %v12408_v37 = vcombine.high %v18632_v11, %v18631_v18 }
0x2009   :  { %11421 = vmatpush1.bf16.msra.mxu1 %v12381_v38  ;;  %11585 = vmatpush1.bf16.msra.mxu0 %v12383_v39  ;;  %v12405_v38 = vcombine.low %v18630_v35, %v18629_v34  ;;  %v12407_v39 = vcombine.low %v18632_v11, %v18631_v18  ;;  %v18655_v35 = vld [vmem:[#allocation156_spill] sm:$0xff] }
0x200a   :  { %11422 = vmatprep.subr.bf16.mxu1 %v12386_v2  ;;  %11586 = vmatprep.subr.bf16.mxu0 %v12388_v41  ;;  %v12410_v2 = vcombine.high %v18634_v49, %v18633_v40  ;;  %v12412_v41 = vcombine.high %v18636_v48, %v18635_v19 }
0x200d   :  { %11423 = vmatpush1.bf16.msra.mxu1 %v12385_v43  ;;  %11587 = vmatpush1.bf16.msra.mxu0 %v12387_v44  ;;  %v9816_v43 = vpack.c.bf16 %v9804_v62, %v9804_v62  ;;  %v12409_v44 = vcombine.low %v18634_v49, %v18633_v40  ;;  %v18659_v49 = vld [vmem:[#allocation160_spill] sm:$0xff] }
0x200e   :  { %11424 = vmatprep.subr.bf16.mxu1 %v12390_v30  ;;  %11588 = vmatprep.subr.bf16.mxu0 %v12392_v60  ;;  %v18638_v30 = vld [vmem:[#allocation137_spill] sm:$0xff]  ;;  %v18640_v60 = vld [vmem:[#allocation138_spill] sm:$0xff] }
0x200f   :  { %v12414_v17 = vcombine.high %v18638_v30, %v18637_v29  ;;  %v12413_v62 = vcombine.low %v18638_v30, %v18637_v29  ;;  %v18663_v29 = vld [vmem:[#allocation164_spill] sm:$0xff]  ;;  %v18664_v30 = vld [vmem:[#allocation162_spill] sm:$0xff] }
0x2011   :  { %11425 = vmatpush1.bf16.msra.mxu1 %v12389_v9  ;;  %11589 = vmatpush1.bf16.msra.mxu0 %v12391_v10  ;;  %v12416_v9 = vcombine.high %v18640_v60, %v18639_v63  ;;  %v12415_v10 = vcombine.low %v18640_v60, %v18639_v63  ;;  %v12439_v60 = vcombine.low %v18664_v30, %v18663_v29 }
0x2012   :  { %11426 = vmatprep.subr.bf16.mxu1 %v12394_v15  ;;  %11590 = vmatprep.subr.bf16.mxu0 %v12396_v8  ;;  %v12418_v15 = vcombine.high %v18642_v22, %v18641_v3  ;;  %v12419_v8 = vcombine.low %v18644_v31, %v18643_v56  ;;  %v18668_v3 = vld [vmem:[#allocation166_spill] sm:$0xff]  ;;  %v18669_v31 = vld [vmem:[#allocation171_spill] sm:$0xff] }
0x2015   :  { %11427 = vmatpush1.bf16.msra.mxu1 %v12393_v0  ;;  %11591 = vmatpush1.bf16.msra.mxu0 %v12395_v14  ;;  %v18645_v0 = vld [vmem:[#allocation147_spill] sm:$0xff]  ;;  %v18646_v14 = vld [vmem:[#allocation145_spill] sm:$0xff] }
0x2016   :  { %11428 = vmatprep.subr.bf16.mxu1 %v12398_v53  ;;  %11592 = vmatprep.subr.bf16.mxu0 %v12400_v20  ;;  %v12422_v42 = vcombine.high %v18646_v14, %v18645_v0  ;;  %v18648_v53 = vld [vmem:[#allocation146_spill] sm:$0xff]  ;;  %v12421_v46 = vcombine.low %v18646_v14, %v18645_v0 }
0x2017   :  { %v12424_v61 = vcombine.high %v18648_v53, %v18647_v13  ;;  %v12423_v20 = vcombine.low %v18648_v53, %v18647_v13  ;;  %v18672_v0 = vld [vmem:[#allocation170_spill] sm:$0xff]  ;;  %v18673_v53 = vld [vmem:[#allocation175_spill] sm:$0xff] }
0x2019   :  { %11429 = vmatpush1.bf16.msra.mxu1 %v12397_v54  ;;  %11593 = vmatpush1.bf16.msra.mxu0 %v12399_v58  ;;  %v18649_v54 = vld [vmem:[#allocation151_spill] sm:$0xff]  ;;  %v18650_v58 = vld [vmem:[#allocation149_spill] sm:$0xff] }
0x201a   :  { %11430 = vmatprep.subr.bf16.mxu1 %v12402_v59  ;;  %11594 = vmatprep.subr.bf16.mxu0 %v12404_v51  ;;  %v12426_v26 = vcombine.high %v18650_v58, %v18649_v54  ;;  %v18652_v59 = vld [vmem:[#allocation150_spill] sm:$0xff]  ;;  %v12425_v32 = vcombine.low %v18650_v58, %v18649_v54 }
0x201b   :  { %v12428_v7 = vcombine.high %v18652_v59, %v18651_v50  ;;  %v12427_v51 = vcombine.low %v18652_v59, %v18651_v50  ;;  %v18676_v54 = vld [vmem:[#allocation174_spill] sm:$0xff]  ;;  %v18677_v59 = vld [vmem:[#allocation179_spill] sm:$0xff] }
0x201d   :  { %11431 = vmatpush1.bf16.msra.mxu1 %v12401_v52  ;;  %11595 = vmatpush1.bf16.msra.mxu0 %v12403_v33  ;;  %v18653_v52 = vld [vmem:[#allocation155_spill] sm:$0xff]  ;;  %v18654_v33 = vld [vmem:[#allocation153_spill] sm:$0xff] }
0x201e   :  { %11432 = vmatprep.subr.bf16.mxu1 %v12406_v36  ;;  %11596 = vmatprep.subr.bf16.mxu0 %v12408_v37  ;;  %v12430_v34 = vcombine.high %v18654_v33, %v18653_v52  ;;  %v18656_v36 = vld [vmem:[#allocation154_spill] sm:$0xff]  ;;  %v12429_v11 = vcombine.low %v18654_v33, %v18653_v52 }
0x201f   :  { %v12432_v18 = vcombine.high %v18656_v36, %v18655_v35  ;;  %v12431_v37 = vcombine.low %v18656_v36, %v18655_v35  ;;  %v18680_v52 = vld [vmem:[#allocation178_spill] sm:$0xff]  ;;  %v18681_v36 = vld [vmem:[#allocation183_spill] sm:$0xff] }
0x2021   :  { %11433 = vmatpush1.bf16.msra.mxu1 %v12405_v38  ;;  %11597 = vmatpush1.bf16.msra.mxu0 %v12407_v39  ;;  %v18657_v38 = vld [vmem:[#allocation159_spill] sm:$0xff]  ;;  %v18658_v39 = vld [vmem:[#allocation157_spill] sm:$0xff] }
0x2022   :  { %11443 = vmatprep.subr.bf16.mxu1 %v12410_v2  ;;  %11607 = vmatprep.subr.bf16.mxu0 %v12412_v41  ;;  %v12434_v40 = vcombine.high %v18658_v39, %v18657_v38  ;;  %v18660_v2 = vld [vmem:[#allocation158_spill] sm:$0xff]  ;;  %v12433_v48 = vcombine.low %v18658_v39, %v18657_v38 }
0x2023   :  { %v12436_v19 = vcombine.high %v18660_v2, %v18659_v49  ;;  %v12435_v41 = vcombine.low %v18660_v2, %v18659_v49  ;;  %v18684_v38 = vld [vmem:[#allocation182_spill] sm:$0xff]  ;;  %v18685_v2 = vld [vmem:[#allocation187_spill] sm:$0xff] }
0x2024   :  { %11435 = vmatmul.mubr.bf16.vlgmr.msra.gmra.mrb[48].mxu1 %v9816_v43  ;;  %11599 = vmatmul.mubr.bf16.vlgmr.msra.gmra.mrb[56].mxu0 %v9816_v43  ;;  %v18661_v43 = vld [vmem:[#allocation163_spill] sm:$0xff] }
0x2025   :  { %11444 = vmatpush1.bf16.msra.mxu1 %v12409_v44  ;;  %11608 = vmatpush1.bf16.msra.mxu0 %v12411_v1  ;;  %v18662_v44 = vld [vmem:[#allocation161_spill] sm:$0xff] }
0x2026   :  { %11445 = vmatprep.subr.bf16.mxu1 %v12414_v17  ;;  %11609 = vmatprep.subr.bf16.mxu0 %v12416_v9  ;;  %v12438_v1 = vcombine.high %v18662_v44, %v18661_v43  ;;  %v12440_v17 = vcombine.high %v18664_v30, %v18663_v29  ;;  %v12437_v63 = vcombine.low %v18662_v44, %v18661_v43  ;;  %v18665_v9 = vld [vmem:[#allocation167_spill] sm:$0xff]  ;;  %v18688_v43 = vld [vmem:[#allocation186_spill] sm:$0xff] }
0x2027   :  { %11475 = vmatprep.mubr.bf16.mxu1 %v9819_v27  ;;  %11639 = vmatprep.mubr.bf16.mxu0 %v9819_v27  ;;  %v18666_v27 = vld [vmem:[#allocation165_spill] sm:$0xff]  ;;  %v18689_v30 = vld [vmem:[#allocation191_spill] sm:$0xff] }
0x2029   :  { %11446 = vmatpush1.bf16.msra.mxu1 %v12413_v62  ;;  %11610 = vmatpush1.bf16.msra.mxu0 %v12415_v10  ;;  %v12442_v62 = vcombine.high %v18666_v27, %v18665_v9  ;;  %v18667_v10 = vld [vmem:[#allocation168_spill] sm:$0xff] }
0x202a   :  { %11447 = vmatprep.subr.bf16.mxu1 %v12418_v15  ;;  %11611 = vmatprep.subr.bf16.mxu0 %v12420_v25  ;;  %v12444_v22 = vcombine.high %v18668_v3, %v18667_v10  ;;  %v12441_v15 = vcombine.low %v18666_v27, %v18665_v9  ;;  %v12443_v56 = vcombine.low %v18668_v3, %v18667_v10  ;;  %v18670_v25 = vld [vmem:[#allocation169_spill] sm:$0xff]  ;;  %v18692_v9 = vld [vmem:[#allocation190_spill] sm:$0xff]  ;;  %v18693_v3 = vld [vmem:[#allocation195_spill] sm:$0xff] }
0x202d   :  { %11448 = vmatpush1.bf16.msra.mxu1 %v12417_v24  ;;  %11612 = vmatpush1.bf16.msra.mxu0 %v12419_v8  ;;  %v12446_v24 = vcombine.high %v18670_v25, %v18669_v31  ;;  %v18671_v8 = vld [vmem:[#allocation172_spill] sm:$0xff] }
0x202e   :  { %11449 = vmatprep.subr.bf16.mxu1 %v12422_v42  ;;  %11613 = vmatprep.subr.bf16.mxu0 %v12424_v61  ;;  %v12448_v14 = vcombine.high %v18672_v0, %v18671_v8  ;;  %v12445_v42 = vcombine.low %v18670_v25, %v18669_v31  ;;  %v12447_v13 = vcombine.low %v18672_v0, %v18671_v8  ;;  %v18674_v61 = vld [vmem:[#allocation173_spill] sm:$0xff]  ;;  %v18696_v31 = vld [vmem:[#allocation194_spill] sm:$0xff]  ;;  %v18697_v0 = vld [vmem:[#allocation199_spill] sm:$0xff] }
0x2031   :  { %11450 = vmatpush1.bf16.msra.mxu1 %v12421_v46  ;;  %11614 = vmatpush1.bf16.msra.mxu0 %v12423_v20  ;;  %v12450_v46 = vcombine.high %v18674_v61, %v18673_v53  ;;  %v18675_v20 = vld [vmem:[#allocation176_spill] sm:$0xff] }
0x2032   :  { %11451 = vmatprep.subr.bf16.mxu1 %v12426_v26  ;;  %11615 = vmatprep.subr.bf16.mxu0 %v12428_v7  ;;  %v12452_v58 = vcombine.high %v18676_v54, %v18675_v20  ;;  %v12449_v26 = vcombine.low %v18674_v61, %v18673_v53  ;;  %v12451_v50 = vcombine.low %v18676_v54, %v18675_v20  ;;  %v18678_v7 = vld [vmem:[#allocation177_spill] sm:$0xff]  ;;  %v18700_v53 = vld [vmem:[#allocation198_spill] sm:$0xff] }
0x2035   :  { %11452 = vmatpush1.bf16.msra.mxu1 %v12425_v32  ;;  %11616 = vmatpush1.bf16.msra.mxu0 %v12427_v51  ;;  %v12454_v32 = vcombine.high %v18678_v7, %v18677_v59  ;;  %v18679_v51 = vld [vmem:[#allocation180_spill] sm:$0xff] }
0x2036   :  { %11453 = vmatprep.subr.bf16.mxu1 %v12430_v34  ;;  %11617 = vmatprep.subr.bf16.mxu0 %v12432_v18  ;;  %v12456_v33 = vcombine.high %v18680_v52, %v18679_v51  ;;  %v12453_v34 = vcombine.low %v18678_v7, %v18677_v59  ;;  %v12455_v35 = vcombine.low %v18680_v52, %v18679_v51  ;;  %v18682_v18 = vld [vmem:[#allocation181_spill] sm:$0xff]  ;;  %v18703_v59 = vld [vmem:[#allocation204_spill] sm:$0xff]  ;;  %v18704_v7 = vld [vmem:[#allocation202_spill] sm:$0xff] }
0x2037   :  { %v12479_v51 = vcombine.low %v18704_v7, %v18703_v59  ;;  %v18705_v52 = vld [vmem:[#allocation207_spill] sm:$0xff] }
0x2039   :  { %11454 = vmatpush1.bf16.msra.mxu1 %v12429_v11  ;;  %11618 = vmatpush1.bf16.msra.mxu0 %v12431_v37  ;;  %v12458_v11 = vcombine.high %v18682_v18, %v18681_v36  ;;  %v18683_v37 = vld [vmem:[#allocation184_spill] sm:$0xff] }
0x203a   :  { %11455 = vmatprep.subr.bf16.mxu1 %v12434_v40  ;;  %11619 = vmatprep.subr.bf16.mxu0 %v12436_v19  ;;  %v12460_v39 = vcombine.high %v18684_v38, %v18683_v37  ;;  %v12457_v40 = vcombine.low %v18682_v18, %v18681_v36  ;;  %v12459_v49 = vcombine.low %v18684_v38, %v18683_v37  ;;  %v18686_v19 = vld [vmem:[#allocation185_spill] sm:$0xff] }
0x203b   :  { %v18710_v37 = vld [vmem:[#allocation209_spill] sm:$0xff] }
0x203d   :  { %11456 = vmatpush1.bf16.msra.mxu1 %v12433_v48  ;;  %11620 = vmatpush1.bf16.msra.mxu0 %v12435_v41  ;;  %v12462_v48 = vcombine.high %v18686_v19, %v18685_v2  ;;  %v18687_v41 = vld [vmem:[#allocation188_spill] sm:$0xff] }
0x203e   :  { %11457 = vmatprep.subr.bf16.mxu1 %v12438_v1  ;;  %11621 = vmatprep.subr.bf16.mxu0 %v12440_v17  ;;  %v12464_v44 = vcombine.high %v18688_v43, %v18687_v41  ;;  %v12461_v1 = vcombine.low %v18686_v19, %v18685_v2  ;;  %v12463_v29 = vcombine.low %v18688_v43, %v18687_v41  ;;  %v18690_v17 = vld [vmem:[#allocation189_spill] sm:$0xff] }
0x203f   :  { %v18714_v41 = vld [vmem:[#allocation213_spill] sm:$0xff] }
0x2041   :  { %11458 = vmatpush1.bf16.msra.mxu1 %v12437_v63  ;;  %11622 = vmatpush1.bf16.msra.mxu0 %v12439_v60  ;;  %v12466_v63 = vcombine.high %v18690_v17, %v18689_v30  ;;  %v18691_v60 = vld [vmem:[#allocation192_spill] sm:$0xff] }
0x2042   :  { %11459 = vmatprep.subr.bf16.mxu1 %v12442_v62  ;;  %11623 = vmatprep.subr.bf16.mxu0 %v12444_v22  ;;  %v12468_v27 = vcombine.high %v18692_v9, %v18691_v60  ;;  %v12465_v62 = vcombine.low %v18690_v17, %v18689_v30  ;;  %v12467_v10 = vcombine.low %v18692_v9, %v18691_v60  ;;  %v18694_v22 = vld [vmem:[#allocation193_spill] sm:$0xff] }
0x2043   :  { %v18718_v60 = vld [vmem:[#allocation217_spill] sm:$0xff] }
0x2045   :  { %11460 = vmatpush1.bf16.msra.mxu1 %v12441_v15  ;;  %11624 = vmatpush1.bf16.msra.mxu0 %v12443_v56  ;;  %v12470_v15 = vcombine.high %v18694_v22, %v18693_v3  ;;  %v18695_v56 = vld [vmem:[#allocation196_spill] sm:$0xff] }
0x2046   :  { %11461 = vmatprep.subr.bf16.mxu1 %v12446_v24  ;;  %11625 = vmatprep.subr.bf16.mxu0 %v12448_v14  ;;  %v12472_v25 = vcombine.high %v18696_v31, %v18695_v56  ;;  %v12469_v24 = vcombine.low %v18694_v22, %v18693_v3  ;;  %v12471_v8 = vcombine.low %v18696_v31, %v18695_v56  ;;  %v18698_v14 = vld [vmem:[#allocation197_spill] sm:$0xff] }
0x2047   :  { %v12473_v20 = vcombine.low %v18698_v14, %v18697_v0  ;;  %v18722_v56 = vld [vmem:[#allocation221_spill] sm:$0xff] }
0x2049   :  { %11462 = vmatpush1.bf16.msra.mxu1 %v12445_v42  ;;  %11626 = vmatpush1.bf16.msra.mxu0 %v12447_v13  ;;  %v12474_v42 = vcombine.high %v18698_v14, %v18697_v0  ;;  %v18699_v13 = vld [vmem:[#allocation200_spill] sm:$0xff] }
0x204a   :  { %11463 = vmatprep.subr.bf16.mxu1 %v12450_v46  ;;  %11627 = vmatprep.subr.bf16.mxu0 %v12452_v58  ;;  %v12476_v61 = vcombine.high %v18700_v53, %v18699_v13  ;;  %v9818_v46 = vpack.c.bf16 %v9806_v4, %v9806_v4  ;;  %v12475_v54 = vcombine.low %v18700_v53, %v18699_v13  ;;  %v18701_v58 = vld [vmem:[#allocation203_spill] sm:$0xff]  ;;  %v18726_v13 = vld [vmem:[#allocation225_spill] sm:$0xff] }
0x204d   :  { %11464 = vmatpush1.bf16.msra.mxu1 %v12449_v26  ;;  %11628 = vmatpush1.bf16.msra.mxu0 %v12451_v50  ;;  %v18702_v26 = vld [vmem:[#allocation201_spill] sm:$0xff] }
0x204e   :  { %11465 = vmatprep.subr.bf16.mxu1 %v12454_v32  ;;  %11629 = vmatprep.subr.bf16.mxu0 %v12456_v33  ;;  %v12478_v50 = vcombine.high %v18702_v26, %v18701_v58  ;;  %v12480_v32 = vcombine.high %v18704_v7, %v18703_v59  ;;  %v12477_v4 = vcombine.low %v18702_v26, %v18701_v58  ;;  %v18706_v33 = vld [vmem:[#allocation205_spill] sm:$0xff]  ;;  %v18729_v26 = vld [vmem:[#allocation231_spill] sm:$0xff]  ;;  %v18731_v7 = vld [vmem:[#allocation232_spill] sm:$0xff] }
0x204f   :  { %v12481_v57 = vcombine.low %v18706_v33, %v18705_v52 }
0x2051   :  { %11466 = vmatpush1.bf16.msra.mxu1 %v12453_v34  ;;  %11630 = vmatpush1.bf16.msra.mxu0 %v12455_v35  ;;  %v12482_v34 = vcombine.high %v18706_v33, %v18705_v52  ;;  %v18707_v35 = vld [vmem:[#allocation208_spill] sm:$0xff]  ;;  %v18733_v52 = vld [vmem:[#allocation235_spill] sm:$0xff]  ;;  %v18734_v33 = vld [vmem:[#allocation233_spill] sm:$0xff] }
0x2052   :  { %11467 = vmatprep.subr.bf16.mxu1 %v12458_v11  ;;  %11631 = vmatprep.subr.bf16.mxu0 %v12460_v39  ;;  %v12484_v36 = vcombine.high %v18708_v47, %v18707_v35  ;;  %v12483_v18 = vcombine.low %v18708_v47, %v18707_v35  ;;  %v18709_v11 = vld [vmem:[#allocation211_spill] sm:$0xff]  ;;  %v18711_v39 = vld [vmem:[#allocation212_spill] sm:$0xff]  ;;  %v18736_v47 = vld [vmem:[#allocation234_spill] sm:$0xff] }
0x2053   :  { %v12486_v38 = vcombine.high %v18710_v37, %v18709_v11  ;;  %v12485_v2 = vcombine.low %v18710_v37, %v18709_v11  ;;  %v18735_v35 = vld [vmem:[#allocation236_spill] sm:$0xff]  ;;  %v18737_v11 = vld [vmem:[#allocation239_spill] sm:$0xff]  ;;  %v18738_v37 = vld [vmem:[#allocation237_spill] sm:$0xff] }
0x2055   :  { %11468 = vmatpush1.bf16.msra.mxu1 %v12457_v40  ;;  %11632 = vmatpush1.bf16.msra.mxu0 %v12459_v49  ;;  %v18712_v40 = vld [vmem:[#allocation210_spill] sm:$0xff] }
0x2056   :  { %11469 = vmatprep.subr.bf16.mxu1 %v12462_v48  ;;  %11633 = vmatprep.subr.bf16.mxu0 %v12464_v44  ;;  %v12488_v49 = vcombine.high %v18712_v40, %v18711_v39  ;;  %v12487_v19 = vcombine.low %v18712_v40, %v18711_v39  ;;  %v18713_v48 = vld [vmem:[#allocation215_spill] sm:$0xff]  ;;  %v18715_v44 = vld [vmem:[#allocation216_spill] sm:$0xff]  ;;  %v18740_v40 = vld [vmem:[#allocation238_spill] sm:$0xff] }
0x2057   :  { %v12490_v43 = vcombine.high %v18714_v41, %v18713_v48  ;;  %v12489_v30 = vcombine.low %v18714_v41, %v18713_v48  ;;  %v18739_v39 = vld [vmem:[#allocation240_spill] sm:$0xff]  ;;  %v18741_v48 = vld [vmem:[#allocation243_spill] sm:$0xff]  ;;  %v18742_v41 = vld [vmem:[#allocation241_spill] sm:$0xff] }
0x2059   :  { %11470 = vmatpush1.bf16.msra.mxu1 %v12461_v1  ;;  %11634 = vmatpush1.bf16.msra.mxu0 %v12463_v29  ;;  %v18716_v1 = vld [vmem:[#allocation214_spill] sm:$0xff] }
0x205a   :  { %11471 = vmatprep.subr.bf16.mxu1 %v12466_v63  ;;  %11635 = vmatprep.subr.bf16.mxu0 %v12468_v27  ;;  %v12492_v29 = vcombine.high %v18716_v1, %v18715_v44  ;;  %v12491_v17 = vcombine.low %v18716_v1, %v18715_v44  ;;  %v18717_v63 = vld [vmem:[#allocation219_spill] sm:$0xff]  ;;  %v18719_v27 = vld [vmem:[#allocation220_spill] sm:$0xff]  ;;  %v18744_v1 = vld [vmem:[#allocation242_spill] sm:$0xff] }
0x205b   :  { %v12494_v9 = vcombine.high %v18718_v60, %v18717_v63  ;;  %v12493_v3 = vcombine.low %v18718_v60, %v18717_v63  ;;  %v18743_v44 = vld [vmem:[#allocation244_spill] sm:$0xff]  ;;  %v18745_v63 = vld [vmem:[#allocation247_spill] sm:$0xff]  ;;  %v18746_v60 = vld [vmem:[#allocation245_spill] sm:$0xff] }
0x205d   :  { %11472 = vmatpush1.bf16.msra.mxu1 %v12465_v62  ;;  %11636 = vmatpush1.bf16.msra.mxu0 %v12467_v10  ;;  %v18720_v62 = vld [vmem:[#allocation218_spill] sm:$0xff] }
0x205e   :  { %11473 = vmatprep.subr.bf16.mxu1 %v12470_v15  ;;  %11637 = vmatprep.subr.bf16.mxu0 %v12472_v25  ;;  %v12496_v10 = vcombine.high %v18720_v62, %v18719_v27  ;;  %v12495_v22 = vcombine.low %v18720_v62, %v18719_v27  ;;  %v18721_v15 = vld [vmem:[#allocation223_spill] sm:$0xff]  ;;  %v18723_v25 = vld [vmem:[#allocation224_spill] sm:$0xff]  ;;  %v18748_v62 = vld [vmem:[#allocation246_spill] sm:$0xff] }
0x205f   :  { %v12498_v31 = vcombine.high %v18722_v56, %v18721_v15  ;;  %v12497_v0 = vcombine.low %v18722_v56, %v18721_v15  ;;  %v18747_v27 = vld [vmem:[#allocation248_spill] sm:$0xff]  ;;  %v18749_v15 = vld [vmem:[#allocation251_spill] sm:$0xff]  ;;  %v18750_v56 = vld [vmem:[#allocation249_spill] sm:$0xff] }
0x2061   :  { %11474 = vmatpush1.bf16.msra.mxu1 %v12469_v24  ;;  %11638 = vmatpush1.bf16.msra.mxu0 %v12471_v8  ;;  %v18724_v24 = vld [vmem:[#allocation222_spill] sm:$0xff] }
0x2062   :  { %11484 = vmatprep.subr.bf16.mxu1 %v12474_v42  ;;  %11648 = vmatprep.subr.bf16.mxu0 %v12476_v61  ;;  %v12500_v8 = vcombine.high %v18724_v24, %v18723_v25  ;;  %v12499_v14 = vcombine.low %v18724_v24, %v18723_v25  ;;  %v18725_v42 = vld [vmem:[#allocation227_spill] sm:$0xff]  ;;  %v18727_v61 = vld [vmem:[#allocation228_spill] sm:$0xff]  ;;  %v18752_v24 = vld [vmem:[#allocation250_spill] sm:$0xff] }
0x2063   :  { %v12502_v53 = vcombine.high %v18726_v13, %v18725_v42  ;;  %v18751_v25 = vld [vmem:[#allocation252_spill] sm:$0xff] }
0x2064   :  { %11476 = vmatmul.mubr.bf16.vlgmr.msra.gmra.mrb[48].mxu1 %v9818_v46  ;;  %11640 = vmatmul.mubr.bf16.vlgmr.msra.gmra.mrb[56].mxu0 %v9818_v46  ;;  %v18728_v46 = vld [vmem:[#allocation226_spill] sm:$0xff] }
0x2065   :  { %11485 = vmatpush1.bf16.msra.mxu1 %v12473_v20  ;;  %11649 = vmatpush1.bf16.msra.mxu0 %v12475_v54  ;;  %v12504_v20 = vcombine.high %v18728_v46, %v18727_v61  ;;  %v12501_v54 = vcombine.low %v18726_v13, %v18725_v42  ;;  %v12503_v58 = vcombine.low %v18728_v46, %v18727_v61  ;;  %v18753_v42 = vld [vmem:[#allocation253_spill] sm:$0xff] }
0x2066   :  { %11486 = vmatprep.subr.bf16.mxu1 %v12478_v50  ;;  %11650 = vmatprep.subr.bf16.mxu0 %v12480_v32  ;;  %v18730_v50 = vld [vmem:[#allocation229_spill] sm:$0xff]  ;;  %v18732_v32 = vld [vmem:[#allocation230_spill] sm:$0xff]  ;;  %v12530_v13 = vcombine.high %v18753_v42, %v18753_v42  ;;  %v12529_v46 = vcombine.low %v18753_v42, %v18753_v42 }
0x2067   :  { %12534 = vmatprep.mubr.msk.bf16.mxu1 %vm11344_vm14, %v9821_v45  ;;  %12536 = vmatprep.mubr.msk.bf16.mxu0 %vm11344_vm14, %v9821_v45  ;;  %v12506_v59 = vcombine.high %v18730_v50, %v18729_v26  ;;  %v12508_v45 = vcombine.high %v18732_v32, %v18731_v7 }
0x2069   :  { %11487 = vmatpush1.bf16.msra.mxu1 %v12477_v4  ;;  %11651 = vmatpush1.bf16.msra.mxu0 %v12479_v51  ;;  %v12505_v4 = vcombine.low %v18730_v50, %v18729_v26  ;;  %v12507_v51 = vcombine.low %v18732_v32, %v18731_v7  ;;  %v9820_v26 = vpack.c.bf16 %v9808_v6, %v9808_v6  ;;  %v10072_v50 = vld [vmem:[%s18027_s6] sm:$0xf] }
0x206a   :  { %11488 = vmatprep.subr.bf16.mxu1 %v12482_v34  ;;  %11652 = vmatprep.subr.bf16.mxu0 %v12484_v36  ;;  %v12510_v34 = vcombine.high %v18734_v33, %v18733_v52  ;;  %v12512_v36 = vcombine.high %v18736_v47, %v18735_v35  ;;  %v10085_v7 = vrot.slane %v10072_v50, %v9444_v12 }
0x206b   :  { %v10081_v32 = vrot.slane %v10072_v50, %v17033_v21  ;;  %v10089_v5 = vrot.slane %v10072_v50, %v9448_v55 }
0x206d   :  { %11489 = vmatpush1.bf16.msra.mxu1 %v12481_v57  ;;  %11653 = vmatpush1.bf16.msra.mxu0 %v12483_v18  ;;  %v12509_v57 = vcombine.low %v18734_v33, %v18733_v52  ;;  %v12511_v18 = vcombine.low %v18736_v47, %v18735_v35 }
0x206e   :  { %11490 = vmatprep.subr.bf16.mxu1 %v12486_v38  ;;  %11654 = vmatprep.subr.bf16.mxu0 %v12488_v49  ;;  %v12514_v38 = vcombine.high %v18738_v37, %v18737_v11  ;;  %v12516_v49 = vcombine.high %v18740_v40, %v18739_v39 }
0x2071   :  { %11491 = vmatpush1.bf16.msra.mxu1 %v12485_v2  ;;  %11655 = vmatpush1.bf16.msra.mxu0 %v12487_v19  ;;  %v12513_v2 = vcombine.low %v18738_v37, %v18737_v11  ;;  %v12515_v19 = vcombine.low %v18740_v40, %v18739_v39 }
0x2072   :  { %11492 = vmatprep.subr.bf16.mxu1 %v12490_v43  ;;  %11656 = vmatprep.subr.bf16.mxu0 %v12492_v29  ;;  %v12518_v43 = vcombine.high %v18742_v41, %v18741_v48  ;;  %v12520_v29 = vcombine.high %v18744_v1, %v18743_v44 }
0x2075   :  { %11493 = vmatpush1.bf16.msra.mxu1 %v12489_v30  ;;  %11657 = vmatpush1.bf16.msra.mxu0 %v12491_v17  ;;  %v12517_v30 = vcombine.low %v18742_v41, %v18741_v48  ;;  %v12519_v17 = vcombine.low %v18744_v1, %v18743_v44 }
0x2076   :  { %11494 = vmatprep.subr.bf16.mxu1 %v12494_v9  ;;  %11658 = vmatprep.subr.bf16.mxu0 %v12496_v10  ;;  %v12522_v9 = vcombine.high %v18746_v60, %v18745_v63  ;;  %v12524_v10 = vcombine.high %v18748_v62, %v18747_v27 }
0x2079   :  { %11495 = vmatpush1.bf16.msra.mxu1 %v12493_v3  ;;  %11659 = vmatpush1.bf16.msra.mxu0 %v12495_v22  ;;  %v12521_v3 = vcombine.low %v18746_v60, %v18745_v63  ;;  %v12523_v22 = vcombine.low %v18748_v62, %v18747_v27 }
0x207a   :  { %11496 = vmatprep.subr.bf16.mxu1 %v12498_v31  ;;  %11660 = vmatprep.subr.bf16.mxu0 %v12500_v8  ;;  %v12526_v31 = vcombine.high %v18750_v56, %v18749_v15  ;;  %v12528_v8 = vcombine.high %v18752_v24, %v18751_v25 }
0x207d   :  { %11497 = vmatpush1.bf16.msra.mxu1 %v12497_v0  ;;  %11661 = vmatpush1.bf16.msra.mxu0 %v12499_v14  ;;  %v12525_v0 = vcombine.low %v18750_v56, %v18749_v15  ;;  %v12527_v14 = vcombine.low %v18752_v24, %v18751_v25 }
0x207e   :  { %11498 = vmatprep.subr.bf16.mxu1 %v12502_v53  ;;  %11662 = vmatprep.subr.bf16.mxu0 %v12504_v20  ;;  %v18754_v53 = vld [vmem:[#allocation254_spill] sm:$0xff] }
0x207f   :  { %v12532_v61 = vcombine.high %v18754_v53, %v18754_v53  ;;  %v12531_v20 = vcombine.low %v18754_v53, %v18754_v53 }
0x2081   :  { %11499 = vmatpush1.bf16.msra.mxu1 %v12501_v54  ;;  %11663 = vmatpush1.bf16.msra.mxu0 %v12503_v58  ;;  %v11350_v54 = vsel %vm11348_vm6, %v12529_v46, 0  ;;  %v11356_v58 = vsel %vm11348_vm6, %v12531_v20, 0 }
0x2082   :  { %11500 = vmatprep.subr.bf16.mxu1 %v12506_v59  ;;  %11664 = vmatprep.subr.bf16.mxu0 %v12508_v45  ;;  %v10077_v59 = vrot.slane %v10072_v50, %v17027_v16 }
0x2085   :  { %11501 = vmatpush1.bf16.msra.mxu1 %v12505_v4  ;;  %11665 = vmatpush1.bf16.msra.mxu0 %v12507_v51 }
0x2086   :  { %11502 = vmatprep.subr.bf16.mxu1 %v12510_v34  ;;  %11666 = vmatprep.subr.bf16.mxu0 %v12512_v36 }
0x2089   :  { %11503 = vmatpush1.bf16.msra.mxu1 %v12509_v57  ;;  %11667 = vmatpush1.bf16.msra.mxu0 %v12511_v18 }
0x208a   :  { %11504 = vmatprep.subr.bf16.mxu1 %v12514_v38  ;;  %11668 = vmatprep.subr.bf16.mxu0 %v12516_v49 }
0x208d   :  { %11505 = vmatpush1.bf16.msra.mxu1 %v12513_v2  ;;  %11669 = vmatpush1.bf16.msra.mxu0 %v12515_v19 }
0x208e   :  { %11506 = vmatprep.subr.bf16.mxu1 %v12518_v43  ;;  %11670 = vmatprep.subr.bf16.mxu0 %v12520_v29 }
0x2091   :  { %11507 = vmatpush1.bf16.msra.mxu1 %v12517_v30  ;;  %11671 = vmatpush1.bf16.msra.mxu0 %v12519_v17 }
0x2092   :  { %11508 = vmatprep.subr.bf16.mxu1 %v12522_v9  ;;  %11672 = vmatprep.subr.bf16.mxu0 %v12524_v10 }
0x2095   :  { %11509 = vmatpush1.bf16.msra.mxu1 %v12521_v3  ;;  %11673 = vmatpush1.bf16.msra.mxu0 %v12523_v22 }
0x2096   :  { %11510 = vmatprep.subr.bf16.mxu1 %v12526_v31  ;;  %11674 = vmatprep.subr.bf16.mxu0 %v12528_v8 }
0x2099   :  { %11511 = vmatpush1.bf16.msra.mxu1 %v12525_v0  ;;  %11675 = vmatpush1.bf16.msra.mxu0 %v12527_v14 }
0x209a   :  { %12533 = vmatprep.subr.msk.bf16.mxu1 %vm11348_vm6, %v12530_v13  ;;  %12535 = vmatprep.subr.msk.bf16.mxu0 %vm11348_vm6, %v12532_v61 }
0x209d   :  { %11513 = vmatpush1.bf16.msra.mxu1 %v11350_v54  ;;  %11677 = vmatpush1.bf16.msra.mxu0 %v11356_v58 }
0x20a0   :  { %11517 = vmatmul.mubr.bf16.vlgmr.msra.gmra.mrb[48].mxu1 %v9820_v26  ;;  %11681 = vmatmul.mubr.bf16.vlgmr.msra.gmra.mrb[56].mxu0 %v9820_v26 }
0x2173   :  { %v11518_v45 = vpop.f32.mrb[48].mxu1  ;;  %v11682_v6 = vpop.f32.mrb[56].mxu0 }
0x2174   :  { %v17991_v4 = vadd.f32 %v11518_v45, %v10077_v59  ;;  %v17993_v51 = vadd.f32 %v11682_v6, %v10085_v7  ;;  %v11520_v52 = vpop.f32.mrb[49].mxu1  ;;  %v11684_v33 = vpop.f32.mrb[57].mxu0 }
0x2175   :  { %v13322_v34 = vadd.f32 %v11520_v52, %v10081_v32  ;;  %v13324_v35 = vadd.f32 %v11684_v33, %v10089_v5  ;;  %v11522_v47 = vpop.f32.mrb[50].mxu1  ;;  %v11686_v16 = vpop.f32.mrb[58].mxu0 }
0x2176   :  { %v11689_v36 = vmax.f32 %v17991_v4, 0.0  ;;  %v11691_v12 = vmax.f32 %v17993_v51, 0.0  ;;  %v11523_v21 = vpop.f32.mrb[51].mxu1  ;;  %v11687_v57 = vpop.f32.mrb[59].mxu0 }
0x2177   :  { %v11690_v28 = vmax.f32 %v13322_v34, 0.0  ;;  %v11692_v55 = vmax.f32 %v13324_v35, 0.0 }
0x2178   :  { %13502 = dma.done.wait [#allocation6 + $0x2], 11648 }
0x2179   :  { %13503 = vsyncadd [#allocation6 + $0x2], 4294955648  ;;  %11829 = vmatprep.mubr.f32.mxu1 %v11690_v28  ;;  %11899 = vmatprep.mubr.f32.mxu0 %v11692_v55  ;;  %v11712_v18 = vld [vmem:[#allocation4 + $0x80] sm:$0xff]  ;;  %v11713_v11 = vld [vmem:[#allocation4 + $0x88] sm:$0xff]  ;;  %s13523_s6 = smov [#allocation7]  }
0x217a   :  { %v11696_v37 = vld [vmem:[#allocation4] sm:$0xff]  ;;  %v13211_v38 = vpack.c.bf16 %v11713_v11, %v11712_v18  ;;  %v11697_v39 = vld [vmem:[#allocation4 + $0x8] sm:$0xff]  ;;  %v11714_v43 = vld [vmem:[#allocation4 + $0x90] sm:$0xff]  ;;  %s12104_s14 = sshll.u32 %s13523_s6, 4  ;;  %s12105_s14 = int_to_ptr.vmem [resolvable:$true] %s12104_s14 }
0x217b   :  { %v11744_v40 = vld [vmem:[#allocation4 + $0x180] sm:$0xff]  ;;  %v11745_v49 = vld [vmem:[#allocation4 + $0x188] sm:$0xff]  ;;  %v13213_v2 = vpack.c.bf16 %v11697_v39, %v11696_v37  ;;  %v11715_v1 = vld [vmem:[#allocation4 + $0x98] sm:$0xff]  ;;  %s13476_s2 = scalar_lea.vmem %s12105_s14, 32  ;;  %p13481_p1 = scmp.lt.s32.totalorder %s12105_s14, %s12105_s14 }
0x217c   :  { %v13243_v19 = vpack.c.bf16 %v11745_v49, %v11744_v40  ;;  %v11728_v48 = vld [vmem:[#allocation4 + $0x100] sm:$0xff]  ;;  %v11729_v41 = vld [vmem:[#allocation4 + $0x108] sm:$0xff]  ;;  %13212 = vmatprep.subr.bf16.mxu1 %v13211_v38  ;;  %v11698_v29 = vld [vmem:[#allocation4 + $0x10] sm:$0xff]  ;;  %v13215_v17 = vpack.c.bf16 %v11715_v1, %v11714_v43  ;;  %p13477_p0 = scmp.ne.s32.totalorder %s12105_s14, %s13476_s2  ;;  %p13482_p2 = scmp.lt.s32.totalorder %s13476_s2, %s13476_s2 }
0x217d   :  { %v13245_v44 = vpack.c.bf16 %v11729_v41, %v11728_v48  ;;  %v11699_v30 = vld [vmem:[#allocation4 + $0x18] sm:$0xff]  ;;  %13214 = vmatpush3.bf16.msra.mxu1 %v13213_v2  ;;  %v11746_v60 = vld [vmem:[#allocation4 + $0x190] sm:$0xff]  ;;  %v11716_v3 = vld [vmem:[#allocation4 + $0xa0] sm:$0xff] }
0x217e   :  { %13244 = vmatprep.subr.bf16.mxu0 %v13243_v19  ;;  %v13217_v63 = vpack.c.bf16 %v11699_v30, %v11698_v29  ;;  %v11747_v9 = vld [vmem:[#allocation4 + $0x198] sm:$0xff]  ;;  %v11730_v27 = vld [vmem:[#allocation4 + $0x110] sm:$0xff]  ;;  %v11717_v22 = vld [vmem:[#allocation4 + $0xa8] sm:$0xff]  ;;  %13216 = vmatprep.subr.bf16.mxu1 %v13215_v17  ;;  %p13483_p3 = por %p13482_p2, %p13481_p1 }
0x217f   :  { %13246 = vmatpush3.bf16.msra.mxu0 %v13245_v44  ;;  %v13247_v62 = vpack.c.bf16 %v11747_v9, %v11746_v60  ;;  %v11731_v10 = vld [vmem:[#allocation4 + $0x118] sm:$0xff]  ;;  %v13219_v56 = vpack.c.bf16 %v11717_v22, %v11716_v3  ;;  %v11700_v31 = vld [vmem:[#allocation4 + $0x20] sm:$0xff]  ;;  %v11701_v25 = vld [vmem:[#allocation4 + $0x28] sm:$0xff] }
0x2180   :  { %v13249_v15 = vpack.c.bf16 %v11731_v10, %v11730_v27  ;;  %v11748_v24 = vld [vmem:[#allocation4 + $0x1a0] sm:$0xff]  ;;  %v11749_v8 = vld [vmem:[#allocation4 + $0x1a8] sm:$0xff]  ;;  %v13221_v42 = vpack.c.bf16 %v11701_v25, %v11700_v31  ;;  %v11718_v53 = vld [vmem:[#allocation4 + $0xb0] sm:$0xff]  ;;  %p13484_p4 = pnand %p13483_p3, %p13477_p0 }
0x2181   :  { %13248 = vmatprep.subr.bf16.mxu0 %v13247_v62  ;;  %v11732_v0 = vld [vmem:[#allocation4 + $0x120] sm:$0xff]  ;;  %v11733_v14 = vld [vmem:[#allocation4 + $0x128] sm:$0xff]  ;;  %13218 = vmatpush3.bf16.msra.mxu1 %v13217_v63  ;;  %v13251_v13 = vpack.c.bf16 %v11749_v8, %v11748_v24  ;;  %v11719_v61 = vld [vmem:[#allocation4 + $0xb8] sm:$0xff] }
0x2182   :  { %v11702_v46 = vld [vmem:[#allocation4 + $0x30] sm:$0xff]  ;;  %13220 = vmatprep.subr.bf16.mxu1 %v13219_v56  ;;  %v13253_v20 = vpack.c.bf16 %v11733_v14, %v11732_v0  ;;  %v13223_v54 = vpack.c.bf16 %v11719_v61, %v11718_v53  ;;  %v11703_v58 = vld [vmem:[#allocation4 + $0x38] sm:$0xff]  ;;  %v11720_v5 = vld [vmem:[#allocation4 + $0xc0] sm:$0xff] }
0x2183   :  { %13250 = vmatpush3.bf16.msra.mxu0 %v13249_v15  ;;  %v11750_v26 = vld [vmem:[#allocation4 + $0x1b0] sm:$0xff]  ;;  %v11751_v50 = vld [vmem:[#allocation4 + $0x1b8] sm:$0xff]  ;;  %v11721_v45 = vld [vmem:[#allocation4 + $0xc8] sm:$0xff]  ;;  %v13225_v6 = vpack.c.bf16 %v11703_v58, %v11702_v46  ;;  %v13522_v58 = vmov 0.0|0.0  }
0x2184   :  { %13252 = vmatprep.subr.bf16.mxu0 %v13251_v13  ;;  %v13255_v59 = vpack.c.bf16 %v11751_v50, %v11750_v26  ;;  %v11734_v7 = vld [vmem:[#allocation4 + $0x130] sm:$0xff]  ;;  %v11735_v32 = vld [vmem:[#allocation4 + $0x138] sm:$0xff]  ;;  %v11752_v52 = vld [vmem:[#allocation4 + $0x1c0] sm:$0xff]  ;;  %v13227_v35 = vpack.c.bf16 %v11721_v45, %v11720_v5 }
0x2185   :  { %13222 = vmatpush3.bf16.msra.mxu1 %v13221_v42  ;;  %v11753_v33 = vld [vmem:[#allocation4 + $0x1c8] sm:$0xff]  ;;  %v13257_v34 = vpack.c.bf16 %v11735_v32, %v11734_v7  ;;  %v11704_v47 = vld [vmem:[#allocation4 + $0x40] sm:$0xff]  ;;  %v11722_v55 = vld [vmem:[#allocation4 + $0xd0] sm:$0xff] }
0x2186   :  { %13224 = vmatprep.subr.bf16.mxu1 %v13223_v54  ;;  %v11705_v16 = vld [vmem:[#allocation4 + $0x48] sm:$0xff]  ;;  %v11736_v21 = vld [vmem:[#allocation4 + $0x140] sm:$0xff]  ;;  %v13259_v57 = vpack.c.bf16 %v11753_v33, %v11752_v52  ;;  %v11723_v18 = vld [vmem:[#allocation4 + $0xd8] sm:$0xff] }
0x2187   :  { %13254 = vmatpush3.bf16.msra.mxu0 %v13253_v20  ;;  %v11737_v28 = vld [vmem:[#allocation4 + $0x148] sm:$0xff]  ;;  %v11754_v11 = vld [vmem:[#allocation4 + $0x1d0] sm:$0xff]  ;;  %v11755_v37 = vld [vmem:[#allocation4 + $0x1d8] sm:$0xff]  ;;  %v13229_v38 = vpack.c.bf16 %v11705_v16, %v11704_v47  ;;  %v13231_v40 = vpack.c.bf16 %v11723_v18, %v11722_v55 }
0x2188   :  { %13256 = vmatprep.subr.bf16.mxu0 %v13255_v59  ;;  %v13261_v39 = vpack.c.bf16 %v11737_v28, %v11736_v21  ;;  %v11706_v49 = vld [vmem:[#allocation4 + $0x50] sm:$0xff]  ;;  %v11707_v2 = vld [vmem:[#allocation4 + $0x58] sm:$0xff]  ;;  %v13263_v48 = vpack.c.bf16 %v11755_v37, %v11754_v11  ;;  %v11724_v43 = vld [vmem:[#allocation4 + $0xe0] sm:$0xff] }
0x2189   :  { %13226 = vmatpush3.bf16.msra.mxu1 %v13225_v6  ;;  %v11738_v19 = vld [vmem:[#allocation4 + $0x150] sm:$0xff]  ;;  %v11739_v41 = vld [vmem:[#allocation4 + $0x158] sm:$0xff]  ;;  %v11725_v44 = vld [vmem:[#allocation4 + $0xe8] sm:$0xff]  ;;  %v13233_v30 = vpack.c.bf16 %v11707_v2, %v11706_v49 }
0x218a   :  { %13228 = vmatprep.subr.bf16.mxu1 %v13227_v35  ;;  %v11756_v1 = vld [vmem:[#allocation4 + $0x1e0] sm:$0xff]  ;;  %v11757_v29 = vld [vmem:[#allocation4 + $0x1e8] sm:$0xff]  ;;  %v13265_v17 = vpack.c.bf16 %v11739_v41, %v11738_v19  ;;  %v13235_v63 = vpack.c.bf16 %v11725_v44, %v11724_v43  ;;  %v11726_v3 = vld [vmem:[#allocation4 + $0xf0] sm:$0xff] }
0x218b   :  { %13258 = vmatpush3.bf16.msra.mxu0 %v13257_v34  ;;  %v11708_v60 = vld [vmem:[#allocation4 + $0x60] sm:$0xff]  ;;  %v11709_v9 = vld [vmem:[#allocation4 + $0x68] sm:$0xff]  ;;  %v13267_v62 = vpack.c.bf16 %v11757_v29, %v11756_v1  ;;  %v11727_v22 = vld [vmem:[#allocation4 + $0xf8] sm:$0xff] }
0x218c   :  { %13260 = vmatprep.subr.bf16.mxu0 %v13259_v57  ;;  %v11740_v27 = vld [vmem:[#allocation4 + $0x160] sm:$0xff]  ;;  %v11741_v10 = vld [vmem:[#allocation4 + $0x168] sm:$0xff]  ;;  %v11758_v15 = vld [vmem:[#allocation4 + $0x1f0] sm:$0xff]  ;;  %v13237_v31 = vpack.c.bf16 %v11709_v9, %v11708_v60  ;;  %v13239_v24 = vpack.c.bf16 %v11727_v22, %v11726_v3 }
0x218d   :  { %13230 = vmatpush3.bf16.msra.mxu1 %v13229_v38  ;;  %v11759_v56 = vld [vmem:[#allocation4 + $0x1f8] sm:$0xff]  ;;  %v13269_v25 = vpack.c.bf16 %v11741_v10, %v11740_v27  ;;  %v11710_v8 = vld [vmem:[#allocation4 + $0x70] sm:$0xff]  ;;  %v11906_v46 = vld [vmem:[#allocation4 + $0x208] sm:$0xff] }
0x218e   :  { %13232 = vmatprep.subr.bf16.mxu1 %v13231_v40  ;;  %v11711_v0 = vld [vmem:[#allocation4 + $0x78] sm:$0xff]  ;;  %v13271_v14 = vpack.c.bf16 %v11759_v56, %v11758_v15  ;;  %v11742_v42 = vld [vmem:[#allocation4 + $0x170] sm:$0xff]  ;;  %v11909_v50 = vld [vmem:[#allocation4 + $0x220] sm:$0xff] }
0x218f   :  { %13262 = vmatpush3.bf16.msra.mxu0 %v13261_v39  ;;  %v11743_v13 = vld [vmem:[#allocation4 + $0x178] sm:$0xff]  ;;  %v13241_v53 = vpack.c.bf16 %v11711_v0, %v11710_v8  ;;  %v11907_v20 = vld [vmem:[#allocation4 + $0x210] sm:$0xff]  ;;  %v11910_v7 = vld [vmem:[#allocation4 + $0x228] sm:$0xff] }
0x2190   :  { %13264 = vmatprep.subr.bf16.mxu0 %v13263_v48  ;;  %v13273_v61 = vpack.c.bf16 %v11743_v13, %v11742_v42  ;;  %v13276_v54 = vpack.c.bf16 %v11907_v20, %v11906_v46  ;;  %v11908_v26 = vld [vmem:[#allocation4 + $0x218] sm:$0xff]  ;;  %v11911_v32 = vld [vmem:[#allocation4 + $0x230] sm:$0xff]  ;;  %v11913_v4 = vld [vmem:[#allocation4 + $0x240] sm:$0xff] }
0x2191   :  { %13234 = vmatpush3.bf16.msra.mxu1 %v13233_v30  ;;  %v13279_v59 = vpack.c.bf16 %v11909_v50, %v11908_v26  ;;  %v13282_v5 = vpack.c.bf16 %v11911_v32, %v11910_v7  ;;  %v11912_v45 = vld [vmem:[#allocation4 + $0x238] sm:$0xff]  ;;  %v11914_v51 = vld [vmem:[#allocation4 + $0x248] sm:$0xff]  ;;  %v11917_v33 = vld [vmem:[#allocation4 + $0x260] sm:$0xff] }
0x2192   :  { %13236 = vmatprep.subr.bf16.mxu1 %v13235_v63  ;;  %v11916_v52 = vld [vmem:[#allocation4 + $0x258] sm:$0xff]  ;;  %v11919_v35 = vld [vmem:[#allocation4 + $0x270] sm:$0xff]  ;;  %v11921_v21 = vld [vmem:[#allocation4 + $0x280] sm:$0xff] }
0x2193   :  { %13266 = vmatpush3.bf16.msra.mxu0 %v13265_v17  ;;  %v13291_v34 = vpack.c.bf16 %v11917_v33, %v11916_v52  ;;  %v11920_v16 = vld [vmem:[#allocation4 + $0x278] sm:$0xff]  ;;  %v11998_v28 = vld [vmem:[#allocation4 + $0x290] sm:$0xff]  ;;  %v12000_v18 = vld [vmem:[#allocation4 + $0x2a0] sm:$0xff] }
0x2194   :  { %13268 = vmatprep.subr.bf16.mxu0 %v13267_v62  ;;  %v13297_v57 = vpack.c.bf16 %v11921_v21, %v11920_v16  ;;  %v11999_v55 = vld [vmem:[#allocation4 + $0x298] sm:$0xff]  ;;  %v12001_v37 = vld [vmem:[#allocation4 + $0x2a8] sm:$0xff]  ;;  %v12002_v39 = vld [vmem:[#allocation4 + $0x2b0] sm:$0xff] }
0x2195   :  { %13238 = vmatpush3.bf16.msra.mxu1 %v13237_v31  ;;  %v13300_v11 = vpack.c.bf16 %v11999_v55, %v11998_v28  ;;  %v13303_v38 = vpack.c.bf16 %v12001_v37, %v12000_v18  ;;  %v12003_v40 = vld [vmem:[#allocation4 + $0x2b8] sm:$0xff]  ;;  %v12537_v19 = vld [vmem:[#allocation4 + $0x200] ss:$0 sm:$0xff]  ;;  %v12005_v60 = vld [vmem:[#allocation4 + $0x2c8] sm:$0xff] }
0x2196   :  { %13240 = vmatprep.subr.bf16.mxu1 %v13239_v24  ;;  %v13306_v49 = vpack.c.bf16 %v12003_v40, %v12002_v39  ;;  %v12004_v63 = vld [vmem:[#allocation4 + $0x2c0] sm:$0xff]  ;;  %v12538_v27 = vld [vmem:[#allocation4 + $0x288] ss:$0 sm:$0xff]  ;;  %v12539_v15 = vld [vmem:[#allocation4 + $0x2d0] ss:$0 sm:$0xff] }
0x2197   :  { %13270 = vmatpush3.bf16.msra.mxu0 %v13269_v25  ;;  %v13309_v9 = vpack.c.bf16 %v12005_v60, %v12004_v63 }
0x2198   :  { %13272 = vmatprep.subr.bf16.mxu0 %v13271_v14 }
0x2199   :  { %13242 = vmatpush3.bf16.msra.mxu1 %v13241_v53 }
0x219a   :  { %13275 = vmatprep.subr.bf16.mxu1 %v13522_v58 }
0x219b   :  { %13274 = vmatpush3.bf16.msra.mxu0 %v13273_v61 }
0x219c   :  { %13299 = vmatprep.subr.bf16.mxu0 %v13522_v58  ;;  %11830 = vmatmul.mubr.f32.vlgmr.msra.gmra.mrb[38].mxu1 %v11689_v36  ;;  %v13285_v36 = vpack.c.bf16 %v11913_v4, %v11912_v45 }
0x219d   :  { %13277 = vmatpush3.bf16.msra.mxu1 %v13276_v54  ;;  %12993 = vmatprep.mubr.msk.f32.mxu1 %vm13511_vm15, %v18512_v23 }
0x219e   :  { %11900 = vmatmul.mubr.f32.vlgmr.msra.gmra.mrb[46].mxu0 %v11691_v12  ;;  %13278 = vmatprep.subr.bf16.mxu1 %v13522_v58  ;;  %v11915_v12 = vld [vmem:[#allocation4 + $0x250] sm:$0xff] }
0x219f   :  { %13012 = vmatprep.mubr.msk.f32.mxu0 %vm13511_vm15, %v18512_v23  ;;  %v13288_v6 = vpack.c.bf16 %v11915_v12, %v11914_v51  ;;  %v11918_v23 = vld [vmem:[#allocation4 + $0x268] sm:$0xff]  ;;  %13301 = vmatpush3.bf16.msra.mxu0 %v13300_v11  ;;  %vm12085_vm15 = vcmask 9216  }
0x21a0   :  { %v13294_v47 = vpack.c.bf16 %v11919_v35, %v11918_v23  ;;  %13302 = vmatprep.subr.bf16.mxu0 %v13522_v58 }
0x21a1   :  { %13280 = vmatpush3.bf16.msra.mxu1 %v13279_v59 }
0x21a2   :  { %13281 = vmatprep.subr.bf16.mxu1 %v13522_v58 }
0x21a3   :  { %13304 = vmatpush3.bf16.msra.mxu0 %v13303_v38 }
0x21a4   :  { %13305 = vmatprep.subr.bf16.mxu0 %v13522_v58 }
0x21a5   :  { %13283 = vmatpush3.bf16.msra.mxu1 %v13282_v5 }
0x21a6   :  { %13284 = vmatprep.subr.bf16.mxu1 %v13522_v58 }
0x21a7   :  { %13307 = vmatpush3.bf16.msra.mxu0 %v13306_v49 }
0x21a8   :  { %13308 = vmatprep.subr.bf16.mxu0 %v13522_v58 }
0x21a9   :  { %13286 = vmatpush3.bf16.msra.mxu1 %v13285_v36 }
0x21aa   :  { %13287 = vmatprep.subr.bf16.mxu1 %v13522_v58 }
0x21ab   :  { %13310 = vmatpush3.bf16.msra.mxu0 %v13309_v9 }
0x21ad   :  { %13289 = vmatpush3.bf16.msra.mxu1 %v13288_v6 }
0x21ae   :  { %13290 = vmatprep.subr.bf16.mxu1 %v13522_v58 }
0x21b1   :  { %13292 = vmatpush3.bf16.msra.mxu1 %v13291_v34 }
0x21b2   :  { %13293 = vmatprep.subr.bf16.mxu1 %v13522_v58 }
0x21b5   :  { %13295 = vmatpush3.bf16.msra.mxu1 %v13294_v47 }
0x21b6   :  { %13296 = vmatprep.subr.bf16.mxu1 %v13522_v58 }
0x21b9   :  { %13298 = vmatpush3.bf16.msra.mxu1 %v13297_v57 }
0x226f   :  { %v12679_v2 = vpop.f32.mrb[38].mxu1 }
0x2270   :  { %v12680_v48 = vpop.f32.mrb[39].mxu1 }
0x2271   :  { %v12714_v41 = vpop.f32.mrb[46].mxu0  ;;  %v12681_v43 = vadd.f32 %v12680_v48, %v12679_v2 }
0x2272   :  { %v12715_v44 = vpop.f32.mrb[47].mxu0 }
0x2273   :  { %v12716_v1 = vadd.f32 %v12715_v44, %v12714_v41  ;;  %v11832_v29 = vadd.f32 %v12681_v43, %v12537_v19 }
0x2275   :  { %v11902_v30 = vadd.f32 %v12716_v1, %v11832_v29 }
0x2277   :  { %v11905_v17 = vmax.f32 %v11902_v30, 0.0 }
0x2279   :  { %12994 = vmatmul.mubr.f32.vlgmr.msra.gmra.mrb[52].mxu1 %v11905_v17 }
0x234c   :  { %v11993_v62 = vpop.f32.mrb[52].mxu1 }
0x234d   :  { %v11994_v10 = vadd.f32 %v12538_v27, %v11993_v62  ;;  %v12995_v3 = vpop.f32.mrb[53].mxu1 }
0x234f   :  { %v11997_v22 = vmax.f32 %v11994_v10, 0.0 }
0x2351   :  { %13013 = vmatmul.mubr.msk.f32.vlgmr.msra.gmra.mrb[60].mxu0 %vm8223_vm10, %v11997_v22 }
0x2424   :  { %v12080_v56 = vpop.f32.mrb[60].mxu0 }
0x2425   :  { %v12081_v31 = vadd.f32 %v12539_v15, %v12080_v56  ;;  %v13014_v25 = vpop.f32.mrb[61].mxu0 }
0x2427   :  { %v12084_v24 = vmax.f32 %v12081_v31, 0.0 }
0x2429   :  { %v12086_v8 = vsel %vm12085_vm15, %v12084_v24, -inf }
0x242a   :  { %12087 = vmax.xlane.f32.xlu0 %v12086_v8 }
0x24b7   :  { %v12088_v0 = vpop.xlane.xlu0 %12087 }
0x24b8   :  { %v12089_v14 = vsub.f32 %v12084_v24, %v12088_v0 }
0x24ba   :  { %v12090_v42 = vmul.f32 1.442695, %v12089_v14 }
0x24bc   :  { %13472 = vpow2.f32 %v12090_v42 }
0x24c6   :  { %v13473_v13 = vpop.eup %13472 }
0x24c7   :  { %v12092_v53 = vsel %vm12085_vm15, %v13473_v13, 0.0 }
0x24c8   :  { %12093 = vadd.xlane.f32.xlu0 %v12092_v53 }
0x2555   :  { %v12094_v61 = vpop.xlane.xlu0 %12093 }
0x2556   :  { %13474 = vrcp.f32 %v12094_v61 }
0x2560   :  { %v13475_v46 = vpop.eup %13474 }
0x2561   :  { %v12096_v20 = vmul.f32 %v13475_v46, %v13473_v13 }
0x2563   :  { %12097 = vst.msk [vmem:[#allocation7] sm:$0x3] %vm12085_vm15, %v12096_v20 }
0x2564   :  { %13487 = shalt.err (!%p13484_p4)
}
0x2565   :  { %s13488_s18 = scalar_lea.hbm %s18031_s10, 32 }
0x2566   :  { %p13489_p5 = scmp.ne.s32.totalorder %s18031_s10, %s13488_s18  ;;  %p13492_p6 = scmp.lt.u32.totalorder %s13488_s18, %s18031_s10 }
0x2568   :  { %p13494_p7 = pnand %p13492_p6, %p13489_p5 }
0x256a   :  { %13497 = shalt.err (!%p13494_p7)
}
0x256b   :  { %12107 = dma.vmem_to_hbm [thread:$0]  %s12105_s14, 32, %s18031_s10, [#allocation8]  }
0x256c   :  { %13504 = dma.done.wait [#allocation8], 32  }
0x256d   :  { %13505 = vsyncadd [#allocation8], 4294967264 }
0x256e   :  { %12111 = vsyncpa [#allocation8], 1 }
0x256f   :  { %12112 = vsyncmov [#allocation6] }
0x2572   :  { %s12113_s9 = vpop.sfrf %12112 }
0x2573   :  { %p12541_p8 = scmp.ne.s32.totalorder %s12113_s9, 0 }
0x2575   :  { %12117 = shalt.err (%p12541_p8)  }
0x2576   :  { %12119 = vsyncmov [#allocation6 + $0x1] }
0x2579   :  { %s12120_s23 = vpop.sfrf %12119 }
0x257a   :  { %p12542_p9 = scmp.ne.s32.totalorder %s12120_s23, 0 }
0x257c   :  { %12124 = shalt.err (%p12542_p9)  }
0x257d   :  { %12126 = vsyncmov [#allocation6 + $0x2] }
0x2580   :  { %s12127_s24 = vpop.sfrf %12126 }
0x2581   :  { %p12543_p10 = scmp.ne.s32.totalorder %s12127_s24, 0 }
0x2583   :  { %12131 = shalt.err (%p12543_p10)  }

</bundles_post_ra>
